<compile_context>
chip_gen: v5e
topology: v5e:2x2
jax: 0.10.0
libtpu: 0.0.40
codegen_flags: <defaults>
</compile_context>

<pallas_src>
import jax
import jax.numpy as jnp
import numpy as np
from jax import lax
from jax.experimental import pallas as pl
from jax.experimental.pallas import tpu as pltpu


def _round_up(x, m):
    return (x + m - 1) // m * m


# ----------------------------- Pallas kernel ---------------------------------
def decoder_kernel(feats_ref, emb_ref, h0_ref, c0_ref,
                   w_enc_ref, b_enc_ref, w_dec_ref, b_dec_ref, w_full_ref,
                   w_fbeta_ref, b_fbeta_ref, w_lstm_ref, b_lstm_ref,
                   w_fc_ref, b_fc_ref,
                   preds_ref, alphas_ref):
    B, P, E = feats_ref.shape
    T = emb_ref.shape[0]
    A = w_enc_ref.shape[1]
    D = h0_ref.shape[1]
    Pp = alphas_ref.shape[2]

    feats = feats_ref[...]                                    # (B, P, E), VMEM-resident

    # --- hoisted, loop-invariant attention encoder projection (computed once) ---
    # flattened to a single 2-D MXU matmul: (B*P, E) @ (E, A)
    att1 = (feats.reshape(B * P, E) @ w_enc_ref[...]
            + b_enc_ref[...]).reshape(B, P, A)                # (B, P, A)

    w_full = w_full_ref[...]                                  # (1, 1, A), pre-transposed
    alpha_pad = jnp.zeros((B, Pp - P), jnp.float32)           # lane padding, hoisted

    def step(t, carry):
        h, c = carry                                          # (B, D) register carries

        # ---- Attention (decoder-dependent part only; att1 is hoisted) ----
        att2 = h @ w_dec_ref[...] + b_dec_ref[...]            # (B, A)
        att = jnp.maximum(att1 + att2[:, None, :], 0.0)       # ReLU, (B, P, A)
        # full_att as VPU multiply + XLU lane reduce instead of an N=1 MXU matmul.
        # (full_att bias omitted: softmax is shift-invariant, result is identical.)
        score = jnp.sum(att * w_full, axis=-1)                # (B, P)
        score = score - jnp.max(score, axis=1, keepdims=True)
        e = jnp.exp(score)
        inv = pl.reciprocal(jnp.sum(e, axis=1, keepdims=True), approx=True)   # EUP
        alpha = e * inv                                       # softmax over pixels
        awe = jnp.sum(feats * alpha[:, :, None], axis=1)      # (B, E)

        # ---- gate = sigmoid(f_beta(h)) ----
        gate = jax.nn.sigmoid(h @ w_fbeta_ref[...] + b_fbeta_ref[...])
        awe = gate * awe

        # ---- LSTMCell: single fused input matmul on concat([emb_t, awe, h]) ----
        x = jnp.concatenate([emb_ref[t], awe, h], axis=-1)    # (B, EMB+E+D)
        gates = x @ w_lstm_ref[...] + b_lstm_ref[...]         # (B, 4D)
        i_g = jax.nn.sigmoid(gates[:, 0 * D:1 * D])
        f_g = jax.nn.sigmoid(gates[:, 1 * D:2 * D])
        g_g = jnp.tanh(gates[:, 2 * D:3 * D])
        o_g = jax.nn.sigmoid(gates[:, 3 * D:4 * D])
        c_new = f_g * c + i_g * g_g
        h_new = o_g * jnp.tanh(c_new)

        # ---- fc (dropout = identity in eval); lane-dense stores (V, P padded to 128) --
        preds_ref[t] = h_new @ w_fc_ref[...] + b_fc_ref[...]             # (B, Vp)
        alphas_ref[t] = jnp.concatenate([alpha, alpha_pad], axis=-1)     # (B, Pp)
        return (h_new, c_new)

    lax.fori_loop(0, T, step, (h0_ref[...], c0_ref[...]), unroll=True)


# ------------------------------- wrapper --------------------------------------
def decoder_rnn_forward(params, features, captions, lengths):
    """Training-branch forward: returns (predictions, captions, decode_lengths, alphas)."""
    B, P, E = features.shape
    A = params['w_enc'].shape[1]
    V = params['w_fc'].shape[1]

    decode_lengths = [int(l) - 1 for l in lengths]
    T = max(decode_lengths)

    # Padded sizes: batch -> multiple of 8 sublanes; output last dims -> multiple of 128.
    Bp = _round_up(B, 8)
    Vp = _round_up(V, 128)
    Pp = _round_up(P, 128)

    feats_p = jnp.pad(features, ((0, Bp - B), (0, 0), (0, 0)))
    caps_p = jnp.pad(captions, ((0, Bp - B), (0, 0)))

    # Embedding lookup + time-major layout done once in the wrapper (XLA gather).
    emb_tm = jnp.transpose(params['embed'][caps_p], (1, 0, 2))[:T]       # (T, Bp, EMB)

    # init_hidden_state moved out of the kernel (runs once; removes 4 resident weights).
    mean_f = jnp.mean(feats_p, axis=1)
    h0 = mean_f @ params['w_init_h'] + params['b_init_h']                # (Bp, D)
    c0 = mean_f @ params['w_init_c'] + params['b_init_c']                # (Bp, D)

    # Pre-stacked / pre-padded / pre-transposed weights.
    w_full_row = jnp.reshape(jnp.transpose(params['w_full']), (1, 1, A))  # (1,1,A)
    w_lstm = jnp.concatenate(
        [params['w_ih_e'], params['w_ih_a'], params['w_hh']], axis=0)    # (EMB+E+D, 4D)
    w_fc_p = jnp.pad(params['w_fc'], ((0, 0), (0, Vp - V)))
    b_fc_p = jnp.pad(params['b_fc'], ((0, 0), (0, Vp - V)))

    inputs = (feats_p, emb_tm, h0, c0,
              params['w_enc'], params['b_enc'], params['w_dec'], params['b_dec'],
              w_full_row, params['w_fbeta'], params['b_fbeta'],
              w_lstm, params['b_lstm'], w_fc_p, b_fc_p)

    vmem = pl.BlockSpec(memory_space=pltpu.MemorySpace.VMEM)
    preds_tm, alphas_tm = pl.pallas_call(
        decoder_kernel,
        out_shape=(jax.ShapeDtypeStruct((T, Bp, Vp), jnp.float32),
                   jax.ShapeDtypeStruct((T, Bp, Pp), jnp.float32)),
        in_specs=[vmem] * len(inputs),
        out_specs=(vmem, vmem),
    )(*inputs)

    predictions = jnp.transpose(preds_tm[:, :B, :V], (1, 0, 2))          # (B, T, V)
    alphas = jnp.transpose(alphas_tm[:, :B, :P], (1, 0, 2))              # (B, T, P)
    return predictions, captions, decode_lengths, alphas


# ------------------------- pure-JAX reference ---------------------------------
def reference_forward(params, features, captions, T):
    embeddings = params['embed'][captions]
    mean_f = features.mean(axis=1)
    h = mean_f @ params['w_init_h'] + params['b_init_h'][0]
    c = mean_f @ params['w_init_c'] + params['b_init_c'][0]
    preds_list, alpha_list = [], []
    D = h.shape[-1]
    for t in range(T):
        att1 = jnp.einsum('bpe,ea->bpa', features, params['w_enc']) + params['b_enc'][0]
        att2 = h @ params['w_dec'] + params['b_dec'][0]
        att = jax.nn.relu(att1 + att2[:, None, :])
        score = (att @ params['w_full'])[..., 0] + params['b_full'][0, 0]
        alpha = jax.nn.softmax(score, axis=1)
        awe = (features * alpha[:, :, None]).sum(axis=1)
        gate = jax.nn.sigmoid(h @ params['w_fbeta'] + params['b_fbeta'][0])
        awe = gate * awe
        gates = (embeddings[:, t, :] @ params['w_ih_e'] + awe @ params['w_ih_a']
                 + h @ params['w_hh'] + params['b_lstm'][0])
        i_g = jax.nn.sigmoid(gates[:, :D]); f_g = jax.nn.sigmoid(gates[:, D:2 * D])
        g_g = jnp.tanh(gates[:, 2 * D:3 * D]); o_g = jax.nn.sigmoid(gates[:, 3 * D:4 * D])
        c = f_g * c + i_g * g_g
        h = o_g * jnp.tanh(c)
        preds_list.append(h @ params['w_fc'] + params['b_fc'][0])
        alpha_list.append(alpha)
    return jnp.stack(preds_list, 1), jnp.stack(alpha_list, 1)


# ------------------------------ param init ------------------------------------
def init_params(key, *, encoder_dim, decoder_dim, attention_dim, embed_size, vocab_size):
    ks = jax.random.split(key, 20)
    s = 0.05
    n = lambda k, shape: (jax.random.normal(k, shape, jnp.float32) * s)
    return dict(
        embed=n(ks[0], (vocab_size, embed_size)),
        # attention
        w_enc=n(ks[1], (encoder_dim, attention_dim)),  b_enc=n(ks[2], (1, attention_dim)),
        w_dec=n(ks[3], (decoder_dim, attention_dim)),  b_dec=n(ks[4], (1, attention_dim)),
        w_full=n(ks[5], (attention_dim, 1)),           b_full=n(ks[6], (1, 1)),
        # gating / output
        w_fbeta=n(ks[7], (decoder_dim, encoder_dim)),  b_fbeta=n(ks[8], (1, encoder_dim)),
        w_fc=n(ks[9], (decoder_dim, vocab_size)),      b_fc=n(ks[10], (1, vocab_size)),
        # LSTMCell (input = embed_size + encoder_dim), weights stored (in, 4D)
        w_ih_e=n(ks[11], (embed_size, 4 * decoder_dim)),
        w_ih_a=n(ks[12], (encoder_dim, 4 * decoder_dim)),
        w_hh=n(ks[13], (decoder_dim, 4 * decoder_dim)),
        b_lstm=n(ks[14], (1, 4 * decoder_dim)),        # b_ih + b_hh folded together
        # init_h / init_c
        w_init_h=n(ks[15], (encoder_dim, decoder_dim)), b_init_h=n(ks[16], (1, decoder_dim)),
        w_init_c=n(ks[17], (encoder_dim, decoder_dim)), b_init_c=n(ks[18], (1, decoder_dim)),
    )


# --------------------------------- main ----------------------------------------
if __name__ == "__main__":
    B = 2            # batch
    P = 16           # num_pixels (e.g. 4x4 encoder grid, spatial flattened)
    E = 32           # encoder_dim
    D = 32           # decoder_dim
    A = 32           # attention_dim
    EMB = 32         # embed_size
    V = 64           # vocab_size
    TCAP = 8         # caption length

    key = jax.random.PRNGKey(0)
    k_feat, k_cap, k_par = jax.random.split(key, 3)

    features = jax.random.normal(k_feat, (B, P, E), jnp.float32)
    captions = jax.random.randint(k_cap, (B, TCAP), 0, V, jnp.int32)
    lengths = [TCAP, TCAP]   # equal lengths -> batch_size_t == B every step

    params = init_params(k_par, encoder_dim=E, decoder_dim=D, attention_dim=A,
                         embed_size=EMB, vocab_size=V)

    predictions, caps_out, decode_lengths, alphas = decoder_rnn_forward(
        params, features, captions, lengths)
    jax.block_until_ready((predictions, alphas))

    # correctness check vs. pure-JAX reference
    T = max(decode_lengths)
    ref_preds, ref_alphas = reference_forward(params, features, captions, T)
    np.testing.assert_allclose(np.asarray(predictions), np.asarray(ref_preds),
                               rtol=1e-2, atol=2e-3)
    np.testing.assert_allclose(np.asarray(alphas), np.asarray(ref_alphas),
                               rtol=1e-2, atol=2e-3)

    print("KERNEL_OK")
</pallas_src>

<mosaic_0001>
module attributes {stable_mosaic.version = 11 : i64} {
  func.func @decoder_kernel(%arg0: memref<8x16x32xf32, #tpu.memory_space<vmem>>, %arg1: memref<7x8x32xf32, #tpu.memory_space<vmem>>, %arg2: memref<8x32xf32, #tpu.memory_space<vmem>>, %arg3: memref<8x32xf32, #tpu.memory_space<vmem>>, %arg4: memref<32x32xf32, #tpu.memory_space<vmem>>, %arg5: memref<1x32xf32, #tpu.memory_space<vmem>>, %arg6: memref<32x32xf32, #tpu.memory_space<vmem>>, %arg7: memref<1x32xf32, #tpu.memory_space<vmem>>, %arg8: memref<1x1x32xf32, #tpu.memory_space<vmem>>, %arg9: memref<32x32xf32, #tpu.memory_space<vmem>>, %arg10: memref<1x32xf32, #tpu.memory_space<vmem>>, %arg11: memref<96x128xf32, #tpu.memory_space<vmem>>, %arg12: memref<1x128xf32, #tpu.memory_space<vmem>>, %arg13: memref<32x128xf32, #tpu.memory_space<vmem>>, %arg14: memref<1x128xf32, #tpu.memory_space<vmem>>, %arg15: memref<7x8x128xf32, #tpu.memory_space<vmem>>, %arg16: memref<7x8x128xf32, #tpu.memory_space<vmem>>) attributes {dimension_semantics = [], scalar_prefetch = 0 : i64, scratch_operands = 0 : i64, tpu.core_type = #tpu.core_type<tc>} {
    %c0 = arith.constant 0 : index
    %c0_0 = arith.constant 0 : index
    %c0_1 = arith.constant 0 : index
    %0 = vector.load %arg0[%c0, %c0_0, %c0_1] : memref<8x16x32xf32, #tpu.memory_space<vmem>>, vector<8x16x32xf32>
    %1 = vector.shape_cast %0 : vector<8x16x32xf32> to vector<128x32xf32>
    %c0_2 = arith.constant 0 : index
    %c0_3 = arith.constant 0 : index
    %2 = vector.load %arg4[%c0_2, %c0_3] : memref<32x32xf32, #tpu.memory_space<vmem>>, vector<32x32xf32>
    %cst = arith.constant dense<0.000000e+00> : vector<128x32xf32>
    %3 = tpu.matmul %1, %2, %cst {dimension_numbers = #tpu.dot_dimension_numbers<[1], [0], [0], [1], [0, 0, 1, 1], [], []>} : vector<128x32xf32>, vector<32x32xf32>, vector<128x32xf32> -> vector<128x32xf32>
    %c0_4 = arith.constant 0 : index
    %c0_5 = arith.constant 0 : index
    %4 = vector.load %arg5[%c0_4, %c0_5] : memref<1x32xf32, #tpu.memory_space<vmem>>, vector<1x32xf32>
    %5 = vector.broadcast %4 : vector<1x32xf32> to vector<128x32xf32>
    %6 = arith.addf %3, %5 : vector<128x32xf32>
    %7 = vector.shape_cast %6 : vector<128x32xf32> to vector<8x16x32xf32>
    %c0_6 = arith.constant 0 : index
    %c0_7 = arith.constant 0 : index
    %c0_8 = arith.constant 0 : index
    %8 = vector.load %arg8[%c0_6, %c0_7, %c0_8] : memref<1x1x32xf32, #tpu.memory_space<vmem>>, vector<1x1x32xf32>
    %cst_9 = arith.constant 0.000000e+00 : f32
    %9 = vector.broadcast %cst_9 : f32 to vector<8x112xf32>
    %c0_10 = arith.constant 0 : index
    %c0_11 = arith.constant 0 : index
    %10 = vector.load %arg2[%c0_10, %c0_11] : memref<8x32xf32, #tpu.memory_space<vmem>>, vector<8x32xf32>
    %c0_12 = arith.constant 0 : index
    %c0_13 = arith.constant 0 : index
    %11 = vector.load %arg3[%c0_12, %c0_13] : memref<8x32xf32, #tpu.memory_space<vmem>>, vector<8x32xf32>
    %c0_i32 = arith.constant 0 : i32
    %c0_14 = arith.constant 0 : index
    %c0_15 = arith.constant 0 : index
    %12 = vector.load %arg6[%c0_14, %c0_15] : memref<32x32xf32, #tpu.memory_space<vmem>>, vector<32x32xf32>
    %cst_16 = arith.constant dense<0.000000e+00> : vector<8x32xf32>
    %13 = tpu.matmul %10, %12, %cst_16 {dimension_numbers = #tpu.dot_dimension_numbers<[1], [0], [0], [1], [0, 0, 1, 1], [], []>} : vector<8x32xf32>, vector<32x32xf32>, vector<8x32xf32> -> vector<8x32xf32>
    %c0_17 = arith.constant 0 : index
    %c0_18 = arith.constant 0 : index
    %14 = vector.load %arg7[%c0_17, %c0_18] : memref<1x32xf32, #tpu.memory_space<vmem>>, vector<1x32xf32>
    %15 = vector.broadcast %14 : vector<1x32xf32> to vector<8x32xf32>
    %16 = arith.addf %13, %15 : vector<8x32xf32>
    %17 = vector.shape_cast %16 : vector<8x32xf32> to vector<8x1x32xf32>
    %18 = vector.broadcast %17 : vector<8x1x32xf32> to vector<8x16x32xf32>
    %19 = arith.addf %7, %18 : vector<8x16x32xf32>
    %cst_19 = arith.constant 0.000000e+00 : f32
    %20 = vector.broadcast %cst_19 : f32 to vector<8x16x32xf32>
    %21 = arith.maximumf %19, %20 : vector<8x16x32xf32>
    %22 = vector.broadcast %8 : vector<1x1x32xf32> to vector<8x16x32xf32>
    %23 = arith.mulf %21, %22 : vector<8x16x32xf32>
    %cst_20 = arith.constant dense<0.000000e+00> : vector<8x16xf32>
    %24 = vector.multi_reduction <add>, %23, %cst_20 [2] : vector<8x16x32xf32> to vector<8x16xf32>
    %cst_21 = arith.constant dense<0xFF800000> : vector<8xf32>
    %25 = vector.multi_reduction <maximumf>, %24, %cst_21 [1] : vector<8x16xf32> to vector<8xf32>
    %26 = vector.shape_cast %25 : vector<8xf32> to vector<8x1xf32>
    %27 = vector.broadcast %26 : vector<8x1xf32> to vector<8x16xf32>
    %28 = arith.subf %24, %27 : vector<8x16xf32>
    %29 = math.exp %28 : vector<8x16xf32>
    %cst_22 = arith.constant dense<0.000000e+00> : vector<8xf32>
    %30 = vector.multi_reduction <add>, %29, %cst_22 [1] : vector<8x16xf32> to vector<8xf32>
    %31 = vector.shape_cast %30 : vector<8xf32> to vector<8x1xf32>
    %32 = tpu.reciprocal %31 {approx = true} : vector<8x1xf32> -> vector<8x1xf32>
    %33 = vector.broadcast %32 : vector<8x1xf32> to vector<8x16xf32>
    %34 = arith.mulf %29, %33 : vector<8x16xf32>
    %35 = vector.shape_cast %34 : vector<8x16xf32> to vector<8x16x1xf32>
    %36 = vector.broadcast %35 : vector<8x16x1xf32> to vector<8x16x32xf32>
    %37 = arith.mulf %0, %36 : vector<8x16x32xf32>
    %cst_23 = arith.constant dense<0.000000e+00> : vector<8x32xf32>
    %38 = vector.multi_reduction <add>, %37, %cst_23 [1] : vector<8x16x32xf32> to vector<8x32xf32>
    %c0_24 = arith.constant 0 : index
    %c0_25 = arith.constant 0 : index
    %39 = vector.load %arg9[%c0_24, %c0_25] : memref<32x32xf32, #tpu.memory_space<vmem>>, vector<32x32xf32>
    %cst_26 = arith.constant dense<0.000000e+00> : vector<8x32xf32>
    %40 = tpu.matmul %10, %39, %cst_26 {dimension_numbers = #tpu.dot_dimension_numbers<[1], [0], [0], [1], [0, 0, 1, 1], [], []>} : vector<8x32xf32>, vector<32x32xf32>, vector<8x32xf32> -> vector<8x32xf32>
    %c0_27 = arith.constant 0 : index
    %c0_28 = arith.constant 0 : index
    %41 = vector.load %arg10[%c0_27, %c0_28] : memref<1x32xf32, #tpu.memory_space<vmem>>, vector<1x32xf32>
    %42 = vector.broadcast %41 : vector<1x32xf32> to vector<8x32xf32>
    %43 = arith.addf %40, %42 : vector<8x32xf32>
    %44 = arith.negf %43 : vector<8x32xf32>
    %45 = math.exp %44 : vector<8x32xf32>
    %cst_29 = arith.constant 1.000000e+00 : f32
    %46 = vector.broadcast %cst_29 : f32 to vector<8x32xf32>
    %47 = arith.addf %46, %45 : vector<8x32xf32>
    %48 = arith.divf %46, %47 : vector<8x32xf32>
    %49 = arith.mulf %48, %38 : vector<8x32xf32>
    %50 = arith.index_cast %c0_i32 : i32 to index
    %c0_30 = arith.constant 0 : index
    %c0_31 = arith.constant 0 : index
    %51 = vector.load %arg1[%50, %c0_30, %c0_31] : memref<7x8x32xf32, #tpu.memory_space<vmem>>, vector<1x8x32xf32>
    %52 = vector.shape_cast %51 : vector<1x8x32xf32> to vector<8x32xf32>
    %53 = tpu.concatenate %52, %49, %10 in 1 : vector<8x32xf32>, vector<8x32xf32>, vector<8x32xf32> -> vector<8x96xf32>
    %c0_32 = arith.constant 0 : index
    %c0_33 = arith.constant 0 : index
    %54 = vector.load %arg11[%c0_32, %c0_33] : memref<96x128xf32, #tpu.memory_space<vmem>>, vector<96x128xf32>
    %cst_34 = arith.constant dense<0.000000e+00> : vector<8x128xf32>
    %55 = tpu.matmul %53, %54, %cst_34 {dimension_numbers = #tpu.dot_dimension_numbers<[1], [0], [0], [1], [0, 0, 1, 1], [], []>} : vector<8x96xf32>, vector<96x128xf32>, vector<8x128xf32> -> vector<8x128xf32>
    %c0_35 = arith.constant 0 : index
    %c0_36 = arith.constant 0 : index
    %56 = vector.load %arg12[%c0_35, %c0_36] : memref<1x128xf32, #tpu.memory_space<vmem>>, vector<1x128xf32>
    %57 = vector.broadcast %56 : vector<1x128xf32> to vector<8x128xf32>
    %58 = arith.addf %55, %57 : vector<8x128xf32>
    %59 = vector.extract_strided_slice %58 {offsets = [0, 0], sizes = [8, 32], strides = [1, 1]} : vector<8x128xf32> to vector<8x32xf32>
    %60 = arith.negf %59 : vector<8x32xf32>
    %61 = math.exp %60 : vector<8x32xf32>
    %cst_37 = arith.constant 1.000000e+00 : f32
    %62 = vector.broadcast %cst_37 : f32 to vector<8x32xf32>
    %63 = arith.addf %62, %61 : vector<8x32xf32>
    %64 = arith.divf %62, %63 : vector<8x32xf32>
    %65 = vector.extract_strided_slice %58 {offsets = [0, 32], sizes = [8, 32], strides = [1, 1]} : vector<8x128xf32> to vector<8x32xf32>
    %66 = arith.negf %65 : vector<8x32xf32>
    %67 = math.exp %66 : vector<8x32xf32>
    %cst_38 = arith.constant 1.000000e+00 : f32
    %68 = vector.broadcast %cst_38 : f32 to vector<8x32xf32>
    %69 = arith.addf %68, %67 : vector<8x32xf32>
    %70 = arith.divf %68, %69 : vector<8x32xf32>
    %71 = vector.extract_strided_slice %58 {offsets = [0, 64], sizes = [8, 32], strides = [1, 1]} : vector<8x128xf32> to vector<8x32xf32>
    %72 = math.tanh %71 : vector<8x32xf32>
    %73 = vector.extract_strided_slice %58 {offsets = [0, 96], sizes = [8, 32], strides = [1, 1]} : vector<8x128xf32> to vector<8x32xf32>
    %74 = arith.negf %73 : vector<8x32xf32>
    %75 = math.exp %74 : vector<8x32xf32>
    %cst_39 = arith.constant 1.000000e+00 : f32
    %76 = vector.broadcast %cst_39 : f32 to vector<8x32xf32>
    %77 = arith.addf %76, %75 : vector<8x32xf32>
    %78 = arith.divf %76, %77 : vector<8x32xf32>
    %79 = arith.mulf %70, %11 : vector<8x32xf32>
    %80 = arith.mulf %64, %72 : vector<8x32xf32>
    %81 = arith.addf %79, %80 : vector<8x32xf32>
    %82 = math.tanh %81 : vector<8x32xf32>
    %83 = arith.mulf %78, %82 : vector<8x32xf32>
    %c0_40 = arith.constant 0 : index
    %c0_41 = arith.constant 0 : index
    %84 = vector.load %arg13[%c0_40, %c0_41] : memref<32x128xf32, #tpu.memory_space<vmem>>, vector<32x128xf32>
    %cst_42 = arith.constant dense<0.000000e+00> : vector<8x128xf32>
    %85 = tpu.matmul %83, %84, %cst_42 {dimension_numbers = #tpu.dot_dimension_numbers<[1], [0], [0], [1], [0, 0, 1, 1], [], []>} : vector<8x32xf32>, vector<32x128xf32>, vector<8x128xf32> -> vector<8x128xf32>
    %c0_43 = arith.constant 0 : index
    %c0_44 = arith.constant 0 : index
    %86 = vector.load %arg14[%c0_43, %c0_44] : memref<1x128xf32, #tpu.memory_space<vmem>>, vector<1x128xf32>
    %87 = vector.broadcast %86 : vector<1x128xf32> to vector<8x128xf32>
    %88 = arith.addf %85, %87 : vector<8x128xf32>
    %89 = arith.index_cast %c0_i32 : i32 to index
    %c0_45 = arith.constant 0 : index
    %c0_46 = arith.constant 0 : index
    %90 = vector.load %arg15[%89, %c0_45, %c0_46] : memref<7x8x128xf32, #tpu.memory_space<vmem>>, vector<1x8x128xf32>
    %91 = vector.shape_cast %90 : vector<1x8x128xf32> to vector<8x128xf32>
    %92 = vector.shape_cast %88 : vector<8x128xf32> to vector<1x8x128xf32>
    tpu.vector_store %arg15[%89, %c0_45, %c0_46], %92 {strides = array<i32>} : memref<7x8x128xf32, #tpu.memory_space<vmem>>, vector<1x8x128xf32>,
    %93 = tpu.concatenate %34, %9 in 1 : vector<8x16xf32>, vector<8x112xf32> -> vector<8x128xf32>
    %94 = arith.index_cast %c0_i32 : i32 to index
    %c0_47 = arith.constant 0 : index
    %c0_48 = arith.constant 0 : index
    %95 = vector.load %arg16[%94, %c0_47, %c0_48] : memref<7x8x128xf32, #tpu.memory_space<vmem>>, vector<1x8x128xf32>
    %96 = vector.shape_cast %95 : vector<1x8x128xf32> to vector<8x128xf32>
    %97 = vector.shape_cast %93 : vector<8x128xf32> to vector<1x8x128xf32>
    tpu.vector_store %arg16[%94, %c0_47, %c0_48], %97 {strides = array<i32>} : memref<7x8x128xf32, #tpu.memory_space<vmem>>, vector<1x8x128xf32>,
    %c1_i32 = arith.constant 1 : i32
    %c0_49 = arith.constant 0 : index
    %c0_50 = arith.constant 0 : index
    %98 = vector.load %arg6[%c0_49, %c0_50] : memref<32x32xf32, #tpu.memory_space<vmem>>, vector<32x32xf32>
    %cst_51 = arith.constant dense<0.000000e+00> : vector<8x32xf32>
    %99 = tpu.matmul %83, %98, %cst_51 {dimension_numbers = #tpu.dot_dimension_numbers<[1], [0], [0], [1], [0, 0, 1, 1], [], []>} : vector<8x32xf32>, vector<32x32xf32>, vector<8x32xf32> -> vector<8x32xf32>
    %c0_52 = arith.constant 0 : index
    %c0_53 = arith.constant 0 : index
    %100 = vector.load %arg7[%c0_52, %c0_53] : memref<1x32xf32, #tpu.memory_space<vmem>>, vector<1x32xf32>
    %101 = vector.broadcast %100 : vector<1x32xf32> to vector<8x32xf32>
    %102 = arith.addf %99, %101 : vector<8x32xf32>
    %103 = vector.shape_cast %102 : vector<8x32xf32> to vector<8x1x32xf32>
    %104 = vector.broadcast %103 : vector<8x1x32xf32> to vector<8x16x32xf32>
    %105 = arith.addf %7, %104 : vector<8x16x32xf32>
    %cst_54 = arith.constant 0.000000e+00 : f32
    %106 = vector.broadcast %cst_54 : f32 to vector<8x16x32xf32>
    %107 = arith.maximumf %105, %106 : vector<8x16x32xf32>
    %108 = vector.broadcast %8 : vector<1x1x32xf32> to vector<8x16x32xf32>
    %109 = arith.mulf %107, %108 : vector<8x16x32xf32>
    %cst_55 = arith.constant dense<0.000000e+00> : vector<8x16xf32>
    %110 = vector.multi_reduction <add>, %109, %cst_55 [2] : vector<8x16x32xf32> to vector<8x16xf32>
    %cst_56 = arith.constant dense<0xFF800000> : vector<8xf32>
    %111 = vector.multi_reduction <maximumf>, %110, %cst_56 [1] : vector<8x16xf32> to vector<8xf32>
    %112 = vector.shape_cast %111 : vector<8xf32> to vector<8x1xf32>
    %113 = vector.broadcast %112 : vector<8x1xf32> to vector<8x16xf32>
    %114 = arith.subf %110, %113 : vector<8x16xf32>
    %115 = math.exp %114 : vector<8x16xf32>
    %cst_57 = arith.constant dense<0.000000e+00> : vector<8xf32>
    %116 = vector.multi_reduction <add>, %115, %cst_57 [1] : vector<8x16xf32> to vector<8xf32>
    %117 = vector.shape_cast %116 : vector<8xf32> to vector<8x1xf32>
    %118 = tpu.reciprocal %117 {approx = true} : vector<8x1xf32> -> vector<8x1xf32>
    %119 = vector.broadcast %118 : vector<8x1xf32> to vector<8x16xf32>
    %120 = arith.mulf %115, %119 : vector<8x16xf32>
    %121 = vector.shape_cast %120 : vector<8x16xf32> to vector<8x16x1xf32>
    %122 = vector.broadcast %121 : vector<8x16x1xf32> to vector<8x16x32xf32>
    %123 = arith.mulf %0, %122 : vector<8x16x32xf32>
    %cst_58 = arith.constant dense<0.000000e+00> : vector<8x32xf32>
    %124 = vector.multi_reduction <add>, %123, %cst_58 [1] : vector<8x16x32xf32> to vector<8x32xf32>
    %c0_59 = arith.constant 0 : index
    %c0_60 = arith.constant 0 : index
    %125 = vector.load %arg9[%c0_59, %c0_60] : memref<32x32xf32, #tpu.memory_space<vmem>>, vector<32x32xf32>
    %cst_61 = arith.constant dense<0.000000e+00> : vector<8x32xf32>
    %126 = tpu.matmul %83, %125, %cst_61 {dimension_numbers = #tpu.dot_dimension_numbers<[1], [0], [0], [1], [0, 0, 1, 1], [], []>} : vector<8x32xf32>, vector<32x32xf32>, vector<8x32xf32> -> vector<8x32xf32>
    %c0_62 = arith.constant 0 : index
    %c0_63 = arith.constant 0 : index
    %127 = vector.load %arg10[%c0_62, %c0_63] : memref<1x32xf32, #tpu.memory_space<vmem>>, vector<1x32xf32>
    %128 = vector.broadcast %127 : vector<1x32xf32> to vector<8x32xf32>
    %129 = arith.addf %126, %128 : vector<8x32xf32>
    %130 = arith.negf %129 : vector<8x32xf32>
    %131 = math.exp %130 : vector<8x32xf32>
    %cst_64 = arith.constant 1.000000e+00 : f32
    %132 = vector.broadcast %cst_64 : f32 to vector<8x32xf32>
    %133 = arith.addf %132, %131 : vector<8x32xf32>
    %134 = arith.divf %132, %133 : vector<8x32xf32>
    %135 = arith.mulf %134, %124 : vector<8x32xf32>
    %136 = arith.index_cast %c1_i32 : i32 to index
    %c0_65 = arith.constant 0 : index
    %c0_66 = arith.constant 0 : index
    %137 = vector.load %arg1[%136, %c0_65, %c0_66] : memref<7x8x32xf32, #tpu.memory_space<vmem>>, vector<1x8x32xf32>
    %138 = vector.shape_cast %137 : vector<1x8x32xf32> to vector<8x32xf32>
    %139 = tpu.concatenate %138, %135, %83 in 1 : vector<8x32xf32>, vector<8x32xf32>, vector<8x32xf32> -> vector<8x96xf32>
    %c0_67 = arith.constant 0 : index
    %c0_68 = arith.constant 0 : index
    %140 = vector.load %arg11[%c0_67, %c0_68] : memref<96x128xf32, #tpu.memory_space<vmem>>, vector<96x128xf32>
    %cst_69 = arith.constant dense<0.000000e+00> : vector<8x128xf32>
    %141 = tpu.matmul %139, %140, %cst_69 {dimension_numbers = #tpu.dot_dimension_numbers<[1], [0], [0], [1], [0, 0, 1, 1], [], []>} : vector<8x96xf32>, vector<96x128xf32>, vector<8x128xf32> -> vector<8x128xf32>
    %c0_70 = arith.constant 0 : index
    %c0_71 = arith.constant 0 : index
    %142 = vector.load %arg12[%c0_70, %c0_71] : memref<1x128xf32, #tpu.memory_space<vmem>>, vector<1x128xf32>
    %143 = vector.broadcast %142 : vector<1x128xf32> to vector<8x128xf32>
    %144 = arith.addf %141, %143 : vector<8x128xf32>
    %145 = vector.extract_strided_slice %144 {offsets = [0, 0], sizes = [8, 32], strides = [1, 1]} : vector<8x128xf32> to vector<8x32xf32>
    %146 = arith.negf %145 : vector<8x32xf32>
    %147 = math.exp %146 : vector<8x32xf32>
    %cst_72 = arith.constant 1.000000e+00 : f32
    %148 = vector.broadcast %cst_72 : f32 to vector<8x32xf32>
    %149 = arith.addf %148, %147 : vector<8x32xf32>
    %150 = arith.divf %148, %149 : vector<8x32xf32>
    %151 = vector.extract_strided_slice %144 {offsets = [0, 32], sizes = [8, 32], strides = [1, 1]} : vector<8x128xf32> to vector<8x32xf32>
    %152 = arith.negf %151 : vector<8x32xf32>
    %153 = math.exp %152 : vector<8x32xf32>
    %cst_73 = arith.constant 1.000000e+00 : f32
    %154 = vector.broadcast %cst_73 : f32 to vector<8x32xf32>
    %155 = arith.addf %154, %153 : vector<8x32xf32>
    %156 = arith.divf %154, %155 : vector<8x32xf32>
    %157 = vector.extract_strided_slice %144 {offsets = [0, 64], sizes = [8, 32], strides = [1, 1]} : vector<8x128xf32> to vector<8x32xf32>
    %158 = math.tanh %157 : vector<8x32xf32>
    %159 = vector.extract_strided_slice %144 {offsets = [0, 96], sizes = [8, 32], strides = [1, 1]} : vector<8x128xf32> to vector<8x32xf32>
    %160 = arith.negf %159 : vector<8x32xf32>
    %161 = math.exp %160 : vector<8x32xf32>
    %cst_74 = arith.constant 1.000000e+00 : f32
    %162 = vector.broadcast %cst_74 : f32 to vector<8x32xf32>
    %163 = arith.addf %162, %161 : vector<8x32xf32>
    %164 = arith.divf %162, %163 : vector<8x32xf32>
    %165 = arith.mulf %156, %81 : vector<8x32xf32>
    %166 = arith.mulf %150, %158 : vector<8x32xf32>
    %167 = arith.addf %165, %166 : vector<8x32xf32>
    %168 = math.tanh %167 : vector<8x32xf32>
    %169 = arith.mulf %164, %168 : vector<8x32xf32>
    %c0_75 = arith.constant 0 : index
    %c0_76 = arith.constant 0 : index
    %170 = vector.load %arg13[%c0_75, %c0_76] : memref<32x128xf32, #tpu.memory_space<vmem>>, vector<32x128xf32>
    %cst_77 = arith.constant dense<0.000000e+00> : vector<8x128xf32>
    %171 = tpu.matmul %169, %170, %cst_77 {dimension_numbers = #tpu.dot_dimension_numbers<[1], [0], [0], [1], [0, 0, 1, 1], [], []>} : vector<8x32xf32>, vector<32x128xf32>, vector<8x128xf32> -> vector<8x128xf32>
    %c0_78 = arith.constant 0 : index
    %c0_79 = arith.constant 0 : index
    %172 = vector.load %arg14[%c0_78, %c0_79] : memref<1x128xf32, #tpu.memory_space<vmem>>, vector<1x128xf32>
    %173 = vector.broadcast %172 : vector<1x128xf32> to vector<8x128xf32>
    %174 = arith.addf %171, %173 : vector<8x128xf32>
    %175 = arith.index_cast %c1_i32 : i32 to index
    %c0_80 = arith.constant 0 : index
    %c0_81 = arith.constant 0 : index
    %176 = vector.load %arg15[%175, %c0_80, %c0_81] : memref<7x8x128xf32, #tpu.memory_space<vmem>>, vector<1x8x128xf32>
    %177 = vector.shape_cast %176 : vector<1x8x128xf32> to vector<8x128xf32>
    %178 = vector.shape_cast %174 : vector<8x128xf32> to vector<1x8x128xf32>
    tpu.vector_store %arg15[%175, %c0_80, %c0_81], %178 {strides = array<i32>} : memref<7x8x128xf32, #tpu.memory_space<vmem>>, vector<1x8x128xf32>,
    %179 = tpu.concatenate %120, %9 in 1 : vector<8x16xf32>, vector<8x112xf32> -> vector<8x128xf32>
    %180 = arith.index_cast %c1_i32 : i32 to index
    %c0_82 = arith.constant 0 : index
    %c0_83 = arith.constant 0 : index
    %181 = vector.load %arg16[%180, %c0_82, %c0_83] : memref<7x8x128xf32, #tpu.memory_space<vmem>>, vector<1x8x128xf32>
    %182 = vector.shape_cast %181 : vector<1x8x128xf32> to vector<8x128xf32>
    %183 = vector.shape_cast %179 : vector<8x128xf32> to vector<1x8x128xf32>
    tpu.vector_store %arg16[%180, %c0_82, %c0_83], %183 {strides = array<i32>} : memref<7x8x128xf32, #tpu.memory_space<vmem>>, vector<1x8x128xf32>,
    %c2_i32 = arith.constant 2 : i32
    %c0_84 = arith.constant 0 : index
    %c0_85 = arith.constant 0 : index
    %184 = vector.load %arg6[%c0_84, %c0_85] : memref<32x32xf32, #tpu.memory_space<vmem>>, vector<32x32xf32>
    %cst_86 = arith.constant dense<0.000000e+00> : vector<8x32xf32>
    %185 = tpu.matmul %169, %184, %cst_86 {dimension_numbers = #tpu.dot_dimension_numbers<[1], [0], [0], [1], [0, 0, 1, 1], [], []>} : vector<8x32xf32>, vector<32x32xf32>, vector<8x32xf32> -> vector<8x32xf32>
    %c0_87 = arith.constant 0 : index
    %c0_88 = arith.constant 0 : index
    %186 = vector.load %arg7[%c0_87, %c0_88] : memref<1x32xf32, #tpu.memory_space<vmem>>, vector<1x32xf32>
    %187 = vector.broadcast %186 : vector<1x32xf32> to vector<8x32xf32>
    %188 = arith.addf %185, %187 : vector<8x32xf32>
    %189 = vector.shape_cast %188 : vector<8x32xf32> to vector<8x1x32xf32>
    %190 = vector.broadcast %189 : vector<8x1x32xf32> to vector<8x16x32xf32>
    %191 = arith.addf %7, %190 : vector<8x16x32xf32>
    %cst_89 = arith.constant 0.000000e+00 : f32
    %192 = vector.broadcast %cst_89 : f32 to vector<8x16x32xf32>
    %193 = arith.maximumf %191, %192 : vector<8x16x32xf32>
    %194 = vector.broadcast %8 : vector<1x1x32xf32> to vector<8x16x32xf32>
    %195 = arith.mulf %193, %194 : vector<8x16x32xf32>
    %cst_90 = arith.constant dense<0.000000e+00> : vector<8x16xf32>
    %196 = vector.multi_reduction <add>, %195, %cst_90 [2] : vector<8x16x32xf32> to vector<8x16xf32>
    %cst_91 = arith.constant dense<0xFF800000> : vector<8xf32>
    %197 = vector.multi_reduction <maximumf>, %196, %cst_91 [1] : vector<8x16xf32> to vector<8xf32>
    %198 = vector.shape_cast %197 : vector<8xf32> to vector<8x1xf32>
    %199 = vector.broadcast %198 : vector<8x1xf32> to vector<8x16xf32>
    %200 = arith.subf %196, %199 : vector<8x16xf32>
    %201 = math.exp %200 : vector<8x16xf32>
    %cst_92 = arith.constant dense<0.000000e+00> : vector<8xf32>
    %202 = vector.multi_reduction <add>, %201, %cst_92 [1] : vector<8x16xf32> to vector<8xf32>
    %203 = vector.shape_cast %202 : vector<8xf32> to vector<8x1xf32>
    %204 = tpu.reciprocal %203 {approx = true} : vector<8x1xf32> -> vector<8x1xf32>
    %205 = vector.broadcast %204 : vector<8x1xf32> to vector<8x16xf32>
    %206 = arith.mulf %201, %205 : vector<8x16xf32>
    %207 = vector.shape_cast %206 : vector<8x16xf32> to vector<8x16x1xf32>
    %208 = vector.broadcast %207 : vector<8x16x1xf32> to vector<8x16x32xf32>
    %209 = arith.mulf %0, %208 : vector<8x16x32xf32>
    %cst_93 = arith.constant dense<0.000000e+00> : vector<8x32xf32>
    %210 = vector.multi_reduction <add>, %209, %cst_93 [1] : vector<8x16x32xf32> to vector<8x32xf32>
    %c0_94 = arith.constant 0 : index
    %c0_95 = arith.constant 0 : index
    %211 = vector.load %arg9[%c0_94, %c0_95] : memref<32x32xf32, #tpu.memory_space<vmem>>, vector<32x32xf32>
    %cst_96 = arith.constant dense<0.000000e+00> : vector<8x32xf32>
    %212 = tpu.matmul %169, %211, %cst_96 {dimension_numbers = #tpu.dot_dimension_numbers<[1], [0], [0], [1], [0, 0, 1, 1], [], []>} : vector<8x32xf32>, vector<32x32xf32>, vector<8x32xf32> -> vector<8x32xf32>
    %c0_97 = arith.constant 0 : index
    %c0_98 = arith.constant 0 : index
    %213 = vector.load %arg10[%c0_97, %c0_98] : memref<1x32xf32, #tpu.memory_space<vmem>>, vector<1x32xf32>
    %214 = vector.broadcast %213 : vector<1x32xf32> to vector<8x32xf32>
    %215 = arith.addf %212, %214 : vector<8x32xf32>
    %216 = arith.negf %215 : vector<8x32xf32>
    %217 = math.exp %216 : vector<8x32xf32>
    %cst_99 = arith.constant 1.000000e+00 : f32
    %218 = vector.broadcast %cst_99 : f32 to vector<8x32xf32>
    %219 = arith.addf %218, %217 : vector<8x32xf32>
    %220 = arith.divf %218, %219 : vector<8x32xf32>
    %221 = arith.mulf %220, %210 : vector<8x32xf32>
    %222 = arith.index_cast %c2_i32 : i32 to index
    %c0_100 = arith.constant 0 : index
    %c0_101 = arith.constant 0 : index
    %223 = vector.load %arg1[%222, %c0_100, %c0_101] : memref<7x8x32xf32, #tpu.memory_space<vmem>>, vector<1x8x32xf32>
    %224 = vector.shape_cast %223 : vector<1x8x32xf32> to vector<8x32xf32>
    %225 = tpu.concatenate %224, %221, %169 in 1 : vector<8x32xf32>, vector<8x32xf32>, vector<8x32xf32> -> vector<8x96xf32>
    %c0_102 = arith.constant 0 : index
    %c0_103 = arith.constant 0 : index
    %226 = vector.load %arg11[%c0_102, %c0_103] : memref<96x128xf32, #tpu.memory_space<vmem>>, vector<96x128xf32>
    %cst_104 = arith.constant dense<0.000000e+00> : vector<8x128xf32>
    %227 = tpu.matmul %225, %226, %cst_104 {dimension_numbers = #tpu.dot_dimension_numbers<[1], [0], [0], [1], [0, 0, 1, 1], [], []>} : vector<8x96xf32>, vector<96x128xf32>, vector<8x128xf32> -> vector<8x128xf32>
    %c0_105 = arith.constant 0 : index
    %c0_106 = arith.constant 0 : index
    %228 = vector.load %arg12[%c0_105, %c0_106] : memref<1x128xf32, #tpu.memory_space<vmem>>, vector<1x128xf32>
    %229 = vector.broadcast %228 : vector<1x128xf32> to vector<8x128xf32>
    %230 = arith.addf %227, %229 : vector<8x128xf32>
    %231 = vector.extract_strided_slice %230 {offsets = [0, 0], sizes = [8, 32], strides = [1, 1]} : vector<8x128xf32> to vector<8x32xf32>
    %232 = arith.negf %231 : vector<8x32xf32>
    %233 = math.exp %232 : vector<8x32xf32>
    %cst_107 = arith.constant 1.000000e+00 : f32
    %234 = vector.broadcast %cst_107 : f32 to vector<8x32xf32>
    %235 = arith.addf %234, %233 : vector<8x32xf32>
    %236 = arith.divf %234, %235 : vector<8x32xf32>
    %237 = vector.extract_strided_slice %230 {offsets = [0, 32], sizes = [8, 32], strides = [1, 1]} : vector<8x128xf32> to vector<8x32xf32>
    %238 = arith.negf %237 : vector<8x32xf32>
    %239 = math.exp %238 : vector<8x32xf32>
    %cst_108 = arith.constant 1.000000e+00 : f32
    %240 = vector.broadcast %cst_108 : f32 to vector<8x32xf32>
    %241 = arith.addf %240, %239 : vector<8x32xf32>
    %242 = arith.divf %240, %241 : vector<8x32xf32>
    %243 = vector.extract_strided_slice %230 {offsets = [0, 64], sizes = [8, 32], strides = [1, 1]} : vector<8x128xf32> to vector<8x32xf32>
    %244 = math.tanh %243 : vector<8x32xf32>
    %245 = vector.extract_strided_slice %230 {offsets = [0, 96], sizes = [8, 32], strides = [1, 1]} : vector<8x128xf32> to vector<8x32xf32>
    %246 = arith.negf %245 : vector<8x32xf32>
    %247 = math.exp %246 : vector<8x32xf32>
    %cst_109 = arith.constant 1.000000e+00 : f32
    %248 = vector.broadcast %cst_109 : f32 to vector<8x32xf32>
    %249 = arith.addf %248, %247 : vector<8x32xf32>
    %250 = arith.divf %248, %249 : vector<8x32xf32>
    %251 = arith.mulf %242, %167 : vector<8x32xf32>
    %252 = arith.mulf %236, %244 : vector<8x32xf32>
    %253 = arith.addf %251, %252 : vector<8x32xf32>
    %254 = math.tanh %253 : vector<8x32xf32>
    %255 = arith.mulf %250, %254 : vector<8x32xf32>
    %c0_110 = arith.constant 0 : index
    %c0_111 = arith.constant 0 : index
    %256 = vector.load %arg13[%c0_110, %c0_111] : memref<32x128xf32, #tpu.memory_space<vmem>>, vector<32x128xf32>
    %cst_112 = arith.constant dense<0.000000e+00> : vector<8x128xf32>
    %257 = tpu.matmul %255, %256, %cst_112 {dimension_numbers = #tpu.dot_dimension_numbers<[1], [0], [0], [1], [0, 0, 1, 1], [], []>} : vector<8x32xf32>, vector<32x128xf32>, vector<8x128xf32> -> vector<8x128xf32>
    %c0_113 = arith.constant 0 : index
    %c0_114 = arith.constant 0 : index
    %258 = vector.load %arg14[%c0_113, %c0_114] : memref<1x128xf32, #tpu.memory_space<vmem>>, vector<1x128xf32>
    %259 = vector.broadcast %258 : vector<1x128xf32> to vector<8x128xf32>
    %260 = arith.addf %257, %259 : vector<8x128xf32>
    %261 = arith.index_cast %c2_i32 : i32 to index
    %c0_115 = arith.constant 0 : index
    %c0_116 = arith.constant 0 : index
    %262 = vector.load %arg15[%261, %c0_115, %c0_116] : memref<7x8x128xf32, #tpu.memory_space<vmem>>, vector<1x8x128xf32>
    %263 = vector.shape_cast %262 : vector<1x8x128xf32> to vector<8x128xf32>
    %264 = vector.shape_cast %260 : vector<8x128xf32> to vector<1x8x128xf32>
    tpu.vector_store %arg15[%261, %c0_115, %c0_116], %264 {strides = array<i32>} : memref<7x8x128xf32, #tpu.memory_space<vmem>>, vector<1x8x128xf32>,
    %265 = tpu.concatenate %206, %9 in 1 : vector<8x16xf32>, vector<8x112xf32> -> vector<8x128xf32>
    %266 = arith.index_cast %c2_i32 : i32 to index
    %c0_117 = arith.constant 0 : index
    %c0_118 = arith.constant 0 : index
    %267 = vector.load %arg16[%266, %c0_117, %c0_118] : memref<7x8x128xf32, #tpu.memory_space<vmem>>, vector<1x8x128xf32>
    %268 = vector.shape_cast %267 : vector<1x8x128xf32> to vector<8x128xf32>
    %269 = vector.shape_cast %265 : vector<8x128xf32> to vector<1x8x128xf32>
    tpu.vector_store %arg16[%266, %c0_117, %c0_118], %269 {strides = array<i32>} : memref<7x8x128xf32, #tpu.memory_space<vmem>>, vector<1x8x128xf32>,
    %c3_i32 = arith.constant 3 : i32
    %c0_119 = arith.constant 0 : index
    %c0_120 = arith.constant 0 : index
    %270 = vector.load %arg6[%c0_119, %c0_120] : memref<32x32xf32, #tpu.memory_space<vmem>>, vector<32x32xf32>
    %cst_121 = arith.constant dense<0.000000e+00> : vector<8x32xf32>
    %271 = tpu.matmul %255, %270, %cst_121 {dimension_numbers = #tpu.dot_dimension_numbers<[1], [0], [0], [1], [0, 0, 1, 1], [], []>} : vector<8x32xf32>, vector<32x32xf32>, vector<8x32xf32> -> vector<8x32xf32>
    %c0_122 = arith.constant 0 : index
    %c0_123 = arith.constant 0 : index
    %272 = vector.load %arg7[%c0_122, %c0_123] : memref<1x32xf32, #tpu.memory_space<vmem>>, vector<1x32xf32>
    %273 = vector.broadcast %272 : vector<1x32xf32> to vector<8x32xf32>
    %274 = arith.addf %271, %273 : vector<8x32xf32>
    %275 = vector.shape_cast %274 : vector<8x32xf32> to vector<8x1x32xf32>
    %276 = vector.broadcast %275 : vector<8x1x32xf32> to vector<8x16x32xf32>
    %277 = arith.addf %7, %276 : vector<8x16x32xf32>
    %cst_124 = arith.constant 0.000000e+00 : f32
    %278 = vector.broadcast %cst_124 : f32 to vector<8x16x32xf32>
    %279 = arith.maximumf %277, %278 : vector<8x16x32xf32>
    %280 = vector.broadcast %8 : vector<1x1x32xf32> to vector<8x16x32xf32>
    %281 = arith.mulf %279, %280 : vector<8x16x32xf32>
    %cst_125 = arith.constant dense<0.000000e+00> : vector<8x16xf32>
    %282 = vector.multi_reduction <add>, %281, %cst_125 [2] : vector<8x16x32xf32> to vector<8x16xf32>
    %cst_126 = arith.constant dense<0xFF800000> : vector<8xf32>
    %283 = vector.multi_reduction <maximumf>, %282, %cst_126 [1] : vector<8x16xf32> to vector<8xf32>
    %284 = vector.shape_cast %283 : vector<8xf32> to vector<8x1xf32>
    %285 = vector.broadcast %284 : vector<8x1xf32> to vector<8x16xf32>
    %286 = arith.subf %282, %285 : vector<8x16xf32>
    %287 = math.exp %286 : vector<8x16xf32>
    %cst_127 = arith.constant dense<0.000000e+00> : vector<8xf32>
    %288 = vector.multi_reduction <add>, %287, %cst_127 [1] : vector<8x16xf32> to vector<8xf32>
    %289 = vector.shape_cast %288 : vector<8xf32> to vector<8x1xf32>
    %290 = tpu.reciprocal %289 {approx = true} : vector<8x1xf32> -> vector<8x1xf32>
    %291 = vector.broadcast %290 : vector<8x1xf32> to vector<8x16xf32>
    %292 = arith.mulf %287, %291 : vector<8x16xf32>
    %293 = vector.shape_cast %292 : vector<8x16xf32> to vector<8x16x1xf32>
    %294 = vector.broadcast %293 : vector<8x16x1xf32> to vector<8x16x32xf32>
    %295 = arith.mulf %0, %294 : vector<8x16x32xf32>
    %cst_128 = arith.constant dense<0.000000e+00> : vector<8x32xf32>
    %296 = vector.multi_reduction <add>, %295, %cst_128 [1] : vector<8x16x32xf32> to vector<8x32xf32>
    %c0_129 = arith.constant 0 : index
    %c0_130 = arith.constant 0 : index
    %297 = vector.load %arg9[%c0_129, %c0_130] : memref<32x32xf32, #tpu.memory_space<vmem>>, vector<32x32xf32>
    %cst_131 = arith.constant dense<0.000000e+00> : vector<8x32xf32>
    %298 = tpu.matmul %255, %297, %cst_131 {dimension_numbers = #tpu.dot_dimension_numbers<[1], [0], [0], [1], [0, 0, 1, 1], [], []>} : vector<8x32xf32>, vector<32x32xf32>, vector<8x32xf32> -> vector<8x32xf32>
    %c0_132 = arith.constant 0 : index
    %c0_133 = arith.constant 0 : index
    %299 = vector.load %arg10[%c0_132, %c0_133] : memref<1x32xf32, #tpu.memory_space<vmem>>, vector<1x32xf32>
    %300 = vector.broadcast %299 : vector<1x32xf32> to vector<8x32xf32>
    %301 = arith.addf %298, %300 : vector<8x32xf32>
    %302 = arith.negf %301 : vector<8x32xf32>
    %303 = math.exp %302 : vector<8x32xf32>
    %cst_134 = arith.constant 1.000000e+00 : f32
    %304 = vector.broadcast %cst_134 : f32 to vector<8x32xf32>
    %305 = arith.addf %304, %303 : vector<8x32xf32>
    %306 = arith.divf %304, %305 : vector<8x32xf32>
    %307 = arith.mulf %306, %296 : vector<8x32xf32>
    %308 = arith.index_cast %c3_i32 : i32 to index
    %c0_135 = arith.constant 0 : index
    %c0_136 = arith.constant 0 : index
    %309 = vector.load %arg1[%308, %c0_135, %c0_136] : memref<7x8x32xf32, #tpu.memory_space<vmem>>, vector<1x8x32xf32>
    %310 = vector.shape_cast %309 : vector<1x8x32xf32> to vector<8x32xf32>
    %311 = tpu.concatenate %310, %307, %255 in 1 : vector<8x32xf32>, vector<8x32xf32>, vector<8x32xf32> -> vector<8x96xf32>
    %c0_137 = arith.constant 0 : index
    %c0_138 = arith.constant 0 : index
    %312 = vector.load %arg11[%c0_137, %c0_138] : memref<96x128xf32, #tpu.memory_space<vmem>>, vector<96x128xf32>
    %cst_139 = arith.constant dense<0.000000e+00> : vector<8x128xf32>
    %313 = tpu.matmul %311, %312, %cst_139 {dimension_numbers = #tpu.dot_dimension_numbers<[1], [0], [0], [1], [0, 0, 1, 1], [], []>} : vector<8x96xf32>, vector<96x128xf32>, vector<8x128xf32> -> vector<8x128xf32>
    %c0_140 = arith.constant 0 : index
    %c0_141 = arith.constant 0 : index
    %314 = vector.load %arg12[%c0_140, %c0_141] : memref<1x128xf32, #tpu.memory_space<vmem>>, vector<1x128xf32>
    %315 = vector.broadcast %314 : vector<1x128xf32> to vector<8x128xf32>
    %316 = arith.addf %313, %315 : vector<8x128xf32>
    %317 = vector.extract_strided_slice %316 {offsets = [0, 0], sizes = [8, 32], strides = [1, 1]} : vector<8x128xf32> to vector<8x32xf32>
    %318 = arith.negf %317 : vector<8x32xf32>
    %319 = math.exp %318 : vector<8x32xf32>
    %cst_142 = arith.constant 1.000000e+00 : f32
    %320 = vector.broadcast %cst_142 : f32 to vector<8x32xf32>
    %321 = arith.addf %320, %319 : vector<8x32xf32>
    %322 = arith.divf %320, %321 : vector<8x32xf32>
    %323 = vector.extract_strided_slice %316 {offsets = [0, 32], sizes = [8, 32], strides = [1, 1]} : vector<8x128xf32> to vector<8x32xf32>
    %324 = arith.negf %323 : vector<8x32xf32>
    %325 = math.exp %324 : vector<8x32xf32>
    %cst_143 = arith.constant 1.000000e+00 : f32
    %326 = vector.broadcast %cst_143 : f32 to vector<8x32xf32>
    %327 = arith.addf %326, %325 : vector<8x32xf32>
    %328 = arith.divf %326, %327 : vector<8x32xf32>
    %329 = vector.extract_strided_slice %316 {offsets = [0, 64], sizes = [8, 32], strides = [1, 1]} : vector<8x128xf32> to vector<8x32xf32>
    %330 = math.tanh %329 : vector<8x32xf32>
    %331 = vector.extract_strided_slice %316 {offsets = [0, 96], sizes = [8, 32], strides = [1, 1]} : vector<8x128xf32> to vector<8x32xf32>
    %332 = arith.negf %331 : vector<8x32xf32>
    %333 = math.exp %332 : vector<8x32xf32>
    %cst_144 = arith.constant 1.000000e+00 : f32
    %334 = vector.broadcast %cst_144 : f32 to vector<8x32xf32>
    %335 = arith.addf %334, %333 : vector<8x32xf32>
    %336 = arith.divf %334, %335 : vector<8x32xf32>
    %337 = arith.mulf %328, %253 : vector<8x32xf32>
    %338 = arith.mulf %322, %330 : vector<8x32xf32>
    %339 = arith.addf %337, %338 : vector<8x32xf32>
    %340 = math.tanh %339 : vector<8x32xf32>
    %341 = arith.mulf %336, %340 : vector<8x32xf32>
    %c0_145 = arith.constant 0 : index
    %c0_146 = arith.constant 0 : index
    %342 = vector.load %arg13[%c0_145, %c0_146] : memref<32x128xf32, #tpu.memory_space<vmem>>, vector<32x128xf32>
    %cst_147 = arith.constant dense<0.000000e+00> : vector<8x128xf32>
    %343 = tpu.matmul %341, %342, %cst_147 {dimension_numbers = #tpu.dot_dimension_numbers<[1], [0], [0], [1], [0, 0, 1, 1], [], []>} : vector<8x32xf32>, vector<32x128xf32>, vector<8x128xf32> -> vector<8x128xf32>
    %c0_148 = arith.constant 0 : index
    %c0_149 = arith.constant 0 : index
    %344 = vector.load %arg14[%c0_148, %c0_149] : memref<1x128xf32, #tpu.memory_space<vmem>>, vector<1x128xf32>
    %345 = vector.broadcast %344 : vector<1x128xf32> to vector<8x128xf32>
    %346 = arith.addf %343, %345 : vector<8x128xf32>
    %347 = arith.index_cast %c3_i32 : i32 to index
    %c0_150 = arith.constant 0 : index
    %c0_151 = arith.constant 0 : index
    %348 = vector.load %arg15[%347, %c0_150, %c0_151] : memref<7x8x128xf32, #tpu.memory_space<vmem>>, vector<1x8x128xf32>
    %349 = vector.shape_cast %348 : vector<1x8x128xf32> to vector<8x128xf32>
    %350 = vector.shape_cast %346 : vector<8x128xf32> to vector<1x8x128xf32>
    tpu.vector_store %arg15[%347, %c0_150, %c0_151], %350 {strides = array<i32>} : memref<7x8x128xf32, #tpu.memory_space<vmem>>, vector<1x8x128xf32>,
    %351 = tpu.concatenate %292, %9 in 1 : vector<8x16xf32>, vector<8x112xf32> -> vector<8x128xf32>
    %352 = arith.index_cast %c3_i32 : i32 to index
    %c0_152 = arith.constant 0 : index
    %c0_153 = arith.constant 0 : index
    %353 = vector.load %arg16[%352, %c0_152, %c0_153] : memref<7x8x128xf32, #tpu.memory_space<vmem>>, vector<1x8x128xf32>
    %354 = vector.shape_cast %353 : vector<1x8x128xf32> to vector<8x128xf32>
    %355 = vector.shape_cast %351 : vector<8x128xf32> to vector<1x8x128xf32>
    tpu.vector_store %arg16[%352, %c0_152, %c0_153], %355 {strides = array<i32>} : memref<7x8x128xf32, #tpu.memory_space<vmem>>, vector<1x8x128xf32>,
    %c4_i32 = arith.constant 4 : i32
    %c0_154 = arith.constant 0 : index
    %c0_155 = arith.constant 0 : index
    %356 = vector.load %arg6[%c0_154, %c0_155] : memref<32x32xf32, #tpu.memory_space<vmem>>, vector<32x32xf32>
    %cst_156 = arith.constant dense<0.000000e+00> : vector<8x32xf32>
    %357 = tpu.matmul %341, %356, %cst_156 {dimension_numbers = #tpu.dot_dimension_numbers<[1], [0], [0], [1], [0, 0, 1, 1], [], []>} : vector<8x32xf32>, vector<32x32xf32>, vector<8x32xf32> -> vector<8x32xf32>
    %c0_157 = arith.constant 0 : index
    %c0_158 = arith.constant 0 : index
    %358 = vector.load %arg7[%c0_157, %c0_158] : memref<1x32xf32, #tpu.memory_space<vmem>>, vector<1x32xf32>
    %359 = vector.broadcast %358 : vector<1x32xf32> to vector<8x32xf32>
    %360 = arith.addf %357, %359 : vector<8x32xf32>
    %361 = vector.shape_cast %360 : vector<8x32xf32> to vector<8x1x32xf32>
    %362 = vector.broadcast %361 : vector<8x1x32xf32> to vector<8x16x32xf32>
    %363 = arith.addf %7, %362 : vector<8x16x32xf32>
    %cst_159 = arith.constant 0.000000e+00 : f32
    %364 = vector.broadcast %cst_159 : f32 to vector<8x16x32xf32>
    %365 = arith.maximumf %363, %364 : vector<8x16x32xf32>
    %366 = vector.broadcast %8 : vector<1x1x32xf32> to vector<8x16x32xf32>
    %367 = arith.mulf %365, %366 : vector<8x16x32xf32>
    %cst_160 = arith.constant dense<0.000000e+00> : vector<8x16xf32>
    %368 = vector.multi_reduction <add>, %367, %cst_160 [2] : vector<8x16x32xf32> to vector<8x16xf32>
    %cst_161 = arith.constant dense<0xFF800000> : vector<8xf32>
    %369 = vector.multi_reduction <maximumf>, %368, %cst_161 [1] : vector<8x16xf32> to vector<8xf32>
    %370 = vector.shape_cast %369 : vector<8xf32> to vector<8x1xf32>
    %371 = vector.broadcast %370 : vector<8x1xf32> to vector<8x16xf32>
    %372 = arith.subf %368, %371 : vector<8x16xf32>
    %373 = math.exp %372 : vector<8x16xf32>
    %cst_162 = arith.constant dense<0.000000e+00> : vector<8xf32>
    %374 = vector.multi_reduction <add>, %373, %cst_162 [1] : vector<8x16xf32> to vector<8xf32>
    %375 = vector.shape_cast %374 : vector<8xf32> to vector<8x1xf32>
    %376 = tpu.reciprocal %375 {approx = true} : vector<8x1xf32> -> vector<8x1xf32>
    %377 = vector.broadcast %376 : vector<8x1xf32> to vector<8x16xf32>
    %378 = arith.mulf %373, %377 : vector<8x16xf32>
    %379 = vector.shape_cast %378 : vector<8x16xf32> to vector<8x16x1xf32>
    %380 = vector.broadcast %379 : vector<8x16x1xf32> to vector<8x16x32xf32>
    %381 = arith.mulf %0, %380 : vector<8x16x32xf32>
    %cst_163 = arith.constant dense<0.000000e+00> : vector<8x32xf32>
    %382 = vector.multi_reduction <add>, %381, %cst_163 [1] : vector<8x16x32xf32> to vector<8x32xf32>
    %c0_164 = arith.constant 0 : index
    %c0_165 = arith.constant 0 : index
    %383 = vector.load %arg9[%c0_164, %c0_165] : memref<32x32xf32, #tpu.memory_space<vmem>>, vector<32x32xf32>
    %cst_166 = arith.constant dense<0.000000e+00> : vector<8x32xf32>
    %384 = tpu.matmul %341, %383, %cst_166 {dimension_numbers = #tpu.dot_dimension_numbers<[1], [0], [0], [1], [0, 0, 1, 1], [], []>} : vector<8x32xf32>, vector<32x32xf32>, vector<8x32xf32> -> vector<8x32xf32>
    %c0_167 = arith.constant 0 : index
    %c0_168 = arith.constant 0 : index
    %385 = vector.load %arg10[%c0_167, %c0_168] : memref<1x32xf32, #tpu.memory_space<vmem>>, vector<1x32xf32>
    %386 = vector.broadcast %385 : vector<1x32xf32> to vector<8x32xf32>
    %387 = arith.addf %384, %386 : vector<8x32xf32>
    %388 = arith.negf %387 : vector<8x32xf32>
    %389 = math.exp %388 : vector<8x32xf32>
    %cst_169 = arith.constant 1.000000e+00 : f32
    %390 = vector.broadcast %cst_169 : f32 to vector<8x32xf32>
    %391 = arith.addf %390, %389 : vector<8x32xf32>
    %392 = arith.divf %390, %391 : vector<8x32xf32>
    %393 = arith.mulf %392, %382 : vector<8x32xf32>
    %394 = arith.index_cast %c4_i32 : i32 to index
    %c0_170 = arith.constant 0 : index
    %c0_171 = arith.constant 0 : index
    %395 = vector.load %arg1[%394, %c0_170, %c0_171] : memref<7x8x32xf32, #tpu.memory_space<vmem>>, vector<1x8x32xf32>
    %396 = vector.shape_cast %395 : vector<1x8x32xf32> to vector<8x32xf32>
    %397 = tpu.concatenate %396, %393, %341 in 1 : vector<8x32xf32>, vector<8x32xf32>, vector<8x32xf32> -> vector<8x96xf32>
    %c0_172 = arith.constant 0 : index
    %c0_173 = arith.constant 0 : index
    %398 = vector.load %arg11[%c0_172, %c0_173] : memref<96x128xf32, #tpu.memory_space<vmem>>, vector<96x128xf32>
    %cst_174 = arith.constant dense<0.000000e+00> : vector<8x128xf32>
    %399 = tpu.matmul %397, %398, %cst_174 {dimension_numbers = #tpu.dot_dimension_numbers<[1], [0], [0], [1], [0, 0, 1, 1], [], []>} : vector<8x96xf32>, vector<96x128xf32>, vector<8x128xf32> -> vector<8x128xf32>
    %c0_175 = arith.constant 0 : index
    %c0_176 = arith.constant 0 : index
    %400 = vector.load %arg12[%c0_175, %c0_176] : memref<1x128xf32, #tpu.memory_space<vmem>>, vector<1x128xf32>
    %401 = vector.broadcast %400 : vector<1x128xf32> to vector<8x128xf32>
    %402 = arith.addf %399, %401 : vector<8x128xf32>
    %403 = vector.extract_strided_slice %402 {offsets = [0, 0], sizes = [8, 32], strides = [1, 1]} : vector<8x128xf32> to vector<8x32xf32>
    %404 = arith.negf %403 : vector<8x32xf32>
    %405 = math.exp %404 : vector<8x32xf32>
    %cst_177 = arith.constant 1.000000e+00 : f32
    %406 = vector.broadcast %cst_177 : f32 to vector<8x32xf32>
    %407 = arith.addf %406, %405 : vector<8x32xf32>
    %408 = arith.divf %406, %407 : vector<8x32xf32>
    %409 = vector.extract_strided_slice %402 {offsets = [0, 32], sizes = [8, 32], strides = [1, 1]} : vector<8x128xf32> to vector<8x32xf32>
    %410 = arith.negf %409 : vector<8x32xf32>
    %411 = math.exp %410 : vector<8x32xf32>
    %cst_178 = arith.constant 1.000000e+00 : f32
    %412 = vector.broadcast %cst_178 : f32 to vector<8x32xf32>
    %413 = arith.addf %412, %411 : vector<8x32xf32>
    %414 = arith.divf %412, %413 : vector<8x32xf32>
    %415 = vector.extract_strided_slice %402 {offsets = [0, 64], sizes = [8, 32], strides = [1, 1]} : vector<8x128xf32> to vector<8x32xf32>
    %416 = math.tanh %415 : vector<8x32xf32>
    %417 = vector.extract_strided_slice %402 {offsets = [0, 96], sizes = [8, 32], strides = [1, 1]} : vector<8x128xf32> to vector<8x32xf32>
    %418 = arith.negf %417 : vector<8x32xf32>
    %419 = math.exp %418 : vector<8x32xf32>
    %cst_179 = arith.constant 1.000000e+00 : f32
    %420 = vector.broadcast %cst_179 : f32 to vector<8x32xf32>
    %421 = arith.addf %420, %419 : vector<8x32xf32>
    %422 = arith.divf %420, %421 : vector<8x32xf32>
    %423 = arith.mulf %414, %339 : vector<8x32xf32>
    %424 = arith.mulf %408, %416 : vector<8x32xf32>
    %425 = arith.addf %423, %424 : vector<8x32xf32>
    %426 = math.tanh %425 : vector<8x32xf32>
    %427 = arith.mulf %422, %426 : vector<8x32xf32>
    %c0_180 = arith.constant 0 : index
    %c0_181 = arith.constant 0 : index
    %428 = vector.load %arg13[%c0_180, %c0_181] : memref<32x128xf32, #tpu.memory_space<vmem>>, vector<32x128xf32>
    %cst_182 = arith.constant dense<0.000000e+00> : vector<8x128xf32>
    %429 = tpu.matmul %427, %428, %cst_182 {dimension_numbers = #tpu.dot_dimension_numbers<[1], [0], [0], [1], [0, 0, 1, 1], [], []>} : vector<8x32xf32>, vector<32x128xf32>, vector<8x128xf32> -> vector<8x128xf32>
    %c0_183 = arith.constant 0 : index
    %c0_184 = arith.constant 0 : index
    %430 = vector.load %arg14[%c0_183, %c0_184] : memref<1x128xf32, #tpu.memory_space<vmem>>, vector<1x128xf32>
    %431 = vector.broadcast %430 : vector<1x128xf32> to vector<8x128xf32>
    %432 = arith.addf %429, %431 : vector<8x128xf32>
    %433 = arith.index_cast %c4_i32 : i32 to index
    %c0_185 = arith.constant 0 : index
    %c0_186 = arith.constant 0 : index
    %434 = vector.load %arg15[%433, %c0_185, %c0_186] : memref<7x8x128xf32, #tpu.memory_space<vmem>>, vector<1x8x128xf32>
    %435 = vector.shape_cast %434 : vector<1x8x128xf32> to vector<8x128xf32>
    %436 = vector.shape_cast %432 : vector<8x128xf32> to vector<1x8x128xf32>
    tpu.vector_store %arg15[%433, %c0_185, %c0_186], %436 {strides = array<i32>} : memref<7x8x128xf32, #tpu.memory_space<vmem>>, vector<1x8x128xf32>,
    %437 = tpu.concatenate %378, %9 in 1 : vector<8x16xf32>, vector<8x112xf32> -> vector<8x128xf32>
    %438 = arith.index_cast %c4_i32 : i32 to index
    %c0_187 = arith.constant 0 : index
    %c0_188 = arith.constant 0 : index
    %439 = vector.load %arg16[%438, %c0_187, %c0_188] : memref<7x8x128xf32, #tpu.memory_space<vmem>>, vector<1x8x128xf32>
    %440 = vector.shape_cast %439 : vector<1x8x128xf32> to vector<8x128xf32>
    %441 = vector.shape_cast %437 : vector<8x128xf32> to vector<1x8x128xf32>
    tpu.vector_store %arg16[%438, %c0_187, %c0_188], %441 {strides = array<i32>} : memref<7x8x128xf32, #tpu.memory_space<vmem>>, vector<1x8x128xf32>,
    %c5_i32 = arith.constant 5 : i32
    %c0_189 = arith.constant 0 : index
    %c0_190 = arith.constant 0 : index
    %442 = vector.load %arg6[%c0_189, %c0_190] : memref<32x32xf32, #tpu.memory_space<vmem>>, vector<32x32xf32>
    %cst_191 = arith.constant dense<0.000000e+00> : vector<8x32xf32>
    %443 = tpu.matmul %427, %442, %cst_191 {dimension_numbers = #tpu.dot_dimension_numbers<[1], [0], [0], [1], [0, 0, 1, 1], [], []>} : vector<8x32xf32>, vector<32x32xf32>, vector<8x32xf32> -> vector<8x32xf32>
    %c0_192 = arith.constant 0 : index
    %c0_193 = arith.constant 0 : index
    %444 = vector.load %arg7[%c0_192, %c0_193] : memref<1x32xf32, #tpu.memory_space<vmem>>, vector<1x32xf32>
    %445 = vector.broadcast %444 : vector<1x32xf32> to vector<8x32xf32>
    %446 = arith.addf %443, %445 : vector<8x32xf32>
    %447 = vector.shape_cast %446 : vector<8x32xf32> to vector<8x1x32xf32>
    %448 = vector.broadcast %447 : vector<8x1x32xf32> to vector<8x16x32xf32>
    %449 = arith.addf %7, %448 : vector<8x16x32xf32>
    %cst_194 = arith.constant 0.000000e+00 : f32
    %450 = vector.broadcast %cst_194 : f32 to vector<8x16x32xf32>
    %451 = arith.maximumf %449, %450 : vector<8x16x32xf32>
    %452 = vector.broadcast %8 : vector<1x1x32xf32> to vector<8x16x32xf32>
    %453 = arith.mulf %451, %452 : vector<8x16x32xf32>
    %cst_195 = arith.constant dense<0.000000e+00> : vector<8x16xf32>
    %454 = vector.multi_reduction <add>, %453, %cst_195 [2] : vector<8x16x32xf32> to vector<8x16xf32>
    %cst_196 = arith.constant dense<0xFF800000> : vector<8xf32>
    %455 = vector.multi_reduction <maximumf>, %454, %cst_196 [1] : vector<8x16xf32> to vector<8xf32>
    %456 = vector.shape_cast %455 : vector<8xf32> to vector<8x1xf32>
    %457 = vector.broadcast %456 : vector<8x1xf32> to vector<8x16xf32>
    %458 = arith.subf %454, %457 : vector<8x16xf32>
    %459 = math.exp %458 : vector<8x16xf32>
    %cst_197 = arith.constant dense<0.000000e+00> : vector<8xf32>
    %460 = vector.multi_reduction <add>, %459, %cst_197 [1] : vector<8x16xf32> to vector<8xf32>
    %461 = vector.shape_cast %460 : vector<8xf32> to vector<8x1xf32>
    %462 = tpu.reciprocal %461 {approx = true} : vector<8x1xf32> -> vector<8x1xf32>
    %463 = vector.broadcast %462 : vector<8x1xf32> to vector<8x16xf32>
    %464 = arith.mulf %459, %463 : vector<8x16xf32>
    %465 = vector.shape_cast %464 : vector<8x16xf32> to vector<8x16x1xf32>
    %466 = vector.broadcast %465 : vector<8x16x1xf32> to vector<8x16x32xf32>
    %467 = arith.mulf %0, %466 : vector<8x16x32xf32>
    %cst_198 = arith.constant dense<0.000000e+00> : vector<8x32xf32>
    %468 = vector.multi_reduction <add>, %467, %cst_198 [1] : vector<8x16x32xf32> to vector<8x32xf32>
    %c0_199 = arith.constant 0 : index
    %c0_200 = arith.constant 0 : index
    %469 = vector.load %arg9[%c0_199, %c0_200] : memref<32x32xf32, #tpu.memory_space<vmem>>, vector<32x32xf32>
    %cst_201 = arith.constant dense<0.000000e+00> : vector<8x32xf32>
    %470 = tpu.matmul %427, %469, %cst_201 {dimension_numbers = #tpu.dot_dimension_numbers<[1], [0], [0], [1], [0, 0, 1, 1], [], []>} : vector<8x32xf32>, vector<32x32xf32>, vector<8x32xf32> -> vector<8x32xf32>
    %c0_202 = arith.constant 0 : index
    %c0_203 = arith.constant 0 : index
    %471 = vector.load %arg10[%c0_202, %c0_203] : memref<1x32xf32, #tpu.memory_space<vmem>>, vector<1x32xf32>
    %472 = vector.broadcast %471 : vector<1x32xf32> to vector<8x32xf32>
    %473 = arith.addf %470, %472 : vector<8x32xf32>
    %474 = arith.negf %473 : vector<8x32xf32>
    %475 = math.exp %474 : vector<8x32xf32>
    %cst_204 = arith.constant 1.000000e+00 : f32
    %476 = vector.broadcast %cst_204 : f32 to vector<8x32xf32>
    %477 = arith.addf %476, %475 : vector<8x32xf32>
    %478 = arith.divf %476, %477 : vector<8x32xf32>
    %479 = arith.mulf %478, %468 : vector<8x32xf32>
    %480 = arith.index_cast %c5_i32 : i32 to index
    %c0_205 = arith.constant 0 : index
    %c0_206 = arith.constant 0 : index
    %481 = vector.load %arg1[%480, %c0_205, %c0_206] : memref<7x8x32xf32, #tpu.memory_space<vmem>>, vector<1x8x32xf32>
    %482 = vector.shape_cast %481 : vector<1x8x32xf32> to vector<8x32xf32>
    %483 = tpu.concatenate %482, %479, %427 in 1 : vector<8x32xf32>, vector<8x32xf32>, vector<8x32xf32> -> vector<8x96xf32>
    %c0_207 = arith.constant 0 : index
    %c0_208 = arith.constant 0 : index
    %484 = vector.load %arg11[%c0_207, %c0_208] : memref<96x128xf32, #tpu.memory_space<vmem>>, vector<96x128xf32>
    %cst_209 = arith.constant dense<0.000000e+00> : vector<8x128xf32>
    %485 = tpu.matmul %483, %484, %cst_209 {dimension_numbers = #tpu.dot_dimension_numbers<[1], [0], [0], [1], [0, 0, 1, 1], [], []>} : vector<8x96xf32>, vector<96x128xf32>, vector<8x128xf32> -> vector<8x128xf32>
    %c0_210 = arith.constant 0 : index
    %c0_211 = arith.constant 0 : index
    %486 = vector.load %arg12[%c0_210, %c0_211] : memref<1x128xf32, #tpu.memory_space<vmem>>, vector<1x128xf32>
    %487 = vector.broadcast %486 : vector<1x128xf32> to vector<8x128xf32>
    %488 = arith.addf %485, %487 : vector<8x128xf32>
    %489 = vector.extract_strided_slice %488 {offsets = [0, 0], sizes = [8, 32], strides = [1, 1]} : vector<8x128xf32> to vector<8x32xf32>
    %490 = arith.negf %489 : vector<8x32xf32>
    %491 = math.exp %490 : vector<8x32xf32>
    %cst_212 = arith.constant 1.000000e+00 : f32
    %492 = vector.broadcast %cst_212 : f32 to vector<8x32xf32>
    %493 = arith.addf %492, %491 : vector<8x32xf32>
    %494 = arith.divf %492, %493 : vector<8x32xf32>
    %495 = vector.extract_strided_slice %488 {offsets = [0, 32], sizes = [8, 32], strides = [1, 1]} : vector<8x128xf32> to vector<8x32xf32>
    %496 = arith.negf %495 : vector<8x32xf32>
    %497 = math.exp %496 : vector<8x32xf32>
    %cst_213 = arith.constant 1.000000e+00 : f32
    %498 = vector.broadcast %cst_213 : f32 to vector<8x32xf32>
    %499 = arith.addf %498, %497 : vector<8x32xf32>
    %500 = arith.divf %498, %499 : vector<8x32xf32>
    %501 = vector.extract_strided_slice %488 {offsets = [0, 64], sizes = [8, 32], strides = [1, 1]} : vector<8x128xf32> to vector<8x32xf32>
    %502 = math.tanh %501 : vector<8x32xf32>
    %503 = vector.extract_strided_slice %488 {offsets = [0, 96], sizes = [8, 32], strides = [1, 1]} : vector<8x128xf32> to vector<8x32xf32>
    %504 = arith.negf %503 : vector<8x32xf32>
    %505 = math.exp %504 : vector<8x32xf32>
    %cst_214 = arith.constant 1.000000e+00 : f32
    %506 = vector.broadcast %cst_214 : f32 to vector<8x32xf32>
    %507 = arith.addf %506, %505 : vector<8x32xf32>
    %508 = arith.divf %506, %507 : vector<8x32xf32>
    %509 = arith.mulf %500, %425 : vector<8x32xf32>
    %510 = arith.mulf %494, %502 : vector<8x32xf32>
    %511 = arith.addf %509, %510 : vector<8x32xf32>
    %512 = math.tanh %511 : vector<8x32xf32>
    %513 = arith.mulf %508, %512 : vector<8x32xf32>
    %c0_215 = arith.constant 0 : index
    %c0_216 = arith.constant 0 : index
    %514 = vector.load %arg13[%c0_215, %c0_216] : memref<32x128xf32, #tpu.memory_space<vmem>>, vector<32x128xf32>
    %cst_217 = arith.constant dense<0.000000e+00> : vector<8x128xf32>
    %515 = tpu.matmul %513, %514, %cst_217 {dimension_numbers = #tpu.dot_dimension_numbers<[1], [0], [0], [1], [0, 0, 1, 1], [], []>} : vector<8x32xf32>, vector<32x128xf32>, vector<8x128xf32> -> vector<8x128xf32>
    %c0_218 = arith.constant 0 : index
    %c0_219 = arith.constant 0 : index
    %516 = vector.load %arg14[%c0_218, %c0_219] : memref<1x128xf32, #tpu.memory_space<vmem>>, vector<1x128xf32>
    %517 = vector.broadcast %516 : vector<1x128xf32> to vector<8x128xf32>
    %518 = arith.addf %515, %517 : vector<8x128xf32>
    %519 = arith.index_cast %c5_i32 : i32 to index
    %c0_220 = arith.constant 0 : index
    %c0_221 = arith.constant 0 : index
    %520 = vector.load %arg15[%519, %c0_220, %c0_221] : memref<7x8x128xf32, #tpu.memory_space<vmem>>, vector<1x8x128xf32>
    %521 = vector.shape_cast %520 : vector<1x8x128xf32> to vector<8x128xf32>
    %522 = vector.shape_cast %518 : vector<8x128xf32> to vector<1x8x128xf32>
    tpu.vector_store %arg15[%519, %c0_220, %c0_221], %522 {strides = array<i32>} : memref<7x8x128xf32, #tpu.memory_space<vmem>>, vector<1x8x128xf32>,
    %523 = tpu.concatenate %464, %9 in 1 : vector<8x16xf32>, vector<8x112xf32> -> vector<8x128xf32>
    %524 = arith.index_cast %c5_i32 : i32 to index
    %c0_222 = arith.constant 0 : index
    %c0_223 = arith.constant 0 : index
    %525 = vector.load %arg16[%524, %c0_222, %c0_223] : memref<7x8x128xf32, #tpu.memory_space<vmem>>, vector<1x8x128xf32>
    %526 = vector.shape_cast %525 : vector<1x8x128xf32> to vector<8x128xf32>
    %527 = vector.shape_cast %523 : vector<8x128xf32> to vector<1x8x128xf32>
    tpu.vector_store %arg16[%524, %c0_222, %c0_223], %527 {strides = array<i32>} : memref<7x8x128xf32, #tpu.memory_space<vmem>>, vector<1x8x128xf32>,
    %c6_i32 = arith.constant 6 : i32
    %c0_224 = arith.constant 0 : index
    %c0_225 = arith.constant 0 : index
    %528 = vector.load %arg6[%c0_224, %c0_225] : memref<32x32xf32, #tpu.memory_space<vmem>>, vector<32x32xf32>
    %cst_226 = arith.constant dense<0.000000e+00> : vector<8x32xf32>
    %529 = tpu.matmul %513, %528, %cst_226 {dimension_numbers = #tpu.dot_dimension_numbers<[1], [0], [0], [1], [0, 0, 1, 1], [], []>} : vector<8x32xf32>, vector<32x32xf32>, vector<8x32xf32> -> vector<8x32xf32>
    %c0_227 = arith.constant 0 : index
    %c0_228 = arith.constant 0 : index
    %530 = vector.load %arg7[%c0_227, %c0_228] : memref<1x32xf32, #tpu.memory_space<vmem>>, vector<1x32xf32>
    %531 = vector.broadcast %530 : vector<1x32xf32> to vector<8x32xf32>
    %532 = arith.addf %529, %531 : vector<8x32xf32>
    %533 = vector.shape_cast %532 : vector<8x32xf32> to vector<8x1x32xf32>
    %534 = vector.broadcast %533 : vector<8x1x32xf32> to vector<8x16x32xf32>
    %535 = arith.addf %7, %534 : vector<8x16x32xf32>
    %cst_229 = arith.constant 0.000000e+00 : f32
    %536 = vector.broadcast %cst_229 : f32 to vector<8x16x32xf32>
    %537 = arith.maximumf %535, %536 : vector<8x16x32xf32>
    %538 = vector.broadcast %8 : vector<1x1x32xf32> to vector<8x16x32xf32>
    %539 = arith.mulf %537, %538 : vector<8x16x32xf32>
    %cst_230 = arith.constant dense<0.000000e+00> : vector<8x16xf32>
    %540 = vector.multi_reduction <add>, %539, %cst_230 [2] : vector<8x16x32xf32> to vector<8x16xf32>
    %cst_231 = arith.constant dense<0xFF800000> : vector<8xf32>
    %541 = vector.multi_reduction <maximumf>, %540, %cst_231 [1] : vector<8x16xf32> to vector<8xf32>
    %542 = vector.shape_cast %541 : vector<8xf32> to vector<8x1xf32>
    %543 = vector.broadcast %542 : vector<8x1xf32> to vector<8x16xf32>
    %544 = arith.subf %540, %543 : vector<8x16xf32>
    %545 = math.exp %544 : vector<8x16xf32>
    %cst_232 = arith.constant dense<0.000000e+00> : vector<8xf32>
    %546 = vector.multi_reduction <add>, %545, %cst_232 [1] : vector<8x16xf32> to vector<8xf32>
    %547 = vector.shape_cast %546 : vector<8xf32> to vector<8x1xf32>
    %548 = tpu.reciprocal %547 {approx = true} : vector<8x1xf32> -> vector<8x1xf32>
    %549 = vector.broadcast %548 : vector<8x1xf32> to vector<8x16xf32>
    %550 = arith.mulf %545, %549 : vector<8x16xf32>
    %551 = vector.shape_cast %550 : vector<8x16xf32> to vector<8x16x1xf32>
    %552 = vector.broadcast %551 : vector<8x16x1xf32> to vector<8x16x32xf32>
    %553 = arith.mulf %0, %552 : vector<8x16x32xf32>
    %cst_233 = arith.constant dense<0.000000e+00> : vector<8x32xf32>
    %554 = vector.multi_reduction <add>, %553, %cst_233 [1] : vector<8x16x32xf32> to vector<8x32xf32>
    %c0_234 = arith.constant 0 : index
    %c0_235 = arith.constant 0 : index
    %555 = vector.load %arg9[%c0_234, %c0_235] : memref<32x32xf32, #tpu.memory_space<vmem>>, vector<32x32xf32>
    %cst_236 = arith.constant dense<0.000000e+00> : vector<8x32xf32>
    %556 = tpu.matmul %513, %555, %cst_236 {dimension_numbers = #tpu.dot_dimension_numbers<[1], [0], [0], [1], [0, 0, 1, 1], [], []>} : vector<8x32xf32>, vector<32x32xf32>, vector<8x32xf32> -> vector<8x32xf32>
    %c0_237 = arith.constant 0 : index
    %c0_238 = arith.constant 0 : index
    %557 = vector.load %arg10[%c0_237, %c0_238] : memref<1x32xf32, #tpu.memory_space<vmem>>, vector<1x32xf32>
    %558 = vector.broadcast %557 : vector<1x32xf32> to vector<8x32xf32>
    %559 = arith.addf %556, %558 : vector<8x32xf32>
    %560 = arith.negf %559 : vector<8x32xf32>
    %561 = math.exp %560 : vector<8x32xf32>
    %cst_239 = arith.constant 1.000000e+00 : f32
    %562 = vector.broadcast %cst_239 : f32 to vector<8x32xf32>
    %563 = arith.addf %562, %561 : vector<8x32xf32>
    %564 = arith.divf %562, %563 : vector<8x32xf32>
    %565 = arith.mulf %564, %554 : vector<8x32xf32>
    %566 = arith.index_cast %c6_i32 : i32 to index
    %c0_240 = arith.constant 0 : index
    %c0_241 = arith.constant 0 : index
    %567 = vector.load %arg1[%566, %c0_240, %c0_241] : memref<7x8x32xf32, #tpu.memory_space<vmem>>, vector<1x8x32xf32>
    %568 = vector.shape_cast %567 : vector<1x8x32xf32> to vector<8x32xf32>
    %569 = tpu.concatenate %568, %565, %513 in 1 : vector<8x32xf32>, vector<8x32xf32>, vector<8x32xf32> -> vector<8x96xf32>
    %c0_242 = arith.constant 0 : index
    %c0_243 = arith.constant 0 : index
    %570 = vector.load %arg11[%c0_242, %c0_243] : memref<96x128xf32, #tpu.memory_space<vmem>>, vector<96x128xf32>
    %cst_244 = arith.constant dense<0.000000e+00> : vector<8x128xf32>
    %571 = tpu.matmul %569, %570, %cst_244 {dimension_numbers = #tpu.dot_dimension_numbers<[1], [0], [0], [1], [0, 0, 1, 1], [], []>} : vector<8x96xf32>, vector<96x128xf32>, vector<8x128xf32> -> vector<8x128xf32>
    %c0_245 = arith.constant 0 : index
    %c0_246 = arith.constant 0 : index
    %572 = vector.load %arg12[%c0_245, %c0_246] : memref<1x128xf32, #tpu.memory_space<vmem>>, vector<1x128xf32>
    %573 = vector.broadcast %572 : vector<1x128xf32> to vector<8x128xf32>
    %574 = arith.addf %571, %573 : vector<8x128xf32>
    %575 = vector.extract_strided_slice %574 {offsets = [0, 0], sizes = [8, 32], strides = [1, 1]} : vector<8x128xf32> to vector<8x32xf32>
    %576 = arith.negf %575 : vector<8x32xf32>
    %577 = math.exp %576 : vector<8x32xf32>
    %cst_247 = arith.constant 1.000000e+00 : f32
    %578 = vector.broadcast %cst_247 : f32 to vector<8x32xf32>
    %579 = arith.addf %578, %577 : vector<8x32xf32>
    %580 = arith.divf %578, %579 : vector<8x32xf32>
    %581 = vector.extract_strided_slice %574 {offsets = [0, 32], sizes = [8, 32], strides = [1, 1]} : vector<8x128xf32> to vector<8x32xf32>
    %582 = arith.negf %581 : vector<8x32xf32>
    %583 = math.exp %582 : vector<8x32xf32>
    %cst_248 = arith.constant 1.000000e+00 : f32
    %584 = vector.broadcast %cst_248 : f32 to vector<8x32xf32>
    %585 = arith.addf %584, %583 : vector<8x32xf32>
    %586 = arith.divf %584, %585 : vector<8x32xf32>
    %587 = vector.extract_strided_slice %574 {offsets = [0, 64], sizes = [8, 32], strides = [1, 1]} : vector<8x128xf32> to vector<8x32xf32>
    %588 = math.tanh %587 : vector<8x32xf32>
    %589 = vector.extract_strided_slice %574 {offsets = [0, 96], sizes = [8, 32], strides = [1, 1]} : vector<8x128xf32> to vector<8x32xf32>
    %590 = arith.negf %589 : vector<8x32xf32>
    %591 = math.exp %590 : vector<8x32xf32>
    %cst_249 = arith.constant 1.000000e+00 : f32
    %592 = vector.broadcast %cst_249 : f32 to vector<8x32xf32>
    %593 = arith.addf %592, %591 : vector<8x32xf32>
    %594 = arith.divf %592, %593 : vector<8x32xf32>
    %595 = arith.mulf %586, %511 : vector<8x32xf32>
    %596 = arith.mulf %580, %588 : vector<8x32xf32>
    %597 = arith.addf %595, %596 : vector<8x32xf32>
    %598 = math.tanh %597 : vector<8x32xf32>
    %599 = arith.mulf %594, %598 : vector<8x32xf32>
    %c0_250 = arith.constant 0 : index
    %c0_251 = arith.constant 0 : index
    %600 = vector.load %arg13[%c0_250, %c0_251] : memref<32x128xf32, #tpu.memory_space<vmem>>, vector<32x128xf32>
    %cst_252 = arith.constant dense<0.000000e+00> : vector<8x128xf32>
    %601 = tpu.matmul %599, %600, %cst_252 {dimension_numbers = #tpu.dot_dimension_numbers<[1], [0], [0], [1], [0, 0, 1, 1], [], []>} : vector<8x32xf32>, vector<32x128xf32>, vector<8x128xf32> -> vector<8x128xf32>
    %c0_253 = arith.constant 0 : index
    %c0_254 = arith.constant 0 : index
    %602 = vector.load %arg14[%c0_253, %c0_254] : memref<1x128xf32, #tpu.memory_space<vmem>>, vector<1x128xf32>
    %603 = vector.broadcast %602 : vector<1x128xf32> to vector<8x128xf32>
    %604 = arith.addf %601, %603 : vector<8x128xf32>
    %605 = arith.index_cast %c6_i32 : i32 to index
    %c0_255 = arith.constant 0 : index
    %c0_256 = arith.constant 0 : index
    %606 = vector.load %arg15[%605, %c0_255, %c0_256] : memref<7x8x128xf32, #tpu.memory_space<vmem>>, vector<1x8x128xf32>
    %607 = vector.shape_cast %606 : vector<1x8x128xf32> to vector<8x128xf32>
    %608 = vector.shape_cast %604 : vector<8x128xf32> to vector<1x8x128xf32>
    tpu.vector_store %arg15[%605, %c0_255, %c0_256], %608 {strides = array<i32>} : memref<7x8x128xf32, #tpu.memory_space<vmem>>, vector<1x8x128xf32>,
    %609 = tpu.concatenate %550, %9 in 1 : vector<8x16xf32>, vector<8x112xf32> -> vector<8x128xf32>
    %610 = arith.index_cast %c6_i32 : i32 to index
    %c0_257 = arith.constant 0 : index
    %c0_258 = arith.constant 0 : index
    %611 = vector.load %arg16[%610, %c0_257, %c0_258] : memref<7x8x128xf32, #tpu.memory_space<vmem>>, vector<1x8x128xf32>
    %612 = vector.shape_cast %611 : vector<1x8x128xf32> to vector<8x128xf32>
    %613 = vector.shape_cast %609 : vector<8x128xf32> to vector<1x8x128xf32>
    tpu.vector_store %arg16[%610, %c0_257, %c0_258], %613 {strides = array<i32>} : memref<7x8x128xf32, #tpu.memory_space<vmem>>, vector<1x8x128xf32>,
    %c7_i32 = arith.constant 7 : i32
    return
  }
}

</mosaic_0001>

<bundles_post_ra>
// kernel: tpu_custom_call.1
= control target key start
LH: loop header
LB: loop body
LE: loop exit
PB: predicated region body
PF: predicated region fallthrough
CT: control target
= control target key end

     0   :  { %s9800_s0 = inlined_call_operand.hbm [shape: f32[8,16,32], index: 0, kind: input, shape index: {}]   ;;  %s9801_s1 = inlined_call_operand.hbm [shape: f32[7,8,32], index: 1, kind: input, shape index: {}]   ;;  %s9802_s2 = inlined_call_operand.hbm [shape: f32[8,32], index: 2, kind: input, shape index: {}]   ;;  %s9803_s3 = inlined_call_operand.hbm [shape: f32[8,32], index: 3, kind: input, shape index: {}]   ;;  %s9804_s4 = inlined_call_operand.hbm [shape: f32[32,32], index: 4, kind: input, shape index: {}]   ;;  %s9805_s5 = inlined_call_operand.vmem [shape: f32[1,32], index: 5, kind: input, shape index: {}]   ;;  %s9806_s6 = inlined_call_operand.hbm [shape: f32[32,32], index: 6, kind: input, shape index: {}]   ;;  %s9807_s7 = inlined_call_operand.vmem [shape: f32[1,32], index: 7, kind: input, shape index: {}]   ;;  %s9808_s8 = inlined_call_operand.vmem [shape: f32[1,1,32], index: 8, kind: input, shape index: {}]   ;;  %s9809_s9 = inlined_call_operand.hbm [shape: f32[32,32], index: 9, kind: input, shape index: {}]   ;;  %s9810_s10 = inlined_call_operand.vmem [shape: f32[1,32], index: 10, kind: input, shape index: {}]   ;;  %s9811_s11 = inlined_call_operand.hbm [shape: f32[96,128], index: 11, kind: input, shape index: {}]   ;;  %s9812_s12 = inlined_call_operand.vmem [shape: f32[1,128], index: 12, kind: input, shape index: {}]   ;;  %s9813_s13 = inlined_call_operand.hbm [shape: f32[32,128], index: 13, kind: input, shape index: {}]   ;;  %s9814_s14 = inlined_call_operand.vmem [shape: f32[1,128], index: 14, kind: input, shape index: {}]   ;;  %s9815_s15 = inlined_call_operand.hbm [shape: f32[7,8,128], index: 15, kind: output, shape index: {0}]   ;;  %s9816_s16 = inlined_call_operand.hbm [shape: f32[7,8,128], index: 16, kind: output, shape index: {1}]  }
   0x1   :  { %9837 = sst [smem:[#allocation37_spill]] %s9800_s0 }
   0x2   :  { %22 = vsyncpa [#allocation3], 0 }
   0x3   :  { %23 = vsyncpa [#allocation6], 0 }
   0x4   :  { %24 = vsyncpa [#allocation9], 0 }
   0x5   :  { %25 = vsyncpa [#allocation12], 0 }
   0x6   :  { %26 = vsyncpa [#allocation15], 0 }
   0x7   :  { %27 = vsyncpa [#allocation4], 0 }
   0x8   :  { %28 = vsyncpa [#allocation19], 0  ;;  %s46_s23 = sshll.u32 %s9801_s1, 4  ;;  %s6710_s24 = smov [#allocation5]   ;;  %s47_s23 = int_to_ptr.hbm [resolvable:$true] %s46_s23 }
   0x9   :  { %s48_s25 = sshll.u32 %s6710_s24, 4  ;;  %s71_s28 = sshll.u32 %s9803_s3, 4  ;;  %s49_s25 = int_to_ptr.vmem [resolvable:$true] %s48_s25  ;;  %s72_s28 = int_to_ptr.hbm [resolvable:$true] %s71_s28 }
   0xa   :  { %s6711_s29 = smov 128   ;;  %s6712_s30 = smov 8  }
   0xb   :  { %54 = dma.hbm_to_vmem [thread:$0]  %s47_s23, 896, %s49_s25, [#allocation6], %s6711_s29, %s6711_s29, %s6712_s30  }
   0xc   :  { %s6713_s0 = smov [#allocation8]   ;;  %s96_s1 = sshll.u32 %s9806_s6, 4  ;;  %s97_s1 = int_to_ptr.hbm [resolvable:$true] %s96_s1 }
   0xd   :  { %s73_s17 = sshll.u32 %s6713_s0, 4  ;;  %s128_s3 = sshll.u32 %s9811_s11, 4  ;;  %s74_s17 = int_to_ptr.vmem [resolvable:$true] %s73_s17  ;;  %s129_s3 = int_to_ptr.hbm [resolvable:$true] %s128_s3 }
   0xe   :  { %76 = dma.hbm_to_vmem [thread:$0]  %s72_s28, 128, %s74_s17, [#allocation9]  }
   0xf   :  { %s6714_s22 = smov [#allocation11]   ;;  %s6715_s23 = smov [#allocation14]  }
  0x10   :  { %s98_s24 = sshll.u32 %s6714_s22, 4  ;;  %s130_s25 = sshll.u32 %s6715_s23, 4  ;;  %s99_s24 = int_to_ptr.vmem [resolvable:$true] %s98_s24  ;;  %s131_s25 = int_to_ptr.vmem [resolvable:$true] %s130_s25 }
  0x11   :  { %104 = dma.hbm_to_vmem [thread:$0]  %s97_s1, 512, %s99_s24, [#allocation12], %s6711_s29, %s6711_s29, %s6712_s30  }
  0x12   :  { %s9838_s6 = sld [smem:[#allocation37_spill]]  ;;  %s60_s17 = sshll.u32 %s9802_s2, 4  ;;  %s61_s17 = int_to_ptr.hbm [resolvable:$true] %s60_s17 }
  0x13   :  { %136 = dma.hbm_to_vmem [thread:$0]  %s129_s3, 1536, %s131_s25, [#allocation15], %s6711_s29, %s6711_s29, %s6712_s30  }
  0x14   :  { %s6716_s18 = smov [#allocation2]   ;;  %s6717_s1 = smov [#allocation7]  }
  0x15   :  { %s35_s19 = sshll.u32 %s6716_s18, 4  ;;  %s62_s20 = sshll.u32 %s6717_s1, 4  ;;  %s36_s19 = int_to_ptr.vmem [resolvable:$true] %s35_s19  ;;  %s63_s20 = int_to_ptr.vmem [resolvable:$true] %s62_s20 }
  0x16   :  { %s81_s24 = sshll.u32 %s9804_s4, 4  ;;  %s113_s2 = sshll.u32 %s9809_s9, 4  ;;  %s82_s24 = int_to_ptr.hbm [resolvable:$true] %s81_s24  ;;  %s114_s2 = int_to_ptr.hbm [resolvable:$true] %s113_s2 }
  0x17   :  { %65 = dma.hbm_to_vmem [thread:$0]  %s61_s17, 128, %s63_s20, [#allocation6]  }
  0x18   :  { %s33_s0 = sshll.u32 %s9838_s6, 4  ;;  %s6718_s25 = smov [#allocation10]   ;;  %s34_s0 = int_to_ptr.hbm [resolvable:$true] %s33_s0 }
  0x19   :  { %41 = dma.hbm_to_vmem [thread:$0]  %s34_s0, 2048, %s36_s19, [#allocation3], %s6711_s29, %s6711_s29, %s6712_s30  }
  0x1a   :  { %s83_s26 = sshll.u32 %s6718_s25, 4  ;;  %s6719_s27 = smov [#allocation13]   ;;  %s84_s26 = int_to_ptr.vmem [resolvable:$true] %s83_s26 }
  0x1b   :  { %89 = dma.hbm_to_vmem [thread:$0]  %s82_s24, 512, %s84_s26, [#allocation9], %s6711_s29, %s6711_s29, %s6712_s30  }
  0x1c   :  { %s115_s6 = sshll.u32 %s6719_s27, 4  ;;  %s143_s4 = sshll.u32 %s9813_s13, 4  ;;  %s116_s6 = int_to_ptr.vmem [resolvable:$true] %s115_s6  ;;  %s144_s4 = int_to_ptr.hbm [resolvable:$true] %s143_s4 }
  0x1d   :  { %121 = dma.hbm_to_vmem [thread:$0]  %s114_s2, 512, %s116_s6, [#allocation12], %s6711_s29, %s6711_s29, %s6712_s30  }
  0x1e   :  { %s6720_s9 = smov [#allocation16]  }
  0x1f   :  { %s145_s28 = sshll.u32 %s6720_s9, 4  ;;  %s146_s28 = int_to_ptr.vmem [resolvable:$true] %s145_s28 }
  0x20   :  { %151 = dma.hbm_to_vmem [thread:$0]  %s144_s4, 512, %s146_s28, [#allocation15], %s6711_s29, %s6711_s29, %s6712_s30  }
  0x21   :  { %6696 = dma.done.wait [#allocation3], 2048  }
  0x22   :  { %6697 = vsyncadd [#allocation3], 4294965248 }
  0x23   :  { %6698 = dma.done.wait [#allocation6], 1024  }
  0x24   :  { %6699 = vsyncadd [#allocation6], 4294966272 }
  0x25   :  { %6700 = dma.done.wait [#allocation9], 640  }
  0x26   :  { %6701 = vsyncadd [#allocation9], 4294966656 }
  0x27   :  { %6702 = dma.done.wait [#allocation12], 1024  }
  0x28   :  { %6703 = vsyncadd [#allocation12], 4294966272 }
  0x29   :  { %6704 = dma.done.wait [#allocation15], 2048  }
  0x2a   :  { %6705 = vsyncadd [#allocation15], 4294965248  ;;  %v209_v0 = vld [vmem:[#allocation10 + $0x18] sm:$0xff]  ;;  %v208_v2 = vld [vmem:[#allocation10 + $0x10] sm:$0xff]  ;;  %vm214_vm0 = vcmask 261120   ;;  %vm506_vm1 = vcmask 130112  }
  0x2b   :  { %v334_v1 = vld [vmem:[#allocation11 + $0x18] sm:$0xff]  ;;  %275 = vmatpush.msra.mxu0 %v209_v0  ;;  %v333_v3 = vld [vmem:[#allocation11 + $0x10] sm:$0xff]  ;;  %v207_v4 = vld [vmem:[#allocation10 + $0x8] sm:$0xff]  ;;  %5953 = vmatpush.msra.mxu2 %v209_v0  ;;  %vm529_vm2 = vcmask 1041409   ;;  %vm531_vm3 = vcmask 1042434   ;;  %vm533_vm4 = vcmask 1043459  }
  0x2c   :  { %354 = vmatpush.msra.mxu1 %v334_v1  ;;  %v332_v5 = vld [vmem:[#allocation11 + $0x8] sm:$0xff]  ;;  %v206_v6 = vld [vmem:[#allocation10] sm:$0xff]  ;;  %v6860_v8 = vld [vmem:[#allocation2] sm:$0xff]  ;;  %vm535_vm5 = vcmask 1044484   ;;  %vm537_vm6 = vcmask 1045509   ;;  %vm539_vm7 = vcmask 1046534  }
  0x2d   :  { %276 = vmatpush.msra.mxu0 %v208_v2  ;;  %v331_v7 = vld [vmem:[#allocation11] sm:$0xff]  ;;  %v6862_v9 = vld [vmem:[#allocation7] sm:$0xff]  ;;  %5954 = vmatpush.msra.mxu2 %v208_v2  ;;  %v6872_v11 = vld [vmem:[#allocation2 + $0x10] sm:$0xff]  ;;  %vm541_vm8 = vcmask 1047559   ;;  %vm544_vm9 = vcmask 130048   ;;  %s6723_s24 = smov 32  }
  0x2e   :  { %355 = vmatpush.msra.mxu1 %v333_v3  ;;  %v6868_v10 = vld [vmem:[#allocation2 + $0x8] sm:$0xff]  ;;  %v6876_v12 = vld [vmem:[#allocation2 + $0x18] sm:$0xff]  ;;  %v6880_v13 = vld [vmem:[#allocation2 + $0x20] sm:$0xff]  ;;  %vm987_vm14 = vcmask 523264   ;;  %vm1005_vm15 = vcmask 785408   ;;  %s6724_s11 = smov 96  }
  0x2f   :  { %277 = vmatpush.msra.mxu0 %v207_v4  ;;  %5955 = vmatpush.msra.mxu2 %v207_v4  ;;  %v205_v14 = vld [vmem:[#allocation2 + $0x78] sm:$0xff]  ;;  %v6885_v15 = vld [vmem:[#allocation2 + $0x28] sm:$0xff]  ;;  %v6889_v16 = vld [vmem:[#allocation2 + $0x30] sm:$0xff]  ;;  %s5860_s9 = sshll.u32 %s9815_s15, 4  ;;  %s5861_s9 = int_to_ptr.hbm [resolvable:$true] %s5860_s9 }
  0x30   :  { %356 = vmatpush.msra.mxu1 %v332_v5  ;;  %v6893_v17 = vld [vmem:[#allocation2 + $0x38] sm:$0xff]  ;;  %v6897_v18 = vld [vmem:[#allocation2 + $0x40] sm:$0xff]  ;;  %v6901_v19 = vld [vmem:[#allocation2 + $0x48] sm:$0xff] }
  0x31   :  { %278 = vmatpush.msra.mxu0 %v206_v6  ;;  %5956 = vmatpush.msra.mxu2 %v206_v6  ;;  %v6905_v20 = vld [vmem:[#allocation2 + $0x50] sm:$0xff]  ;;  %v6909_v21 = vld [vmem:[#allocation2 + $0x58] sm:$0xff]  ;;  %v6913_v22 = vld [vmem:[#allocation2 + $0x60] sm:$0xff] }
  0x32   :  { %357 = vmatpush.msra.mxu1 %v331_v7  ;;  %5895 = vmatmul.msk.f32.vlgmr.msra.gmra.mxu0 %vm214_vm0, %v6860_v8  ;;  %v6917_v23 = vld [vmem:[#allocation2 + $0x68] sm:$0xff]  ;;  %v6921_v24 = vld [vmem:[#allocation2 + $0x70] sm:$0xff]  ;;  %v5978_v25 = vld [vmem:[%s9807_s7] ss:$0 sm:$0xff] }
  0x33   :  { %5911 = vmatmul.msk.f32.vlgmr.msra.gmra.mxu1 %vm214_vm0, %v6862_v9  ;;  %5910 = vmatmul.msk.f32.vlgmr.msra.gmra.mxu2 %vm214_vm0, %v205_v14  ;;  %v6931_v26 = vld [vmem:[%s9805_s5] ss:$0 sm:$0xff]  ;;  %s6722_s5 = smov 64  }
  0x34   :  { %v6943_v33 = vld [vmem:[%s9808_s8] ss:$0 sm:$0xff] }
  0x3a   :  { %5896 = vmatmul.msk.f32.gmra.mxu0 %vm214_vm0, %v6868_v10 }
  0x42   :  { %5897 = vmatmul.msk.f32.gmra.mxu0 %vm214_vm0, %v6872_v11 }
  0x4a   :  { %5898 = vmatmul.msk.f32.gmra.mxu0 %vm214_vm0, %v6876_v12 }
  0x52   :  { %5899 = vmatmul.msk.f32.gmra.mxu0 %vm214_vm0, %v6880_v13 }
  0x5a   :  { %5900 = vmatmul.msk.f32.gmra.mxu0 %vm214_vm0, %v6885_v15 }
  0x62   :  { %5901 = vmatmul.msk.f32.gmra.mxu0 %vm214_vm0, %v6889_v16 }
  0x6a   :  { %5902 = vmatmul.msk.f32.gmra.mxu0 %vm214_vm0, %v6893_v17 }
  0x72   :  { %5903 = vmatmul.msk.f32.gmra.mxu0 %vm214_vm0, %v6897_v18 }
  0x7a   :  { %5904 = vmatmul.msk.f32.gmra.mxu0 %vm214_vm0, %v6901_v19 }
  0x82   :  { %5905 = vmatmul.msk.f32.gmra.mxu0 %vm214_vm0, %v6905_v20 }
  0x8a   :  { %5906 = vmatmul.msk.f32.gmra.mxu0 %vm214_vm0, %v6909_v21 }
  0x92   :  { %5907 = vmatmul.msk.f32.gmra.mxu0 %vm214_vm0, %v6913_v22 }
  0x9a   :  { %5908 = vmatmul.msk.f32.gmra.mxu0 %vm214_vm0, %v6917_v23 }
  0xa2   :  { %5909 = vmatmul.msk.f32.gmra.mxu0 %vm214_vm0, %v6921_v24 }
  0xaf   :  { %v280_v27 = vpop.f32.mrf.mxu0 }
  0xb0   :  { %v359_v28 = vpop.f32.mrf.mxu1  ;;  %v6936_v30 = vadd.f32 %v6931_v26, %v280_v27 }
  0xb1   :  { %v6933_v29 = vadd.f32 %v5978_v25, %v359_v28 }
  0xb3   :  { %v370_v31 = vperm.slane %v6933_v29, 0  ;;  %v363_v40 = vrot.slane %v6933_v29, 1  ;;  %v364_v54 = vrot.slane %v6933_v29, 2  ;;  %v365_v4 = vrot.slane %v6933_v29, 3 }
  0xb5   :  { %v386_v32 = vadd.f32 %v370_v31, %v6936_v30  ;;  %v371_v43 = vperm.slane %v363_v40, 0  ;;  %v372_v57 = vperm.slane %v364_v54, 0  ;;  %v373_v7 = vperm.slane %v365_v4, 0 }
  0xb7   :  { %v402_v34 = vmax.f32 %v386_v32, 0.0  ;;  %v283_v35 = vpop.f32.mrf.mxu0 }
  0xb8   :  { %v6946_v36 = vadd.f32 %v6931_v26, %v283_v35 }
  0xb9   :  { %v421_v37 = vmul.f32 %v6943_v33, %v402_v34 }
  0xba   :  { %v387_v39 = vadd.f32 %v370_v31, %v6946_v36 }
  0xbb   :  { %v437_v38 = vsel %vm214_vm0, %v421_v37, 0.0 }
  0xbc   :  { %438 = vadd.xlane.f32.xlu0 %v437_v38  ;;  %v403_v41 = vmax.f32 %v387_v39, 0.0  ;;  %v366_v39 = vrot.slane %v6933_v29, 4 }
  0xbe   :  { %v422_v42 = vmul.f32 %v6943_v33, %v403_v41 }
  0xbf   :  { %v286_v44 = vpop.f32.mrf.mxu0 }
  0xc0   :  { %v6954_v45 = vadd.f32 %v6931_v26, %v286_v44  ;;  %v440_v46 = vsel %vm214_vm0, %v422_v42, 0.0  ;;  %v374_v42 = vperm.slane %v366_v39, 0 }
  0xc2   :  { %v388_v47 = vadd.f32 %v371_v43, %v6954_v45 }
  0xc4   :  { %441 = vadd.xlane.f32.xlu0 %v440_v46  ;;  %v404_v48 = vmax.f32 %v388_v47, 0.0 }
  0xc6   :  { %v423_v49 = vmul.f32 %v6943_v33, %v404_v48 }
  0xc7   :  { %v289_v50 = vpop.f32.mrf.mxu0 }
  0xc8   :  { %v6960_v51 = vadd.f32 %v6931_v26, %v289_v50  ;;  %v443_v52 = vsel %vm214_vm0, %v423_v49, 0.0 }
  0xc9   :  { %444 = vadd.xlane.f32.xlu1 %v443_v52 }
  0xca   :  { %v389_v53 = vadd.f32 %v371_v43, %v6960_v51 }
  0xcc   :  { %v405_v55 = vmax.f32 %v389_v53, 0.0 }
  0xce   :  { %v424_v56 = vmul.f32 %v6943_v33, %v405_v55 }
  0xcf   :  { %v292_v58 = vpop.f32.mrf.mxu0 }
  0xd0   :  { %v6967_v59 = vadd.f32 %v6931_v26, %v292_v58  ;;  %v446_v60 = vsel %vm214_vm0, %v424_v56, 0.0  ;;  %v367_v56 = vrot.slane %v6933_v29, 5 }
  0xd1   :  { %447 = vadd.xlane.f32.xlu1 %v446_v60 }
  0xd2   :  { %v390_v61 = vadd.f32 %v372_v57, %v6967_v59 }
  0xd4   :  { %v406_v62 = vmax.f32 %v390_v61, 0.0 }
  0xd6   :  { %v425_v63 = vmul.f32 %v6943_v33, %v406_v62  ;;  %v375_v62 = vperm.slane %v367_v56, 0 }
  0xd7   :  { %v295_v0 = vpop.f32.mrf.mxu0 }
  0xd8   :  { %v6973_v1 = vadd.f32 %v6931_v26, %v295_v0  ;;  %v449_v2 = vsel %vm214_vm0, %v425_v63, 0.0 }
  0xd9   :  { %450 = vadd.xlane.f32.xlu2 %v449_v2 }
  0xda   :  { %v391_v3 = vadd.f32 %v372_v57, %v6973_v1 }
  0xdc   :  { %v407_v5 = vmax.f32 %v391_v3, 0.0 }
  0xde   :  { %v426_v6 = vmul.f32 %v6943_v33, %v407_v5 }
  0xdf   :  { %v298_v14 = vpop.f32.mrf.mxu0 }
  0xe0   :  { %v6980_v25 = vadd.f32 %v6931_v26, %v298_v14  ;;  %v452_v27 = vsel %vm214_vm0, %v426_v6, 0.0 }
  0xe1   :  { %453 = vadd.xlane.f32.xlu2 %v452_v27  ;;  %v368_v27 = vrot.slane %v6933_v29, 6 }
  0xe2   :  { %9839 = vst [vmem:[#allocation27_spill] sm:$0xff] %v6980_v25  ;;  %v392_v28 = vadd.f32 %v373_v7, %v6980_v25 }
  0xe3   :  { %v376_v39 = vperm.slane %v368_v27, 0 }
  0xe4   :  { %v408_v31 = vmax.f32 %v392_v28, 0.0  ;;  %v369_v28 = vrot.slane %v6933_v29, 7 }
  0xe6   :  { %v427_v32 = vmul.f32 %v6943_v33, %v408_v31 }
  0xe7   :  { %v301_v34 = vpop.f32.mrf.mxu0 }
  0xe8   :  { %v6986_v35 = vadd.f32 %v6931_v26, %v301_v34  ;;  %v455_v37 = vsel %vm214_vm0, %v427_v32, 0.0 }
  0xe9   :  { %456 = vadd.xlane.f32.xlu0 %v455_v37 }
  0xea   :  { %9840 = vst [vmem:[#allocation28_spill] sm:$0xff] %v6986_v35  ;;  %v393_v38 = vadd.f32 %v373_v7, %v6986_v35  ;;  %v325_v7 = vpop.f32.mrf.mxu2 }
  0xeb   :  { %v7020_v32 = vadd.f32 %v6931_v26, %v325_v7 }
  0xec   :  { %v409_v40 = vmax.f32 %v393_v38, 0.0 }
  0xed   :  { %9845 = vst [vmem:[#allocation33_spill] sm:$0xff] %v7020_v32 }
  0xee   :  { %v428_v41 = vmul.f32 %v6943_v33, %v409_v40  ;;  %v377_v40 = vperm.slane %v369_v28, 0 }
  0xef   :  { %v304_v43 = vpop.f32.mrf.mxu0 }
  0xf0   :  { %v6993_v44 = vadd.f32 %v6931_v26, %v304_v43  ;;  %v458_v46 = vsel %vm214_vm0, %v428_v41, 0.0  ;;  %v401_v43 = vadd.f32 %v377_v40, %v7020_v32 }
  0xf1   :  { %459 = vadd.xlane.f32.xlu1 %v458_v46 }
  0xf2   :  { %9841 = vst [vmem:[#allocation29_spill] sm:$0xff] %v6993_v44  ;;  %v394_v47 = vadd.f32 %v374_v42, %v6993_v44 }
  0xf4   :  { %v410_v48 = vmax.f32 %v394_v47, 0.0 }
  0xf6   :  { %v429_v49 = vmul.f32 %v6943_v33, %v410_v48 }
  0xf7   :  { %v307_v50 = vpop.f32.mrf.mxu0 }
  0xf8   :  { %v6999_v52 = vadd.f32 %v6931_v26, %v307_v50  ;;  %v461_v53 = vsel %vm214_vm0, %v429_v49, 0.0  ;;  %v417_v49 = vmax.f32 %v401_v43, 0.0 }
  0xf9   :  { %462 = vadd.xlane.f32.xlu2 %v461_v53 }
  0xfa   :  { %9842 = vst [vmem:[#allocation30_spill] sm:$0xff] %v6999_v52  ;;  %v395_v54 = vadd.f32 %v374_v42, %v6999_v52 }
  0xfc   :  { %v411_v55 = vmax.f32 %v395_v54, 0.0  ;;  %v436_v54 = vmul.f32 %v6943_v33, %v417_v49 }
  0xfe   :  { %v430_v57 = vmul.f32 %v6943_v33, %v411_v55 }
  0xff   :  { %v310_v58 = vpop.f32.mrf.mxu0 }
 0x100   :  { %v7006_v60 = vadd.f32 %v6931_v26, %v310_v58  ;;  %v464_v61 = vsel %vm214_vm0, %v430_v57, 0.0 }
 0x101   :  { %465 = vadd.xlane.f32.xlu0 %v464_v61  ;;  %v482_v61 = vsel %vm214_vm0, %v436_v54, 0.0 }
 0x102   :  { %9843 = vst [vmem:[#allocation31_spill] sm:$0xff] %v7006_v60  ;;  %v396_v63 = vadd.f32 %v375_v62, %v7006_v60 }
 0x104   :  { %v412_v0 = vmax.f32 %v396_v63, 0.0 }
 0x106   :  { %v431_v2 = vmul.f32 %v6943_v33, %v412_v0 }
 0x107   :  { %v313_v3 = vpop.f32.mrf.mxu0 }
 0x108   :  { %v7012_v4 = vadd.f32 %v6931_v26, %v313_v3  ;;  %v467_v5 = vsel %vm214_vm0, %v431_v2, 0.0 }
 0x109   :  { %468 = vadd.xlane.f32.xlu1 %v467_v5 }
 0x10a   :  { %9844 = vst [vmem:[#allocation32_spill] sm:$0xff] %v7012_v4  ;;  %v397_v6 = vadd.f32 %v375_v62, %v7012_v4 }
 0x10c   :  { %v413_v14 = vmax.f32 %v397_v6, 0.0 }
 0x10e   :  { %v432_v31 = vmul.f32 %v6943_v33, %v413_v14 }
 0x10f   :  { %v316_v34 = vpop.f32.mrf.mxu0 }
 0x110   :  { %v7023_v37 = vadd.f32 %v6931_v26, %v316_v34  ;;  %v470_v38 = vsel %vm214_vm0, %v432_v31, 0.0  ;;  %v501_v31 = vlaneseq }
 0x111   :  { %471 = vadd.xlane.f32.xlu2 %v470_v38 }
 0x112   :  { %9846 = vst [vmem:[#allocation34_spill] sm:$0xff] %v7023_v37  ;;  %v398_v41 = vadd.f32 %v376_v39, %v7023_v37 }
 0x114   :  { %v414_v42 = vmax.f32 %v398_v41, 0.0 }
 0x116   :  { %v433_v29 = vmul.f32 %v6943_v33, %v414_v42 }
 0x117   :  { %v319_v46 = vpop.f32.mrf.mxu0 }
 0x118   :  { %v7030_v47 = vadd.f32 %v6931_v26, %v319_v46  ;;  %v473_v48 = vsel %vm214_vm0, %v433_v29, 0.0 }
 0x119   :  { %474 = vadd.xlane.f32.xlu0 %v473_v48 }
 0x11a   :  { %9847 = vst [vmem:[#allocation35_spill] sm:$0xff] %v7030_v47  ;;  %v399_v50 = vadd.f32 %v376_v39, %v7030_v47  ;;  %v7066_v39 = vand.u32 127, %v501_v31 }
 0x11c   :  { %v415_v53 = vmax.f32 %v399_v50, 0.0  ;;  %v7071_v41 = vadd.s32 4294967288, %v7066_v39 }
 0x11e   :  { %v434_v55 = vmul.f32 %v6943_v33, %v415_v53 }
 0x11f   :  { %v322_v56 = vpop.f32.mrf.mxu0 }
 0x120   :  { %v7037_v57 = vadd.f32 %v6931_v26, %v322_v56  ;;  %v476_v58 = vsel %vm214_vm0, %v434_v55, 0.0 }
 0x121   :  { %477 = vadd.xlane.f32.xlu1 %v476_v58  ;;  %483 = vadd.xlane.f32.xlu0 %v482_v61 }
 0x122   :  { %9848 = vst [vmem:[#allocation36_spill] sm:$0xff] %v7037_v57  ;;  %v400_v62 = vadd.f32 %v377_v40, %v7037_v57 }
 0x124   :  { %v416_v63 = vmax.f32 %v400_v62, 0.0 }
 0x126   :  { %v435_v0 = vmul.f32 %v6943_v33, %v416_v63 }
 0x128   :  { %v479_v2 = vsel %vm214_vm0, %v435_v0, 0.0 }
 0x129   :  { %480 = vadd.xlane.f32.xlu2 %v479_v2 }
 0x12f   :  { %v7044_v3 = vpop.xlane.xlu0 %438 }
 0x130   :  { %v503_v55 = vperm.slane %v7044_v3, %v7066_v39 }
 0x137   :  { %v7048_v26 = vpop.xlane.xlu0 %441 }
 0x138   :  { %v505_v46 = vperm.slane %v7048_v26, %v7071_v41 }
 0x13a   :  { %v507_v2 = vsel %vm506_vm1, %v505_v46, %v503_v55 }
 0x13c   :  { %v7046_v5 = vpop.xlane.xlu1 %444 }
 0x13d   :  { %v508_v48 = vperm.slane %v7046_v5, %v7066_v39 }
 0x144   :  { %v7052_v7 = vpop.xlane.xlu1 %447 }
 0x145   :  { %v509_v42 = vperm.slane %v7052_v7, %v7071_v41 }
 0x147   :  { %v510_v56 = vsel %vm506_vm1, %v509_v42, %v508_v48 }
 0x148   :  { %v530_v48 = vsel %vm529_vm2, %v510_v56, %v507_v2 }
 0x14c   :  { %v7050_v6 = vpop.xlane.xlu2 %450 }
 0x14d   :  { %v511_v53 = vperm.slane %v7050_v6, %v7066_v39 }
 0x154   :  { %v7056_v27 = vpop.xlane.xlu2 %453 }
 0x155   :  { %v512_v43 = vperm.slane %v7056_v27, %v7071_v41 }
 0x157   :  { %v513_v62 = vsel %vm506_vm1, %v512_v43, %v511_v53 }
 0x158   :  { %v532_v47 = vsel %vm531_vm3, %v513_v62, %v530_v48 }
 0x15c   :  { %v7054_v14 = vpop.xlane.xlu0 %456 }
 0x15d   :  { %v514_v58 = vperm.slane %v7054_v14, %v7066_v39 }
 0x164   :  { %v7058_v28 = vpop.xlane.xlu1 %459 }
 0x165   :  { %v515_v49 = vperm.slane %v7058_v28, %v7071_v41 }
 0x167   :  { %v516_v31 = vsel %vm506_vm1, %v515_v49, %v514_v58 }
 0x168   :  { %v534_v49 = vsel %vm533_vm4, %v516_v31, %v532_v47  ;;  %v6721_v31 = vmov 0  }
 0x169   :  { %5976 = vset.pattern.permute.xlu1 %v6721_v31  ;;  %5975 = vset.pattern.permute.xlu0 %v6721_v31 }
 0x16a   :  { %5974 = vset.pattern.permute.xlu2 %v6721_v31 }
 0x16c   :  { %v7062_v34 = vpop.xlane.xlu2 %462 }
 0x16d   :  { %v517_v63 = vperm.slane %v7062_v34, %v7066_v39 }
 0x174   :  { %v7060_v33 = vpop.xlane.xlu0 %465 }
 0x175   :  { %v518_v54 = vperm.slane %v7060_v33, %v7071_v41 }
 0x177   :  { %v519_v32 = vsel %vm506_vm1, %v518_v54, %v517_v63 }
 0x178   :  { %v536_v63 = vsel %vm535_vm5, %v519_v32, %v534_v49 }
 0x17c   :  { %v7064_v38 = vpop.xlane.xlu1 %468 }
 0x17d   :  { %v520_v42 = vperm.slane %v7064_v38, %v7066_v39 }
 0x184   :  { %v7077_v29 = vpop.xlane.xlu2 %471 }
 0x185   :  { %v521_v61 = vperm.slane %v7077_v29, %v7071_v41 }
 0x187   :  { %v522_v46 = vsel %vm506_vm1, %v521_v61, %v520_v42 }
 0x188   :  { %v538_v62 = vsel %vm537_vm6, %v522_v46, %v536_v63 }
 0x18c   :  { %v7068_v40 = vpop.xlane.xlu0 %474 }
 0x18d   :  { %v523_v43 = vperm.slane %v7068_v40, %v7066_v39 }
 0x194   :  { %v7085_v50 = vpop.xlane.xlu1 %477  ;;  %v7111_v53 = vpop.xlane.xlu0 %483 }
 0x195   :  { %v524_v0 = vperm.slane %v7085_v50, %v7071_v41  ;;  %v527_v54 = vperm.slane %v7111_v53, %v7071_v41 }
 0x197   :  { %v525_v58 = vsel %vm506_vm1, %v524_v0, %v523_v43 }
 0x198   :  { %v540_v47 = vsel %vm539_vm7, %v525_v58, %v538_v62 }
 0x19c   :  { %v7116_v55 = vpop.xlane.xlu2 %480 }
 0x19d   :  { %v526_v56 = vperm.slane %v7116_v55, %v7066_v39 }
 0x19f   :  { %v528_v61 = vsel %vm506_vm1, %v527_v54, %v526_v56 }
 0x1a0   :  { %v542_v2 = vsel %vm541_vm8, %v528_v61, %v540_v47 }
 0x1a1   :  { %v545_v0 = vsel %vm544_vm9, %v542_v2, -inf }
 0x1a2   :  { %546 = vmax.xlane.f32.xlu1 %v545_v0 }
 0x215   :  { %v7129_v42 = vpop.xlane.xlu1 %546 }
 0x216   :  { %v550_v32 = vperm.slane %v7129_v42, 1  ;;  %v549_v48 = vperm.slane %v7129_v42, 0  ;;  %v551_v58 = vperm.slane %v7129_v42, 2  ;;  %v553_v54 = vperm.slane %v7129_v42, 4 }
 0x217   :  { %v554_v0 = vperm.slane %v7129_v42, 5 }
 0x218   :  { %v567_v43 = vsub.f32 %v7046_v5, %v550_v32  ;;  %v566_v46 = vsub.f32 %v7048_v26, %v549_v48  ;;  %v565_v49 = vsub.f32 %v7044_v3, %v549_v48  ;;  %v570_v61 = vsub.f32 %v7056_v27, %v551_v58 }
 0x219   :  { %v573_v47 = vsub.f32 %v7062_v34, %v553_v54  ;;  %v568_v5 = vsub.f32 %v7052_v7, %v550_v32  ;;  %v552_v26 = vperm.slane %v7129_v42, 3  ;;  %v576_v34 = vsub.f32 %v7077_v29, %v554_v0 }
 0x21a   :  { %v585_v56 = vmul.f32 1.442695, %v567_v43  ;;  %v583_v63 = vmul.f32 1.442695, %v566_v46  ;;  %v581_v62 = vmul.f32 1.442695, %v565_v49  ;;  %v569_v32 = vsub.f32 %v7050_v6, %v551_v58 }
 0x21b   :  { %v591_v2 = vmul.f32 1.442695, %v570_v61  ;;  %v597_v3 = vmul.f32 1.442695, %v573_v47  ;;  %v587_v48 = vmul.f32 1.442695, %v568_v5  ;;  %v572_v7 = vsub.f32 %v7058_v28, %v552_v26 }
 0x21c   :  { %6007 = vpow2.f32 %v585_v56  ;;  %v603_v49 = vmul.f32 1.442695, %v576_v34  ;;  %v556_v56 = vperm.slane %v7129_v42, 7  ;;  %v575_v29 = vsub.f32 %v7064_v38, %v554_v0 }
 0x21d   :  { %6009 = vpow2.f32 %v583_v63  ;;  %v595_v46 = vmul.f32 1.442695, %v572_v7  ;;  %v571_v58 = vsub.f32 %v7054_v14, %v552_v26  ;;  %v555_v5 = vperm.slane %v7129_v42, 6 }
 0x21e   :  { %6011 = vpow2.f32 %v581_v62  ;;  %v589_v62 = vmul.f32 1.442695, %v569_v32  ;;  %v579_v6 = vsub.f32 %v7116_v55, %v556_v56  ;;  %v601_v47 = vmul.f32 1.442695, %v575_v29 }
 0x21f   :  { %6013 = vpow2.f32 %v591_v2  ;;  %v578_v55 = vsub.f32 %v7085_v50, %v555_v5  ;;  %v574_v14 = vsub.f32 %v7060_v33, %v553_v54  ;;  %v577_v50 = vsub.f32 %v7068_v40, %v555_v5 }
 0x220   :  { %6015 = vpow2.f32 %v597_v3  ;;  %v609_v2 = vmul.f32 1.442695, %v579_v6 }
 0x221   :  { %6017 = vpow2.f32 %v587_v48  ;;  %v593_v48 = vmul.f32 1.442695, %v571_v58  ;;  %v607_v42 = vmul.f32 1.442695, %v578_v55  ;;  %v599_v0 = vmul.f32 1.442695, %v574_v14 }
 0x222   :  { %v7143_v31 = vpop.eup %6007  ;;  %6019 = vpow2.f32 %v595_v46  ;;  %v605_v33 = vmul.f32 1.442695, %v577_v50 }
 0x223   :  { %v7145_v43 = vpop.eup %6009  ;;  %636 = vperm.xlu1 %5976, %v7143_v31   ;;  %6021 = vpow2.f32 %v603_v49  ;;  %v580_v49 = vsub.f32 %v7111_v53, %v556_v56 }
 0x224   :  { %v7148_v27 = vpop.eup %6011  ;;  %633 = vperm.xlu0 %5975, %v7145_v43   ;;  %6023 = vpow2.f32 %v589_v62 }
 0x225   :  { %630 = vperm.xlu2 %5974, %v7148_v27   ;;  %v7156_v63 = vpop.eup %6013  ;;  %6025 = vpow2.f32 %v601_v47  ;;  %v611_v62 = vmul.f32 1.442695, %v580_v49 }
 0x226   :  { %v7158_v61 = vpop.eup %6015  ;;  %6027 = vpow2.f32 %v609_v2 }
 0x227   :  { %v7161_v28 = vpop.eup %6017  ;;  %6029 = vpow2.f32 %v593_v48 }
 0x228   :  { %v7169_v3 = vpop.eup %6019  ;;  %6031 = vpow2.f32 %v607_v42 }
 0x229   :  { %v7171_v7 = vpop.eup %6021  ;;  %6033 = vpow2.f32 %v599_v0 }
 0x22a   :  { %v7174_v38 = vpop.eup %6023  ;;  %6035 = vpow2.f32 %v605_v33 }
 0x22b   :  { %645 = vperm.xlu1 %5976, %v7156_v63   ;;  %v7180_v26 = vpop.eup %6025  ;;  %6037 = vpow2.f32 %v611_v62 }
 0x22c   :  { %654 = vperm.xlu0 %5975, %v7158_v61   ;;  %v7182_v34 = vpop.eup %6027 }
 0x22d   :  { %639 = vperm.xlu2 %5974, %v7161_v28   ;;  %v7185_v32 = vpop.eup %6029 }
 0x22e   :  { %v7190_v46 = vpop.eup %6031 }
 0x22f   :  { %v7193_v54 = vpop.eup %6033 }
 0x230   :  { %v7197_v29 = vpop.eup %6035 }
 0x231   :  { %v7200_v6 = vpop.eup %6037 }
 0x233   :  { %651 = vperm.xlu1 %5976, %v7169_v3  }
 0x234   :  { %663 = vperm.xlu0 %5975, %v7171_v7  }
 0x235   :  { %642 = vperm.xlu2 %5974, %v7174_v38  }
 0x23b   :  { %660 = vperm.xlu1 %5976, %v7180_v26  }
 0x23c   :  { %672 = vperm.xlu0 %5975, %v7182_v34  }
 0x23d   :  { %648 = vperm.xlu2 %5974, %v7185_v32  }
 0x243   :  { %669 = vperm.xlu1 %5976, %v7190_v46  }
 0x245   :  { %657 = vperm.xlu2 %5974, %v7193_v54  }
 0x24d   :  { %666 = vperm.xlu2 %5974, %v7197_v29  }
 0x255   :  { %675 = vperm.xlu2 %5974, %v7200_v6  }
 0x27f   :  { %v631_v40 = vpop.permute.xlu2 %630 }
 0x280   :  { %v677_v62 = vperm.slane %v631_v40, %v7066_v39 }
 0x287   :  { %v640_v58 = vpop.permute.xlu2 %639 }
 0x288   :  { %v681_v37 = vperm.slane %v640_v58, %v7071_v41 }
 0x28f   :  { %v643_v47 = vpop.permute.xlu2 %642 }
 0x290   :  { %v683_v52 = vperm.slane %v643_v47, %v7066_v39 }
 0x295   :  { %v637_v5 = vpop.permute.xlu1 %636 }
 0x296   :  { %v634_v2 = vpop.permute.xlu0 %633  ;;  %v680_v50 = vperm.slane %v637_v5, %v7066_v39 }
 0x297   :  { %v649_v48 = vpop.permute.xlu2 %648  ;;  %v678_v33 = vperm.slane %v634_v2, %v7071_v41 }
 0x298   :  { %v682_v4 = vsel %vm506_vm1, %v681_v37, %v680_v50  ;;  %v686_v25 = vperm.slane %v649_v48, %v7066_v39 }
 0x299   :  { %v679_v35 = vsel %vm506_vm1, %v678_v33, %v677_v62 }
 0x29a   :  { %v701_v40 = vsel %vm529_vm2, %v682_v4, %v679_v35 }
 0x29d   :  { %v646_v55 = vpop.permute.xlu1 %645 }
 0x29e   :  { %v655_v14 = vpop.permute.xlu0 %654  ;;  %v684_v49 = vperm.slane %v646_v55, %v7071_v41 }
 0x29f   :  { %v658_v42 = vpop.permute.xlu2 %657  ;;  %v689_v58 = vperm.slane %v655_v14, %v7066_v39 }
 0x2a0   :  { %v685_v5 = vsel %vm506_vm1, %v684_v49, %v683_v52 }
 0x2a1   :  { %v702_v37 = vsel %vm531_vm3, %v685_v5, %v701_v40  ;;  %v7243_v40 = vld [vmem:[#allocation13] sm:$0xff] }
 0x2a5   :  { %v652_v53 = vpop.permute.xlu1 %651 }
 0x2a6   :  { %v664_v56 = vpop.permute.xlu0 %663  ;;  %v687_v57 = vperm.slane %v652_v53, %v7071_v41  ;;  %v690_v53 = vperm.slane %v658_v42, %v7071_v41 }
 0x2a7   :  { %v667_v0 = vpop.permute.xlu2 %666  ;;  %v693_v50 = vperm.slane %v664_v56, %v7071_v41 }
 0x2a8   :  { %v688_v2 = vsel %vm506_vm1, %v687_v57, %v686_v25  ;;  %v691_v35 = vsel %vm506_vm1, %v690_v53, %v689_v58  ;;  %v695_v4 = vperm.slane %v667_v0, %v7066_v39  ;;  %v7238_v0 = vld [vmem:[#allocation13 + $0x10] sm:$0xff] }
 0x2a9   :  { %v703_v48 = vsel %vm533_vm4, %v688_v2, %v702_v37  ;;  %v7235_v2 = vld [vmem:[#allocation13 + $0x18] sm:$0xff] }
 0x2aa   :  { %v704_v42 = vsel %vm535_vm5, %v691_v35, %v703_v48  ;;  %934 = vmatpush.msrb.mxu2 %v7235_v2 }
 0x2ac   :  { %935 = vmatpush.msrb.mxu2 %v7238_v0 }
 0x2ad   :  { %v661_v60 = vpop.permute.xlu1 %660 }
 0x2ae   :  { %v692_v55 = vperm.slane %v661_v60, %v7066_v39  ;;  %v673_v44 = vpop.permute.xlu0 %672 }
 0x2af   :  { %v676_v47 = vpop.permute.xlu2 %675  ;;  %v698_v25 = vperm.slane %v673_v44, %v7066_v39 }
 0x2b0   :  { %v694_v52 = vsel %vm506_vm1, %v693_v50, %v692_v55  ;;  %v699_v60 = vperm.slane %v676_v47, %v7071_v41  ;;  %v7240_v55 = vld [vmem:[#allocation13 + $0x8] sm:$0xff] }
 0x2b1   :  { %v705_v56 = vsel %vm537_vm6, %v694_v52, %v704_v42  ;;  %936 = vmatpush.msrb.mxu2 %v7240_v55 }
 0x2b2   :  { %v700_v49 = vsel %vm506_vm1, %v699_v60, %v698_v25 }
 0x2b3   :  { %937 = vmatpush.msrb.mxu2 %v7243_v40 }
 0x2b4   :  { %5912 = vmatmul.msk.f32.vlgmr.msrb.gmra.mxu2 %vm214_vm0, %v6862_v9 }
 0x2b5   :  { %v670_v57 = vpop.permute.xlu1 %669 }
 0x2b6   :  { %v696_v14 = vperm.slane %v670_v57, %v7071_v41 }
 0x2b8   :  { %v697_v33 = vsel %vm506_vm1, %v696_v14, %v695_v4 }
 0x2b9   :  { %v706_v62 = vsel %vm539_vm7, %v697_v33, %v705_v56 }
 0x2ba   :  { %v707_v44 = vsel %vm541_vm8, %v700_v49, %v706_v62 }
 0x2bb   :  { %v709_v5 = vsel %vm544_vm9, %v707_v44, 0.0  ;;  %v5980_v44 = vld [vmem:[%s9810_s10] ss:$0 sm:$0xff] }
 0x2bc   :  { %710 = vadd.xlane.f32.xlu1 %v709_v5 }
 0x32f   :  { %v711_v58 = vpop.xlane.xlu1 %710 }
 0x330   :  { %6039 = vrcp.f32 %v711_v58 }
 0x336   :  { %v6040_v53 = vpop.eup %6039 }
 0x337   :  { %v719_v47 = vperm.slane %v6040_v53, 5  ;;  %v714_v37 = vperm.slane %v6040_v53, 0  ;;  %v715_v25 = vperm.slane %v6040_v53, 1  ;;  %v716_v35 = vperm.slane %v6040_v53, 2 }
 0x338   :  { %v718_v42 = vperm.slane %v6040_v53, 4  ;;  %v720_v33 = vperm.slane %v6040_v53, 6  ;;  %v721_v56 = vperm.slane %v6040_v53, 7 }
 0x339   :  { %v740_v50 = vmul.f32 %v7180_v26, %v719_v47  ;;  %v731_v48 = vmul.f32 %v7145_v43, %v714_v37  ;;  %v730_v52 = vmul.f32 %v7148_v27, %v714_v37  ;;  %v733_v60 = vmul.f32 %v7161_v28, %v715_v25 }
 0x33a   :  { %v732_v57 = vmul.f32 %v7143_v31, %v715_v25  ;;  %v735_v4 = vmul.f32 %v7156_v63, %v716_v35  ;;  %v734_v14 = vmul.f32 %v7174_v38, %v716_v35  ;;  %v717_v43 = vperm.slane %v6040_v53, 3 }
 0x33b   :  { %798 = vperm.xlu1 %5976, %v740_v50   ;;  %753 = vperm.xlu2 %5974, %v731_v48   ;;  %v739_v28 = vmul.f32 %v7193_v54, %v718_v42  ;;  %v738_v31 = vmul.f32 %v7158_v61, %v718_v42  ;;  %v742_v63 = vmul.f32 %v7197_v29, %v720_v33 }
 0x33c   :  { %748 = vperm.xlu0 %5975, %v730_v52   ;;  %v737_v27 = vmul.f32 %v7169_v3, %v717_v43  ;;  %v736_v26 = vmul.f32 %v7185_v32, %v717_v43  ;;  %v741_v38 = vmul.f32 %v7171_v7, %v719_v47  ;;  %v744_v3 = vmul.f32 %v7182_v34, %v721_v56 }
 0x33d   :  { %v743_v32 = vmul.f32 %v7190_v46, %v720_v33  ;;  %v745_v61 = vmul.f32 %v7200_v6, %v721_v56 }
 0x343   :  { %763 = vperm.xlu2 %5974, %v733_v60   ;;  %983 = vrot.lane.b32.xlu1 %v6862_v9, %s6722_s5  ;;  %v939_v9 = vpop.f32.mrf.mxu2 }
 0x344   :  { %758 = vperm.xlu0 %5975, %v732_v57   ;;  %v940_v6 = vadd.f32 %v5980_v44, %v939_v9 }
 0x346   :  { %v5913_v37 = vmul.f32 -1.442695, %v940_v6 }
 0x348   :  { %6041 = vpow2.f32 %v5913_v37 }
 0x34b   :  { %773 = vperm.xlu2 %5974, %v735_v4  }
 0x34c   :  { %768 = vperm.xlu0 %5975, %v734_v14  }
 0x34e   :  { %v6042_v42 = vpop.eup %6041 }
 0x353   :  { %783 = vperm.xlu2 %5974, %v737_v27  }
 0x354   :  { %778 = vperm.xlu0 %5975, %v736_v26  }
 0x35b   :  { %793 = vperm.xlu2 %5974, %v739_v28  }
 0x35c   :  { %788 = vperm.xlu0 %5975, %v738_v31  }
 0x363   :  { %808 = vperm.xlu2 %5974, %v742_v63  }
 0x364   :  { %803 = vperm.xlu0 %5975, %v741_v38  }
 0x36b   :  { %818 = vperm.xlu2 %5974, %v744_v3  }
 0x36c   :  { %813 = vperm.xlu0 %5975, %v743_v32   ;;  %v7322_v32 = vadd.f32 1.0, %v6042_v42 }
 0x36e   :  { %6043 = vrcp.f32 %v7322_v32  ;;  %vm951_vm10 = vweird.f32 %v7322_v32 }
 0x374   :  { %823 = vperm.xlu0 %5975, %v745_v61  }
 0x395   :  { %v7267_v54 = vpop.permute.xlu2 %753 }
 0x396   :  { %v827_v53 = vmul.f32 %v7267_v54, %v6868_v10  ;;  %v1105_v37 = vperm.slane %v7267_v54, %v7071_v41 }
 0x398   :  { %v843_v52 = vsel %vm214_vm0, %v827_v53, 0.0 }
 0x39d   :  { %v764_v29 = vpop.permute.xlu2 %763 }
 0x39e   :  { %v829_v25 = vmul.f32 %v764_v29, %v6876_v12 }
 0x3a5   :  { %v7271_v49 = vpop.permute.xlu2 %773 }
 0x3a6   :  { %v831_v35 = vmul.f32 %v7271_v49, %v6885_v15 }
 0x3a8   :  { %v861_v28 = vsel %vm214_vm0, %v831_v35, 0.0 }
 0x3ad   :  { %v7275_v46 = vpop.permute.xlu2 %783  ;;  %v7302_v14 = vpop.permute.xlu1 %798 }
 0x3ae   :  { %v7269_v7 = vpop.permute.xlu0 %748  ;;  %v833_v12 = vmul.f32 %v7275_v46, %v6893_v17  ;;  %v836_v31 = vmul.f32 %v7302_v14, %v6905_v20  ;;  %v1108_v20 = vperm.slane %v764_v29, %v7071_v41  ;;  %v1119_v35 = vperm.slane %v7302_v14, %v7066_v39 }
 0x3af   :  { %v826_v58 = vmul.f32 %v7269_v7, %v6860_v8 }
 0x3b0   :  { %v870_v33 = vsel %vm214_vm0, %v833_v12, 0.0  ;;  %v887_v6 = vsel %vm214_vm0, %v836_v31, 0.0 }
 0x3b1   :  { %v842_v50 = vsel %vm214_vm0, %v826_v58, 0.0 }
 0x3b2   :  { %v844_v60 = vadd.f32 %v843_v52, %v842_v50 }
 0x3b4   :  { %v845_v43 = vrot.slane %v844_v60, 4 }
 0x3b5   :  { %v7286_v47 = vpop.permute.xlu2 %793 }
 0x3b6   :  { %v759_v62 = vpop.permute.xlu0 %758  ;;  %v846_v63 = vadd.f32 %v845_v43, %v844_v60  ;;  %v999_v60 = vld [vmem:[#allocation14 + $0x50] sm:$0xff]  ;;  %v998_v43 = vld [vmem:[#allocation14 + $0x48] sm:$0xff] }
 0x3b7   :  { %v828_v48 = vmul.f32 %v759_v62, %v6872_v11  ;;  %v852_v11 = vsel %vm214_vm0, %v829_v25, 0.0  ;;  %v1000_v25 = vld [vmem:[#allocation14 + $0x58] sm:$0xff] }
 0x3b8   :  { %v847_v50 = vrot.slane %v846_v63, 2  ;;  %1013 = vmatpush.msra.mxu3 %v1000_v25 }
 0x3b9   :  { %v851_v8 = vsel %vm214_vm0, %v828_v48, 0.0 }
 0x3ba   :  { %v853_v26 = vadd.f32 %v852_v11, %v851_v8  ;;  %v1111_v8 = vperm.slane %v7271_v49, %v7071_v41  ;;  %1014 = vmatpush.msra.mxu3 %v999_v60 }
 0x3bc   :  { %1015 = vmatpush.msra.mxu3 %v998_v43  ;;  %v993_v43 = vld [vmem:[#allocation14 + $0x20] sm:$0xff] }
 0x3bd   :  { %v7310_v15 = vpop.permute.xlu2 %808 }
 0x3be   :  { %v7273_v34 = vpop.permute.xlu0 %768 }
 0x3bf   :  { %v830_v10 = vmul.f32 %v7273_v34, %v6880_v13  ;;  %v835_v13 = vmul.f32 %v7286_v47, %v6901_v19  ;;  %v854_v19 = vrot.slane %v853_v26, 4 }
 0x3c1   :  { %v879_v44 = vsel %vm214_vm0, %v835_v13, 0.0  ;;  %v855_v52 = vadd.f32 %v854_v19, %v853_v26  ;;  %v996_v19 = vld [vmem:[#allocation14 + $0x38] sm:$0xff] }
 0x3c3   :  { %v856_v13 = vrot.slane %v855_v52, 2 }
 0x3c6   :  { %v7280_v5 = vpop.permute.xlu0 %778 }
 0x3c7   :  { %v832_v4 = vmul.f32 %v7280_v5, %v6889_v16  ;;  %v860_v16 = vsel %vm214_vm0, %v830_v10, 0.0  ;;  %v1110_v10 = vperm.slane %v7273_v34, %v7066_v39  ;;  %v819_v34 = vpop.permute.xlu2 %818 }
 0x3c8   :  { %v862_v3 = vadd.f32 %v861_v28, %v860_v16  ;;  %v997_v28 = vld [vmem:[#allocation14 + $0x40] sm:$0xff] }
 0x3c9   :  { %v869_v17 = vsel %vm214_vm0, %v832_v4, 0.0  ;;  %v1114_v4 = vperm.slane %v7275_v46, %v7071_v41  ;;  %v1113_v46 = vperm.slane %v7280_v5, %v7066_v39  ;;  %1016 = vmatpush.msra.mxu3 %v997_v28 }
 0x3ca   :  { %v871_v9 = vadd.f32 %v870_v33, %v869_v17  ;;  %v863_v29 = vrot.slane %v862_v3, 4  ;;  %v1112_v17 = vsel %vm506_vm1, %v1111_v8, %v1110_v10 }
 0x3cb   :  { %1017 = vmatpush.msra.mxu3 %v996_v19 }
 0x3cc   :  { %v872_v54 = vrot.slane %v871_v9, 4  ;;  %v864_v14 = vadd.f32 %v863_v29, %v862_v3  ;;  %v1122_v3 = vperm.slane %v7310_v15, %v7066_v39 }
 0x3ce   :  { %v7292_v57 = vpop.permute.xlu0 %788  ;;  %v873_v33 = vadd.f32 %v872_v54, %v871_v9  ;;  %v865_v9 = vrot.slane %v864_v14, 2 }
 0x3cf   :  { %v834_v27 = vmul.f32 %v7292_v57, %v6897_v18  ;;  %v1107_v18 = vperm.slane %v759_v62, %v7066_v39  ;;  %v1104_v62 = vperm.slane %v7269_v7, %v7066_v39  ;;  %v838_v7 = vmul.f32 %v7310_v15, %v6913_v22 }
 0x3d0   :  { %v1117_v22 = vperm.slane %v7286_v47, %v7071_v41  ;;  %v1116_v47 = vperm.slane %v7292_v57, %v7066_v39  ;;  %v857_v57 = vadd.f32 %v856_v13, %v855_v52  ;;  %v866_v10 = vadd.f32 %v865_v9, %v864_v14 }
 0x3d1   :  { %v878_v38 = vsel %vm214_vm0, %v834_v27, 0.0  ;;  %v1106_v11 = vsel %vm506_vm1, %v1105_v37, %v1104_v62  ;;  %v7347_v27 = vadd.f32 %v847_v50, %v846_v63  ;;  %v896_v31 = vsel %vm214_vm0, %v838_v7, 0.0  ;;  %v7359_v63 = vpop.eup %6043  ;;  %v995_v62 = vld [vmem:[#allocation14 + $0x30] sm:$0xff] }
 0x3d2   :  { %v880_v58 = vadd.f32 %v879_v44, %v878_v38  ;;  %v1125_v50 = vperm.slane %v819_v34, %v7066_v39  ;;  %1018 = vmatpush.msra.mxu3 %v995_v62  ;;  %vm952_vm11 = vweird.f32 %v7359_v63 }
 0x3d3   :  { %vm953_vm12 = vmor %vm951_vm10, %vm952_vm11 }
 0x3d4   :  { %v881_v12 = vrot.slane %v880_v58, 4 }
 0x3d6   :  { %v7320_v56 = vpop.permute.xlu0 %803  ;;  %v882_v38 = vadd.f32 %v881_v12, %v880_v58  ;;  %v874_v58 = vrot.slane %v873_v33, 2 }
 0x3d7   :  { %v837_v61 = vmul.f32 %v7320_v56, %v6909_v21  ;;  %v1109_v21 = vsel %vm506_vm1, %v1108_v20, %v1107_v18  ;;  %v840_v18 = vmul.f32 %v819_v34, %v6921_v24  ;;  %v1120_v5 = vperm.slane %v7320_v56, %v7071_v41 }
 0x3d8   :  { %v1128_v49 = vsel %vm529_vm2, %v1109_v21, %v1106_v11  ;;  %v1115_v24 = vsel %vm506_vm1, %v1114_v4, %v1113_v46  ;;  %v947_v56 = vmul.f32 %v7359_v63, %v7322_v32  ;;  %v994_v21 = vld [vmem:[#allocation14 + $0x28] sm:$0xff]  ;;  %v6329_v4 = vld [vmem:[#allocation2 + $0x78] sm:$0xff]  ;;  %v992_v46 = vld [vmem:[#allocation14 + $0x18] sm:$0xff] }
 0x3d9   :  { %v888_v53 = vsel %vm214_vm0, %v837_v61, 0.0  ;;  %v905_v15 = vsel %vm214_vm0, %v840_v18, 0.0  ;;  %v1121_v52 = vsel %vm506_vm1, %v1120_v5, %v1119_v35  ;;  %1019 = vmatpush.msra.mxu3 %v994_v21  ;;  %v991_v5 = vld [vmem:[#allocation14 + $0x10] sm:$0xff] }
 0x3da   :  { %v889_v48 = vadd.f32 %v888_v53, %v887_v6  ;;  %v1129_v6 = vsel %vm531_vm3, %v1112_v17, %v1128_v49  ;;  %v1118_v53 = vsel %vm506_vm1, %v1117_v22, %v1116_v47  ;;  %v875_v22 = vadd.f32 %v874_v58, %v873_v33 }
 0x3db   :  { %v1130_v29 = vsel %vm533_vm4, %v1115_v24, %v1129_v6  ;;  %v948_v34 = vsub.f32 1.0, %v947_v56  ;;  %1020 = vmatpush.msra.mxu3 %v993_v43  ;;  %v867_v33 = vrot.slane %v866_v10, 1 }
 0x3dc   :  { %v890_v26 = vrot.slane %v889_v48, 4  ;;  %v1131_v54 = vsel %vm535_vm5, %v1118_v53, %v1130_v29 }
 0x3dd   :  { %v1132_v35 = vsel %vm537_vm6, %v1121_v52, %v1131_v54  ;;  %1021 = vmatpush.msra.mxu3 %v992_v46  ;;  %v868_v24 = vadd.f32 %v867_v33, %v866_v10 }
 0x3de   :  { %v814_v42 = vpop.permute.xlu0 %813  ;;  %v891_v61 = vadd.f32 %v890_v26, %v889_v48  ;;  %v883_v48 = vrot.slane %v882_v38, 2 }
 0x3df   :  { %v839_v16 = vmul.f32 %v814_v42, %v6917_v23  ;;  %v1123_v44 = vperm.slane %v814_v42, %v7071_v41  ;;  %1022 = vmatpush.msra.mxu3 %v991_v5 }
 0x3e0   :  { %v892_v25 = vrot.slane %v891_v61, 2  ;;  %v884_v26 = vadd.f32 %v883_v48, %v882_v38  ;;  %v849_v38 = vrot.slane %v7347_v27, 1 }
 0x3e1   :  { %v897_v23 = vsel %vm214_vm0, %v839_v16, 0.0  ;;  %v1124_v8 = vsel %vm506_vm1, %v1123_v44, %v1122_v3  ;;  %v858_v16 = vrot.slane %v857_v57, 1  ;;  %v990_v44 = vld [vmem:[#allocation14 + $0x8] sm:$0xff] }
 0x3e2   :  { %v898_v20 = vadd.f32 %v897_v23, %v896_v31  ;;  %v1133_v42 = vsel %vm539_vm7, %v1124_v8, %v1132_v35  ;;  %v893_v28 = vadd.f32 %v892_v25, %v891_v61  ;;  %v876_v23 = vrot.slane %v875_v22, 1  ;;  %1023 = vmatpush.msra.mxu3 %v990_v44  ;;  %v330_v35 = vld [vmem:[#allocation8] sm:$0xff] }
 0x3e3   :  { %v885_v3 = vrot.slane %v884_v26, 1  ;;  %v859_v61 = vadd.f32 %v858_v16, %v857_v57  ;;  %v850_v58 = vadd.f32 %v849_v38, %v7347_v27  ;;  %v955_v57 = vand.u32 2147483647, %v7322_v32 }
 0x3e4   :  { %v899_v37 = vrot.slane %v898_v20, 4  ;;  %v894_v9 = vrot.slane %v893_v28, 1  ;;  %v877_v56 = vadd.f32 %v876_v23, %v875_v22  ;;  %v989_v22 = vld [vmem:[#allocation14] sm:$0xff] }
 0x3e5   :  { %v969_v48 = vsel %vm529_vm2, %v859_v61, %v850_v58  ;;  %vm956_vm13 = vcmp.eq.f32.partialorder %v955_v57, 8.507059e+37  ;;  %1024 = vmatpush.msra.mxu3 %v989_v22  ;;  %v1139_v57 = vld [vmem:[#allocation11 + $0x8] sm:$0xff] }
 0x3e6   :  { %v900_v60 = vadd.f32 %v899_v37, %v898_v20  ;;  %v824_v7 = vpop.permute.xlu0 %823  ;;  %v949_v20 = vmul.f32 %v7359_v63, %v948_v34  ;;  %v957_v37 = vand.u32 2147483648, %v7322_v32  ;;  %v895_v52 = vadd.f32 %v894_v9, %v893_v28 }
 0x3e7   :  { %v841_v11 = vmul.f32 %v6329_v4, %v824_v7  ;;  %v1126_v12 = vperm.slane %v824_v7, %v7071_v41  ;;  %v970_v25 = vsel %vm531_vm3, %v868_v24, %v969_v48  ;;  %v1071_v48 = vld [vmem:[#allocation16 + $0x8] sm:$0xff] }
 0x3e8   :  { %v901_v49 = vrot.slane %v900_v60, 2  ;;  %v958_v27 = vor.u32 1.1754944e-38, %v957_v37  ;;  %v971_v8 = vsel %vm533_vm4, %v877_v56, %v970_v25  ;;  %v1073_v37 = vld [vmem:[#allocation16 + $0x18] sm:$0xff] }
 0x3e9   :  { %v906_v13 = vsel %vm214_vm0, %v841_v11, 0.0  ;;  %v1127_v14 = vsel %vm506_vm1, %v1126_v12, %v1125_v50  ;;  %v950_v50 = vadd.f32 %v7359_v63, %v949_v20  ;;  %1095 = vmatpush.msrb.mxu1 %v1073_v37 }
 0x3ea   :  { %v907_v31 = vadd.f32 %v906_v13, %v905_v15  ;;  %v1134_v17 = vsel %vm541_vm8, %v1127_v14, %v1133_v42  ;;  %v902_v47 = vadd.f32 %v901_v49, %v900_v60  ;;  %v886_v15 = vadd.f32 %v885_v3, %v884_v26  ;;  %v984_v49 = vpop.permute.xlu1 %983  ;;  %v5981_v13 = vld [vmem:[%s9812_s12] ss:$0 sm:$0xff] }
 0x3eb   :  { %v1136_v18 = vsel %vm544_vm9, %v1134_v17, 0.0  ;;  %v954_v7 = vsel %vm953_vm12, %v7359_v63, %v950_v50  ;;  %v978_v63 = vld [vmem:[#allocation5] sm:$0xff]  ;;  %v1072_v50 = vld [vmem:[#allocation16 + $0x10] sm:$0xff] }
 0x3ec   :  { %v908_v19 = vrot.slane %v907_v31, 4  ;;  %1137 = vst [vmem:[#allocation18] sm:$0xff] %v1136_v18  ;;  %v903_v62 = vrot.slane %v902_v47, 1  ;;  %v972_v10 = vsel %vm535_vm5, %v886_v15, %v971_v8  ;;  %v959_v11 = vsel %vm956_vm13, %v958_v27, %v954_v7  ;;  %v1140_v15 = vld [vmem:[#allocation11 + $0x10] sm:$0xff]  ;;  %1096 = vmatpush.msrb.mxu1 %v1072_v50 }
 0x3ed   :  { %v973_v32 = vsel %vm537_vm6, %v895_v52, %v972_v10  ;;  %v1138_v52 = vld [vmem:[#allocation11] sm:$0xff] }
 0x3ee   :  { %v909_v6 = vadd.f32 %v908_v19, %v907_v31  ;;  %v904_v29 = vadd.f32 %v903_v62, %v902_v47  ;;  %1097 = vmatpush.msrb.mxu1 %v1071_v48 }
 0x3f0   :  { %v910_v53 = vrot.slane %v909_v6, 2  ;;  %v974_v4 = vsel %vm539_vm7, %v904_v29, %v973_v32 }
 0x3f2   :  { %v911_v21 = vadd.f32 %v910_v53, %v909_v6  ;;  %v1141_v53 = vld [vmem:[#allocation11 + $0x18] sm:$0xff] }
 0x3f3   :  { %1158 = vmatpush.msra.mxu2 %v1141_v53 }
 0x3f4   :  { %v912_v60 = vrot.slane %v911_v21, 1 }
 0x3f5   :  { %1159 = vmatpush.msra.mxu2 %v1140_v15 }
 0x3f6   :  { %v913_v54 = vadd.f32 %v912_v60, %v911_v21  ;;  %v1070_v21 = vld [vmem:[#allocation16] sm:$0xff] }
 0x3f7   :  { %1160 = vmatpush.msra.mxu2 %v1139_v57  ;;  %1098 = vmatpush.msrb.mxu1 %v1070_v21 }
 0x3f8   :  { %v975_v12 = vsel %vm541_vm8, %v913_v54, %v974_v4 }
 0x3f9   :  { %v977_v43 = vmul.f32 %v975_v12, %v959_v11  ;;  %1161 = vmatpush.msra.mxu2 %v1138_v52  ;;  %1723 = vmatpush.msra.mxu1 %v7235_v2  ;;  %v5982_v2 = vld [vmem:[%s9814_s14] ss:$0 sm:$0xff] }
 0x3fb   :  { %980 = vrot.lane.b32.xlu2 %v977_v43, %s6723_s24  ;;  %1724 = vmatpush.msra.mxu1 %v7238_v0 }
 0x3fd   :  { %1725 = vmatpush.msra.mxu1 %v7240_v55 }
 0x3ff   :  { %1726 = vmatpush.msra.mxu1 %v7243_v40  ;;  %v5983_v40 = vld [vmem:[%s9807_s7] ss:$0 sm:$0xff] }
 0x403   :  { %1050 = vrot.lane.b32.xlu2 %v330_v35, %s6723_s24 }
 0x455   :  { %v981_v34 = vpop.permute.xlu2 %980 }
 0x456   :  { %v986_v26 = vsel %vm214_vm0, %v978_v63, %v981_v34 }
 0x457   :  { %v988_v42 = vsel %vm987_vm14, %v986_v26, %v984_v49 }
 0x458   :  { %5914 = vmatmul.msk.f32.vlgmr.msra.gmra.mxu3 %vm1005_vm15, %v988_v42  ;;  %v7441_v42 = vld [vmem:[%s9808_s8] ss:$0 sm:$0xff] }
 0x45d   :  { %v1051_v6 = vpop.permute.xlu2 %1050 }
 0x4db   :  { %v1026_v14 = vpop.f32.mrf.mxu3 }
 0x4dc   :  { %v1027_v46 = vadd.f32 %v5981_v13, %v1026_v14 }
 0x4de   :  { %6045 = vtanh.f32 %v1027_v46  ;;  %v5915_v28 = vmul.f32 -1.442695, %v1027_v46 }
 0x4e0   :  { %6047 = vpow2.f32 %v5915_v28 }
 0x4e4   :  { %v6046_v16 = vpop.eup %6045 }
 0x4e5   :  { %1055 = vrot.lane.b32.xlu0 %v6046_v16, %s6722_s5 }
 0x4e6   :  { %v6048_v31 = vpop.eup %6047 }
 0x4e7   :  { %v1032_v17 = vadd.f32 1.0, %v6048_v31 }
 0x4e9   :  { %6049 = vrcp.f32 %v1032_v17  ;;  %v1044_v23 = vand.u32 2147483648, %v1032_v17  ;;  %vm1038_vm11 = vweird.f32 %v1032_v17  ;;  %v1042_v19 = vand.u32 2147483647, %v1032_v17 }
 0x4eb   :  { %v1045_v20 = vor.u32 1.1754944e-38, %v1044_v23  ;;  %vm1043_vm13 = vcmp.eq.f32.partialorder %v1042_v19, 8.507059e+37  ;;  %v9849_v19 = vld [vmem:[#allocation29_spill] sm:$0xff] }
 0x4ef   :  { %v6050_v33 = vpop.eup %6049 }
 0x4f0   :  { %v1034_v47 = vmul.f32 %v6050_v33, %v1032_v17  ;;  %vm1039_vm10 = vweird.f32 %v6050_v33 }
 0x4f1   :  { %vm1040_vm12 = vmor %vm1038_vm11, %vm1039_vm10 }
 0x4f2   :  { %v1035_v18 = vsub.f32 1.0, %v1034_v47 }
 0x4f4   :  { %v1036_v5 = vmul.f32 %v6050_v33, %v1035_v18 }
 0x4f6   :  { %v1037_v38 = vadd.f32 %v6050_v33, %v1036_v5 }
 0x4f8   :  { %v1041_v3 = vsel %vm1040_vm12, %v6050_v33, %v1037_v38 }
 0x4f9   :  { %v1046_v44 = vsel %vm1043_vm13, %v1045_v20, %v1041_v3 }
 0x4fa   :  { %v1053_v24 = vmul.f32 %v1051_v6, %v1046_v44 }
 0x557   :  { %v1056_v61 = vpop.permute.xlu0 %1055 }
 0x558   :  { %v1058_v9 = vmul.f32 %v1056_v61, %v1046_v44  ;;  %v9850_v61 = vld [vmem:[#allocation27_spill] sm:$0xff] }
 0x55a   :  { %1060 = vrot.lane.b32.xlu1 %v1058_v9, %s6723_s24 }
 0x5cc   :  { %v1061_v62 = vpop.permute.xlu1 %1060 }
 0x5cd   :  { %v7412_v58 = vadd.f32 %v1061_v62, %v1053_v24  ;;  %v9851_v62 = vld [vmem:[#allocation28_spill] sm:$0xff] }
 0x5cf   :  { %6051 = vtanh.f32 %v7412_v58 }
 0x5d5   :  { %v6052_v56 = vpop.eup %6051 }
 0x5d6   :  { %1066 = vrot.lane.b32.xlu0 %v6052_v56, %s6722_s5 }
 0x648   :  { %v1067_v29 = vpop.permute.xlu0 %1066 }
 0x649   :  { %v7420_v25 = vmul.f32 %v1067_v29, %v1046_v44 }
 0x64b   :  { %1079 = vrot.lane.b32.xlu2 %v7420_v25, %s6723_s24 }
 0x6a5   :  { %v1080_v60 = vpop.permute.xlu2 %1079 }
 0x6a6   :  { %5916 = vmatmul.msk.f32.vlgmr.msrb.gmra.mxu1 %vm214_vm0, %v1080_v60  ;;  %5917 = vmatmul.msk.f32.vlgmr.msra.gmra.mxu2 %vm214_vm0, %v1080_v60 }
 0x6ae   :  { %5918 = vmatmul.msk.f32.vlgmr.msra.gmra.mxu1 %vm214_vm0, %v1080_v60 }
 0x723   :  { %v1100_v0 = vpop.f32.mrf.mxu1 }
 0x724   :  { %v1101_v55 = vadd.f32 %v5982_v2, %v1100_v0  ;;  %v9852_v2 = vld [vmem:[#allocation32_spill] sm:$0xff] }
 0x726   :  { %1103 = vst [vmem:[#allocation17] sm:$0xff] %v1101_v55  ;;  %v9853_v55 = vld [vmem:[#allocation30_spill] sm:$0xff] }
 0x729   :  { %v1163_v27 = vpop.f32.mrf.mxu2 }
 0x72a   :  { %v1164_v8 = vadd.f32 %v5983_v40, %v1163_v27 }
 0x72c   :  { %v1174_v7 = vperm.slane %v1164_v8, 0  ;;  %v1167_v10 = vrot.slane %v1164_v8, 1  ;;  %v1168_v54 = vrot.slane %v1164_v8, 2  ;;  %v1170_v43 = vrot.slane %v1164_v8, 4 }
 0x72d   :  { %v1169_v22 = vrot.slane %v1164_v8, 3  ;;  %v1171_v6 = vrot.slane %v1164_v8, 5  ;;  %v1173_v29 = vrot.slane %v1164_v8, 7  ;;  %v1172_v27 = vrot.slane %v1164_v8, 6 }
 0x72e   :  { %v1191_v32 = vadd.f32 %v1174_v7, %v6946_v36  ;;  %v1190_v4 = vadd.f32 %v1174_v7, %v6936_v30  ;;  %v1175_v11 = vperm.slane %v1167_v10, 0  ;;  %v1176_v12 = vperm.slane %v1168_v54, 0  ;;  %v9854_v10 = vld [vmem:[#allocation31_spill] sm:$0xff] }
 0x72f   :  { %v1178_v31 = vperm.slane %v1170_v43, 0  ;;  %v1177_v17 = vperm.slane %v1169_v22, 0  ;;  %v1179_v57 = vperm.slane %v1171_v6, 0  ;;  %v1180_v22 = vperm.slane %v1172_v27, 0 }
 0x730   :  { %v1207_v35 = vmax.f32 %v1191_v32, 0.0  ;;  %v1206_v63 = vmax.f32 %v1190_v4, 0.0  ;;  %v1192_v49 = vadd.f32 %v1175_v11, %v6954_v45  ;;  %v1195_v34 = vadd.f32 %v1176_v12, %v6973_v1 }
 0x731   :  { %v1193_v26 = vadd.f32 %v1175_v11, %v6960_v51  ;;  %v1194_v16 = vadd.f32 %v1176_v12, %v6967_v59  ;;  %v1198_v3 = vadd.f32 %v1178_v31, %v9849_v19  ;;  %v1196_v9 = vadd.f32 %v1177_v17, %v9850_v61 }
 0x732   :  { %v1223_v13 = vmul.f32 %v7441_v42, %v1207_v35  ;;  %v1222_v14 = vmul.f32 %v7441_v42, %v1206_v63  ;;  %v1208_v46 = vmax.f32 %v1192_v49, 0.0  ;;  %v1211_v28 = vmax.f32 %v1195_v34, 0.0  ;;  %v9855_v34 = vld [vmem:[#allocation36_spill] sm:$0xff] }
 0x733   :  { %v1209_v5 = vmax.f32 %v1193_v26, 0.0  ;;  %v1210_v23 = vmax.f32 %v1194_v16, 0.0  ;;  %v1197_v56 = vadd.f32 %v1177_v17, %v9851_v62  ;;  %v1214_v53 = vmax.f32 %v1198_v3, 0.0  ;;  %v9857_v16 = vld [vmem:[#allocation35_spill] sm:$0xff]  ;;  %v9858_v3 = vld [vmem:[#allocation33_spill] sm:$0xff] }
 0x734   :  { %v1241_v33 = vsel %vm214_vm0, %v1223_v13, 0.0  ;;  %v1238_v47 = vsel %vm214_vm0, %v1222_v14, 0.0  ;;  %v1224_v18 = vmul.f32 %v7441_v42, %v1208_v46  ;;  %v1227_v20 = vmul.f32 %v7441_v42, %v1211_v28  ;;  %v9856_v13 = vld [vmem:[#allocation34_spill] sm:$0xff] }
 0x735   :  { %1242 = vadd.xlane.f32.xlu0 %v1241_v33  ;;  %1239 = vadd.xlane.f32.xlu1 %v1238_v47  ;;  %v1225_v44 = vmul.f32 %v7441_v42, %v1209_v5  ;;  %v1226_v24 = vmul.f32 %v7441_v42, %v1210_v23  ;;  %v1212_v50 = vmax.f32 %v1196_v9, 0.0  ;;  %v1213_v52 = vmax.f32 %v1197_v56, 0.0 }
 0x736   :  { %v1244_v38 = vsel %vm214_vm0, %v1224_v18, 0.0  ;;  %v1253_v37 = vsel %vm214_vm0, %v1227_v20, 0.0  ;;  %v1230_v21 = vmul.f32 %v7441_v42, %v1214_v53  ;;  %v1201_v0 = vadd.f32 %v1179_v57, %v9852_v2 }
 0x737   :  { %1245 = vadd.xlane.f32.xlu2 %v1244_v38  ;;  %v1247_v15 = vsel %vm214_vm0, %v1225_v44, 0.0  ;;  %v1250_v48 = vsel %vm214_vm0, %v1226_v24, 0.0  ;;  %v1228_v60 = vmul.f32 %v7441_v42, %v1212_v50  ;;  %v1199_v40 = vadd.f32 %v1178_v31, %v9853_v55 }
 0x738   :  { %v1229_v7 = vmul.f32 %v7441_v42, %v1213_v52  ;;  %v1200_v54 = vadd.f32 %v1179_v57, %v9854_v10  ;;  %v1262_v32 = vsel %vm214_vm0, %v1230_v21, 0.0  ;;  %v1181_v4 = vperm.slane %v1173_v29, 0 }
 0x739   :  { %v1256_v11 = vsel %vm214_vm0, %v1228_v60, 0.0  ;;  %v1217_v12 = vmax.f32 %v1201_v0, 0.0  ;;  %v1215_v43 = vmax.f32 %v1199_v40, 0.0  ;;  %v1202_v14 = vadd.f32 %v1180_v22, %v9856_v13 }
 0x73a   :  { %v1259_v35 = vsel %vm214_vm0, %v1229_v7, 0.0  ;;  %v1216_v63 = vmax.f32 %v1200_v54, 0.0  ;;  %v1204_v26 = vadd.f32 %v1181_v4, %v9855_v34  ;;  %v1203_v28 = vadd.f32 %v1180_v22, %v9857_v16 }
 0x73b   :  { %v1233_v8 = vmul.f32 %v7441_v42, %v1217_v12  ;;  %v1231_v49 = vmul.f32 %v7441_v42, %v1215_v43  ;;  %v1218_v47 = vmax.f32 %v1202_v14, 0.0  ;;  %v1205_v20 = vadd.f32 %v1181_v4, %v9858_v3 }
 0x73c   :  { %v1232_v46 = vmul.f32 %v7441_v42, %v1216_v63  ;;  %v1220_v33 = vmax.f32 %v1204_v26, 0.0  ;;  %v1219_v5 = vmax.f32 %v1203_v28, 0.0 }
 0x73d   :  { %1254 = vadd.xlane.f32.xlu0 %v1253_v37  ;;  %1248 = vadd.xlane.f32.xlu1 %v1247_v15  ;;  %v1271_v31 = vsel %vm214_vm0, %v1233_v8, 0.0  ;;  %v1265_v17 = vsel %vm214_vm0, %v1231_v49, 0.0  ;;  %v1234_v23 = vmul.f32 %v7441_v42, %v1218_v47  ;;  %v1221_v24 = vmax.f32 %v1205_v20, 0.0 }
 0x73e   :  { %v1268_v18 = vsel %vm214_vm0, %v1232_v46, 0.0  ;;  %v1236_v38 = vmul.f32 %v7441_v42, %v1220_v33  ;;  %v1235_v44 = vmul.f32 %v7441_v42, %v1219_v5 }
 0x73f   :  { %1251 = vadd.xlane.f32.xlu2 %v1250_v48  ;;  %v1274_v6 = vsel %vm214_vm0, %v1234_v23, 0.0  ;;  %v1237_v53 = vmul.f32 %v7441_v42, %v1221_v24 }
 0x740   :  { %v1280_v9 = vsel %vm214_vm0, %v1236_v38, 0.0  ;;  %v1277_v56 = vsel %vm214_vm0, %v1235_v44, 0.0 }
 0x741   :  { %v1283_v37 = vsel %vm214_vm0, %v1237_v53, 0.0 }
 0x745   :  { %1263 = vadd.xlane.f32.xlu0 %v1262_v32  ;;  %1257 = vadd.xlane.f32.xlu1 %v1256_v11 }
 0x747   :  { %1260 = vadd.xlane.f32.xlu2 %v1259_v35 }
 0x74d   :  { %1272 = vadd.xlane.f32.xlu0 %v1271_v31  ;;  %1266 = vadd.xlane.f32.xlu1 %v1265_v17 }
 0x74f   :  { %1269 = vadd.xlane.f32.xlu2 %v1268_v18 }
 0x755   :  { %1281 = vadd.xlane.f32.xlu0 %v1280_v9  ;;  %1275 = vadd.xlane.f32.xlu1 %v1274_v6 }
 0x757   :  { %1278 = vadd.xlane.f32.xlu2 %v1277_v56 }
 0x75d   :  { %1284 = vadd.xlane.f32.xlu1 %v1283_v37 }
 0x7a8   :  { %v1243_v15 = vpop.xlane.xlu0 %1242  ;;  %v1240_v50 = vpop.xlane.xlu1 %1239 }
 0x7a9   :  { %v1303_v54 = vperm.slane %v1243_v15, %v7071_v41  ;;  %v1302_v32 = vperm.slane %v1240_v50, %v7066_v39 }
 0x7aa   :  { %v1246_v57 = vpop.xlane.xlu2 %1245 }
 0x7ab   :  { %v1305_v4 = vperm.slane %v1246_v57, %v7066_v39  ;;  %v1304_v8 = vsel %vm506_vm1, %v1303_v54, %v1302_v32 }
 0x7b0   :  { %v1255_v48 = vpop.xlane.xlu0 %1254  ;;  %v1249_v52 = vpop.xlane.xlu1 %1248 }
 0x7b1   :  { %v1306_v42 = vperm.slane %v1249_v52, %v7071_v41  ;;  %v1309_v22 = vperm.slane %v1255_v48, %v7071_v41 }
 0x7b2   :  { %v7486_v21 = vpop.xlane.xlu2 %1251 }
 0x7b3   :  { %v1308_v11 = vperm.slane %v7486_v21, %v7066_v39  ;;  %v1307_v12 = vsel %vm506_vm1, %v1306_v42, %v1305_v4 }
 0x7b4   :  { %v1326_v26 = vsel %vm529_vm2, %v1307_v12, %v1304_v8 }
 0x7b5   :  { %v1310_v14 = vsel %vm506_vm1, %v1309_v22, %v1308_v11 }
 0x7b6   :  { %v1327_v18 = vsel %vm531_vm3, %v1310_v14, %v1326_v26 }
 0x7b8   :  { %v1258_v29 = vpop.xlane.xlu1 %1257  ;;  %v7488_v60 = vpop.xlane.xlu0 %1263 }
 0x7b9   :  { %v1311_v49 = vperm.slane %v1258_v29, %v7066_v39  ;;  %v1314_v46 = vperm.slane %v7488_v60, %v7066_v39 }
 0x7ba   :  { %v7490_v0 = vpop.xlane.xlu2 %1260 }
 0x7bb   :  { %v1312_v43 = vperm.slane %v7490_v0, %v7071_v41 }
 0x7bd   :  { %v1313_v31 = vsel %vm506_vm1, %v1312_v43, %v1311_v49 }
 0x7be   :  { %v1328_v38 = vsel %vm533_vm4, %v1313_v31, %v1327_v18 }
 0x7c0   :  { %v7492_v40 = vpop.xlane.xlu1 %1266  ;;  %v7497_v7 = vpop.xlane.xlu0 %1272 }
 0x7c1   :  { %v1315_v35 = vperm.slane %v7492_v40, %v7071_v41  ;;  %v1318_v5 = vperm.slane %v7497_v7, %v7071_v41 }
 0x7c2   :  { %v7494_v27 = vpop.xlane.xlu2 %1269 }
 0x7c3   :  { %v1317_v17 = vperm.slane %v7494_v27, %v7066_v39  ;;  %v1316_v33 = vsel %vm506_vm1, %v1315_v35, %v1314_v46 }
 0x7c4   :  { %v1329_v9 = vsel %vm535_vm5, %v1316_v33, %v1328_v38 }
 0x7c5   :  { %v1319_v44 = vsel %vm506_vm1, %v1318_v5, %v1317_v17 }
 0x7c6   :  { %v1330_v37 = vsel %vm537_vm6, %v1319_v44, %v1329_v9 }
 0x7c8   :  { %v7510_v63 = vpop.xlane.xlu1 %1275  ;;  %v7530_v23 = vpop.xlane.xlu0 %1281 }
 0x7c9   :  { %v1320_v20 = vperm.slane %v7510_v63, %v7066_v39  ;;  %v1323_v56 = vperm.slane %v7530_v23, %v7066_v39 }
 0x7ca   :  { %v7518_v28 = vpop.xlane.xlu2 %1278 }
 0x7cb   :  { %v1321_v47 = vperm.slane %v7518_v28, %v7071_v41 }
 0x7cd   :  { %v1322_v24 = vsel %vm506_vm1, %v1321_v47, %v1320_v20 }
 0x7ce   :  { %v1331_v54 = vsel %vm539_vm7, %v1322_v24, %v1330_v37 }
 0x7d0   :  { %v7536_v6 = vpop.xlane.xlu1 %1284 }
 0x7d1   :  { %v1324_v53 = vperm.slane %v7536_v6, %v7071_v41 }
 0x7d3   :  { %v1325_v42 = vsel %vm506_vm1, %v1324_v53, %v1323_v56 }
 0x7d4   :  { %v1332_v32 = vsel %vm541_vm8, %v1325_v42, %v1331_v54 }
 0x7d5   :  { %v1334_v4 = vsel %vm544_vm9, %v1332_v32, -inf }
 0x7d6   :  { %1335 = vmax.xlane.f32.xlu2 %v1334_v4 }
 0x849   :  { %v7548_v11 = vpop.xlane.xlu2 %1335 }
 0x84a   :  { %v1339_v12 = vperm.slane %v7548_v11, 1  ;;  %v1338_v43 = vperm.slane %v7548_v11, 0  ;;  %v1341_v49 = vperm.slane %v7548_v11, 3  ;;  %v1340_v26 = vperm.slane %v7548_v11, 2 }
 0x84b   :  { %v1342_v5 = vperm.slane %v7548_v11, 4  ;;  %v1344_v9 = vperm.slane %v7548_v11, 6  ;;  %v1343_v56 = vperm.slane %v7548_v11, 5  ;;  %v1345_v4 = vperm.slane %v7548_v11, 7 }
 0x84c   :  { %v1356_v22 = vsub.f32 %v1246_v57, %v1339_v12  ;;  %v1355_v35 = vsub.f32 %v1243_v15, %v1338_v43  ;;  %v1354_v8 = vsub.f32 %v1240_v50, %v1338_v43  ;;  %v1360_v17 = vsub.f32 %v1258_v29, %v1341_v49 }
 0x84d   :  { %v1359_v33 = vsub.f32 %v1255_v48, %v1340_v26  ;;  %v1357_v47 = vsub.f32 %v1249_v52, %v1339_v12  ;;  %v1363_v48 = vsub.f32 %v7492_v40, %v1342_v5  ;;  %v1362_v52 = vsub.f32 %v7488_v60, %v1342_v5 }
 0x84e   :  { %v1374_v14 = vmul.f32 1.442695, %v1356_v22  ;;  %v1372_v46 = vmul.f32 1.442695, %v1355_v35  ;;  %v1370_v31 = vmul.f32 1.442695, %v1354_v8  ;;  %v1358_v29 = vsub.f32 %v7486_v21, %v1340_v26 }
 0x84f   :  { %v1382_v18 = vmul.f32 1.442695, %v1360_v17  ;;  %v1380_v38 = vmul.f32 1.442695, %v1359_v33  ;;  %v1376_v15 = vmul.f32 1.442695, %v1357_v47  ;;  %v1366_v21 = vsub.f32 %v7510_v63, %v1344_v9 }
 0x850   :  { %6053 = vpow2.f32 %v1374_v14  ;;  %v1388_v44 = vmul.f32 1.442695, %v1363_v48  ;;  %v1386_v24 = vmul.f32 1.442695, %v1362_v52  ;;  %v1378_v37 = vmul.f32 1.442695, %v1358_v29 }
 0x851   :  { %6055 = vpow2.f32 %v1372_v46  ;;  %v1365_v60 = vsub.f32 %v7497_v7, %v1343_v56  ;;  %v1361_v54 = vsub.f32 %v7490_v0, %v1341_v49  ;;  %v1394_v32 = vmul.f32 1.442695, %v1366_v21 }
 0x852   :  { %6057 = vpow2.f32 %v1370_v31  ;;  %v1369_v7 = vsub.f32 %v7536_v6, %v1345_v4  ;;  %v1368_v0 = vsub.f32 %v7530_v23, %v1345_v4  ;;  %v1364_v11 = vsub.f32 %v7494_v27, %v1343_v56 }
 0x853   :  { %6059 = vpow2.f32 %v1382_v18  ;;  %v1392_v12 = vmul.f32 1.442695, %v1365_v60  ;;  %v1384_v22 = vmul.f32 1.442695, %v1361_v54  ;;  %v1367_v27 = vsub.f32 %v7518_v28, %v1344_v9 }
 0x854   :  { %6061 = vpow2.f32 %v1380_v38  ;;  %v1400_v8 = vmul.f32 1.442695, %v1369_v7  ;;  %v1398_v49 = vmul.f32 1.442695, %v1368_v0  ;;  %v1390_v14 = vmul.f32 1.442695, %v1364_v11 }
 0x855   :  { %6063 = vpow2.f32 %v1376_v15  ;;  %v1396_v6 = vmul.f32 1.442695, %v1367_v27 }
 0x856   :  { %v7555_v57 = vpop.eup %6053  ;;  %6065 = vpow2.f32 %v1388_v44 }
 0x857   :  { %v7557_v50 = vpop.eup %6055  ;;  %1425 = vperm.xlu2 %5974, %v7555_v57   ;;  %6067 = vpow2.f32 %v1386_v24 }
 0x858   :  { %v7560_v20 = vpop.eup %6057  ;;  %1422 = vperm.xlu1 %5976, %v7557_v50   ;;  %6069 = vpow2.f32 %v1378_v37 }
 0x859   :  { %1419 = vperm.xlu0 %5975, %v7560_v20   ;;  %v7569_v53 = vpop.eup %6059  ;;  %6071 = vpow2.f32 %v1394_v32 }
 0x85a   :  { %v7571_v42 = vpop.eup %6061  ;;  %6073 = vpow2.f32 %v1392_v12 }
 0x85b   :  { %v7574_v40 = vpop.eup %6063  ;;  %6075 = vpow2.f32 %v1384_v22 }
 0x85c   :  { %v7582_v43 = vpop.eup %6065  ;;  %6077 = vpow2.f32 %v1400_v8 }
 0x85d   :  { %v7584_v35 = vpop.eup %6067  ;;  %6079 = vpow2.f32 %v1398_v49 }
 0x85e   :  { %v7587_v63 = vpop.eup %6069  ;;  %6081 = vpow2.f32 %v1390_v14 }
 0x85f   :  { %1437 = vperm.xlu2 %5974, %v7569_v53   ;;  %v7594_v26 = vpop.eup %6071  ;;  %6083 = vpow2.f32 %v1396_v6 }
 0x860   :  { %1434 = vperm.xlu1 %5976, %v7571_v42   ;;  %v7596_v46 = vpop.eup %6073 }
 0x861   :  { %1428 = vperm.xlu0 %5975, %v7574_v40   ;;  %v7599_v31 = vpop.eup %6075 }
 0x862   :  { %v7604_v23 = vpop.eup %6077 }
 0x863   :  { %v7606_v17 = vpop.eup %6079 }
 0x864   :  { %v7609_v33 = vpop.eup %6081 }
 0x865   :  { %v7613_v47 = vpop.eup %6083 }
 0x867   :  { %1446 = vperm.xlu2 %5974, %v7582_v43  }
 0x868   :  { %1443 = vperm.xlu1 %5976, %v7584_v35  }
 0x869   :  { %1431 = vperm.xlu0 %5975, %v7587_v63  }
 0x86f   :  { %1455 = vperm.xlu2 %5974, %v7594_v26  }
 0x870   :  { %1452 = vperm.xlu1 %5976, %v7596_v46  }
 0x871   :  { %1440 = vperm.xlu0 %5975, %v7599_v31  }
 0x877   :  { %1464 = vperm.xlu2 %5974, %v7604_v23  }
 0x878   :  { %1461 = vperm.xlu1 %5976, %v7606_v17  }
 0x879   :  { %1449 = vperm.xlu0 %5975, %v7609_v33  }
 0x881   :  { %1458 = vperm.xlu0 %5975, %v7613_v47  }
 0x8b1   :  { %v1426_v18 = vpop.permute.xlu2 %1425 }
 0x8b2   :  { %v1469_v60 = vperm.slane %v1426_v18, %v7066_v39 }
 0x8b9   :  { %v1438_v48 = vpop.permute.xlu2 %1437 }
 0x8ba   :  { %v1475_v7 = vperm.slane %v1438_v48, %v7066_v39 }
 0x8c1   :  { %v1447_v44 = vpop.permute.xlu2 %1446 }
 0x8c9   :  { %v1456_v56 = vpop.permute.xlu2 %1455 }
 0x8ca   :  { %v1423_v28 = vpop.permute.xlu1 %1422 }
 0x8cb   :  { %v1420_v5 = vpop.permute.xlu0 %1419  ;;  %v1467_v54 = vperm.slane %v1423_v28, %v7071_v41 }
 0x8cc   :  { %v1466_v32 = vperm.slane %v1420_v5, %v7066_v39 }
 0x8ce   :  { %v1468_v8 = vsel %vm506_vm1, %v1467_v54, %v1466_v32 }
 0x8d2   :  { %v1435_v38 = vpop.permute.xlu1 %1434 }
 0x8d3   :  { %v1429_v15 = vpop.permute.xlu0 %1428  ;;  %v1473_v22 = vperm.slane %v1435_v38, %v7071_v41  ;;  %v1479_v38 = vperm.slane %v1447_v44, %v7071_v41 }
 0x8d4   :  { %v1470_v37 = vperm.slane %v1429_v15, %v7071_v41  ;;  %v1465_v15 = vpop.permute.xlu2 %1464 }
 0x8d5   :  { %v1488_v54 = vperm.slane %v1465_v15, %v7071_v41 }
 0x8d6   :  { %v1471_v0 = vsel %vm506_vm1, %v1470_v37, %v1469_v60 }
 0x8d7   :  { %v1490_v27 = vsel %vm529_vm2, %v1471_v0, %v1468_v8 }
 0x8da   :  { %v1444_v29 = vpop.permute.xlu1 %1443 }
 0x8db   :  { %v1432_v52 = vpop.permute.xlu0 %1431  ;;  %v1478_v6 = vperm.slane %v1444_v29, %v7066_v39 }
 0x8dc   :  { %v1472_v21 = vperm.slane %v1432_v52, %v7066_v39 }
 0x8dd   :  { %v1480_v60 = vsel %vm506_vm1, %v1479_v38, %v1478_v6 }
 0x8de   :  { %v1474_v11 = vsel %vm506_vm1, %v1473_v22, %v1472_v21  ;;  %v1484_v21 = vperm.slane %v1456_v56, %v7066_v39 }
 0x8df   :  { %v1491_v28 = vsel %vm531_vm3, %v1474_v11, %v1490_v27 }
 0x8e2   :  { %v1453_v24 = vpop.permute.xlu1 %1452 }
 0x8e3   :  { %v1441_v9 = vpop.permute.xlu0 %1440  ;;  %v1482_v5 = vperm.slane %v1453_v24, %v7071_v41 }
 0x8e4   :  { %v1476_v4 = vperm.slane %v1441_v9, %v7071_v41 }
 0x8e6   :  { %v1477_v49 = vsel %vm506_vm1, %v1476_v4, %v1475_v7 }
 0x8e7   :  { %v1492_v48 = vsel %vm533_vm4, %v1477_v49, %v1491_v28 }
 0x8e8   :  { %v1493_v24 = vsel %vm535_vm5, %v1480_v60, %v1492_v48 }
 0x8ea   :  { %v1462_v18 = vpop.permute.xlu1 %1461 }
 0x8eb   :  { %v1450_v12 = vpop.permute.xlu0 %1449  ;;  %v1487_v52 = vperm.slane %v1462_v18, %v7066_v39 }
 0x8ec   :  { %v1481_v14 = vperm.slane %v1450_v12, %v7066_v39 }
 0x8ed   :  { %v1489_v4 = vsel %vm506_vm1, %v1488_v54, %v1487_v52 }
 0x8ee   :  { %v1483_v9 = vsel %vm506_vm1, %v1482_v5, %v1481_v14 }
 0x8ef   :  { %v1494_v32 = vsel %vm537_vm6, %v1483_v9, %v1493_v24 }
 0x8f3   :  { %v1459_v37 = vpop.permute.xlu0 %1458 }
 0x8f4   :  { %v1485_v29 = vperm.slane %v1459_v37, %v7071_v41 }
 0x8f6   :  { %v1486_v44 = vsel %vm506_vm1, %v1485_v29, %v1484_v21 }
 0x8f7   :  { %v1495_v12 = vsel %vm539_vm7, %v1486_v44, %v1494_v32  ;;  %v6331_v32 = vld [vmem:[#allocation2] sm:$0xff] }
 0x8f8   :  { %v1496_v22 = vsel %vm541_vm8, %v1489_v4, %v1495_v12  ;;  %v6332_v12 = vld [vmem:[#allocation2 + $0x8] sm:$0xff] }
 0x8f9   :  { %v1498_v56 = vsel %vm544_vm9, %v1496_v22, 0.0 }
 0x8fa   :  { %1499 = vadd.xlane.f32.xlu0 %v1498_v56  ;;  %v6333_v56 = vld [vmem:[#allocation2 + $0x10] sm:$0xff] }
 0x96d   :  { %v1500_v7 = vpop.xlane.xlu0 %1499 }
 0x96e   :  { %6085 = vrcp.f32 %v1500_v7 }
 0x974   :  { %v6086_v0 = vpop.eup %6085 }
 0x975   :  { %v1508_v11 = vperm.slane %v6086_v0, 5  ;;  %v1503_v8 = vperm.slane %v6086_v0, 0  ;;  %v1504_v6 = vperm.slane %v6086_v0, 1  ;;  %v1505_v5 = vperm.slane %v6086_v0, 2 }
 0x976   :  { %v1509_v48 = vperm.slane %v6086_v0, 6  ;;  %v1510_v52 = vperm.slane %v6086_v0, 7 }
 0x977   :  { %v1530_v49 = vmul.f32 %v7596_v46, %v1508_v11  ;;  %v1520_v14 = vmul.f32 %v7557_v50, %v1503_v8  ;;  %v1519_v27 = vmul.f32 %v7560_v20, %v1503_v8  ;;  %v1522_v18 = vmul.f32 %v7574_v40, %v1504_v6  ;;  %v6334_v8 = vld [vmem:[#allocation2 + $0x18] sm:$0xff] }
 0x978   :  { %v1521_v28 = vmul.f32 %v7555_v57, %v1504_v6  ;;  %v1524_v46 = vmul.f32 %v7571_v42, %v1505_v5  ;;  %v1523_v50 = vmul.f32 %v7587_v63, %v1505_v5  ;;  %v1506_v20 = vperm.slane %v6086_v0, 3 }
 0x979   :  { %1592 = vperm.xlu0 %5975, %v1530_v49   ;;  %1542 = vperm.xlu2 %5974, %v1520_v14   ;;  %v1507_v57 = vperm.slane %v6086_v0, 4  ;;  %v1531_v42 = vmul.f32 %v7594_v26, %v1509_v48  ;;  %v1529_v63 = vmul.f32 %v7609_v33, %v1508_v11  ;;  %v5984_v26 = vld [vmem:[%s9810_s10] ss:$0 sm:$0xff]  ;;  %v1728_v33 = vpop.f32.mrf.mxu1 }
 0x97a   :  { %1537 = vperm.xlu1 %5976, %v1519_v27   ;;  %v1526_v38 = vmul.f32 %v7599_v31, %v1506_v20  ;;  %v1525_v40 = vmul.f32 %v7569_v53, %v1506_v20  ;;  %v1533_v31 = vmul.f32 %v7606_v17, %v1510_v52  ;;  %v1532_v53 = vmul.f32 %v7613_v47, %v1509_v48 }
 0x97b   :  { %v1528_v15 = vmul.f32 %v7582_v43, %v1507_v57  ;;  %v1534_v43 = vmul.f32 %v7604_v23, %v1510_v52  ;;  %v1729_v17 = vadd.f32 %v5984_v26, %v1728_v33  ;;  %v6341_v33 = vld [vmem:[#allocation2 + $0x58] sm:$0xff] }
 0x97d   :  { %v5919_v60 = vmul.f32 -1.442695, %v1729_v17 }
 0x97f   :  { %6087 = vpow2.f32 %v5919_v60 }
 0x981   :  { %1773 = vrot.lane.b32.xlu0 %v7420_v25, %s6724_s11  ;;  %1552 = vperm.xlu2 %5974, %v1522_v18   ;;  %v1527_v25 = vmul.f32 %v7584_v35, %v1507_v57 }
 0x982   :  { %1547 = vperm.xlu1 %5976, %v1521_v28   ;;  %v6335_v28 = vld [vmem:[#allocation2 + $0x20] sm:$0xff] }
 0x985   :  { %v6088_v54 = vpop.eup %6087 }
 0x986   :  { %v7685_v44 = vadd.f32 1.0, %v6088_v54 }
 0x988   :  { %6089 = vrcp.f32 %v7685_v44  ;;  %vm1740_vm11 = vweird.f32 %v7685_v44 }
 0x989   :  { %1562 = vperm.xlu2 %5974, %v1524_v46   ;;  %v6336_v46 = vld [vmem:[#allocation2 + $0x30] sm:$0xff] }
 0x98a   :  { %1557 = vperm.xlu1 %5976, %v1523_v50  }
 0x98e   :  { %v7706_v48 = vpop.eup %6089 }
 0x98f   :  { %v7715_v54 = vmul.f32 %v7706_v48, %v7685_v44  ;;  %vm1741_vm10 = vweird.f32 %v7706_v48 }
 0x990   :  { %vm1742_vm12 = vmor %vm1740_vm11, %vm1741_vm10 }
 0x991   :  { %1572 = vperm.xlu2 %5974, %v1526_v38   ;;  %v6337_v38 = vld [vmem:[#allocation2 + $0x28] sm:$0xff] }
 0x992   :  { %1567 = vperm.xlu1 %5976, %v1525_v40  }
 0x999   :  { %1582 = vperm.xlu2 %5974, %v1528_v15   ;;  %v6338_v15 = vld [vmem:[#allocation2 + $0x40] sm:$0xff] }
 0x99a   :  { %1577 = vperm.xlu1 %5976, %v1527_v25  }
 0x9a1   :  { %1597 = vperm.xlu2 %5974, %v1531_v42   ;;  %v6339_v42 = vld [vmem:[#allocation2 + $0x38] sm:$0xff] }
 0x9a2   :  { %1587 = vperm.xlu1 %5976, %v1529_v63  }
 0x9a9   :  { %1607 = vperm.xlu2 %5974, %v1533_v31  }
 0x9aa   :  { %1602 = vperm.xlu1 %5976, %v1532_v53   ;;  %v6340_v53 = vld [vmem:[#allocation2 + $0x48] sm:$0xff] }
 0x9b2   :  { %1612 = vperm.xlu1 %5976, %v1534_v43  }
 0x9d3   :  { %v7666_v35 = vpop.permute.xlu2 %1542 }
 0x9d4   :  { %v1616_v22 = vmul.f32 %v6332_v12, %v7666_v35 }
 0x9d6   :  { %v1632_v27 = vsel %vm214_vm0, %v1616_v22, 0.0 }
 0x9db   :  { %v7670_v37 = vpop.permute.xlu2 %1552 }
 0x9dc   :  { %v1618_v49 = vmul.f32 %v6334_v8, %v7670_v37  ;;  %v6342_v8 = vld [vmem:[#allocation2 + $0x50] sm:$0xff] }
 0x9de   :  { %v1641_v20 = vsel %vm214_vm0, %v1618_v49, 0.0 }
 0x9e3   :  { %v7677_v47 = vpop.permute.xlu2 %1562 }
 0x9e4   :  { %v1620_v40 = vmul.f32 %v6337_v38, %v7677_v47 }
 0x9eb   :  { %v7681_v23 = vpop.permute.xlu2 %1572  ;;  %v7703_v57 = vpop.permute.xlu0 %1592 }
 0x9ec   :  { %v7668_v9 = vpop.permute.xlu1 %1537  ;;  %v1622_v63 = vmul.f32 %v6339_v42, %v7681_v23  ;;  %v1626_v17 = vmul.f32 %v6341_v33, %v7703_v57  ;;  %v1899_v33 = vperm.slane %v7681_v23, %v7071_v41 }
 0x9ed   :  { %v1615_v4 = vmul.f32 %v6331_v32, %v7668_v9  ;;  %v1650_v32 = vsel %vm214_vm0, %v1620_v40, 0.0  ;;  %v1889_v38 = vperm.slane %v7668_v9, %v7066_v39 }
 0x9ee   :  { %v1659_v22 = vsel %vm214_vm0, %v1622_v63, 0.0 }
 0x9ef   :  { %v1631_v0 = vsel %vm214_vm0, %v1615_v4, 0.0 }
 0x9f0   :  { %v1633_v6 = vadd.f32 %v1632_v27, %v1631_v0 }
 0x9f2   :  { %v1634_v31 = vrot.slane %v1633_v6, 4 }
 0x9f3   :  { %v7692_v11 = vpop.permute.xlu2 %1582 }
 0x9f4   :  { %v7675_v21 = vpop.permute.xlu1 %1547  ;;  %v1624_v43 = vmul.f32 %v6340_v53, %v7692_v11  ;;  %v1635_v27 = vadd.f32 %v1634_v31, %v1633_v6  ;;  %v1890_v6 = vperm.slane %v7666_v35, %v7071_v41  ;;  %v1789_v31 = vld [vmem:[#allocation14 + $0x58] sm:$0xff]  ;;  %v1788_v53 = vld [vmem:[#allocation14 + $0x50] sm:$0xff] }
 0x9f5   :  { %v1617_v7 = vmul.f32 %v6333_v56, %v7675_v21  ;;  %1801 = vmatpush.msrb.mxu2 %v1789_v31 }
 0x9f6   :  { %v1636_v9 = vrot.slane %v1635_v27, 2 }
 0x9f7   :  { %v1640_v18 = vsel %vm214_vm0, %v1617_v7, 0.0  ;;  %1802 = vmatpush.msrb.mxu2 %v1788_v53 }
 0x9f8   :  { %v1642_v52 = vadd.f32 %v1641_v20, %v1640_v18  ;;  %v1668_v18 = vsel %vm214_vm0, %v1624_v43, 0.0  ;;  %v1905_v43 = vperm.slane %v7703_v57, %v7071_v41 }
 0x9fa   :  { %v1643_v56 = vrot.slane %v1642_v52, 4 }
 0x9fb   :  { %v7722_v7 = vpop.permute.xlu2 %1597 }
 0x9fc   :  { %v7679_v29 = vpop.permute.xlu1 %1557  ;;  %v1644_v42 = vadd.f32 %v1643_v56, %v1642_v52 }
 0x9fd   :  { %v1619_v5 = vmul.f32 %v6335_v28, %v7679_v29  ;;  %v1895_v57 = vperm.slane %v7679_v29, %v7066_v39 }
 0x9fe   :  { %v1645_v56 = vrot.slane %v1644_v42, 2 }
 0x9ff   :  { %v1649_v26 = vsel %vm214_vm0, %v1619_v5, 0.0  ;;  %v1677_v5 = vsel %vm214_vm0, %v1626_v17, 0.0  ;;  %v6343_v17 = vld [vmem:[#allocation2 + $0x60] sm:$0xff] }
 0xa00   :  { %v1651_v0 = vadd.f32 %v1650_v32, %v1649_v26  ;;  %v1891_v32 = vsel %vm506_vm1, %v1890_v6, %v1889_v38 }
 0xa02   :  { %v1652_v63 = vrot.slane %v1651_v0, 4 }
 0xa03   :  { %v1608_v6 = vpop.permute.xlu2 %1607 }
 0xa04   :  { %v7683_v24 = vpop.permute.xlu1 %1567  ;;  %v1653_v23 = vadd.f32 %v1652_v63, %v1651_v0  ;;  %v1785_v63 = vld [vmem:[#allocation14 + $0x38] sm:$0xff] }
 0xa05   :  { %v1621_v50 = vmul.f32 %v6336_v46, %v7683_v24  ;;  %v1892_v46 = vperm.slane %v7675_v21, %v7066_v39  ;;  %v1896_v21 = vperm.slane %v7677_v47, %v7071_v41  ;;  %v1902_v47 = vperm.slane %v7692_v11, %v7071_v41 }
 0xa07   :  { %v1658_v60 = vsel %vm214_vm0, %v1621_v50, 0.0 }
 0xa08   :  { %v1660_v28 = vadd.f32 %v1659_v22, %v1658_v60  ;;  %v1787_v60 = vld [vmem:[#allocation14 + $0x48] sm:$0xff] }
 0xa09   :  { %1803 = vmatpush.msrb.mxu2 %v1787_v60 }
 0xa0a   :  { %v1661_v26 = vrot.slane %v1660_v28, 4 }
 0xa0c   :  { %v7695_v14 = vpop.permute.xlu1 %1577  ;;  %v1662_v38 = vadd.f32 %v1661_v26, %v1660_v28  ;;  %v1654_v26 = vrot.slane %v1653_v23, 2 }
 0xa0d   :  { %v1623_v25 = vmul.f32 %v6338_v15, %v7695_v14  ;;  %v1737_v15 = vsub.f32 1.0, %v7715_v54  ;;  %v1901_v11 = vperm.slane %v7695_v14, %v7066_v39  ;;  %v1907_v14 = vperm.slane %v7722_v7, %v7066_v39 }
 0xa0f   :  { %v1667_v4 = vsel %vm214_vm0, %v1623_v25, 0.0  ;;  %v1893_v25 = vperm.slane %v7670_v37, %v7071_v41  ;;  %v1627_v37 = vmul.f32 %v6343_v17, %v7722_v7  ;;  %v6345_v17 = vld [vmem:[#allocation2 + $0x70] sm:$0xff] }
 0xa10   :  { %v1669_v50 = vadd.f32 %v1668_v18, %v1667_v4 }
 0xa11   :  { %v1894_v35 = vsel %vm506_vm1, %v1893_v25, %v1892_v46  ;;  %v7752_v46 = vadd.f32 %v1636_v9, %v1635_v27  ;;  %v1685_v29 = vsel %vm214_vm0, %v1627_v37, 0.0  ;;  %v1897_v27 = vsel %vm506_vm1, %v1896_v21, %v1895_v57  ;;  %v1783_v57 = vld [vmem:[#allocation14 + $0x28] sm:$0xff] }
 0xa12   :  { %v1670_v52 = vrot.slane %v1669_v50, 4  ;;  %v1646_v9 = vadd.f32 %v1645_v56, %v1644_v42  ;;  %v1663_v37 = vrot.slane %v1662_v38, 2  ;;  %v1910_v21 = vperm.slane %v1608_v6, %v7066_v39 }
 0xa14   :  { %v7719_v12 = vpop.permute.xlu1 %1587  ;;  %v1671_v25 = vadd.f32 %v1670_v52, %v1669_v50  ;;  %v1903_v52 = vsel %vm506_vm1, %v1902_v47, %v1901_v11 }
 0xa15   :  { %v1625_v49 = vmul.f32 %v6342_v8, %v7719_v12  ;;  %v1898_v8 = vperm.slane %v7683_v24, %v7066_v39  ;;  %v1904_v0 = vperm.slane %v7719_v12, %v7066_v39  ;;  %v1629_v12 = vmul.f32 %v6345_v17, %v1608_v6  ;;  %v1780_v17 = vld [vmem:[#allocation14 + $0x10] sm:$0xff] }
 0xa17   :  { %v1676_v20 = vsel %vm214_vm0, %v1625_v49, 0.0  ;;  %v6344_v49 = vld [vmem:[#allocation2 + $0x68] sm:$0xff]  ;;  %v1900_v50 = vsel %vm506_vm1, %v1899_v33, %v1898_v8  ;;  %v1906_v42 = vsel %vm506_vm1, %v1905_v43, %v1904_v0  ;;  %v1655_v8 = vadd.f32 %v1654_v26, %v1653_v23 }
 0xa18   :  { %v1678_v40 = vadd.f32 %v1677_v5, %v1676_v20  ;;  %v1786_v5 = vld [vmem:[#allocation14 + $0x40] sm:$0xff]  ;;  %v1913_v20 = vsel %vm529_vm2, %v1894_v35, %v1891_v32  ;;  %v1784_v35 = vld [vmem:[#allocation14 + $0x30] sm:$0xff]  ;;  %v1672_v32 = vrot.slane %v1671_v25, 2  ;;  %v1694_v11 = vsel %vm214_vm0, %v1629_v12, 0.0 }
 0xa19   :  { %1804 = vmatpush.msrb.mxu2 %v1786_v5  ;;  %v1664_v43 = vadd.f32 %v1663_v37, %v1662_v38 }
 0xa1a   :  { %v1679_v4 = vrot.slane %v1678_v40, 4  ;;  %v1673_v0 = vadd.f32 %v1672_v32, %v1671_v25  ;;  %v1638_v25 = vrot.slane %v7752_v46, 1 }
 0xa1b   :  { %1805 = vmatpush.msrb.mxu2 %v1785_v63  ;;  %v1665_v12 = vrot.slane %v1664_v43, 1 }
 0xa1c   :  { %v1603_v22 = vpop.permute.xlu1 %1602  ;;  %v1680_v31 = vadd.f32 %v1679_v4, %v1678_v40  ;;  %v1914_v40 = vsel %vm531_vm3, %v1897_v27, %v1913_v20  ;;  %v1782_v20 = vld [vmem:[#allocation14 + $0x20] sm:$0xff]  ;;  %v1781_v27 = vld [vmem:[#allocation14 + $0x18] sm:$0xff] }
 0xa1d   :  { %v1628_v18 = vmul.f32 %v6344_v49, %v1603_v22  ;;  %v1908_v28 = vperm.slane %v1603_v22, %v7071_v41  ;;  %v1915_v7 = vsel %vm533_vm4, %v1900_v50, %v1914_v40  ;;  %1806 = vmatpush.msrb.mxu2 %v1784_v35  ;;  %v6346_v49 = vld [vmem:[#allocation2 + $0x78] sm:$0xff]  ;;  %v1656_v50 = vrot.slane %v1655_v8, 1 }
 0xa1e   :  { %v1681_v4 = vrot.slane %v1680_v31, 2  ;;  %v1916_v47 = vsel %vm535_vm5, %v1903_v52, %v1915_v7  ;;  %v1674_v52 = vrot.slane %v1673_v0, 1  ;;  %v1639_v7 = vadd.f32 %v1638_v25, %v7752_v46 }
 0xa1f   :  { %v1686_v24 = vsel %vm214_vm0, %v1628_v18, 0.0  ;;  %v1909_v22 = vsel %vm506_vm1, %v1908_v28, %v1907_v14  ;;  %1807 = vmatpush.msrb.mxu2 %v1783_v57 }
 0xa20   :  { %v1687_v53 = vadd.f32 %v1686_v24, %v1685_v29  ;;  %v1917_v29 = vsel %vm537_vm6, %v1906_v42, %v1916_v47  ;;  %v1682_v28 = vadd.f32 %v1681_v4, %v1680_v31  ;;  %v1738_v31 = vmul.f32 %v7706_v48, %v1737_v15 }
 0xa21   :  { %v1918_v24 = vsel %vm539_vm7, %v1909_v22, %v1917_v29  ;;  %1808 = vmatpush.msrb.mxu2 %v1782_v20  ;;  %v1657_v42 = vadd.f32 %v1656_v50, %v1655_v8  ;;  %v1666_v4 = vadd.f32 %v1665_v12, %v1664_v43  ;;  %v1675_v22 = vadd.f32 %v1674_v52, %v1673_v0 }
 0xa22   :  { %v1688_v60 = vrot.slane %v1687_v53, 4  ;;  %v1744_v8 = vand.u32 2147483647, %v7685_v44 }
 0xa23   :  { %1809 = vmatpush.msrb.mxu2 %v1781_v27  ;;  %v1768_v27 = vld [vmem:[#allocation5 + $0x8] sm:$0xff] }
 0xa24   :  { %v1689_v33 = vadd.f32 %v1688_v60, %v1687_v53  ;;  %v1613_v56 = vpop.permute.xlu1 %1612  ;;  %v1647_v53 = vrot.slane %v1646_v9, 1  ;;  %v1779_v60 = vld [vmem:[#allocation14 + $0x8] sm:$0xff]  ;;  %vm1745_vm13 = vcmp.eq.f32.partialorder %v1744_v8, 8.507059e+37  ;;  %v1856_v8 = vld [vmem:[#allocation16 + $0x10] sm:$0xff] }
 0xa25   :  { %v1630_v18 = vmul.f32 %v6346_v49, %v1613_v56  ;;  %v1911_v5 = vperm.slane %v1613_v56, %v7071_v41  ;;  %1810 = vmatpush.msrb.mxu2 %v1780_v17  ;;  %v1739_v56 = vadd.f32 %v7706_v48, %v1738_v31 }
 0xa26   :  { %v1690_v6 = vrot.slane %v1689_v33, 2  ;;  %v1648_v40 = vadd.f32 %v1647_v53, %v1646_v9  ;;  %v1746_v9 = vand.u32 2147483648, %v7685_v44 }
 0xa27   :  { %v1695_v63 = vsel %vm214_vm0, %v1630_v18, 0.0  ;;  %v1912_v23 = vsel %vm506_vm1, %v1911_v5, %v1910_v21  ;;  %v1683_v21 = vrot.slane %v1682_v28, 1  ;;  %1811 = vmatpush.msrb.mxu2 %v1779_v60  ;;  %v1743_v20 = vsel %vm1742_vm12, %v7706_v48, %v1739_v56  ;;  %v1774_v48 = vpop.permute.xlu0 %1773 }
 0xa28   :  { %v1696_v14 = vadd.f32 %v1695_v63, %v1694_v11  ;;  %v1919_v26 = vsel %vm541_vm8, %v1912_v23, %v1918_v24  ;;  %v1691_v38 = vadd.f32 %v1690_v6, %v1689_v33  ;;  %v1758_v54 = vsel %vm529_vm2, %v1648_v40, %v1639_v7  ;;  %v1778_v23 = vld [vmem:[#allocation14] sm:$0xff] }
 0xa29   :  { %v1921_v35 = vsel %vm544_vm9, %v1919_v26, 0.0  ;;  %v1684_v15 = vadd.f32 %v1683_v21, %v1682_v28  ;;  %v1759_v46 = vsel %vm531_vm3, %v1657_v42, %v1758_v54  ;;  %v1747_v29 = vor.u32 1.1754944e-38, %v1746_v9  ;;  %1812 = vmatpush.msrb.mxu2 %v1778_v23  ;;  %v5985_v26 = vld [vmem:[%s9812_s12] ss:$0 sm:$0xff] }
 0xa2a   :  { %v1697_v37 = vrot.slane %v1696_v14, 4  ;;  %1923 = vst [vmem:[#allocation18 + $0x8] sm:$0xff] %v1921_v35  ;;  %v1692_v57 = vrot.slane %v1691_v38, 1  ;;  %v1760_v5 = vsel %vm533_vm4, %v1666_v4, %v1759_v46  ;;  %v1857_v9 = vld [vmem:[#allocation16 + $0x18] sm:$0xff]  ;;  %v1925_v46 = vld [vmem:[#allocation11 + $0x8] sm:$0xff] }
 0xa2b   :  { %v1761_v11 = vsel %vm535_vm5, %v1675_v22, %v1760_v5  ;;  %v1748_v24 = vsel %vm1745_vm13, %v1747_v29, %v1743_v20  ;;  %1879 = vmatpush.msrb.mxu1 %v1857_v9  ;;  %v1924_v5 = vld [vmem:[#allocation11] sm:$0xff]  ;;  %v2491_v29 = vld [vmem:[#allocation13 + $0x10] sm:$0xff] }
 0xa2c   :  { %v1698_v32 = vadd.f32 %v1697_v37, %v1696_v14  ;;  %v1693_v49 = vadd.f32 %v1692_v57, %v1691_v38  ;;  %v1762_v6 = vsel %vm537_vm6, %v1684_v15, %v1761_v11 }
 0xa2d   :  { %1880 = vmatpush.msrb.mxu1 %v1856_v8 }
 0xa2e   :  { %v1699_v33 = vrot.slane %v1698_v32, 2  ;;  %v1763_v0 = vsel %vm539_vm7, %v1693_v49, %v1762_v6  ;;  %v1926_v49 = vld [vmem:[#allocation11 + $0x10] sm:$0xff]  ;;  %v2490_v6 = vld [vmem:[#allocation13 + $0x8] sm:$0xff] }
 0xa30   :  { %v1700_v47 = vadd.f32 %v1699_v33, %v1698_v32 }
 0xa32   :  { %v1701_v18 = vrot.slane %v1700_v47, 1 }
 0xa34   :  { %v1702_v43 = vadd.f32 %v1701_v18, %v1700_v47  ;;  %v1927_v47 = vld [vmem:[#allocation11 + $0x18] sm:$0xff]  ;;  %v1855_v18 = vld [vmem:[#allocation16 + $0x8] sm:$0xff] }
 0xa35   :  { %1944 = vmatpush.msrb.mxu3 %v1927_v47  ;;  %1881 = vmatpush.msrb.mxu1 %v1855_v18 }
 0xa36   :  { %v1764_v44 = vsel %vm541_vm8, %v1702_v43, %v1763_v0  ;;  %v2492_v43 = vld [vmem:[#allocation13 + $0x18] sm:$0xff]  ;;  %v2489_v0 = vld [vmem:[#allocation13] sm:$0xff] }
 0xa37   :  { %v1766_v63 = vmul.f32 %v1764_v44, %v1748_v24  ;;  %1945 = vmatpush.msrb.mxu3 %v1926_v49  ;;  %v5986_v44 = vld [vmem:[%s9814_s14] ss:$0 sm:$0xff] }
 0xa39   :  { %1770 = vrot.lane.b32.xlu2 %v1766_v63, %s6723_s24  ;;  %1946 = vmatpush.msrb.mxu3 %v1925_v46 }
 0xa3b   :  { %1947 = vmatpush.msrb.mxu3 %v1924_v5 }
 0xa93   :  { %v1771_v53 = vpop.permute.xlu2 %1770 }
 0xa94   :  { %v1776_v28 = vsel %vm214_vm0, %v1768_v27, %v1771_v53  ;;  %v5987_v27 = vld [vmem:[%s9807_s7] ss:$0 sm:$0xff] }
 0xa95   :  { %v1777_v14 = vsel %vm987_vm14, %v1776_v28, %v1774_v48 }
 0xa96   :  { %5920 = vmatmul.msk.f32.vlgmr.msrb.gmra.mxu2 %vm1005_vm15, %v1777_v14 }
 0xb19   :  { %v1814_v50 = vpop.f32.mrf.mxu2 }
 0xb1a   :  { %v1815_v38 = vadd.f32 %v5985_v26, %v1814_v50 }
 0xb1c   :  { %6091 = vtanh.f32 %v1815_v38  ;;  %v5921_v17 = vmul.f32 -1.442695, %v1815_v38 }
 0xb1e   :  { %6093 = vpow2.f32 %v5921_v17 }
 0xb22   :  { %v6092_v35 = vpop.eup %6091 }
 0xb23   :  { %1839 = vrot.lane.b32.xlu1 %v6092_v35, %s6722_s5 }
 0xb24   :  { %v6094_v25 = vpop.eup %6093 }
 0xb25   :  { %v1820_v12 = vadd.f32 1.0, %v6094_v25 }
 0xb27   :  { %6095 = vrcp.f32 %v1820_v12  ;;  %v1832_v21 = vand.u32 2147483648, %v1820_v12  ;;  %vm1826_vm11 = vweird.f32 %v1820_v12  ;;  %v1830_v32 = vand.u32 2147483647, %v1820_v12 }
 0xb29   :  { %v1833_v57 = vor.u32 1.1754944e-38, %v1832_v21  ;;  %vm1831_vm13 = vcmp.eq.f32.partialorder %v1830_v32, 8.507059e+37  ;;  %v7841_v21 = vld [vmem:[%s9808_s8] ss:$0 sm:$0xff] }
 0xb2d   :  { %v6096_v37 = vpop.eup %6095 }
 0xb2e   :  { %v1822_v52 = vmul.f32 %v6096_v37, %v1820_v12  ;;  %vm1827_vm10 = vweird.f32 %v6096_v37 }
 0xb2f   :  { %vm1828_vm12 = vmor %vm1826_vm11, %vm1827_vm10 }
 0xb30   :  { %v1823_v31 = vsub.f32 1.0, %v1822_v52 }
 0xb32   :  { %v1824_v60 = vmul.f32 %v6096_v37, %v1823_v31 }
 0xb34   :  { %v1825_v40 = vadd.f32 %v6096_v37, %v1824_v60 }
 0xb36   :  { %v1829_v42 = vsel %vm1828_vm12, %v6096_v37, %v1825_v40 }
 0xb37   :  { %v1834_v4 = vsel %vm1831_vm13, %v1833_v57, %v1829_v42 }
 0xb38   :  { %v1837_v22 = vmul.f32 %v1834_v4, %v7412_v58  ;;  %v1854_v58 = vld [vmem:[#allocation16] sm:$0xff] }
 0xb39   :  { %1882 = vmatpush.msrb.mxu1 %v1854_v58 }
 0xb3b   :  { %2509 = vmatpush.msra.mxu1 %v2492_v43 }
 0xb3d   :  { %2510 = vmatpush.msra.mxu1 %v2491_v29 }
 0xb3f   :  { %2511 = vmatpush.msra.mxu1 %v2490_v6 }
 0xb41   :  { %2512 = vmatpush.msra.mxu1 %v2489_v0 }
 0xb95   :  { %v1840_v7 = vpop.permute.xlu1 %1839 }
 0xb96   :  { %v1842_v33 = vmul.f32 %v1840_v7, %v1834_v4 }
 0xb98   :  { %1844 = vrot.lane.b32.xlu2 %v1842_v33, %s6723_s24 }
 0xbf2   :  { %v1845_v56 = vpop.permute.xlu2 %1844 }
 0xbf3   :  { %v7809_v54 = vadd.f32 %v1845_v56, %v1837_v22 }
 0xbf5   :  { %6097 = vtanh.f32 %v7809_v54 }
 0xbfb   :  { %v6098_v15 = vpop.eup %6097 }
 0xbfc   :  { %1850 = vrot.lane.b32.xlu0 %v6098_v15, %s6722_s5 }
 0xc6e   :  { %v1851_v20 = vpop.permute.xlu0 %1850 }
 0xc6f   :  { %v7813_v11 = vmul.f32 %v1851_v20, %v1834_v4 }
 0xc71   :  { %1863 = vrot.lane.b32.xlu1 %v7813_v11, %s6723_s24 }
 0xce3   :  { %v1864_v24 = vpop.permute.xlu1 %1863 }
 0xce4   :  { %5922 = vmatmul.msk.f32.vlgmr.msrb.gmra.mxu1 %vm214_vm0, %v1864_v24  ;;  %5923 = vmatmul.msk.f32.vlgmr.msrb.gmra.mxu3 %vm214_vm0, %v1864_v24 }
 0xcec   :  { %5924 = vmatmul.msk.f32.vlgmr.msra.gmra.mxu1 %vm214_vm0, %v1864_v24 }
 0xd61   :  { %v1884_v63 = vpop.f32.mrf.mxu1 }
 0xd62   :  { %v1885_v23 = vadd.f32 %v5986_v44, %v1884_v63 }
 0xd64   :  { %1888 = vst [vmem:[#allocation17 + $0x8] sm:$0xff] %v1885_v23 }
 0xd67   :  { %v1949_v53 = vpop.f32.mrf.mxu3 }
 0xd68   :  { %v7826_v48 = vadd.f32 %v5987_v27, %v1949_v53 }
 0xd6a   :  { %v1960_v28 = vperm.slane %v7826_v48, 0  ;;  %v1953_v14 = vrot.slane %v7826_v48, 1  ;;  %v1954_v26 = vrot.slane %v7826_v48, 2  ;;  %v1955_v25 = vrot.slane %v7826_v48, 3 }
 0xd6b   :  { %v1956_v40 = vrot.slane %v7826_v48, 4  ;;  %v1957_v46 = vrot.slane %v7826_v48, 5  ;;  %v1958_v53 = vrot.slane %v7826_v48, 6 }
 0xd6c   :  { %v1977_v50 = vadd.f32 %v1960_v28, %v6946_v36  ;;  %v1976_v38 = vadd.f32 %v1960_v28, %v6936_v30  ;;  %v1961_v35 = vperm.slane %v1953_v14, 0  ;;  %v1962_v17 = vperm.slane %v1954_v26, 0 }
 0xd6d   :  { %v1963_v33 = vperm.slane %v1955_v25, 0  ;;  %v1964_v8 = vperm.slane %v1956_v40, 0  ;;  %v1965_v6 = vperm.slane %v1957_v46, 0  ;;  %v1966_v25 = vperm.slane %v1958_v53, 0 }
 0xd6e   :  { %v1993_v12 = vmax.f32 %v1977_v50, 0.0  ;;  %v1992_v37 = vmax.f32 %v1976_v38, 0.0  ;;  %v1978_v52 = vadd.f32 %v1961_v35, %v6954_v45  ;;  %v1980_v31 = vadd.f32 %v1962_v17, %v6967_v59 }
 0xd6f   :  { %v1979_v60 = vadd.f32 %v1961_v35, %v6960_v51  ;;  %v1981_v7 = vadd.f32 %v1962_v17, %v6973_v1  ;;  %v1983_v58 = vadd.f32 %v1963_v33, %v9851_v62  ;;  %v1982_v20 = vadd.f32 %v1963_v33, %v9850_v61 }
 0xd70   :  { %v2009_v32 = vmul.f32 %v7841_v21, %v1993_v12  ;;  %v2008_v42 = vmul.f32 %v7841_v21, %v1992_v37  ;;  %v1994_v57 = vmax.f32 %v1978_v52, 0.0  ;;  %v1996_v4 = vmax.f32 %v1980_v31, 0.0 }
 0xd71   :  { %v1995_v47 = vmax.f32 %v1979_v60, 0.0  ;;  %v1997_v49 = vmax.f32 %v1981_v7, 0.0  ;;  %v1984_v29 = vadd.f32 %v1964_v8, %v9849_v19  ;;  %v1999_v44 = vmax.f32 %v1983_v58, 0.0 }
 0xd72   :  { %v2027_v22 = vsel %vm214_vm0, %v2009_v32, 0.0  ;;  %v2024_v56 = vsel %vm214_vm0, %v2008_v42, 0.0  ;;  %v2010_v15 = vmul.f32 %v7841_v21, %v1994_v57  ;;  %v2012_v18 = vmul.f32 %v7841_v21, %v1996_v4 }
 0xd73   :  { %2028 = vadd.xlane.f32.xlu0 %v2027_v22  ;;  %2025 = vadd.xlane.f32.xlu2 %v2024_v56  ;;  %v2011_v5 = vmul.f32 %v7841_v21, %v1995_v47  ;;  %v2013_v43 = vmul.f32 %v7841_v21, %v1997_v49  ;;  %v1998_v63 = vmax.f32 %v1982_v20, 0.0  ;;  %v2000_v27 = vmax.f32 %v1984_v29, 0.0 }
 0xd74   :  { %v2030_v9 = vsel %vm214_vm0, %v2010_v15, 0.0  ;;  %v2036_v0 = vsel %vm214_vm0, %v2012_v18, 0.0  ;;  %v2015_v28 = vmul.f32 %v7841_v21, %v1999_v44  ;;  %v1986_v26 = vadd.f32 %v1965_v6, %v9854_v10 }
 0xd75   :  { %2031 = vadd.xlane.f32.xlu1 %v2030_v9  ;;  %v2033_v24 = vsel %vm214_vm0, %v2011_v5, 0.0  ;;  %v2039_v23 = vsel %vm214_vm0, %v2013_v43, 0.0  ;;  %v2014_v14 = vmul.f32 %v7841_v21, %v1998_v63  ;;  %v1985_v50 = vadd.f32 %v1964_v8, %v9853_v55 }
 0xd76   :  { %v2016_v38 = vmul.f32 %v7841_v21, %v2000_v27  ;;  %v1987_v35 = vadd.f32 %v1965_v6, %v9852_v2  ;;  %v1959_v17 = vrot.slane %v7826_v48, 7  ;;  %v2045_v12 = vsel %vm214_vm0, %v2015_v28, 0.0 }
 0xd77   :  { %v2042_v37 = vsel %vm214_vm0, %v2014_v14, 0.0  ;;  %v2002_v52 = vmax.f32 %v1986_v26, 0.0  ;;  %v2001_v31 = vmax.f32 %v1985_v50, 0.0  ;;  %v1989_v48 = vadd.f32 %v1966_v25, %v9857_v16 }
 0xd78   :  { %v2048_v60 = vsel %vm214_vm0, %v2016_v38, 0.0  ;;  %v2003_v40 = vmax.f32 %v1987_v35, 0.0  ;;  %v1967_v32 = vperm.slane %v1959_v17, 0  ;;  %v1988_v7 = vadd.f32 %v1966_v25, %v9856_v13 }
 0xd79   :  { %v2018_v42 = vmul.f32 %v7841_v21, %v2002_v52  ;;  %v2017_v57 = vmul.f32 %v7841_v21, %v2001_v31  ;;  %v2005_v15 = vmax.f32 %v1989_v48, 0.0 }
 0xd7a   :  { %v2019_v4 = vmul.f32 %v7841_v21, %v2003_v40  ;;  %v1990_v33 = vadd.f32 %v1967_v32, %v9855_v34  ;;  %v2004_v47 = vmax.f32 %v1988_v7, 0.0  ;;  %v1991_v18 = vadd.f32 %v1967_v32, %v9858_v3 }
 0xd7b   :  { %2037 = vadd.xlane.f32.xlu0 %v2036_v0  ;;  %2034 = vadd.xlane.f32.xlu2 %v2033_v24  ;;  %v2054_v22 = vsel %vm214_vm0, %v2018_v42, 0.0  ;;  %v2051_v56 = vsel %vm214_vm0, %v2017_v57, 0.0  ;;  %v2021_v8 = vmul.f32 %v7841_v21, %v2005_v15 }
 0xd7c   :  { %v2057_v9 = vsel %vm214_vm0, %v2019_v4, 0.0  ;;  %v2006_v49 = vmax.f32 %v1990_v33, 0.0  ;;  %v2020_v46 = vmul.f32 %v7841_v21, %v2004_v47  ;;  %v2007_v43 = vmax.f32 %v1991_v18, 0.0 }
 0xd7d   :  { %2040 = vadd.xlane.f32.xlu1 %v2039_v23  ;;  %v2063_v58 = vsel %vm214_vm0, %v2021_v8, 0.0 }
 0xd7e   :  { %v2022_v5 = vmul.f32 %v7841_v21, %v2006_v49  ;;  %v2060_v20 = vsel %vm214_vm0, %v2020_v46, 0.0  ;;  %v2023_v6 = vmul.f32 %v7841_v21, %v2007_v43 }
 0xd80   :  { %v2066_v29 = vsel %vm214_vm0, %v2022_v5, 0.0  ;;  %v2069_v0 = vsel %vm214_vm0, %v2023_v6, 0.0 }
 0xd83   :  { %2046 = vadd.xlane.f32.xlu0 %v2045_v12  ;;  %2043 = vadd.xlane.f32.xlu2 %v2042_v37 }
 0xd85   :  { %2049 = vadd.xlane.f32.xlu1 %v2048_v60 }
 0xd8b   :  { %2055 = vadd.xlane.f32.xlu0 %v2054_v22  ;;  %2052 = vadd.xlane.f32.xlu2 %v2051_v56 }
 0xd8d   :  { %2058 = vadd.xlane.f32.xlu1 %v2057_v9 }
 0xd93   :  { %2064 = vadd.xlane.f32.xlu0 %v2063_v58  ;;  %2061 = vadd.xlane.f32.xlu2 %v2060_v20 }
 0xd95   :  { %2067 = vadd.xlane.f32.xlu1 %v2066_v29 }
 0xd9b   :  { %2070 = vadd.xlane.f32.xlu2 %v2069_v0 }
 0xde6   :  { %v2029_v24 = vpop.xlane.xlu0 %2028  ;;  %v2026_v44 = vpop.xlane.xlu2 %2025 }
 0xde7   :  { %v2089_v17 = vperm.slane %v2029_v24, %v7071_v41  ;;  %v2088_v25 = vperm.slane %v2026_v44, %v7066_v39 }
 0xde8   :  { %v2032_v63 = vpop.xlane.xlu1 %2031 }
 0xde9   :  { %v2091_v12 = vperm.slane %v2032_v63, %v7066_v39  ;;  %v2090_v57 = vsel %vm506_vm1, %v2089_v17, %v2088_v25 }
 0xdee   :  { %v2038_v23 = vpop.xlane.xlu0 %2037  ;;  %v2035_v27 = vpop.xlane.xlu2 %2034 }
 0xdef   :  { %v2092_v21 = vperm.slane %v2035_v27, %v7071_v41  ;;  %v2094_v40 = vperm.slane %v2038_v23, %v7066_v39 }
 0xdf0   :  { %v2041_v53 = vpop.xlane.xlu1 %2040 }
 0xdf1   :  { %v2095_v37 = vperm.slane %v2041_v53, %v7071_v41  ;;  %v2093_v52 = vsel %vm506_vm1, %v2092_v21, %v2091_v12 }
 0xdf2   :  { %v2112_v7 = vsel %vm529_vm2, %v2093_v52, %v2090_v57 }
 0xdf3   :  { %v2096_v4 = vsel %vm506_vm1, %v2095_v37, %v2094_v40 }
 0xdf4   :  { %v2113_v49 = vsel %vm531_vm3, %v2096_v4, %v2112_v7 }
 0xdf6   :  { %v7889_v28 = vpop.xlane.xlu0 %2046  ;;  %v7891_v14 = vpop.xlane.xlu2 %2043 }
 0xdf7   :  { %v2098_v31 = vperm.slane %v7889_v28, %v7071_v41  ;;  %v2097_v60 = vperm.slane %v7891_v14, %v7066_v39 }
 0xdf8   :  { %v7893_v26 = vpop.xlane.xlu1 %2049 }
 0xdf9   :  { %v2100_v33 = vperm.slane %v7893_v26, %v7066_v39  ;;  %v2099_v22 = vsel %vm506_vm1, %v2098_v31, %v2097_v60 }
 0xdfa   :  { %v2114_v46 = vsel %vm533_vm4, %v2099_v22, %v2113_v49 }
 0xdfe   :  { %v7895_v50 = vpop.xlane.xlu0 %2055  ;;  %v7897_v38 = vpop.xlane.xlu2 %2052 }
 0xdff   :  { %v2101_v32 = vperm.slane %v7897_v38, %v7071_v41  ;;  %v2103_v8 = vperm.slane %v7895_v50, %v7066_v39 }
 0xe00   :  { %v7900_v35 = vpop.xlane.xlu1 %2058 }
 0xe01   :  { %v2104_v56 = vperm.slane %v7900_v35, %v7071_v41  ;;  %v2102_v15 = vsel %vm506_vm1, %v2101_v32, %v2100_v33 }
 0xe02   :  { %v2115_v58 = vsel %vm535_vm5, %v2102_v15, %v2114_v46 }
 0xe03   :  { %v2105_v5 = vsel %vm506_vm1, %v2104_v56, %v2103_v8 }
 0xe04   :  { %v2116_v0 = vsel %vm537_vm6, %v2105_v5, %v2115_v58 }
 0xe06   :  { %v7914_v42 = vpop.xlane.xlu2 %2061  ;;  %v7917_v48 = vpop.xlane.xlu0 %2064 }
 0xe07   :  { %v2107_v47 = vperm.slane %v7917_v48, %v7071_v41  ;;  %v2106_v9 = vperm.slane %v7914_v42, %v7066_v39 }
 0xe08   :  { %v7935_v18 = vpop.xlane.xlu1 %2067 }
 0xe09   :  { %v2108_v43 = vsel %vm506_vm1, %v2107_v47, %v2106_v9  ;;  %v2109_v29 = vperm.slane %v7935_v18, %v7066_v39 }
 0xe0a   :  { %v2117_v17 = vsel %vm539_vm7, %v2108_v43, %v2116_v0 }
 0xe0e   :  { %v7939_v20 = vpop.xlane.xlu2 %2070 }
 0xe0f   :  { %v2110_v6 = vperm.slane %v7939_v20, %v7071_v41 }
 0xe11   :  { %v2111_v21 = vsel %vm506_vm1, %v2110_v6, %v2109_v29 }
 0xe12   :  { %v2118_v25 = vsel %vm541_vm8, %v2111_v21, %v2117_v17 }
 0xe13   :  { %v2120_v12 = vsel %vm544_vm9, %v2118_v25, -inf }
 0xe14   :  { %2121 = vmax.xlane.f32.xlu0 %v2120_v12 }
 0xe87   :  { %v7951_v37 = vpop.xlane.xlu0 %2121 }
 0xe88   :  { %v2125_v52 = vperm.slane %v7951_v37, 1  ;;  %v2124_v31 = vperm.slane %v7951_v37, 0  ;;  %v2126_v57 = vperm.slane %v7951_v37, 2  ;;  %v2127_v9 = vperm.slane %v7951_v37, 3 }
 0xe89   :  { %v2128_v49 = vperm.slane %v7951_v37, 4  ;;  %v2129_v58 = vperm.slane %v7951_v37, 5  ;;  %v2130_v25 = vperm.slane %v7951_v37, 6  ;;  %v2131_v12 = vperm.slane %v7951_v37, 7 }
 0xe8a   :  { %v2142_v60 = vsub.f32 %v2032_v63, %v2125_v52  ;;  %v2141_v40 = vsub.f32 %v2029_v24, %v2124_v31  ;;  %v2140_v32 = vsub.f32 %v2026_v44, %v2124_v31  ;;  %v2143_v22 = vsub.f32 %v2035_v27, %v2125_v52 }
 0xe8b   :  { %v2145_v56 = vsub.f32 %v2041_v53, %v2126_v57  ;;  %v2144_v15 = vsub.f32 %v2038_v23, %v2126_v57  ;;  %v2146_v23 = vsub.f32 %v7891_v14, %v2127_v9  ;;  %v2148_v27 = vsub.f32 %v7893_v26, %v2128_v49 }
 0xe8c   :  { %v2160_v7 = vmul.f32 1.442695, %v2142_v60  ;;  %v2158_v4 = vmul.f32 1.442695, %v2141_v40  ;;  %v2156_v33 = vmul.f32 1.442695, %v2140_v32  ;;  %v2147_v53 = vsub.f32 %v7889_v28, %v2127_v9 }
 0xe8d   :  { %v2162_v47 = vmul.f32 1.442695, %v2143_v22  ;;  %v2166_v8 = vmul.f32 1.442695, %v2145_v56  ;;  %v2164_v24 = vmul.f32 1.442695, %v2144_v15  ;;  %v2149_v26 = vsub.f32 %v7897_v38, %v2128_v49 }
 0xe8e   :  { %6099 = vpow2.f32 %v2160_v7  ;;  %v2168_v5 = vmul.f32 1.442695, %v2146_v23  ;;  %v2172_v43 = vmul.f32 1.442695, %v2148_v27  ;;  %v2170_v6 = vmul.f32 1.442695, %v2147_v53 }
 0xe8f   :  { %6101 = vpow2.f32 %v2158_v4  ;;  %v2151_v28 = vsub.f32 %v7900_v35, %v2129_v58  ;;  %v2150_v21 = vsub.f32 %v7895_v50, %v2129_v58  ;;  %v2174_v17 = vmul.f32 1.442695, %v2149_v26 }
 0xe90   :  { %6103 = vpow2.f32 %v2156_v33  ;;  %v2152_v50 = vsub.f32 %v7914_v42, %v2130_v25  ;;  %v2154_v35 = vsub.f32 %v7935_v18, %v2131_v12  ;;  %v2153_v37 = vsub.f32 %v7917_v48, %v2130_v25 }
 0xe91   :  { %6105 = vpow2.f32 %v2162_v47  ;;  %v2178_v52 = vmul.f32 1.442695, %v2151_v28  ;;  %v2176_v60 = vmul.f32 1.442695, %v2150_v21  ;;  %v2155_v42 = vsub.f32 %v7939_v20, %v2131_v12 }
 0xe92   :  { %6107 = vpow2.f32 %v2166_v8  ;;  %v2180_v32 = vmul.f32 1.442695, %v2152_v50  ;;  %v2184_v57 = vmul.f32 1.442695, %v2154_v35  ;;  %v2182_v4 = vmul.f32 1.442695, %v2153_v37 }
 0xe93   :  { %6109 = vpow2.f32 %v2164_v24  ;;  %v2186_v48 = vmul.f32 1.442695, %v2155_v42 }
 0xe94   :  { %v7958_v63 = vpop.eup %6099  ;;  %6111 = vpow2.f32 %v2168_v5 }
 0xe95   :  { %v7960_v44 = vpop.eup %6101  ;;  %2211 = vperm.xlu0 %5975, %v7958_v63   ;;  %6113 = vpow2.f32 %v2172_v43 }
 0xe96   :  { %v7963_v46 = vpop.eup %6103  ;;  %2208 = vperm.xlu2 %5974, %v7960_v44   ;;  %6115 = vpow2.f32 %v2170_v6 }
 0xe97   :  { %2205 = vperm.xlu1 %5976, %v7963_v46   ;;  %v7971_v29 = vpop.eup %6105  ;;  %6117 = vpow2.f32 %v2174_v17 }
 0xe98   :  { %v7973_v0 = vpop.eup %6107  ;;  %6119 = vpow2.f32 %v2178_v52 }
 0xe99   :  { %v7976_v14 = vpop.eup %6109  ;;  %6121 = vpow2.f32 %v2176_v60 }
 0xe9a   :  { %v7985_v31 = vpop.eup %6111  ;;  %6123 = vpow2.f32 %v2180_v32 }
 0xe9b   :  { %v7987_v40 = vpop.eup %6113  ;;  %6125 = vpow2.f32 %v2184_v57 }
 0xe9c   :  { %v7990_v38 = vpop.eup %6115  ;;  %6127 = vpow2.f32 %v2182_v4 }
 0xe9d   :  { %2214 = vperm.xlu0 %5975, %v7971_v29   ;;  %v7997_v7 = vpop.eup %6117  ;;  %6129 = vpow2.f32 %v2186_v48 }
 0xe9e   :  { %2220 = vperm.xlu2 %5974, %v7973_v0   ;;  %v7999_v33 = vpop.eup %6119 }
 0xe9f   :  { %2217 = vperm.xlu1 %5976, %v7976_v14   ;;  %v8002_v22 = vpop.eup %6121 }
 0xea0   :  { %v8007_v18 = vpop.eup %6123 }
 0xea1   :  { %v8009_v56 = vpop.eup %6125 }
 0xea2   :  { %v8012_v15 = vpop.eup %6127 }
 0xea3   :  { %v8016_v47 = vpop.eup %6129 }
 0xea5   :  { %2223 = vperm.xlu0 %5975, %v7985_v31  }
 0xea6   :  { %2229 = vperm.xlu2 %5974, %v7987_v40  }
 0xea7   :  { %2226 = vperm.xlu1 %5976, %v7990_v38  }
 0xead   :  { %2232 = vperm.xlu0 %5975, %v7997_v7  }
 0xeae   :  { %2238 = vperm.xlu2 %5974, %v7999_v33  }
 0xeaf   :  { %2235 = vperm.xlu1 %5976, %v8002_v22  }
 0xeb5   :  { %2241 = vperm.xlu0 %5975, %v8007_v18  }
 0xeb6   :  { %2247 = vperm.xlu2 %5974, %v8009_v56  }
 0xeb7   :  { %2244 = vperm.xlu1 %5976, %v8012_v15  }
 0xebd   :  { %2250 = vperm.xlu0 %5975, %v8016_v47  }
 0xef0   :  { %v2209_v20 = vpop.permute.xlu2 %2208 }
 0xef1   :  { %v2253_v25 = vperm.slane %v2209_v20, %v7071_v41 }
 0xef8   :  { %v2221_v8 = vpop.permute.xlu2 %2220 }
 0xef9   :  { %v2259_v50 = vperm.slane %v2221_v8, %v7071_v41 }
 0xf00   :  { %v2230_v53 = vpop.permute.xlu2 %2229 }
 0xf01   :  { %v2264_v57 = vperm.slane %v2230_v53, %v7066_v39 }
 0xf07   :  { %v2212_v9 = vpop.permute.xlu0 %2211 }
 0xf08   :  { %v2239_v26 = vpop.permute.xlu2 %2238  ;;  %v2255_v28 = vperm.slane %v2212_v9, %v7066_v39 }
 0xf09   :  { %v2206_v49 = vpop.permute.xlu1 %2205 }
 0xf0a   :  { %v2252_v21 = vperm.slane %v2206_v49, %v7066_v39 }
 0xf0c   :  { %v2254_v32 = vsel %vm506_vm1, %v2253_v25, %v2252_v21 }
 0xf0f   :  { %v2215_v24 = vpop.permute.xlu0 %2214 }
 0xf10   :  { %v2256_v6 = vperm.slane %v2215_v24, %v7071_v41  ;;  %v2248_v53 = vpop.permute.xlu2 %2247 }
 0xf11   :  { %v2218_v23 = vpop.permute.xlu1 %2217  ;;  %v2273_v21 = vperm.slane %v2248_v53, %v7066_v39 }
 0xf12   :  { %v2258_v17 = vperm.slane %v2218_v23, %v7066_v39  ;;  %v2257_v12 = vsel %vm506_vm1, %v2256_v6, %v2255_v28  ;;  %v2268_v23 = vperm.slane %v2239_v26, %v7071_v41 }
 0xf13   :  { %v2276_v4 = vsel %vm529_vm2, %v2257_v12, %v2254_v32 }
 0xf14   :  { %v2260_v42 = vsel %vm506_vm1, %v2259_v50, %v2258_v17 }
 0xf17   :  { %v2224_v27 = vpop.permute.xlu0 %2223 }
 0xf18   :  { %v2261_v52 = vperm.slane %v2224_v27, %v7066_v39  ;;  %v2277_v27 = vsel %vm531_vm3, %v2260_v42, %v2276_v4 }
 0xf19   :  { %v2227_v5 = vpop.permute.xlu1 %2226 }
 0xf1a   :  { %v2262_v60 = vperm.slane %v2227_v5, %v7071_v41 }
 0xf1c   :  { %v2263_v20 = vsel %vm506_vm1, %v2262_v60, %v2261_v52 }
 0xf1d   :  { %v2278_v5 = vsel %vm533_vm4, %v2263_v20, %v2277_v27 }
 0xf1f   :  { %v2233_v58 = vpop.permute.xlu0 %2232 }
 0xf20   :  { %v2265_v35 = vperm.slane %v2233_v58, %v7071_v41 }
 0xf21   :  { %v2236_v43 = vpop.permute.xlu1 %2235 }
 0xf22   :  { %v2267_v9 = vperm.slane %v2236_v43, %v7066_v39  ;;  %v2266_v49 = vsel %vm506_vm1, %v2265_v35, %v2264_v57 }
 0xf23   :  { %v2279_v6 = vsel %vm535_vm5, %v2266_v49, %v2278_v5  ;;  %v2514_v5 = vpop.f32.mrf.mxu1 }
 0xf24   :  { %v2269_v58 = vsel %vm506_vm1, %v2268_v23, %v2267_v9 }
 0xf25   :  { %v2280_v25 = vsel %vm537_vm6, %v2269_v58, %v2279_v6 }
 0xf27   :  { %v2242_v37 = vpop.permute.xlu0 %2241 }
 0xf28   :  { %v2270_v8 = vperm.slane %v2242_v37, %v7066_v39 }
 0xf29   :  { %v2245_v48 = vpop.permute.xlu1 %2244 }
 0xf2a   :  { %v2271_v24 = vperm.slane %v2245_v48, %v7071_v41 }
 0xf2c   :  { %v2272_v43 = vsel %vm506_vm1, %v2271_v24, %v2270_v8 }
 0xf2d   :  { %v2281_v12 = vsel %vm539_vm7, %v2272_v43, %v2280_v25  ;;  %v6348_v25 = vld [vmem:[#allocation2 + $0x18] sm:$0xff] }
 0xf2f   :  { %v2251_v28 = vpop.permute.xlu0 %2250 }
 0xf30   :  { %v2274_v17 = vperm.slane %v2251_v28, %v7071_v41 }
 0xf32   :  { %v2275_v26 = vsel %vm506_vm1, %v2274_v17, %v2273_v21 }
 0xf33   :  { %v2282_v52 = vsel %vm541_vm8, %v2275_v26, %v2281_v12  ;;  %v6349_v12 = vld [vmem:[#allocation2 + $0x8] sm:$0xff] }
 0xf34   :  { %v2284_v60 = vsel %vm544_vm9, %v2282_v52, 0.0 }
 0xf35   :  { %2285 = vadd.xlane.f32.xlu1 %v2284_v60  ;;  %v6350_v60 = vld [vmem:[#allocation2 + $0x10] sm:$0xff] }
 0xfa8   :  { %v2286_v50 = vpop.xlane.xlu1 %2285 }
 0xfa9   :  { %6131 = vrcp.f32 %v2286_v50 }
 0xfaf   :  { %v6132_v35 = vpop.eup %6131 }
 0xfb0   :  { %v2294_v37 = vperm.slane %v6132_v35, 5  ;;  %v2289_v32 = vperm.slane %v6132_v35, 0  ;;  %v2290_v48 = vperm.slane %v6132_v35, 1  ;;  %v2291_v49 = vperm.slane %v6132_v35, 2 }
 0xfb1   :  { %v2293_v23 = vperm.slane %v6132_v35, 4  ;;  %v2295_v27 = vperm.slane %v6132_v35, 6  ;;  %v2296_v53 = vperm.slane %v6132_v35, 7 }
 0xfb2   :  { %v2316_v57 = vmul.f32 %v7999_v33, %v2294_v37  ;;  %v2306_v4 = vmul.f32 %v7960_v44, %v2289_v32  ;;  %v2305_v42 = vmul.f32 %v7963_v46, %v2289_v32  ;;  %v2308_v20 = vmul.f32 %v7971_v29, %v2290_v48  ;;  %v6352_v32 = vld [vmem:[#allocation2 + $0x28] sm:$0xff] }
 0xfb3   :  { %v2307_v9 = vmul.f32 %v7958_v63, %v2290_v48  ;;  %v2310_v8 = vmul.f32 %v7973_v0, %v2291_v49  ;;  %v2309_v24 = vmul.f32 %v7976_v14, %v2291_v49  ;;  %v2292_v44 = vperm.slane %v6132_v35, 3  ;;  %v6351_v35 = vld [vmem:[#allocation2] sm:$0xff] }
 0xfb4   :  { %2378 = vperm.xlu1 %5976, %v2316_v57   ;;  %2328 = vperm.xlu0 %5975, %v2306_v4   ;;  %v2314_v29 = vmul.f32 %v7997_v7, %v2293_v23  ;;  %v2313_v63 = vmul.f32 %v7987_v40, %v2293_v23  ;;  %v2317_v0 = vmul.f32 %v8007_v18, %v2295_v27  ;;  %v6355_v23 = vld [vmem:[#allocation2 + $0x30] sm:$0xff] }
 0xfb5   :  { %2323 = vperm.xlu2 %5974, %v2305_v42   ;;  %v2312_v46 = vmul.f32 %v7990_v38, %v2292_v44  ;;  %v2311_v33 = vmul.f32 %v7985_v31, %v2292_v44  ;;  %v2315_v14 = vmul.f32 %v8002_v22, %v2294_v37  ;;  %v2319_v38 = vmul.f32 %v8009_v56, %v2296_v53  ;;  %v5988_v56 = vld [vmem:[%s9810_s10] ss:$0 sm:$0xff] }
 0xfb6   :  { %v2318_v31 = vmul.f32 %v8012_v15, %v2295_v27  ;;  %v2320_v7 = vmul.f32 %v8016_v47, %v2296_v53  ;;  %v2515_v15 = vadd.f32 %v5988_v56, %v2514_v5  ;;  %v6356_v56 = vld [vmem:[#allocation2 + $0x50] sm:$0xff] }
 0xfb8   :  { %v5925_v6 = vmul.f32 -1.442695, %v2515_v15 }
 0xfba   :  { %6133 = vpow2.f32 %v5925_v6 }
 0xfbc   :  { %2338 = vperm.xlu0 %5975, %v2308_v20   ;;  %v6353_v20 = vld [vmem:[#allocation2 + $0x20] sm:$0xff] }
 0xfbd   :  { %2333 = vperm.xlu2 %5974, %v2307_v9  }
 0xfc4   :  { %2348 = vperm.xlu0 %5975, %v2310_v8   ;;  %v6354_v8 = vld [vmem:[#allocation2 + $0x38] sm:$0xff] }
 0xfc5   :  { %2343 = vperm.xlu2 %5974, %v2309_v24  }
 0xfcc   :  { %2358 = vperm.xlu0 %5975, %v2312_v46  }
 0xfcd   :  { %2353 = vperm.xlu2 %5974, %v2311_v33  }
 0xfd4   :  { %2368 = vperm.xlu0 %5975, %v2314_v29  }
 0xfd5   :  { %2363 = vperm.xlu2 %5974, %v2313_v63  }
 0xfdc   :  { %2383 = vperm.xlu0 %5975, %v2317_v0  }
 0xfdd   :  { %2373 = vperm.xlu2 %5974, %v2315_v14  }
 0xfe4   :  { %2393 = vperm.xlu0 %5975, %v2319_v38  }
 0xfe5   :  { %2388 = vperm.xlu2 %5974, %v2318_v31  }
 0xfed   :  { %2398 = vperm.xlu2 %5974, %v2320_v7  }
 0xff5   :  { %2559 = vrot.lane.b32.xlu2 %v7813_v11, %s6724_s11  ;;  %v6134_v11 = vpop.eup %6133 }
 0xff6   :  { %v8088_v17 = vadd.f32 1.0, %v6134_v11  ;;  %v6357_v11 = vld [vmem:[#allocation2 + $0x40] sm:$0xff] }
 0xff8   :  { %6135 = vrcp.f32 %v8088_v17  ;;  %vm2526_vm11 = vweird.f32 %v8088_v17 }
 0xffe   :  { %v8105_v46 = vpop.eup %6135 }
 0xfff   :  { %v8116_v31 = vmul.f32 %v8105_v46, %v8088_v17  ;;  %vm2527_vm10 = vweird.f32 %v8105_v46 }
0x1000   :  { %vm2528_vm12 = vmor %vm2526_vm11, %vm2527_vm10 }
0x100f   :  { %v8069_v40 = vpop.permute.xlu2 %2323 }
0x1010   :  { %v2401_v37 = vmul.f32 %v6351_v35, %v8069_v40  ;;  %v6359_v35 = vld [vmem:[#allocation2 + $0x48] sm:$0xff] }
0x1012   :  { %v2417_v33 = vsel %vm214_vm0, %v2401_v37, 0.0 }
0x1017   :  { %v8071_v18 = vpop.permute.xlu2 %2333 }
0x1018   :  { %v2403_v50 = vmul.f32 %v6350_v60, %v8071_v18 }
0x101a   :  { %v2426_v44 = vsel %vm214_vm0, %v2403_v50, 0.0 }
0x101f   :  { %v8073_v22 = vpop.permute.xlu2 %2343 }
0x1020   :  { %v2405_v9 = vmul.f32 %v6353_v20, %v8073_v22 }
0x1022   :  { %v2435_v14 = vsel %vm214_vm0, %v2405_v9, 0.0 }
0x1026   :  { %v8078_v58 = vpop.permute.xlu0 %2328  ;;  %v8111_v53 = vpop.permute.xlu1 %2378 }
0x1027   :  { %v8080_v47 = vpop.permute.xlu2 %2353  ;;  %v2402_v52 = vmul.f32 %v6349_v12, %v8078_v58 }
0x1028   :  { %v2407_v29 = vmul.f32 %v6355_v23, %v8080_v47 }
0x1029   :  { %v2418_v49 = vsel %vm214_vm0, %v2402_v52, 0.0 }
0x102a   :  { %v2419_v0 = vadd.f32 %v2418_v49, %v2417_v33  ;;  %v2444_v15 = vsel %vm214_vm0, %v2407_v29, 0.0 }
0x102c   :  { %v2420_v52 = vrot.slane %v2419_v0, 4 }
0x102e   :  { %v8082_v28 = vpop.permute.xlu0 %2338  ;;  %v2421_v23 = vadd.f32 %v2420_v52, %v2419_v0 }
0x102f   :  { %v8084_v43 = vpop.permute.xlu2 %2363  ;;  %v2404_v26 = vmul.f32 %v6348_v25, %v8082_v28 }
0x1030   :  { %v2409_v25 = vmul.f32 %v6357_v11, %v8084_v43 }
0x1031   :  { %v2427_v4 = vsel %vm214_vm0, %v2404_v26, 0.0  ;;  %v6358_v26 = vld [vmem:[#allocation2 + $0x58] sm:$0xff] }
0x1032   :  { %v2428_v63 = vadd.f32 %v2427_v4, %v2426_v44  ;;  %v2412_v12 = vmul.f32 %v6358_v26, %v8111_v53  ;;  %v2573_v26 = vld [vmem:[#allocation14 + $0x48] sm:$0xff] }
0x1034   :  { %v2429_v6 = vrot.slane %v2428_v63, 4  ;;  %v2463_v33 = vsel %vm214_vm0, %v2412_v12, 0.0  ;;  %v2422_v12 = vrot.slane %v2421_v23, 2 }
0x1036   :  { %v8086_v21 = vpop.permute.xlu0 %2348  ;;  %v2430_v49 = vadd.f32 %v2429_v6, %v2428_v63  ;;  %v2681_v63 = vperm.slane %v8073_v22, %v7066_v39 }
0x1037   :  { %v2406_v57 = vmul.f32 %v6352_v32, %v8086_v21  ;;  %v8097_v42 = vpop.permute.xlu2 %2373  ;;  %v2523_v32 = vsub.f32 1.0, %v8116_v31  ;;  %v2682_v0 = vperm.slane %v8086_v21, %v7071_v41  ;;  %v2687_v21 = vperm.slane %v8084_v43, %v7066_v39 }
0x1038   :  { %v2411_v5 = vmul.f32 %v6356_v56, %v8097_v42  ;;  %v2574_v56 = vld [vmem:[#allocation14 + $0x50] sm:$0xff]  ;;  %v2431_v11 = vrot.slane %v2430_v49, 2 }
0x1039   :  { %v2436_v27 = vsel %vm214_vm0, %v2406_v57, 0.0  ;;  %v2676_v57 = vperm.slane %v8078_v58, %v7071_v41  ;;  %v2675_v58 = vperm.slane %v8069_v40, %v7066_v39 }
0x103a   :  { %v2437_v7 = vadd.f32 %v2436_v27, %v2435_v14  ;;  %v2462_v20 = vsel %vm214_vm0, %v2411_v5, 0.0  ;;  %v2678_v14 = vperm.slane %v8071_v18, %v7066_v39  ;;  %v2684_v5 = vperm.slane %v8080_v47, %v7066_v39 }
0x103b   :  { %v2677_v52 = vsel %vm506_vm1, %v2676_v57, %v2675_v58 }
0x103c   :  { %v2438_v4 = vrot.slane %v2437_v7, 4 }
0x103e   :  { %v8099_v48 = vpop.permute.xlu0 %2358 }
0x103f   :  { %v2408_v24 = vmul.f32 %v6354_v8, %v8099_v48  ;;  %v8126_v9 = vpop.permute.xlu2 %2388  ;;  %v2679_v8 = vperm.slane %v8082_v28, %v7071_v41  ;;  %v2575_v28 = vld [vmem:[#allocation14 + $0x58] sm:$0xff]  ;;  %v2685_v18 = vperm.slane %v8099_v48, %v7071_v41  ;;  %v2572_v48 = vld [vmem:[#allocation14 + $0x40] sm:$0xff] }
0x1040   :  { %2587 = vmatpush.msra.mxu3 %v2575_v28 }
0x1041   :  { %v2445_v38 = vsel %vm214_vm0, %v2408_v24, 0.0  ;;  %v2453_v24 = vsel %vm214_vm0, %v2409_v25, 0.0  ;;  %v2680_v40 = vsel %vm506_vm1, %v2679_v8, %v2678_v14  ;;  %v6360_v25 = vld [vmem:[#allocation2 + $0x68] sm:$0xff]  ;;  %v2686_v57 = vsel %vm506_vm1, %v2685_v18, %v2684_v5 }
0x1042   :  { %v2446_v60 = vadd.f32 %v2445_v38, %v2444_v15  ;;  %v2464_v38 = vadd.f32 %v2463_v33, %v2462_v20  ;;  %v2439_v15 = vadd.f32 %v2438_v4, %v2437_v7  ;;  %v2414_v22 = vmul.f32 %v6360_v25, %v8126_v9  ;;  %2588 = vmatpush.msra.mxu3 %v2574_v56  ;;  %v6361_v20 = vld [vmem:[#allocation2 + $0x60] sm:$0xff] }
0x1043   :  { %v2683_v33 = vsel %vm506_vm1, %v2682_v0, %v2681_v63  ;;  %v2570_v0 = vld [vmem:[#allocation14 + $0x30] sm:$0xff]  ;;  %v2694_v18 = vperm.slane %v8126_v9, %v7071_v41 }
0x1044   :  { %v2447_v29 = vrot.slane %v2446_v60, 4  ;;  %2589 = vmatpush.msra.mxu3 %v2573_v26 }
0x1046   :  { %v2369_v50 = vpop.permute.xlu0 %2368  ;;  %v2448_v47 = vadd.f32 %v2447_v29, %v2446_v60  ;;  %v2690_v60 = vperm.slane %v8097_v42, %v7066_v39  ;;  %v2472_v29 = vsel %vm214_vm0, %v2414_v22, 0.0  ;;  %2590 = vmatpush.msra.mxu3 %v2572_v48  ;;  %v2691_v42 = vperm.slane %v8111_v53, %v7071_v41  ;;  %v6363_v48 = vld [vmem:[#allocation2 + $0x70] sm:$0xff] }
0x1047   :  { %v2410_v37 = vmul.f32 %v6359_v35, %v2369_v50  ;;  %v2688_v7 = vperm.slane %v2369_v50, %v7071_v41  ;;  %v2432_v50 = vadd.f32 %v2431_v11, %v2430_v49  ;;  %v2399_v28 = vpop.permute.xlu2 %2398  ;;  %v2423_v22 = vadd.f32 %v2422_v12, %v2421_v23  ;;  %v2568_v12 = vld [vmem:[#allocation14 + $0x20] sm:$0xff] }
0x1048   :  { %v2449_v58 = vrot.slane %v2448_v47, 2  ;;  %v2692_v26 = vsel %vm506_vm1, %v2691_v42, %v2690_v60  ;;  %v2697_v9 = vperm.slane %v2399_v28, %v7071_v41 }
0x1049   :  { %v2454_v44 = vsel %vm214_vm0, %v2410_v37, 0.0  ;;  %v2465_v37 = vrot.slane %v2464_v38, 4  ;;  %v2689_v14 = vsel %vm506_vm1, %v2688_v7, %v2687_v21  ;;  %v6362_v7 = vld [vmem:[#allocation2 + $0x78] sm:$0xff]  ;;  %v2433_v21 = vrot.slane %v2432_v50, 1 }
0x104a   :  { %v2455_v27 = vadd.f32 %v2454_v44, %v2453_v24  ;;  %v2699_v24 = vsel %vm529_vm2, %v2680_v40, %v2677_v52  ;;  %v2440_v44 = vrot.slane %v2439_v15, 2  ;;  %v2416_v53 = vmul.f32 %v6362_v7, %v2399_v28 }
0x104b   :  { %v2700_v49 = vsel %vm531_vm3, %v2683_v33, %v2699_v24  ;;  %v2466_v63 = vadd.f32 %v2465_v37, %v2464_v38  ;;  %v2450_v38 = vadd.f32 %v2449_v58, %v2448_v47  ;;  %v2424_v58 = vrot.slane %v2423_v22, 1 }
0x104c   :  { %v2456_v6 = vrot.slane %v2455_v27, 4  ;;  %v2441_v11 = vadd.f32 %v2440_v44, %v2439_v15  ;;  %v2701_v40 = vsel %vm533_vm4, %v2686_v57, %v2700_v49  ;;  %v2481_v47 = vsel %vm214_vm0, %v2416_v53, 0.0 }
0x104d   :  { %v2702_v52 = vsel %vm535_vm5, %v2689_v14, %v2701_v40  ;;  %v2467_v33 = vrot.slane %v2466_v63, 2  ;;  %v2451_v14 = vrot.slane %v2450_v38, 1  ;;  %v2425_v7 = vadd.f32 %v2424_v58, %v2423_v22 }
0x104e   :  { %v2384_v35 = vpop.permute.xlu0 %2383  ;;  %v2457_v4 = vadd.f32 %v2456_v6, %v2455_v27  ;;  %v2571_v27 = vld [vmem:[#allocation14 + $0x38] sm:$0xff]  ;;  %v2442_v44 = vrot.slane %v2441_v11, 1  ;;  %v2703_v57 = vsel %vm537_vm6, %v2692_v26, %v2702_v52  ;;  %v2524_v26 = vmul.f32 %v8105_v46, %v2523_v32  ;;  %v2565_v52 = vld [vmem:[#allocation14 + $0x8] sm:$0xff] }
0x104f   :  { %v2413_v8 = vmul.f32 %v6361_v20, %v2384_v35  ;;  %v2693_v6 = vperm.slane %v2384_v35, %v7066_v39  ;;  %2591 = vmatpush.msra.mxu3 %v2571_v27  ;;  %v2569_v35 = vld [vmem:[#allocation14 + $0x28] sm:$0xff]  ;;  %v2567_v27 = vld [vmem:[#allocation14 + $0x18] sm:$0xff]  ;;  %v2468_v40 = vadd.f32 %v2467_v33, %v2466_v63  ;;  %v2452_v53 = vadd.f32 %v2451_v14, %v2450_v38 }
0x1050   :  { %v2458_v5 = vrot.slane %v2457_v4, 2  ;;  %v2532_v22 = vand.u32 2147483648, %v8088_v17  ;;  %v2530_v38 = vand.u32 2147483647, %v8088_v17  ;;  %v2564_v17 = vld [vmem:[#allocation14] sm:$0xff] }
0x1051   :  { %v2471_v43 = vsel %vm214_vm0, %v2413_v8, 0.0  ;;  %v2695_v15 = vsel %vm506_vm1, %v2694_v18, %v2693_v6  ;;  %2592 = vmatpush.msra.mxu3 %v2570_v0  ;;  %v2434_v0 = vadd.f32 %v2433_v21, %v2432_v50  ;;  %v5989_v14 = vld [vmem:[%s9812_s12] ss:$0 sm:$0xff] }
0x1052   :  { %v2473_v56 = vadd.f32 %v2472_v29, %v2471_v43  ;;  %v2459_v8 = vadd.f32 %v2458_v5, %v2457_v4  ;;  %v2704_v29 = vsel %vm539_vm7, %v2695_v15, %v2703_v57  ;;  %v2566_v5 = vld [vmem:[#allocation14 + $0x10] sm:$0xff]  ;;  %vm2531_vm13 = vcmp.eq.f32.partialorder %v2530_v38, 8.507059e+37  ;;  %v2711_v38 = vld [vmem:[#allocation11 + $0x8] sm:$0xff] }
0x1053   :  { %2593 = vmatpush.msra.mxu3 %v2569_v35 }
0x1054   :  { %v2474_v25 = vrot.slane %v2473_v56, 4  ;;  %v2460_v6 = vrot.slane %v2459_v8, 1 }
0x1055   :  { %2594 = vmatpush.msra.mxu3 %v2568_v12 }
0x1056   :  { %v2475_v37 = vadd.f32 %v2474_v25, %v2473_v56  ;;  %v2394_v20 = vpop.permute.xlu0 %2393  ;;  %v2443_v25 = vadd.f32 %v2442_v44, %v2441_v11  ;;  %v2461_v15 = vadd.f32 %v2460_v6, %v2459_v8  ;;  %v2525_v11 = vadd.f32 %v8105_v46, %v2524_v26 }
0x1057   :  { %v2415_v24 = vmul.f32 %v6363_v48, %v2394_v20  ;;  %v2696_v23 = vperm.slane %v2394_v20, %v7066_v39  ;;  %2595 = vmatpush.msra.mxu3 %v2567_v27  ;;  %v2544_v20 = vsel %vm529_vm2, %v2434_v0, %v2425_v7  ;;  %v2533_v44 = vor.u32 1.1754944e-38, %v2532_v22  ;;  %v2560_v27 = vpop.permute.xlu2 %2559  ;;  %v2712_v22 = vld [vmem:[#allocation11 + $0x10] sm:$0xff] }
0x1058   :  { %v2476_v60 = vrot.slane %v2475_v37, 2  ;;  %v2545_v63 = vsel %vm531_vm3, %v2443_v25, %v2544_v20 }
0x1059   :  { %v2480_v43 = vsel %vm214_vm0, %v2415_v24, 0.0  ;;  %v2698_v4 = vsel %vm506_vm1, %v2697_v9, %v2696_v23  ;;  %2596 = vmatpush.msra.mxu3 %v2566_v5  ;;  %v2469_v9 = vrot.slane %v2468_v40, 1  ;;  %v2546_v31 = vsel %vm533_vm4, %v2452_v53, %v2545_v63 }
0x105a   :  { %v2482_v28 = vadd.f32 %v2481_v47, %v2480_v43  ;;  %v2705_v56 = vsel %vm541_vm8, %v2698_v4, %v2704_v29  ;;  %v2477_v42 = vadd.f32 %v2476_v60, %v2475_v37  ;;  %v2547_v8 = vsel %vm535_vm5, %v2461_v15, %v2546_v31  ;;  %v2554_v43 = vld [vmem:[#allocation5 + $0x10] sm:$0xff]  ;;  %v2713_v31 = vld [vmem:[#allocation11 + $0x18] sm:$0xff] }
0x105b   :  { %v2707_v49 = vsel %vm544_vm9, %v2705_v56, 0.0  ;;  %2597 = vmatpush.msra.mxu3 %v2565_v52  ;;  %v2470_v48 = vadd.f32 %v2469_v9, %v2468_v40  ;;  %v2529_v23 = vsel %vm2528_vm12, %v8105_v46, %v2525_v11  ;;  %2730 = vmatpush.msra.mxu2 %v2713_v31 }
0x105c   :  { %v2483_v18 = vrot.slane %v2482_v28, 4  ;;  %2709 = vst [vmem:[#allocation18 + $0x10] sm:$0xff] %v2707_v49  ;;  %v2478_v37 = vrot.slane %v2477_v42, 1  ;;  %v2534_v57 = vsel %vm2531_vm13, %v2533_v44, %v2529_v23  ;;  %v3277_v44 = vld [vmem:[#allocation13 + $0x10] sm:$0xff] }
0x105d   :  { %v2548_v33 = vsel %vm537_vm6, %v2470_v48, %v2547_v8  ;;  %2598 = vmatpush.msra.mxu3 %v2564_v17  ;;  %v2641_v8 = vld [vmem:[#allocation16 + $0x8] sm:$0xff]  ;;  %2731 = vmatpush.msra.mxu2 %v2712_v22  ;;  %v2710_v48 = vld [vmem:[#allocation11] sm:$0xff] }
0x105e   :  { %v2484_v35 = vadd.f32 %v2483_v18, %v2482_v28  ;;  %v2479_v21 = vadd.f32 %v2478_v37, %v2477_v42 }
0x105f   :  { %2732 = vmatpush.msra.mxu2 %v2711_v38 }
0x1060   :  { %v2485_v50 = vrot.slane %v2484_v35, 2  ;;  %v2549_v60 = vsel %vm539_vm7, %v2479_v21, %v2548_v33  ;;  %v2642_v21 = vld [vmem:[#allocation16 + $0x10] sm:$0xff]  ;;  %v3276_v33 = vld [vmem:[#allocation13 + $0x8] sm:$0xff] }
0x1061   :  { %2733 = vmatpush.msra.mxu2 %v2710_v48 }
0x1062   :  { %v2486_v32 = vadd.f32 %v2485_v50, %v2484_v35 }
0x1064   :  { %v2487_v24 = vrot.slane %v2486_v32, 1 }
0x1066   :  { %v2488_v12 = vadd.f32 %v2487_v24, %v2486_v32  ;;  %v2643_v32 = vld [vmem:[#allocation16 + $0x18] sm:$0xff] }
0x1067   :  { %2665 = vmatpush.msrb.mxu1 %v2643_v32 }
0x1068   :  { %v2550_v47 = vsel %vm541_vm8, %v2488_v12, %v2549_v60  ;;  %v3278_v12 = vld [vmem:[#allocation13 + $0x18] sm:$0xff]  ;;  %v3275_v60 = vld [vmem:[#allocation13] sm:$0xff] }
0x1069   :  { %v2552_v29 = vmul.f32 %v2550_v47, %v2534_v57  ;;  %2666 = vmatpush.msrb.mxu1 %v2642_v21  ;;  %v5990_v47 = vld [vmem:[%s9814_s14] ss:$0 sm:$0xff] }
0x106b   :  { %2556 = vrot.lane.b32.xlu0 %v2552_v29, %s6723_s24  ;;  %2667 = vmatpush.msrb.mxu1 %v2641_v8 }
0x10dd   :  { %v2557_v4 = vpop.permute.xlu0 %2556 }
0x10de   :  { %v2562_v46 = vsel %vm214_vm0, %v2554_v43, %v2557_v4  ;;  %v5991_v43 = vld [vmem:[%s9807_s7] ss:$0 sm:$0xff] }
0x10df   :  { %v2563_v58 = vsel %vm987_vm14, %v2562_v46, %v2560_v27 }
0x10e0   :  { %5926 = vmatmul.msk.f32.vlgmr.msra.gmra.mxu3 %vm1005_vm15, %v2563_v58 }
0x1163   :  { %v2600_v28 = vpop.f32.mrf.mxu3 }
0x1164   :  { %v2601_v56 = vadd.f32 %v5989_v14, %v2600_v28 }
0x1166   :  { %6137 = vtanh.f32 %v2601_v56  ;;  %v5927_v42 = vmul.f32 -1.442695, %v2601_v56 }
0x1168   :  { %6139 = vpow2.f32 %v5927_v42 }
0x116c   :  { %v6138_v6 = vpop.eup %6137 }
0x116d   :  { %2625 = vrot.lane.b32.xlu1 %v6138_v6, %s6722_s5 }
0x116e   :  { %v6140_v49 = vpop.eup %6139 }
0x116f   :  { %v2606_v5 = vadd.f32 1.0, %v6140_v49 }
0x1171   :  { %6141 = vrcp.f32 %v2606_v5  ;;  %v2618_v52 = vand.u32 2147483648, %v2606_v5  ;;  %vm2612_vm11 = vweird.f32 %v2606_v5  ;;  %v2616_v7 = vand.u32 2147483647, %v2606_v5 }
0x1173   :  { %v2619_v35 = vor.u32 1.1754944e-38, %v2618_v52  ;;  %vm2617_vm13 = vcmp.eq.f32.partialorder %v2616_v7, 8.507059e+37  ;;  %v8236_v52 = vld [vmem:[%s9808_s8] ss:$0 sm:$0xff] }
0x1177   :  { %v6142_v0 = vpop.eup %6141 }
0x1178   :  { %v2608_v40 = vmul.f32 %v6142_v0, %v2606_v5  ;;  %vm2613_vm10 = vweird.f32 %v6142_v0 }
0x1179   :  { %vm2614_vm12 = vmor %vm2612_vm11, %vm2613_vm10 }
0x117a   :  { %v2609_v18 = vsub.f32 1.0, %v2608_v40 }
0x117c   :  { %v2610_v25 = vmul.f32 %v6142_v0, %v2609_v18 }
0x117e   :  { %v2611_v26 = vadd.f32 %v6142_v0, %v2610_v25 }
0x1180   :  { %v2615_v53 = vsel %vm2614_vm12, %v6142_v0, %v2611_v26 }
0x1181   :  { %v2620_v37 = vsel %vm2617_vm13, %v2619_v35, %v2615_v53 }
0x1182   :  { %v2623_v9 = vmul.f32 %v2620_v37, %v7809_v54  ;;  %v2640_v54 = vld [vmem:[#allocation16] sm:$0xff] }
0x1183   :  { %2668 = vmatpush.msrb.mxu1 %v2640_v54 }
0x1185   :  { %3295 = vmatpush.msra.mxu1 %v3278_v12 }
0x1187   :  { %3296 = vmatpush.msra.mxu1 %v3277_v44 }
0x1189   :  { %3297 = vmatpush.msra.mxu1 %v3276_v33 }
0x118b   :  { %3298 = vmatpush.msra.mxu1 %v3275_v60 }
0x11df   :  { %v2626_v15 = vpop.permute.xlu1 %2625 }
0x11e0   :  { %v2628_v20 = vmul.f32 %v2626_v15, %v2620_v37 }
0x11e2   :  { %2630 = vrot.lane.b32.xlu0 %v2628_v20, %s6723_s24 }
0x1254   :  { %v2631_v50 = vpop.permute.xlu0 %2630 }
0x1255   :  { %v8204_v63 = vadd.f32 %v2631_v50, %v2623_v9 }
0x1257   :  { %6143 = vtanh.f32 %v8204_v63 }
0x125d   :  { %v6144_v11 = vpop.eup %6143 }
0x125e   :  { %2636 = vrot.lane.b32.xlu2 %v6144_v11, %s6722_s5 }
0x12b8   :  { %v2637_v24 = vpop.permute.xlu2 %2636 }
0x12b9   :  { %v8208_v23 = vmul.f32 %v2637_v24, %v2620_v37 }
0x12bb   :  { %2649 = vrot.lane.b32.xlu1 %v8208_v23, %s6723_s24 }
0x132d   :  { %v2650_v57 = vpop.permute.xlu1 %2649 }
0x132e   :  { %5928 = vmatmul.msk.f32.vlgmr.msrb.gmra.mxu1 %vm214_vm0, %v2650_v57  ;;  %5929 = vmatmul.msk.f32.vlgmr.msra.gmra.mxu2 %vm214_vm0, %v2650_v57 }
0x1336   :  { %5930 = vmatmul.msk.f32.vlgmr.msra.gmra.mxu1 %vm214_vm0, %v2650_v57 }
0x13ab   :  { %v2670_v29 = vpop.f32.mrf.mxu1 }
0x13ac   :  { %v2671_v17 = vadd.f32 %v5990_v47, %v2670_v29 }
0x13ae   :  { %2674 = vst [vmem:[#allocation17 + $0x10] sm:$0xff] %v2671_v17 }
0x13b1   :  { %v2735_v4 = vpop.f32.mrf.mxu2 }
0x13b2   :  { %v8221_v27 = vadd.f32 %v5991_v43, %v2735_v4 }
0x13b4   :  { %v2746_v46 = vperm.slane %v8221_v27, 0  ;;  %v2739_v58 = vrot.slane %v8221_v27, 1  ;;  %v2740_v14 = vrot.slane %v8221_v27, 2  ;;  %v2741_v49 = vrot.slane %v8221_v27, 3 }
0x13b5   :  { %v2742_v26 = vrot.slane %v8221_v27, 4  ;;  %v2743_v38 = vrot.slane %v8221_v27, 5  ;;  %v2744_v4 = vrot.slane %v8221_v27, 6 }
0x13b6   :  { %v2763_v28 = vadd.f32 %v2746_v46, %v6946_v36  ;;  %v2762_v56 = vadd.f32 %v2746_v46, %v6936_v30  ;;  %v2747_v6 = vperm.slane %v2739_v58, 0  ;;  %v2748_v42 = vperm.slane %v2740_v14, 0 }
0x13b7   :  { %v2749_v20 = vperm.slane %v2741_v49, 0  ;;  %v2750_v21 = vperm.slane %v2742_v26, 0  ;;  %v2751_v33 = vperm.slane %v2743_v38, 0  ;;  %v2752_v49 = vperm.slane %v2744_v4, 0 }
0x13b8   :  { %v2779_v5 = vmax.f32 %v2763_v28, 0.0  ;;  %v2778_v0 = vmax.f32 %v2762_v56, 0.0  ;;  %v2764_v40 = vadd.f32 %v2747_v6, %v6954_v45  ;;  %v2766_v18 = vadd.f32 %v2748_v42, %v6967_v59 }
0x13b9   :  { %v2765_v25 = vadd.f32 %v2747_v6, %v6960_v51  ;;  %v2767_v15 = vadd.f32 %v2748_v42, %v6973_v1  ;;  %v2769_v54 = vadd.f32 %v2749_v20, %v9851_v62  ;;  %v2768_v24 = vadd.f32 %v2749_v20, %v9850_v61 }
0x13ba   :  { %v2795_v7 = vmul.f32 %v8236_v52, %v2779_v5  ;;  %v2794_v53 = vmul.f32 %v8236_v52, %v2778_v0  ;;  %v2780_v35 = vmax.f32 %v2764_v40, 0.0  ;;  %v2782_v37 = vmax.f32 %v2766_v18, 0.0 }
0x13bb   :  { %v2781_v31 = vmax.f32 %v2765_v25, 0.0  ;;  %v2783_v22 = vmax.f32 %v2767_v15, 0.0  ;;  %v2770_v44 = vadd.f32 %v2750_v21, %v9849_v19  ;;  %v2785_v47 = vmax.f32 %v2769_v54, 0.0 }
0x13bc   :  { %v2813_v9 = vsel %vm214_vm0, %v2795_v7, 0.0  ;;  %v2810_v50 = vsel %vm214_vm0, %v2794_v53, 0.0  ;;  %v2796_v11 = vmul.f32 %v8236_v52, %v2780_v35  ;;  %v2798_v8 = vmul.f32 %v8236_v52, %v2782_v37 }
0x13bd   :  { %2814 = vadd.xlane.f32.xlu2 %v2813_v9  ;;  %2811 = vadd.xlane.f32.xlu0 %v2810_v50  ;;  %v2797_v48 = vmul.f32 %v8236_v52, %v2781_v31  ;;  %v2799_v12 = vmul.f32 %v8236_v52, %v2783_v22  ;;  %v2784_v29 = vmax.f32 %v2768_v24, 0.0  ;;  %v2786_v43 = vmax.f32 %v2770_v44, 0.0 }
0x13be   :  { %v2816_v32 = vsel %vm214_vm0, %v2796_v11, 0.0  ;;  %v2822_v60 = vsel %vm214_vm0, %v2798_v8, 0.0  ;;  %v2801_v46 = vmul.f32 %v8236_v52, %v2785_v47  ;;  %v2772_v14 = vadd.f32 %v2751_v33, %v9854_v10 }
0x13bf   :  { %2817 = vadd.xlane.f32.xlu1 %v2816_v32  ;;  %v2819_v57 = vsel %vm214_vm0, %v2797_v48, 0.0  ;;  %v2825_v17 = vsel %vm214_vm0, %v2799_v12, 0.0  ;;  %v2800_v58 = vmul.f32 %v8236_v52, %v2784_v29  ;;  %v2771_v28 = vadd.f32 %v2750_v21, %v9853_v55 }
0x13c0   :  { %v2802_v56 = vmul.f32 %v8236_v52, %v2786_v43  ;;  %v2773_v6 = vadd.f32 %v2751_v33, %v9852_v2  ;;  %v2745_v42 = vrot.slane %v8221_v27, 7  ;;  %v2831_v5 = vsel %vm214_vm0, %v2801_v46, 0.0 }
0x13c1   :  { %v2828_v0 = vsel %vm214_vm0, %v2800_v58, 0.0  ;;  %v2788_v40 = vmax.f32 %v2772_v14, 0.0  ;;  %v2787_v18 = vmax.f32 %v2771_v28, 0.0  ;;  %v2775_v27 = vadd.f32 %v2752_v49, %v9857_v16 }
0x13c2   :  { %v2834_v25 = vsel %vm214_vm0, %v2802_v56, 0.0  ;;  %v2789_v26 = vmax.f32 %v2773_v6, 0.0  ;;  %v2753_v7 = vperm.slane %v2745_v42, 0  ;;  %v2774_v15 = vadd.f32 %v2752_v49, %v9856_v13 }
0x13c3   :  { %v2804_v53 = vmul.f32 %v8236_v52, %v2788_v40  ;;  %v2803_v35 = vmul.f32 %v8236_v52, %v2787_v18  ;;  %v2791_v11 = vmax.f32 %v2775_v27, 0.0 }
0x13c4   :  { %v2805_v37 = vmul.f32 %v8236_v52, %v2789_v26  ;;  %v2776_v20 = vadd.f32 %v2753_v7, %v9855_v34  ;;  %v2790_v31 = vmax.f32 %v2774_v15, 0.0  ;;  %v2777_v8 = vadd.f32 %v2753_v7, %v9858_v3 }
0x13c5   :  { %2823 = vadd.xlane.f32.xlu0 %v2822_v60  ;;  %2820 = vadd.xlane.f32.xlu2 %v2819_v57  ;;  %v2840_v9 = vsel %vm214_vm0, %v2804_v53, 0.0  ;;  %v2837_v50 = vsel %vm214_vm0, %v2803_v35, 0.0  ;;  %v2807_v21 = vmul.f32 %v8236_v52, %v2791_v11 }
0x13c6   :  { %v2843_v32 = vsel %vm214_vm0, %v2805_v37, 0.0  ;;  %v2792_v22 = vmax.f32 %v2776_v20, 0.0  ;;  %v2806_v38 = vmul.f32 %v8236_v52, %v2790_v31  ;;  %v2793_v12 = vmax.f32 %v2777_v8, 0.0 }
0x13c7   :  { %2826 = vadd.xlane.f32.xlu1 %v2825_v17  ;;  %v2849_v54 = vsel %vm214_vm0, %v2807_v21, 0.0 }
0x13c8   :  { %v2808_v48 = vmul.f32 %v8236_v52, %v2792_v22  ;;  %v2846_v24 = vsel %vm214_vm0, %v2806_v38, 0.0  ;;  %v2809_v33 = vmul.f32 %v8236_v52, %v2793_v12 }
0x13ca   :  { %v2852_v44 = vsel %vm214_vm0, %v2808_v48, 0.0  ;;  %v2855_v60 = vsel %vm214_vm0, %v2809_v33, 0.0 }
0x13cd   :  { %2832 = vadd.xlane.f32.xlu0 %v2831_v5  ;;  %2829 = vadd.xlane.f32.xlu2 %v2828_v0 }
0x13cf   :  { %2835 = vadd.xlane.f32.xlu1 %v2834_v25 }
0x13d5   :  { %2841 = vadd.xlane.f32.xlu0 %v2840_v9  ;;  %2838 = vadd.xlane.f32.xlu2 %v2837_v50 }
0x13d7   :  { %2844 = vadd.xlane.f32.xlu1 %v2843_v32 }
0x13dd   :  { %2850 = vadd.xlane.f32.xlu0 %v2849_v54  ;;  %2847 = vadd.xlane.f32.xlu2 %v2846_v24 }
0x13df   :  { %2853 = vadd.xlane.f32.xlu1 %v2852_v44 }
0x13e5   :  { %2856 = vadd.xlane.f32.xlu2 %v2855_v60 }
0x1430   :  { %v2815_v57 = vpop.xlane.xlu2 %2814  ;;  %v2812_v47 = vpop.xlane.xlu0 %2811 }
0x1431   :  { %v2875_v42 = vperm.slane %v2815_v57, %v7071_v41  ;;  %v2874_v49 = vperm.slane %v2812_v47, %v7066_v39 }
0x1432   :  { %v2818_v29 = vpop.xlane.xlu1 %2817 }
0x1433   :  { %v2877_v5 = vperm.slane %v2818_v29, %v7066_v39  ;;  %v2876_v35 = vsel %vm506_vm1, %v2875_v42, %v2874_v49 }
0x1438   :  { %v2824_v17 = vpop.xlane.xlu0 %2823  ;;  %v2821_v43 = vpop.xlane.xlu2 %2820 }
0x1439   :  { %v2878_v52 = vperm.slane %v2821_v43, %v7071_v41  ;;  %v2880_v26 = vperm.slane %v2824_v17, %v7066_v39 }
0x143a   :  { %v2827_v4 = vpop.xlane.xlu1 %2826 }
0x143b   :  { %v2881_v0 = vperm.slane %v2827_v4, %v7071_v41  ;;  %v2879_v40 = vsel %vm506_vm1, %v2878_v52, %v2877_v5 }
0x143c   :  { %v2898_v15 = vsel %vm529_vm2, %v2879_v40, %v2876_v35 }
0x143d   :  { %v2882_v37 = vsel %vm506_vm1, %v2881_v0, %v2880_v26 }
0x143e   :  { %v2899_v22 = vsel %vm531_vm3, %v2882_v37, %v2898_v15 }
0x1440   :  { %v8284_v46 = vpop.xlane.xlu0 %2832  ;;  %v8286_v58 = vpop.xlane.xlu2 %2829 }
0x1441   :  { %v2884_v18 = vperm.slane %v8284_v46, %v7071_v41  ;;  %v2883_v25 = vperm.slane %v8286_v58, %v7066_v39 }
0x1442   :  { %v8288_v14 = vpop.xlane.xlu1 %2835 }
0x1443   :  { %v2886_v20 = vperm.slane %v8288_v14, %v7066_v39  ;;  %v2885_v9 = vsel %vm506_vm1, %v2884_v18, %v2883_v25 }
0x1444   :  { %v2900_v38 = vsel %vm533_vm4, %v2885_v9, %v2899_v22 }
0x1448   :  { %v8290_v28 = vpop.xlane.xlu0 %2841  ;;  %v8292_v56 = vpop.xlane.xlu2 %2838 }
0x1449   :  { %v2887_v7 = vperm.slane %v8292_v56, %v7071_v41  ;;  %v2889_v21 = vperm.slane %v8290_v28, %v7066_v39 }
0x144a   :  { %v8295_v6 = vpop.xlane.xlu1 %2844 }
0x144b   :  { %v2890_v50 = vperm.slane %v8295_v6, %v7071_v41  ;;  %v2888_v11 = vsel %vm506_vm1, %v2887_v7, %v2886_v20 }
0x144c   :  { %v2901_v54 = vsel %vm535_vm5, %v2888_v11, %v2900_v38 }
0x144d   :  { %v2891_v48 = vsel %vm506_vm1, %v2890_v50, %v2889_v21 }
0x144e   :  { %v2902_v60 = vsel %vm537_vm6, %v2891_v48, %v2901_v54 }
0x1450   :  { %v8309_v53 = vpop.xlane.xlu2 %2847  ;;  %v8312_v27 = vpop.xlane.xlu0 %2850 }
0x1451   :  { %v2893_v31 = vperm.slane %v8312_v27, %v7071_v41  ;;  %v2892_v32 = vperm.slane %v8309_v53, %v7066_v39 }
0x1452   :  { %v8330_v8 = vpop.xlane.xlu1 %2853 }
0x1453   :  { %v2894_v12 = vsel %vm506_vm1, %v2893_v31, %v2892_v32  ;;  %v2895_v44 = vperm.slane %v8330_v8, %v7066_v39 }
0x1454   :  { %v2903_v42 = vsel %vm539_vm7, %v2894_v12, %v2902_v60 }
0x1458   :  { %v8334_v24 = vpop.xlane.xlu2 %2856 }
0x1459   :  { %v2896_v33 = vperm.slane %v8334_v24, %v7071_v41 }
0x145b   :  { %v2897_v52 = vsel %vm506_vm1, %v2896_v33, %v2895_v44 }
0x145c   :  { %v2904_v49 = vsel %vm541_vm8, %v2897_v52, %v2903_v42 }
0x145d   :  { %v2906_v5 = vsel %vm544_vm9, %v2904_v49, -inf }
0x145e   :  { %2907 = vmax.xlane.f32.xlu0 %v2906_v5 }
0x14d1   :  { %v8346_v0 = vpop.xlane.xlu0 %2907 }
0x14d2   :  { %v2910_v40 = vperm.slane %v8346_v0, 0  ;;  %v2911_v18 = vperm.slane %v8346_v0, 1  ;;  %v2912_v35 = vperm.slane %v8346_v0, 2  ;;  %v2913_v31 = vperm.slane %v8346_v0, 3 }
0x14d3   :  { %v2914_v22 = vperm.slane %v8346_v0, 4  ;;  %v2915_v54 = vperm.slane %v8346_v0, 5  ;;  %v2916_v42 = vperm.slane %v8346_v0, 6  ;;  %v2917_v5 = vperm.slane %v8346_v0, 7 }
0x14d4   :  { %v2926_v25 = vsub.f32 %v2812_v47, %v2910_v40  ;;  %v2927_v26 = vsub.f32 %v2815_v57, %v2910_v40  ;;  %v2928_v7 = vsub.f32 %v2818_v29, %v2911_v18  ;;  %v2929_v9 = vsub.f32 %v2821_v43, %v2911_v18 }
0x14d5   :  { %v2931_v50 = vsub.f32 %v2827_v4, %v2912_v35  ;;  %v2930_v11 = vsub.f32 %v2824_v17, %v2912_v35  ;;  %v2932_v43 = vsub.f32 %v8286_v58, %v2913_v31  ;;  %v2934_v17 = vsub.f32 %v8288_v14, %v2914_v22 }
0x14d6   :  { %v2942_v15 = vmul.f32 1.442695, %v2926_v25  ;;  %v2944_v37 = vmul.f32 1.442695, %v2927_v26  ;;  %v2946_v20 = vmul.f32 1.442695, %v2928_v7  ;;  %v2933_v4 = vsub.f32 %v8284_v46, %v2913_v31 }
0x14d7   :  { %v2948_v32 = vmul.f32 1.442695, %v2929_v9  ;;  %v2952_v21 = vmul.f32 1.442695, %v2931_v50  ;;  %v2950_v57 = vmul.f32 1.442695, %v2930_v11  ;;  %v2935_v14 = vsub.f32 %v8292_v56, %v2914_v22 }
0x14d8   :  { %6145 = vpow2.f32 %v2946_v20  ;;  %v2954_v48 = vmul.f32 1.442695, %v2932_v43  ;;  %v2958_v12 = vmul.f32 1.442695, %v2934_v17  ;;  %v2956_v33 = vmul.f32 1.442695, %v2933_v4 }
0x14d9   :  { %6147 = vpow2.f32 %v2944_v37  ;;  %v2937_v46 = vsub.f32 %v8295_v6, %v2915_v54  ;;  %v2936_v52 = vsub.f32 %v8290_v28, %v2915_v54  ;;  %v2960_v49 = vmul.f32 1.442695, %v2935_v14 }
0x14da   :  { %6149 = vpow2.f32 %v2942_v15  ;;  %v2938_v26 = vsub.f32 %v8309_v53, %v2916_v42  ;;  %v2940_v28 = vsub.f32 %v8330_v8, %v2917_v5  ;;  %v2939_v0 = vsub.f32 %v8312_v27, %v2916_v42 }
0x14db   :  { %6151 = vpow2.f32 %v2948_v32  ;;  %v2964_v40 = vmul.f32 1.442695, %v2937_v46  ;;  %v2962_v56 = vmul.f32 1.442695, %v2936_v52  ;;  %v2941_v9 = vsub.f32 %v8334_v24, %v2917_v5 }
0x14dc   :  { %6153 = vpow2.f32 %v2952_v21  ;;  %v2966_v7 = vmul.f32 1.442695, %v2938_v26  ;;  %v2970_v35 = vmul.f32 1.442695, %v2940_v28  ;;  %v2968_v37 = vmul.f32 1.442695, %v2939_v0 }
0x14dd   :  { %6155 = vpow2.f32 %v2950_v57  ;;  %v2972_v27 = vmul.f32 1.442695, %v2941_v9 }
0x14de   :  { %v8353_v47 = vpop.eup %6145  ;;  %6157 = vpow2.f32 %v2954_v48 }
0x14df   :  { %v8355_v29 = vpop.eup %6147  ;;  %2997 = vperm.xlu0 %5975, %v8353_v47   ;;  %6159 = vpow2.f32 %v2958_v12 }
0x14e0   :  { %v8358_v38 = vpop.eup %6149  ;;  %2994 = vperm.xlu2 %5974, %v8355_v29   ;;  %6161 = vpow2.f32 %v2956_v33 }
0x14e1   :  { %2991 = vperm.xlu1 %5976, %v8358_v38   ;;  %v8366_v44 = vpop.eup %6151  ;;  %6163 = vpow2.f32 %v2960_v49 }
0x14e2   :  { %v8368_v60 = vpop.eup %6153  ;;  %6165 = vpow2.f32 %v2964_v40 }
0x14e3   :  { %v8371_v58 = vpop.eup %6155  ;;  %6167 = vpow2.f32 %v2962_v56 }
0x14e4   :  { %v8380_v18 = vpop.eup %6157  ;;  %6169 = vpow2.f32 %v2966_v7 }
0x14e5   :  { %v8382_v25 = vpop.eup %6159  ;;  %6171 = vpow2.f32 %v2970_v35 }
0x14e6   :  { %v8385_v6 = vpop.eup %6161  ;;  %6173 = vpow2.f32 %v2968_v37 }
0x14e7   :  { %3000 = vperm.xlu0 %5975, %v8366_v44   ;;  %v8392_v15 = vpop.eup %6163  ;;  %6175 = vpow2.f32 %v2972_v27 }
0x14e8   :  { %3006 = vperm.xlu2 %5974, %v8368_v60   ;;  %v8394_v20 = vpop.eup %6165 }
0x14e9   :  { %3003 = vperm.xlu1 %5976, %v8371_v58   ;;  %v8397_v53 = vpop.eup %6167 }
0x14ea   :  { %v8402_v8 = vpop.eup %6169 }
0x14eb   :  { %v8404_v50 = vpop.eup %6171 }
0x14ec   :  { %v8407_v11 = vpop.eup %6173 }
0x14ed   :  { %v8411_v24 = vpop.eup %6175 }
0x14ef   :  { %3009 = vperm.xlu0 %5975, %v8380_v18  }
0x14f0   :  { %3015 = vperm.xlu2 %5974, %v8382_v25  }
0x14f1   :  { %3012 = vperm.xlu1 %5976, %v8385_v6  }
0x14f7   :  { %3018 = vperm.xlu0 %5975, %v8392_v15  }
0x14f8   :  { %3024 = vperm.xlu2 %5974, %v8394_v20  }
0x14f9   :  { %3021 = vperm.xlu1 %5976, %v8397_v53  }
0x14ff   :  { %3027 = vperm.xlu0 %5975, %v8402_v8  }
0x1500   :  { %3033 = vperm.xlu2 %5974, %v8404_v50  }
0x1501   :  { %3030 = vperm.xlu1 %5976, %v8407_v11  }
0x1507   :  { %3036 = vperm.xlu0 %5975, %v8411_v24  }
0x153a   :  { %v2995_v31 = vpop.permute.xlu2 %2994 }
0x153b   :  { %v3039_v49 = vperm.slane %v2995_v31, %v7071_v41 }
0x1542   :  { %v3007_v21 = vpop.permute.xlu2 %3006 }
0x1543   :  { %v3045_v26 = vperm.slane %v3007_v21, %v7071_v41 }
0x154a   :  { %v3016_v4 = vpop.permute.xlu2 %3015 }
0x154b   :  { %v3050_v35 = vperm.slane %v3016_v4, %v7066_v39 }
0x1551   :  { %v2998_v32 = vpop.permute.xlu0 %2997 }
0x1552   :  { %v3025_v14 = vpop.permute.xlu2 %3024  ;;  %v3041_v46 = vperm.slane %v2998_v32, %v7066_v39 }
0x1553   :  { %v2992_v22 = vpop.permute.xlu1 %2991 }
0x1554   :  { %v3038_v52 = vperm.slane %v2992_v22, %v7066_v39 }
0x1556   :  { %v3040_v7 = vsel %vm506_vm1, %v3039_v49, %v3038_v52 }
0x1559   :  { %v3001_v57 = vpop.permute.xlu0 %3000 }
0x155a   :  { %v3042_v33 = vperm.slane %v3001_v57, %v7071_v41  ;;  %v3034_v4 = vpop.permute.xlu2 %3033 }
0x155b   :  { %v3004_v43 = vpop.permute.xlu1 %3003  ;;  %v3059_v52 = vperm.slane %v3034_v4, %v7066_v39 }
0x155c   :  { %v3044_v42 = vperm.slane %v3004_v43, %v7066_v39  ;;  %v3043_v5 = vsel %vm506_vm1, %v3042_v33, %v3041_v46  ;;  %v3054_v43 = vperm.slane %v3025_v14, %v7071_v41 }
0x155d   :  { %v3062_v37 = vsel %vm529_vm2, %v3043_v5, %v3040_v7 }
0x155e   :  { %v3046_v9 = vsel %vm506_vm1, %v3045_v26, %v3044_v42 }
0x1561   :  { %v3010_v17 = vpop.permute.xlu0 %3009 }
0x1562   :  { %v3047_v40 = vperm.slane %v3010_v17, %v7066_v39  ;;  %v3063_v17 = vsel %vm531_vm3, %v3046_v9, %v3062_v37 }
0x1563   :  { %v3013_v48 = vpop.permute.xlu1 %3012 }
0x1564   :  { %v3048_v56 = vperm.slane %v3013_v48, %v7071_v41 }
0x1566   :  { %v3049_v31 = vsel %vm506_vm1, %v3048_v56, %v3047_v40 }
0x1567   :  { %v3064_v48 = vsel %vm533_vm4, %v3049_v31, %v3063_v17 }
0x1569   :  { %v3019_v54 = vpop.permute.xlu0 %3018 }
0x156a   :  { %v3051_v28 = vperm.slane %v3019_v54, %v7071_v41 }
0x156b   :  { %v3022_v12 = vpop.permute.xlu1 %3021 }
0x156c   :  { %v3053_v32 = vperm.slane %v3022_v12, %v7066_v39  ;;  %v3052_v22 = vsel %vm506_vm1, %v3051_v28, %v3050_v35 }
0x156d   :  { %v3065_v54 = vsel %vm535_vm5, %v3052_v22, %v3064_v48 }
0x156e   :  { %v3055_v33 = vsel %vm506_vm1, %v3054_v43, %v3053_v32 }
0x156f   :  { %v3066_v49 = vsel %vm537_vm6, %v3055_v33, %v3065_v54 }
0x1571   :  { %v3028_v0 = vpop.permute.xlu0 %3027 }
0x1572   :  { %v3056_v21 = vperm.slane %v3028_v0, %v7066_v39 }
0x1573   :  { %v3031_v27 = vpop.permute.xlu1 %3030 }
0x1574   :  { %v3057_v57 = vperm.slane %v3031_v27, %v7071_v41 }
0x1576   :  { %v3058_v46 = vsel %vm506_vm1, %v3057_v57, %v3056_v21 }
0x1577   :  { %v3067_v5 = vsel %vm539_vm7, %v3058_v46, %v3066_v49  ;;  %v6365_v49 = vld [vmem:[#allocation2 + $0x18] sm:$0xff] }
0x1579   :  { %v3037_v12 = vpop.permute.xlu0 %3036 }
0x157a   :  { %v3060_v42 = vperm.slane %v3037_v12, %v7071_v41 }
0x157c   :  { %v3061_v14 = vsel %vm506_vm1, %v3060_v42, %v3059_v52 }
0x157d   :  { %v3068_v40 = vsel %vm541_vm8, %v3061_v14, %v3067_v5  ;;  %v6366_v5 = vld [vmem:[#allocation2 + $0x8] sm:$0xff] }
0x157e   :  { %v3070_v56 = vsel %vm544_vm9, %v3068_v40, 0.0 }
0x157f   :  { %3071 = vadd.xlane.f32.xlu1 %v3070_v56  ;;  %v6367_v56 = vld [vmem:[#allocation2 + $0x10] sm:$0xff] }
0x15f2   :  { %v3072_v26 = vpop.xlane.xlu1 %3071 }
0x15f3   :  { %6177 = vrcp.f32 %v3072_v26 }
0x15f9   :  { %v6178_v28 = vpop.eup %6177 }
0x15fa   :  { %v3080_v0 = vperm.slane %v6178_v28, 5  ;;  %v3075_v7 = vperm.slane %v6178_v28, 0  ;;  %v3076_v27 = vperm.slane %v6178_v28, 1  ;;  %v3077_v22 = vperm.slane %v6178_v28, 2 }
0x15fb   :  { %v3081_v43 = vperm.slane %v6178_v28, 6  ;;  %v3082_v17 = vperm.slane %v6178_v28, 7 }
0x15fc   :  { %v3101_v35 = vmul.f32 %v8397_v53, %v3080_v0  ;;  %v3092_v37 = vmul.f32 %v8355_v29, %v3075_v7  ;;  %v3091_v9 = vmul.f32 %v8358_v38, %v3075_v7  ;;  %v3094_v31 = vmul.f32 %v8366_v44, %v3076_v27  ;;  %v6369_v7 = vld [vmem:[#allocation2 + $0x28] sm:$0xff] }
0x15fd   :  { %v3093_v32 = vmul.f32 %v8353_v47, %v3076_v27  ;;  %v3096_v53 = vmul.f32 %v8368_v60, %v3077_v22  ;;  %v3095_v29 = vmul.f32 %v8371_v58, %v3077_v22  ;;  %v3078_v38 = vperm.slane %v6178_v28, 3 }
0x15fe   :  { %3159 = vperm.xlu1 %5976, %v3101_v35   ;;  %3114 = vperm.xlu0 %5975, %v3092_v37   ;;  %v3079_v47 = vperm.slane %v6178_v28, 4  ;;  %v3103_v60 = vmul.f32 %v8402_v8, %v3081_v43  ;;  %v3102_v58 = vmul.f32 %v8394_v20, %v3080_v0  ;;  %v5992_v20 = vld [vmem:[%s9810_s10] ss:$0 sm:$0xff]  ;;  %v3300_v8 = vpop.f32.mrf.mxu1 }
0x15ff   :  { %3109 = vperm.xlu2 %5974, %v3091_v9   ;;  %v3098_v21 = vmul.f32 %v8385_v6, %v3078_v38  ;;  %v3097_v57 = vmul.f32 %v8380_v18, %v3078_v38  ;;  %v3105_v6 = vmul.f32 %v8404_v50, %v3082_v17  ;;  %v3104_v18 = vmul.f32 %v8407_v11, %v3081_v43  ;;  %v6368_v28 = vld [vmem:[#allocation2] sm:$0xff] }
0x1600   :  { %v3100_v44 = vmul.f32 %v8392_v15, %v3079_v47  ;;  %v3106_v15 = vmul.f32 %v8411_v24, %v3082_v17  ;;  %v3301_v54 = vadd.f32 %v5992_v20, %v3300_v8  ;;  %v6373_v20 = vld [vmem:[#allocation2 + $0x58] sm:$0xff] }
0x1602   :  { %v5931_v11 = vmul.f32 -1.442695, %v3301_v54 }
0x1604   :  { %6179 = vpow2.f32 %v5931_v11 }
0x1606   :  { %3345 = vrot.lane.b32.xlu1 %v8208_v23, %s6724_s11  ;;  %3124 = vperm.xlu0 %5975, %v3094_v31   ;;  %v3099_v23 = vmul.f32 %v8382_v25, %v3079_v47  ;;  %v6370_v31 = vld [vmem:[#allocation2 + $0x20] sm:$0xff]  ;;  %v6372_v47 = vld [vmem:[#allocation2 + $0x30] sm:$0xff] }
0x1607   :  { %3119 = vperm.xlu2 %5974, %v3093_v32  }
0x160a   :  { %v6180_v46 = vpop.eup %6179 }
0x160b   :  { %v8483_v42 = vadd.f32 1.0, %v6180_v46  ;;  %v6374_v46 = vld [vmem:[#allocation2 + $0x40] sm:$0xff] }
0x160d   :  { %6181 = vrcp.f32 %v8483_v42  ;;  %vm3312_vm11 = vweird.f32 %v8483_v42 }
0x160e   :  { %3134 = vperm.xlu0 %5975, %v3096_v53   ;;  %v6371_v53 = vld [vmem:[#allocation2 + $0x38] sm:$0xff] }
0x160f   :  { %3129 = vperm.xlu2 %5974, %v3095_v29  }
0x1616   :  { %3144 = vperm.xlu0 %5975, %v3098_v21   ;;  %v8500_v21 = vpop.eup %6181 }
0x1617   :  { %3139 = vperm.xlu2 %5974, %v3097_v57   ;;  %vm3313_vm10 = vweird.f32 %v8500_v21 }
0x1618   :  { %vm3314_vm12 = vmor %vm3312_vm11, %vm3313_vm10 }
0x161e   :  { %3154 = vperm.xlu0 %5975, %v3100_v44  }
0x161f   :  { %3149 = vperm.xlu2 %5974, %v3099_v23  }
0x1626   :  { %3169 = vperm.xlu0 %5975, %v3103_v60  }
0x1627   :  { %3164 = vperm.xlu2 %5974, %v3102_v58  }
0x162e   :  { %3179 = vperm.xlu0 %5975, %v3105_v6  }
0x162f   :  { %3174 = vperm.xlu2 %5974, %v3104_v18   ;;  %v8511_v18 = vmul.f32 %v8500_v21, %v8483_v42 }
0x1637   :  { %3184 = vperm.xlu2 %5974, %v3106_v15  }
0x1659   :  { %v8464_v25 = vpop.permute.xlu2 %3109 }
0x165a   :  { %v3187_v0 = vmul.f32 %v6368_v28, %v8464_v25  ;;  %v6376_v28 = vld [vmem:[#allocation2 + $0x48] sm:$0xff] }
0x165c   :  { %v3203_v57 = vsel %vm214_vm0, %v3187_v0, 0.0 }
0x1661   :  { %v8466_v4 = vpop.permute.xlu2 %3119 }
0x1662   :  { %v3189_v26 = vmul.f32 %v6367_v56, %v8466_v4 }
0x1664   :  { %v3212_v38 = vsel %vm214_vm0, %v3189_v26, 0.0 }
0x1669   :  { %v8468_v48 = vpop.permute.xlu2 %3129 }
0x166a   :  { %v3191_v32 = vmul.f32 %v6370_v31, %v8468_v48 }
0x166c   :  { %v3221_v58 = vsel %vm214_vm0, %v3191_v32, 0.0 }
0x1670   :  { %v8473_v50 = vpop.permute.xlu0 %3114  ;;  %v8506_v17 = vpop.permute.xlu1 %3159 }
0x1671   :  { %v8475_v33 = vpop.permute.xlu2 %3139  ;;  %v3188_v40 = vmul.f32 %v6366_v5, %v8473_v50 }
0x1672   :  { %v3193_v44 = vmul.f32 %v6372_v47, %v8475_v33 }
0x1673   :  { %v3204_v22 = vsel %vm214_vm0, %v3188_v40, 0.0 }
0x1674   :  { %v3205_v60 = vadd.f32 %v3204_v22, %v3203_v57  ;;  %v3230_v54 = vsel %vm214_vm0, %v3193_v44, 0.0 }
0x1676   :  { %v3206_v40 = vrot.slane %v3205_v60, 4 }
0x1678   :  { %v8477_v24 = vpop.permute.xlu0 %3124  ;;  %v3207_v47 = vadd.f32 %v3206_v40, %v3205_v60 }
0x1679   :  { %v8479_v12 = vpop.permute.xlu2 %3149  ;;  %v3190_v14 = vmul.f32 %v6365_v49, %v8477_v24 }
0x167a   :  { %v3195_v49 = vmul.f32 %v6374_v46, %v8479_v12 }
0x167b   :  { %v3213_v37 = vsel %vm214_vm0, %v3190_v14, 0.0  ;;  %v6375_v14 = vld [vmem:[#allocation2 + $0x50] sm:$0xff] }
0x167c   :  { %v3214_v23 = vadd.f32 %v3213_v37, %v3212_v38  ;;  %v3197_v5 = vmul.f32 %v6375_v14, %v8506_v17  ;;  %v3359_v14 = vld [vmem:[#allocation14 + $0x48] sm:$0xff] }
0x167e   :  { %v3215_v11 = vrot.slane %v3214_v23, 4  ;;  %v3248_v57 = vsel %vm214_vm0, %v3197_v5, 0.0  ;;  %v3208_v5 = vrot.slane %v3207_v47, 2 }
0x1680   :  { %v8481_v52 = vpop.permute.xlu0 %3134  ;;  %v3216_v22 = vadd.f32 %v3215_v11, %v3214_v23  ;;  %v3467_v23 = vperm.slane %v8468_v48, %v7066_v39 }
0x1681   :  { %v3192_v35 = vmul.f32 %v6369_v7, %v8481_v52  ;;  %v8492_v9 = vpop.permute.xlu2 %3164  ;;  %v3309_v7 = vsub.f32 1.0, %v8511_v18  ;;  %v3468_v60 = vperm.slane %v8481_v52, %v7071_v41  ;;  %v3473_v52 = vperm.slane %v8479_v12, %v7066_v39 }
0x1682   :  { %v3198_v8 = vmul.f32 %v6373_v20, %v8492_v9  ;;  %v3360_v20 = vld [vmem:[#allocation14 + $0x50] sm:$0xff]  ;;  %v3217_v46 = vrot.slane %v3216_v22, 2 }
0x1683   :  { %v3222_v43 = vsel %vm214_vm0, %v3192_v35, 0.0  ;;  %v3462_v35 = vperm.slane %v8473_v50, %v7071_v41  ;;  %v3461_v50 = vperm.slane %v8464_v25, %v7066_v39 }
0x1684   :  { %v3223_v15 = vadd.f32 %v3222_v43, %v3221_v58  ;;  %v3249_v31 = vsel %vm214_vm0, %v3198_v8, 0.0  ;;  %v3464_v58 = vperm.slane %v8466_v4, %v7066_v39  ;;  %v3470_v8 = vperm.slane %v8475_v33, %v7066_v39 }
0x1685   :  { %v3463_v40 = vsel %vm506_vm1, %v3462_v35, %v3461_v50 }
0x1686   :  { %v3224_v37 = vrot.slane %v3223_v15, 4 }
0x1688   :  { %v8494_v27 = vpop.permute.xlu0 %3144 }
0x1689   :  { %v3194_v29 = vmul.f32 %v6371_v53, %v8494_v27  ;;  %v8521_v32 = vpop.permute.xlu2 %3174  ;;  %v3465_v53 = vperm.slane %v8477_v24, %v7071_v41  ;;  %v3361_v24 = vld [vmem:[#allocation14 + $0x58] sm:$0xff]  ;;  %v3471_v4 = vperm.slane %v8494_v27, %v7071_v41  ;;  %v3358_v27 = vld [vmem:[#allocation14 + $0x40] sm:$0xff] }
0x168a   :  { %3373 = vmatpush.msrb.mxu2 %v3361_v24 }
0x168b   :  { %v3231_v6 = vsel %vm214_vm0, %v3194_v29, 0.0  ;;  %v3239_v29 = vsel %vm214_vm0, %v3195_v49, 0.0  ;;  %v3466_v25 = vsel %vm506_vm1, %v3465_v53, %v3464_v58  ;;  %v6377_v49 = vld [vmem:[#allocation2 + $0x68] sm:$0xff]  ;;  %v3472_v35 = vsel %vm506_vm1, %v3471_v4, %v3470_v8 }
0x168c   :  { %v3232_v56 = vadd.f32 %v3231_v6, %v3230_v54  ;;  %v3250_v6 = vadd.f32 %v3249_v31, %v3248_v57  ;;  %v3225_v54 = vadd.f32 %v3224_v37, %v3223_v15  ;;  %v3200_v48 = vmul.f32 %v6377_v49, %v8521_v32  ;;  %3374 = vmatpush.msrb.mxu2 %v3360_v20  ;;  %v6378_v31 = vld [vmem:[#allocation2 + $0x60] sm:$0xff] }
0x168d   :  { %v3469_v57 = vsel %vm506_vm1, %v3468_v60, %v3467_v23  ;;  %v3356_v60 = vld [vmem:[#allocation14 + $0x30] sm:$0xff]  ;;  %v3480_v4 = vperm.slane %v8521_v32, %v7071_v41 }
0x168e   :  { %v3233_v44 = vrot.slane %v3232_v56, 4  ;;  %3375 = vmatpush.msrb.mxu2 %v3359_v14 }
0x1690   :  { %v3155_v26 = vpop.permute.xlu0 %3154  ;;  %v3234_v33 = vadd.f32 %v3233_v44, %v3232_v56  ;;  %v3477_v56 = vperm.slane %v8492_v9, %v7071_v41  ;;  %v3258_v44 = vsel %vm214_vm0, %v3200_v48, 0.0  ;;  %3376 = vmatpush.msrb.mxu2 %v3358_v27  ;;  %v3476_v9 = vperm.slane %v8506_v17, %v7066_v39  ;;  %v6380_v27 = vld [vmem:[#allocation2 + $0x70] sm:$0xff] }
0x1691   :  { %v3196_v0 = vmul.f32 %v6376_v28, %v3155_v26  ;;  %v3474_v15 = vperm.slane %v3155_v26, %v7071_v41  ;;  %v3218_v26 = vadd.f32 %v3217_v46, %v3216_v22  ;;  %v3185_v24 = vpop.permute.xlu2 %3184  ;;  %v3209_v48 = vadd.f32 %v3208_v5, %v3207_v47  ;;  %v3354_v5 = vld [vmem:[#allocation14 + $0x20] sm:$0xff] }
0x1692   :  { %v3235_v50 = vrot.slane %v3234_v33, 2  ;;  %v3478_v14 = vsel %vm506_vm1, %v3477_v56, %v3476_v9  ;;  %v3483_v32 = vperm.slane %v3185_v24, %v7071_v41 }
0x1693   :  { %v3240_v38 = vsel %vm214_vm0, %v3196_v0, 0.0  ;;  %v3251_v0 = vrot.slane %v3250_v6, 4  ;;  %v3475_v58 = vsel %vm506_vm1, %v3474_v15, %v3473_v52  ;;  %v6379_v15 = vld [vmem:[#allocation2 + $0x78] sm:$0xff]  ;;  %v3219_v52 = vrot.slane %v3218_v26, 1 }
0x1694   :  { %v3241_v43 = vadd.f32 %v3240_v38, %v3239_v29  ;;  %v3485_v29 = vsel %vm529_vm2, %v3466_v25, %v3463_v40  ;;  %v3226_v38 = vrot.slane %v3225_v54, 2  ;;  %v3202_v17 = vmul.f32 %v6379_v15, %v3185_v24 }
0x1695   :  { %v3486_v22 = vsel %vm531_vm3, %v3469_v57, %v3485_v29  ;;  %v3252_v23 = vadd.f32 %v3251_v0, %v3250_v6  ;;  %v3236_v6 = vadd.f32 %v3235_v50, %v3234_v33  ;;  %v3210_v50 = vrot.slane %v3209_v48, 1 }
0x1696   :  { %v3242_v11 = vrot.slane %v3241_v43, 4  ;;  %v3227_v46 = vadd.f32 %v3226_v38, %v3225_v54  ;;  %v3487_v25 = vsel %vm533_vm4, %v3472_v35, %v3486_v22  ;;  %v3267_v33 = vsel %vm214_vm0, %v3202_v17, 0.0 }
0x1697   :  { %v3488_v40 = vsel %vm535_vm5, %v3475_v58, %v3487_v25  ;;  %v3253_v57 = vrot.slane %v3252_v23, 2  ;;  %v3237_v58 = vrot.slane %v3236_v6, 1  ;;  %v3211_v15 = vadd.f32 %v3210_v50, %v3209_v48 }
0x1698   :  { %v3170_v28 = vpop.permute.xlu0 %3169  ;;  %v3243_v37 = vadd.f32 %v3242_v11, %v3241_v43  ;;  %v3357_v43 = vld [vmem:[#allocation14 + $0x38] sm:$0xff]  ;;  %v3228_v38 = vrot.slane %v3227_v46, 1  ;;  %v3489_v35 = vsel %vm537_vm6, %v3478_v14, %v3488_v40  ;;  %v3310_v14 = vmul.f32 %v8500_v21, %v3309_v7  ;;  %v3351_v40 = vld [vmem:[#allocation14 + $0x8] sm:$0xff] }
0x1699   :  { %v3199_v53 = vmul.f32 %v6378_v31, %v3170_v28  ;;  %v3479_v11 = vperm.slane %v3170_v28, %v7066_v39  ;;  %3377 = vmatpush.msrb.mxu2 %v3357_v43  ;;  %v3355_v28 = vld [vmem:[#allocation14 + $0x28] sm:$0xff]  ;;  %v3353_v43 = vld [vmem:[#allocation14 + $0x18] sm:$0xff]  ;;  %v3254_v25 = vadd.f32 %v3253_v57, %v3252_v23  ;;  %v3238_v17 = vadd.f32 %v3237_v58, %v3236_v6 }
0x169a   :  { %v3244_v8 = vrot.slane %v3243_v37, 2  ;;  %v3318_v48 = vand.u32 2147483648, %v8483_v42  ;;  %v3316_v6 = vand.u32 2147483647, %v8483_v42  ;;  %v3350_v42 = vld [vmem:[#allocation14] sm:$0xff] }
0x169b   :  { %v3257_v12 = vsel %vm214_vm0, %v3199_v53, 0.0  ;;  %v3481_v54 = vsel %vm506_vm1, %v3480_v4, %v3479_v11  ;;  %3378 = vmatpush.msrb.mxu2 %v3356_v60  ;;  %v3220_v60 = vadd.f32 %v3219_v52, %v3218_v26  ;;  %v5993_v58 = vld [vmem:[%s9812_s12] ss:$0 sm:$0xff] }
0x169c   :  { %v3259_v20 = vadd.f32 %v3258_v44, %v3257_v12  ;;  %v3245_v53 = vadd.f32 %v3244_v8, %v3243_v37  ;;  %v3490_v44 = vsel %vm539_vm7, %v3481_v54, %v3489_v35  ;;  %v3352_v8 = vld [vmem:[#allocation14 + $0x10] sm:$0xff]  ;;  %vm3317_vm13 = vcmp.eq.f32.partialorder %v3316_v6, 8.507059e+37  ;;  %v3497_v6 = vld [vmem:[#allocation11 + $0x8] sm:$0xff] }
0x169d   :  { %3379 = vmatpush.msrb.mxu2 %v3355_v28 }
0x169e   :  { %v3260_v49 = vrot.slane %v3259_v20, 4  ;;  %v3246_v11 = vrot.slane %v3245_v53, 1 }
0x169f   :  { %3380 = vmatpush.msrb.mxu2 %v3354_v5 }
0x16a0   :  { %v3261_v0 = vadd.f32 %v3260_v49, %v3259_v20  ;;  %v3180_v31 = vpop.permute.xlu0 %3179  ;;  %v3229_v49 = vadd.f32 %v3228_v38, %v3227_v46  ;;  %v3247_v54 = vadd.f32 %v3246_v11, %v3245_v53  ;;  %v3311_v46 = vadd.f32 %v8500_v21, %v3310_v14 }
0x16a1   :  { %v3201_v29 = vmul.f32 %v6380_v27, %v3180_v31  ;;  %v3482_v47 = vperm.slane %v3180_v31, %v7066_v39  ;;  %3381 = vmatpush.msrb.mxu2 %v3353_v43  ;;  %v3330_v31 = vsel %vm529_vm2, %v3220_v60, %v3211_v15  ;;  %v3319_v38 = vor.u32 1.1754944e-38, %v3318_v48  ;;  %v3346_v43 = vpop.permute.xlu1 %3345  ;;  %v3498_v48 = vld [vmem:[#allocation11 + $0x10] sm:$0xff] }
0x16a2   :  { %v3262_v56 = vrot.slane %v3261_v0, 2  ;;  %v3331_v23 = vsel %vm531_vm3, %v3229_v49, %v3330_v31 }
0x16a3   :  { %v3266_v12 = vsel %vm214_vm0, %v3201_v29, 0.0  ;;  %v3484_v37 = vsel %vm506_vm1, %v3483_v32, %v3482_v47  ;;  %3382 = vmatpush.msrb.mxu2 %v3352_v8  ;;  %v3255_v32 = vrot.slane %v3254_v25, 1  ;;  %v3332_v18 = vsel %vm533_vm4, %v3238_v17, %v3331_v23 }
0x16a4   :  { %v3268_v24 = vadd.f32 %v3267_v33, %v3266_v12  ;;  %v3491_v20 = vsel %vm541_vm8, %v3484_v37, %v3490_v44  ;;  %v3263_v9 = vadd.f32 %v3262_v56, %v3261_v0  ;;  %v3333_v53 = vsel %vm535_vm5, %v3247_v54, %v3332_v18  ;;  %v3340_v12 = vld [vmem:[#allocation5 + $0x18] sm:$0xff]  ;;  %v3499_v18 = vld [vmem:[#allocation11 + $0x18] sm:$0xff] }
0x16a5   :  { %v3493_v22 = vsel %vm544_vm9, %v3491_v20, 0.0  ;;  %3383 = vmatpush.msrb.mxu2 %v3351_v40  ;;  %v3256_v27 = vadd.f32 %v3255_v32, %v3254_v25  ;;  %v3315_v47 = vsel %vm3314_vm12, %v8500_v21, %v3311_v46  ;;  %3516 = vmatpush.msrb.mxu3 %v3499_v18 }
0x16a6   :  { %v3269_v4 = vrot.slane %v3268_v24, 4  ;;  %3495 = vst [vmem:[#allocation18 + $0x18] sm:$0xff] %v3493_v22  ;;  %v3264_v0 = vrot.slane %v3263_v9, 1  ;;  %v3320_v35 = vsel %vm3317_vm13, %v3319_v38, %v3315_v47  ;;  %v4063_v38 = vld [vmem:[#allocation13 + $0x10] sm:$0xff] }
0x16a7   :  { %v3334_v57 = vsel %vm537_vm6, %v3256_v27, %v3333_v53  ;;  %3384 = vmatpush.msrb.mxu2 %v3350_v42  ;;  %v3427_v53 = vld [vmem:[#allocation16 + $0x8] sm:$0xff]  ;;  %3517 = vmatpush.msrb.mxu3 %v3498_v48  ;;  %v3496_v27 = vld [vmem:[#allocation11] sm:$0xff] }
0x16a8   :  { %v3270_v28 = vadd.f32 %v3269_v4, %v3268_v24  ;;  %v3265_v52 = vadd.f32 %v3264_v0, %v3263_v9 }
0x16a9   :  { %3518 = vmatpush.msrb.mxu3 %v3497_v6 }
0x16aa   :  { %v3271_v26 = vrot.slane %v3270_v28, 2  ;;  %v3335_v56 = vsel %vm539_vm7, %v3265_v52, %v3334_v57  ;;  %v3428_v52 = vld [vmem:[#allocation16 + $0x10] sm:$0xff]  ;;  %v4062_v57 = vld [vmem:[#allocation13 + $0x8] sm:$0xff] }
0x16ab   :  { %3519 = vmatpush.msrb.mxu3 %v3496_v27 }
0x16ac   :  { %v3272_v7 = vadd.f32 %v3271_v26, %v3270_v28 }
0x16ae   :  { %v3273_v29 = vrot.slane %v3272_v7, 1 }
0x16b0   :  { %v3274_v5 = vadd.f32 %v3273_v29, %v3272_v7  ;;  %v3429_v7 = vld [vmem:[#allocation16 + $0x18] sm:$0xff] }
0x16b1   :  { %3451 = vmatpush.msrb.mxu1 %v3429_v7 }
0x16b2   :  { %v3336_v33 = vsel %vm541_vm8, %v3274_v5, %v3335_v56  ;;  %v4064_v5 = vld [vmem:[#allocation13 + $0x18] sm:$0xff]  ;;  %v4061_v56 = vld [vmem:[#allocation13] sm:$0xff] }
0x16b3   :  { %v3338_v44 = vmul.f32 %v3336_v33, %v3320_v35  ;;  %3452 = vmatpush.msrb.mxu1 %v3428_v52  ;;  %v5994_v33 = vld [vmem:[%s9814_s14] ss:$0 sm:$0xff] }
0x16b5   :  { %3342 = vrot.lane.b32.xlu0 %v3338_v44, %s6723_s24  ;;  %3453 = vmatpush.msrb.mxu1 %v3427_v53 }
0x1727   :  { %v3343_v37 = vpop.permute.xlu0 %3342 }
0x1728   :  { %v3348_v21 = vsel %vm214_vm0, %v3340_v12, %v3343_v37  ;;  %v5995_v12 = vld [vmem:[%s9807_s7] ss:$0 sm:$0xff] }
0x1729   :  { %v3349_v50 = vsel %vm987_vm14, %v3348_v21, %v3346_v43 }
0x172a   :  { %5932 = vmatmul.msk.f32.vlgmr.msrb.gmra.mxu2 %vm1005_vm15, %v3349_v50 }
0x17ad   :  { %v3386_v24 = vpop.f32.mrf.mxu2 }
0x17ae   :  { %v3387_v20 = vadd.f32 %v5993_v58, %v3386_v24 }
0x17b0   :  { %6183 = vtanh.f32 %v3387_v20  ;;  %v5933_v9 = vmul.f32 -1.442695, %v3387_v20 }
0x17b2   :  { %6185 = vpow2.f32 %v5933_v9 }
0x17b6   :  { %v6184_v11 = vpop.eup %6183 }
0x17b7   :  { %3411 = vrot.lane.b32.xlu2 %v6184_v11, %s6722_s5 }
0x17b8   :  { %v6186_v22 = vpop.eup %6185 }
0x17b9   :  { %v3392_v8 = vadd.f32 1.0, %v6186_v22 }
0x17bb   :  { %6187 = vrcp.f32 %v3392_v8  ;;  %v3404_v40 = vand.u32 2147483648, %v3392_v8  ;;  %vm3398_vm11 = vweird.f32 %v3392_v8  ;;  %v3402_v15 = vand.u32 2147483647, %v3392_v8 }
0x17bd   :  { %v3405_v28 = vor.u32 1.1754944e-38, %v3404_v40  ;;  %vm3403_vm13 = vcmp.eq.f32.partialorder %v3402_v15, 8.507059e+37  ;;  %v8624_v40 = vld [vmem:[%s9808_s8] ss:$0 sm:$0xff] }
0x17c1   :  { %v6188_v60 = vpop.eup %6187 }
0x17c2   :  { %v3394_v25 = vmul.f32 %v6188_v60, %v3392_v8  ;;  %vm3399_vm10 = vweird.f32 %v6188_v60 }
0x17c3   :  { %vm3400_vm12 = vmor %vm3398_vm11, %vm3399_vm10 }
0x17c4   :  { %v3395_v4 = vsub.f32 1.0, %v3394_v25 }
0x17c6   :  { %v3396_v49 = vmul.f32 %v6188_v60, %v3395_v4 }
0x17c8   :  { %v3397_v14 = vadd.f32 %v6188_v60, %v3396_v49 }
0x17ca   :  { %v3401_v17 = vsel %vm3400_vm12, %v6188_v60, %v3397_v14 }
0x17cb   :  { %v3406_v0 = vsel %vm3403_vm13, %v3405_v28, %v3401_v17 }
0x17cc   :  { %v3409_v32 = vmul.f32 %v3406_v0, %v8204_v63  ;;  %v3426_v63 = vld [vmem:[#allocation16] sm:$0xff] }
0x17cd   :  { %3454 = vmatpush.msrb.mxu1 %v3426_v63 }
0x17cf   :  { %4081 = vmatpush.msra.mxu1 %v4064_v5 }
0x17d1   :  { %4082 = vmatpush.msra.mxu1 %v4063_v38 }
0x17d3   :  { %4083 = vmatpush.msra.mxu1 %v4062_v57 }
0x17d5   :  { %4084 = vmatpush.msra.mxu1 %v4061_v56 }
0x1811   :  { %v3412_v54 = vpop.permute.xlu2 %3411 }
0x1812   :  { %v3414_v31 = vmul.f32 %v3412_v54, %v3406_v0 }
0x1814   :  { %3416 = vrot.lane.b32.xlu0 %v3414_v31, %s6723_s24 }
0x1886   :  { %v3417_v26 = vpop.permute.xlu0 %3416 }
0x1887   :  { %v8599_v23 = vadd.f32 %v3417_v26, %v3409_v32 }
0x1889   :  { %6189 = vtanh.f32 %v8599_v23 }
0x188f   :  { %v6190_v46 = vpop.eup %6189 }
0x1890   :  { %3422 = vrot.lane.b32.xlu1 %v6190_v46, %s6722_s5 }
0x1902   :  { %v3423_v29 = vpop.permute.xlu1 %3422 }
0x1903   :  { %v8603_v47 = vmul.f32 %v3423_v29, %v3406_v0 }
0x1905   :  { %3435 = vrot.lane.b32.xlu2 %v8603_v47, %s6723_s24 }
0x195f   :  { %v3436_v35 = vpop.permute.xlu2 %3435 }
0x1960   :  { %5934 = vmatmul.msk.f32.vlgmr.msrb.gmra.mxu1 %vm214_vm0, %v3436_v35  ;;  %5935 = vmatmul.msk.f32.vlgmr.msrb.gmra.mxu3 %vm214_vm0, %v3436_v35 }
0x1968   :  { %5936 = vmatmul.msk.f32.vlgmr.msra.gmra.mxu1 %vm214_vm0, %v3436_v35 }
0x19dd   :  { %v3456_v44 = vpop.f32.mrf.mxu1 }
0x19de   :  { %v3457_v42 = vadd.f32 %v5994_v33, %v3456_v44 }
0x19e0   :  { %3460 = vst [vmem:[#allocation17 + $0x18] sm:$0xff] %v3457_v42 }
0x19e3   :  { %v3521_v37 = vpop.f32.mrf.mxu3 }
0x19e4   :  { %v3522_v43 = vadd.f32 %v5995_v12, %v3521_v37 }
0x19e6   :  { %v3532_v21 = vperm.slane %v3522_v43, 0  ;;  %v3525_v50 = vrot.slane %v3522_v43, 1  ;;  %v3526_v58 = vrot.slane %v3522_v43, 2  ;;  %v3528_v22 = vrot.slane %v3522_v43, 4 }
0x19e7   :  { %v3527_v8 = vrot.slane %v3522_v43, 3  ;;  %v3529_v29 = vrot.slane %v3522_v43, 5 }
0x19e8   :  { %v3549_v24 = vadd.f32 %v3532_v21, %v6946_v36  ;;  %v3548_v20 = vadd.f32 %v3532_v21, %v6936_v30  ;;  %v3533_v11 = vperm.slane %v3525_v50, 0  ;;  %v3534_v9 = vperm.slane %v3526_v58, 0 }
0x19e9   :  { %v3536_v31 = vperm.slane %v3528_v22, 0  ;;  %v3535_v32 = vperm.slane %v3527_v8, 0  ;;  %v3537_v44 = vperm.slane %v3529_v29, 0  ;;  %v3531_v21 = vrot.slane %v3522_v43, 7 }
0x19ea   :  { %v3565_v60 = vmax.f32 %v3549_v24, 0.0  ;;  %v3564_v25 = vmax.f32 %v3548_v20, 0.0  ;;  %v3550_v4 = vadd.f32 %v3533_v11, %v6954_v45  ;;  %v3553_v49 = vadd.f32 %v3534_v9, %v6973_v1 }
0x19eb   :  { %v3551_v14 = vadd.f32 %v3533_v11, %v6960_v51  ;;  %v3552_v54 = vadd.f32 %v3534_v9, %v6967_v59  ;;  %v3556_v6 = vadd.f32 %v3536_v31, %v9849_v19  ;;  %v3554_v63 = vadd.f32 %v3535_v32, %v9850_v61 }
0x19ec   :  { %v3581_v15 = vmul.f32 %v8624_v40, %v3565_v60  ;;  %v3580_v17 = vmul.f32 %v8624_v40, %v3564_v25  ;;  %v3566_v28 = vmax.f32 %v3550_v4, 0.0  ;;  %v3569_v0 = vmax.f32 %v3553_v49, 0.0 }
0x19ed   :  { %v3567_v7 = vmax.f32 %v3551_v14, 0.0  ;;  %v3568_v52 = vmax.f32 %v3552_v54, 0.0  ;;  %v3555_v38 = vadd.f32 %v3535_v32, %v9851_v62  ;;  %v3572_v57 = vmax.f32 %v3556_v6, 0.0 }
0x19ee   :  { %v3599_v26 = vsel %vm214_vm0, %v3581_v15, 0.0  ;;  %v3596_v46 = vsel %vm214_vm0, %v3580_v17, 0.0  ;;  %v3582_v18 = vmul.f32 %v8624_v40, %v3566_v28  ;;  %v3585_v53 = vmul.f32 %v8624_v40, %v3569_v0 }
0x19ef   :  { %3600 = vadd.xlane.f32.xlu1 %v3599_v26  ;;  %3597 = vadd.xlane.f32.xlu0 %v3596_v46  ;;  %v3583_v27 = vmul.f32 %v8624_v40, %v3567_v7  ;;  %v3584_v5 = vmul.f32 %v8624_v40, %v3568_v52  ;;  %v3570_v33 = vmax.f32 %v3554_v63, 0.0  ;;  %v3571_v12 = vmax.f32 %v3555_v38, 0.0 }
0x19f0   :  { %v3602_v48 = vsel %vm214_vm0, %v3582_v18, 0.0  ;;  %v3611_v56 = vsel %vm214_vm0, %v3585_v53, 0.0  ;;  %v3588_v37 = vmul.f32 %v8624_v40, %v3572_v57  ;;  %v3559_v58 = vadd.f32 %v3537_v44, %v9852_v2 }
0x19f1   :  { %3603 = vadd.xlane.f32.xlu2 %v3602_v48  ;;  %v3605_v35 = vsel %vm214_vm0, %v3583_v27, 0.0  ;;  %v3608_v42 = vsel %vm214_vm0, %v3584_v5, 0.0  ;;  %v3586_v50 = vmul.f32 %v8624_v40, %v3570_v33  ;;  %v3557_v24 = vadd.f32 %v3536_v31, %v9853_v55 }
0x19f2   :  { %v3530_v20 = vrot.slane %v3522_v43, 6  ;;  %v3587_v11 = vmul.f32 %v8624_v40, %v3571_v12  ;;  %v3558_v9 = vadd.f32 %v3537_v44, %v9854_v10  ;;  %v3620_v22 = vsel %vm214_vm0, %v3588_v37, 0.0 }
0x19f3   :  { %v3539_v8 = vperm.slane %v3531_v21, 0  ;;  %v3614_v60 = vsel %vm214_vm0, %v3586_v50, 0.0  ;;  %v3575_v25 = vmax.f32 %v3559_v58, 0.0  ;;  %v3573_v4 = vmax.f32 %v3557_v24, 0.0 }
0x19f4   :  { %v3538_v49 = vperm.slane %v3530_v20, 0  ;;  %v3617_v14 = vsel %vm214_vm0, %v3587_v11, 0.0  ;;  %v3574_v15 = vmax.f32 %v3558_v9, 0.0 }
0x19f5   :  { %v3591_v43 = vmul.f32 %v8624_v40, %v3575_v25  ;;  %v3589_v17 = vmul.f32 %v8624_v40, %v3573_v4  ;;  %v3562_v28 = vadd.f32 %v3539_v8, %v9855_v34  ;;  %v3563_v53 = vadd.f32 %v3539_v8, %v9858_v3 }
0x19f6   :  { %v3560_v54 = vadd.f32 %v3538_v49, %v9856_v13  ;;  %v3590_v0 = vmul.f32 %v8624_v40, %v3574_v15  ;;  %v3561_v31 = vadd.f32 %v3538_v49, %v9857_v16 }
0x19f7   :  { %3612 = vadd.xlane.f32.xlu1 %v3611_v56  ;;  %3606 = vadd.xlane.f32.xlu0 %v3605_v35  ;;  %v3629_v32 = vsel %vm214_vm0, %v3591_v43, 0.0  ;;  %v3623_v26 = vsel %vm214_vm0, %v3589_v17, 0.0  ;;  %v3578_v46 = vmax.f32 %v3562_v28, 0.0  ;;  %v3579_v5 = vmax.f32 %v3563_v53, 0.0 }
0x19f8   :  { %v3576_v18 = vmax.f32 %v3560_v54, 0.0  ;;  %v3626_v7 = vsel %vm214_vm0, %v3590_v0, 0.0  ;;  %v3577_v48 = vmax.f32 %v3561_v31, 0.0 }
0x19f9   :  { %3609 = vadd.xlane.f32.xlu2 %v3608_v42  ;;  %v3594_v52 = vmul.f32 %v8624_v40, %v3578_v46  ;;  %v3595_v57 = vmul.f32 %v8624_v40, %v3579_v5 }
0x19fa   :  { %v3592_v6 = vmul.f32 %v8624_v40, %v3576_v18  ;;  %v3593_v27 = vmul.f32 %v8624_v40, %v3577_v48 }
0x19fb   :  { %v3638_v63 = vsel %vm214_vm0, %v3594_v52, 0.0  ;;  %v3641_v56 = vsel %vm214_vm0, %v3595_v57, 0.0 }
0x19fc   :  { %v3632_v29 = vsel %vm214_vm0, %v3592_v6, 0.0  ;;  %v3635_v38 = vsel %vm214_vm0, %v3593_v27, 0.0 }
0x19ff   :  { %3621 = vadd.xlane.f32.xlu1 %v3620_v22  ;;  %3615 = vadd.xlane.f32.xlu0 %v3614_v60 }
0x1a01   :  { %3618 = vadd.xlane.f32.xlu2 %v3617_v14 }
0x1a07   :  { %3630 = vadd.xlane.f32.xlu1 %v3629_v32  ;;  %3624 = vadd.xlane.f32.xlu0 %v3623_v26 }
0x1a09   :  { %3627 = vadd.xlane.f32.xlu2 %v3626_v7 }
0x1a0f   :  { %3639 = vadd.xlane.f32.xlu1 %v3638_v63  ;;  %3633 = vadd.xlane.f32.xlu0 %v3632_v29 }
0x1a11   :  { %3636 = vadd.xlane.f32.xlu2 %v3635_v38 }
0x1a17   :  { %3642 = vadd.xlane.f32.xlu0 %v3641_v56 }
0x1a62   :  { %v3601_v35 = vpop.xlane.xlu1 %3600  ;;  %v3598_v33 = vpop.xlane.xlu0 %3597 }
0x1a63   :  { %v3661_v9 = vperm.slane %v3601_v35, %v7071_v41  ;;  %v3660_v22 = vperm.slane %v3598_v33, %v7066_v39 }
0x1a64   :  { %v3604_v44 = vpop.xlane.xlu2 %3603 }
0x1a65   :  { %v3663_v8 = vperm.slane %v3604_v44, %v7066_v39  ;;  %v3662_v43 = vsel %vm506_vm1, %v3661_v9, %v3660_v22 }
0x1a6a   :  { %v3613_v42 = vpop.xlane.xlu1 %3612  ;;  %v3607_v12 = vpop.xlane.xlu0 %3606 }
0x1a6b   :  { %v3664_v40 = vperm.slane %v3607_v12, %v7071_v41  ;;  %v3667_v49 = vperm.slane %v3613_v42, %v7071_v41 }
0x1a6c   :  { %v3610_v37 = vpop.xlane.xlu2 %3609 }
0x1a6d   :  { %v3666_v60 = vperm.slane %v3610_v37, %v7066_v39  ;;  %v3665_v25 = vsel %vm506_vm1, %v3664_v40, %v3663_v8 }
0x1a6e   :  { %v3684_v28 = vsel %vm529_vm2, %v3665_v25, %v3662_v43 }
0x1a6f   :  { %v3668_v54 = vsel %vm506_vm1, %v3667_v49, %v3666_v60 }
0x1a70   :  { %v3685_v7 = vsel %vm531_vm3, %v3668_v54, %v3684_v28 }
0x1a72   :  { %v8669_v21 = vpop.xlane.xlu0 %3615  ;;  %v8671_v50 = vpop.xlane.xlu1 %3621 }
0x1a73   :  { %v3669_v17 = vperm.slane %v8669_v21, %v7066_v39  ;;  %v3672_v0 = vperm.slane %v8671_v50, %v7066_v39 }
0x1a74   :  { %v8673_v58 = vpop.xlane.xlu2 %3618 }
0x1a75   :  { %v3670_v4 = vperm.slane %v8673_v58, %v7071_v41 }
0x1a77   :  { %v3671_v32 = vsel %vm506_vm1, %v3670_v4, %v3669_v17 }
0x1a78   :  { %v3686_v52 = vsel %vm533_vm4, %v3671_v32, %v3685_v7 }
0x1a7a   :  { %v8675_v24 = vpop.xlane.xlu0 %3624  ;;  %v8680_v11 = vpop.xlane.xlu1 %3630 }
0x1a7b   :  { %v3673_v14 = vperm.slane %v8675_v24, %v7071_v41  ;;  %v3676_v48 = vperm.slane %v8680_v11, %v7071_v41 }
0x1a7c   :  { %v8677_v20 = vpop.xlane.xlu2 %3627 }
0x1a7d   :  { %v3675_v26 = vperm.slane %v8677_v20, %v7066_v39  ;;  %v3674_v46 = vsel %vm506_vm1, %v3673_v14, %v3672_v0 }
0x1a7e   :  { %v3687_v63 = vsel %vm535_vm5, %v3674_v46, %v3686_v52 }
0x1a7f   :  { %v3677_v27 = vsel %vm506_vm1, %v3676_v48, %v3675_v26 }
0x1a80   :  { %v3688_v56 = vsel %vm537_vm6, %v3677_v27, %v3687_v63 }
0x1a82   :  { %v8692_v15 = vpop.xlane.xlu0 %3633  ;;  %v8713_v6 = vpop.xlane.xlu1 %3639 }
0x1a83   :  { %v3678_v53 = vperm.slane %v8692_v15, %v7066_v39  ;;  %v3681_v38 = vperm.slane %v8713_v6, %v7066_v39 }
0x1a84   :  { %v8701_v31 = vpop.xlane.xlu2 %3636 }
0x1a85   :  { %v3679_v18 = vperm.slane %v8701_v31, %v7071_v41 }
0x1a87   :  { %v3680_v5 = vsel %vm506_vm1, %v3679_v18, %v3678_v53 }
0x1a88   :  { %v3689_v9 = vsel %vm539_vm7, %v3680_v5, %v3688_v56 }
0x1a8a   :  { %v8719_v29 = vpop.xlane.xlu0 %3642 }
0x1a8b   :  { %v3682_v57 = vperm.slane %v8719_v29, %v7071_v41 }
0x1a8d   :  { %v3683_v40 = vsel %vm506_vm1, %v3682_v57, %v3681_v38 }
0x1a8e   :  { %v3690_v22 = vsel %vm541_vm8, %v3683_v40, %v3689_v9 }
0x1a8f   :  { %v3692_v8 = vsel %vm544_vm9, %v3690_v22, -inf }
0x1a90   :  { %3693 = vmax.xlane.f32.xlu2 %v3692_v8 }
0x1b03   :  { %v8731_v60 = vpop.xlane.xlu2 %3693 }
0x1b04   :  { %v3696_v25 = vperm.slane %v8731_v60, 0  ;;  %v3697_v4 = vperm.slane %v8731_v60, 1  ;;  %v3698_v17 = vperm.slane %v8731_v60, 2  ;;  %v3700_v18 = vperm.slane %v8731_v60, 4 }
0x1b05   :  { %v3699_v48 = vperm.slane %v8731_v60, 3  ;;  %v3701_v27 = vperm.slane %v8731_v60, 5  ;;  %v3703_v9 = vperm.slane %v8731_v60, 7  ;;  %v3702_v8 = vperm.slane %v8731_v60, 6 }
0x1b06   :  { %v3712_v49 = vsub.f32 %v3598_v33, %v3696_v25  ;;  %v3713_v14 = vsub.f32 %v3601_v35, %v3696_v25  ;;  %v3714_v43 = vsub.f32 %v3604_v44, %v3697_v4  ;;  %v3717_v32 = vsub.f32 %v3613_v42, %v3698_v17 }
0x1b07   :  { %v3715_v26 = vsub.f32 %v3607_v12, %v3697_v4  ;;  %v3716_v46 = vsub.f32 %v3610_v37, %v3698_v17  ;;  %v3720_v42 = vsub.f32 %v8671_v50, %v3700_v18  ;;  %v3718_v12 = vsub.f32 %v8669_v21, %v3699_v48 }
0x1b08   :  { %v3728_v28 = vmul.f32 1.442695, %v3712_v49  ;;  %v3730_v54 = vmul.f32 1.442695, %v3713_v14  ;;  %v3732_v0 = vmul.f32 1.442695, %v3714_v43  ;;  %v3719_v37 = vsub.f32 %v8673_v58, %v3699_v48 }
0x1b09   :  { %v3738_v7 = vmul.f32 1.442695, %v3717_v32  ;;  %v3734_v52 = vmul.f32 1.442695, %v3715_v26  ;;  %v3736_v35 = vmul.f32 1.442695, %v3716_v46  ;;  %v3723_v21 = vsub.f32 %v8680_v11, %v3701_v27 }
0x1b0a   :  { %6191 = vpow2.f32 %v3732_v0  ;;  %v3744_v63 = vmul.f32 1.442695, %v3720_v42  ;;  %v3740_v5 = vmul.f32 1.442695, %v3718_v12  ;;  %v3742_v57 = vmul.f32 1.442695, %v3719_v37 }
0x1b0b   :  { %6193 = vpow2.f32 %v3730_v54  ;;  %v3721_v58 = vsub.f32 %v8675_v24, %v3700_v18  ;;  %v3722_v40 = vsub.f32 %v8677_v20, %v3701_v27  ;;  %v3750_v22 = vmul.f32 1.442695, %v3723_v21 }
0x1b0c   :  { %6195 = vpow2.f32 %v3728_v28  ;;  %v3726_v14 = vsub.f32 %v8713_v6, %v3703_v9  ;;  %v3724_v20 = vsub.f32 %v8692_v15, %v3702_v8  ;;  %v3725_v60 = vsub.f32 %v8701_v31, %v3702_v8 }
0x1b0d   :  { %6197 = vpow2.f32 %v3738_v7  ;;  %v3746_v25 = vmul.f32 1.442695, %v3721_v58  ;;  %v3748_v11 = vmul.f32 1.442695, %v3722_v40  ;;  %v3727_v15 = vsub.f32 %v8719_v29, %v3703_v9 }
0x1b0e   :  { %6199 = vpow2.f32 %v3734_v52  ;;  %v3756_v43 = vmul.f32 1.442695, %v3726_v14  ;;  %v3752_v17 = vmul.f32 1.442695, %v3724_v20  ;;  %v3754_v54 = vmul.f32 1.442695, %v3725_v60 }
0x1b0f   :  { %6201 = vpow2.f32 %v3736_v35  ;;  %v3758_v31 = vmul.f32 1.442695, %v3727_v15 }
0x1b10   :  { %v8738_v33 = vpop.eup %6191  ;;  %6203 = vpow2.f32 %v3744_v63 }
0x1b11   :  { %v8740_v44 = vpop.eup %6193  ;;  %3783 = vperm.xlu2 %5974, %v8738_v33   ;;  %6205 = vpow2.f32 %v3740_v5 }
0x1b12   :  { %v8743_v53 = vpop.eup %6195  ;;  %3780 = vperm.xlu0 %5975, %v8740_v44   ;;  %6207 = vpow2.f32 %v3742_v57 }
0x1b13   :  { %3777 = vperm.xlu1 %5976, %v8743_v53   ;;  %v8751_v38 = vpop.eup %6197  ;;  %6209 = vpow2.f32 %v3750_v22 }
0x1b14   :  { %v8753_v56 = vpop.eup %6199  ;;  %6211 = vpow2.f32 %v3746_v25 }
0x1b15   :  { %v8756_v50 = vpop.eup %6201  ;;  %6213 = vpow2.f32 %v3748_v11 }
0x1b16   :  { %v8765_v4 = vpop.eup %6203  ;;  %6215 = vpow2.f32 %v3756_v43 }
0x1b17   :  { %v8767_v49 = vpop.eup %6205  ;;  %6217 = vpow2.f32 %v3752_v17 }
0x1b18   :  { %v8770_v24 = vpop.eup %6207  ;;  %6219 = vpow2.f32 %v3754_v54 }
0x1b19   :  { %3792 = vperm.xlu2 %5974, %v8751_v38   ;;  %v8777_v28 = vpop.eup %6209  ;;  %6221 = vpow2.f32 %v3758_v31 }
0x1b1a   :  { %3786 = vperm.xlu0 %5975, %v8753_v56   ;;  %v8779_v0 = vpop.eup %6211 }
0x1b1b   :  { %3789 = vperm.xlu1 %5976, %v8756_v50   ;;  %v8782_v6 = vpop.eup %6213 }
0x1b1c   :  { %v8787_v32 = vpop.eup %6215 }
0x1b1d   :  { %v8789_v26 = vpop.eup %6217 }
0x1b1e   :  { %v8792_v46 = vpop.eup %6219 }
0x1b1f   :  { %v8796_v18 = vpop.eup %6221 }
0x1b21   :  { %3801 = vperm.xlu2 %5974, %v8765_v4  }
0x1b22   :  { %3795 = vperm.xlu0 %5975, %v8767_v49  }
0x1b23   :  { %3798 = vperm.xlu1 %5976, %v8770_v24  }
0x1b29   :  { %3810 = vperm.xlu2 %5974, %v8777_v28  }
0x1b2a   :  { %3804 = vperm.xlu0 %5975, %v8779_v0  }
0x1b2b   :  { %3807 = vperm.xlu1 %5976, %v8782_v6  }
0x1b31   :  { %3819 = vperm.xlu2 %5974, %v8787_v32  }
0x1b32   :  { %3813 = vperm.xlu0 %5975, %v8789_v26  }
0x1b33   :  { %3816 = vperm.xlu1 %5976, %v8792_v46  }
0x1b3a   :  { %3822 = vperm.xlu0 %5975, %v8796_v18  }
0x1b6b   :  { %v3784_v29 = vpop.permute.xlu2 %3783 }
0x1b6c   :  { %v3827_v58 = vperm.slane %v3784_v29, %v7066_v39 }
0x1b73   :  { %v3793_v52 = vpop.permute.xlu2 %3792 }
0x1b74   :  { %v3831_v14 = vperm.slane %v3793_v52, %v7071_v41 }
0x1b7b   :  { %v3802_v27 = vpop.permute.xlu2 %3801 }
0x1b7c   :  { %v3836_v54 = vperm.slane %v3802_v27, %v7066_v39 }
0x1b83   :  { %v3811_v21 = vpop.permute.xlu2 %3810 }
0x1b84   :  { %v3781_v7 = vpop.permute.xlu0 %3780 }
0x1b85   :  { %v3778_v48 = vpop.permute.xlu1 %3777  ;;  %v3825_v40 = vperm.slane %v3781_v7, %v7071_v41 }
0x1b86   :  { %v3824_v9 = vperm.slane %v3778_v48, %v7066_v39 }
0x1b88   :  { %v3826_v43 = vsel %vm506_vm1, %v3825_v40, %v3824_v9 }
0x1b8c   :  { %v3787_v35 = vpop.permute.xlu0 %3786 }
0x1b8d   :  { %v3790_v42 = vpop.permute.xlu1 %3789  ;;  %v3828_v57 = vperm.slane %v3787_v35, %v7071_v41 }
0x1b8e   :  { %v3830_v22 = vperm.slane %v3790_v42, %v7066_v39  ;;  %v3840_v42 = vperm.slane %v3811_v21, %v7071_v41 }
0x1b8f   :  { %v3829_v8 = vsel %vm506_vm1, %v3828_v57, %v3827_v58 }
0x1b90   :  { %v3848_v15 = vsel %vm529_vm2, %v3829_v8, %v3826_v43  ;;  %v3832_v31 = vsel %vm506_vm1, %v3831_v14, %v3830_v22 }
0x1b94   :  { %v3796_v12 = vpop.permute.xlu0 %3795 }
0x1b95   :  { %v3799_v37 = vpop.permute.xlu1 %3798  ;;  %v3833_v25 = vperm.slane %v3796_v12, %v7066_v39  ;;  %v3849_v12 = vsel %vm531_vm3, %v3832_v31, %v3848_v15 }
0x1b96   :  { %v3834_v11 = vperm.slane %v3799_v37, %v7071_v41  ;;  %v3820_v37 = vpop.permute.xlu2 %3819 }
0x1b97   :  { %v3845_v40 = vperm.slane %v3820_v37, %v7066_v39 }
0x1b98   :  { %v3835_v29 = vsel %vm506_vm1, %v3834_v11, %v3833_v25 }
0x1b99   :  { %v3850_v27 = vsel %vm533_vm4, %v3835_v29, %v3849_v12 }
0x1b9c   :  { %v3805_v63 = vpop.permute.xlu0 %3804 }
0x1b9d   :  { %v3808_v5 = vpop.permute.xlu1 %3807  ;;  %v3837_v20 = vperm.slane %v3805_v63, %v7071_v41 }
0x1b9e   :  { %v3839_v7 = vperm.slane %v3808_v5, %v7066_v39 }
0x1b9f   :  { %v3838_v48 = vsel %vm506_vm1, %v3837_v20, %v3836_v54 }
0x1ba0   :  { %v3851_v63 = vsel %vm535_vm5, %v3838_v48, %v3850_v27  ;;  %v3841_v57 = vsel %vm506_vm1, %v3840_v42, %v3839_v7 }
0x1ba1   :  { %v3852_v22 = vsel %vm537_vm6, %v3841_v57, %v3851_v63 }
0x1ba4   :  { %v3814_v60 = vpop.permute.xlu0 %3813 }
0x1ba5   :  { %v3817_v17 = vpop.permute.xlu1 %3816  ;;  %v3842_v52 = vperm.slane %v3814_v60, %v7066_v39 }
0x1ba6   :  { %v3843_v35 = vperm.slane %v3817_v17, %v7071_v41 }
0x1ba8   :  { %v3844_v58 = vsel %vm506_vm1, %v3843_v35, %v3842_v52 }
0x1ba9   :  { %v3853_v8 = vsel %vm539_vm7, %v3844_v58, %v3852_v22  ;;  %v6382_v22 = vld [vmem:[#allocation2 + $0x18] sm:$0xff] }
0x1bac   :  { %v3823_v5 = vpop.permute.xlu0 %3822 }
0x1bad   :  { %v3846_v9 = vperm.slane %v3823_v5, %v7071_v41 }
0x1baf   :  { %v3847_v21 = vsel %vm506_vm1, %v3846_v9, %v3845_v40 }
0x1bb0   :  { %v3854_v25 = vsel %vm541_vm8, %v3847_v21, %v3853_v8  ;;  %v6383_v8 = vld [vmem:[#allocation2 + $0x8] sm:$0xff] }
0x1bb1   :  { %v3856_v11 = vsel %vm544_vm9, %v3854_v25, 0.0 }
0x1bb2   :  { %3857 = vadd.xlane.f32.xlu1 %v3856_v11  ;;  %v6384_v11 = vld [vmem:[#allocation2 + $0x10] sm:$0xff] }
0x1c25   :  { %v3858_v14 = vpop.xlane.xlu1 %3857 }
0x1c26   :  { %6223 = vrcp.f32 %v3858_v14 }
0x1c2c   :  { %v6224_v20 = vpop.eup %6223 }
0x1c2d   :  { %v3866_v60 = vperm.slane %v6224_v20, 5  ;;  %v3861_v43 = vperm.slane %v6224_v20, 0  ;;  %v3862_v31 = vperm.slane %v6224_v20, 1  ;;  %v3863_v48 = vperm.slane %v6224_v20, 2 }
0x1c2e   :  { %v3867_v42 = vperm.slane %v6224_v20, 6  ;;  %v3868_v12 = vperm.slane %v6224_v20, 7 }
0x1c2f   :  { %v3887_v17 = vmul.f32 %v8782_v6, %v3866_v60  ;;  %v3878_v54 = vmul.f32 %v8740_v44, %v3861_v43  ;;  %v3877_v15 = vmul.f32 %v8743_v53, %v3861_v43  ;;  %v3880_v29 = vmul.f32 %v8753_v56, %v3862_v31  ;;  %v6386_v43 = vld [vmem:[#allocation2 + $0x28] sm:$0xff] }
0x1c30   :  { %v3879_v7 = vmul.f32 %v8738_v33, %v3862_v31  ;;  %v3882_v6 = vmul.f32 %v8751_v38, %v3863_v48  ;;  %v3881_v44 = vmul.f32 %v8756_v50, %v3863_v48  ;;  %v3864_v53 = vperm.slane %v6224_v20, 3 }
0x1c31   :  { %3945 = vperm.xlu1 %5976, %v3887_v17   ;;  %3900 = vperm.xlu0 %5975, %v3878_v54   ;;  %v3865_v33 = vperm.slane %v6224_v20, 4  ;;  %v3889_v38 = vmul.f32 %v8789_v26, %v3867_v42  ;;  %v3888_v50 = vmul.f32 %v8777_v28, %v3866_v60  ;;  %v5996_v28 = vld [vmem:[%s9810_s10] ss:$0 sm:$0xff]  ;;  %v4086_v26 = vpop.f32.mrf.mxu1 }
0x1c32   :  { %3895 = vperm.xlu2 %5974, %v3877_v15   ;;  %v3884_v52 = vmul.f32 %v8770_v24, %v3864_v53  ;;  %v3883_v35 = vmul.f32 %v8767_v49, %v3864_v53  ;;  %v3891_v24 = vmul.f32 %v8787_v32, %v3868_v12  ;;  %v3890_v49 = vmul.f32 %v8792_v46, %v3867_v42  ;;  %v6385_v20 = vld [vmem:[#allocation2] sm:$0xff] }
0x1c33   :  { %v3886_v56 = vmul.f32 %v8779_v0, %v3865_v33  ;;  %v3892_v0 = vmul.f32 %v8796_v18, %v3868_v12  ;;  %v4087_v63 = vadd.f32 %v5996_v28, %v4086_v26  ;;  %v6390_v28 = vld [vmem:[#allocation2 + $0x58] sm:$0xff] }
0x1c35   :  { %v5937_v46 = vmul.f32 -1.442695, %v4087_v63 }
0x1c37   :  { %6225 = vpow2.f32 %v5937_v46 }
0x1c39   :  { %4131 = vrot.lane.b32.xlu1 %v8603_v47, %s6724_s11  ;;  %3910 = vperm.xlu0 %5975, %v3880_v29   ;;  %v3885_v47 = vmul.f32 %v8765_v4, %v3865_v33  ;;  %v6387_v29 = vld [vmem:[#allocation2 + $0x20] sm:$0xff]  ;;  %v6389_v33 = vld [vmem:[#allocation2 + $0x30] sm:$0xff] }
0x1c3a   :  { %3905 = vperm.xlu2 %5974, %v3879_v7  }
0x1c3d   :  { %v6226_v58 = vpop.eup %6225 }
0x1c3e   :  { %v8868_v9 = vadd.f32 1.0, %v6226_v58  ;;  %v6391_v58 = vld [vmem:[#allocation2 + $0x40] sm:$0xff] }
0x1c40   :  { %6227 = vrcp.f32 %v8868_v9  ;;  %vm4098_vm11 = vweird.f32 %v8868_v9 }
0x1c41   :  { %3920 = vperm.xlu0 %5975, %v3882_v6   ;;  %v6388_v6 = vld [vmem:[#allocation2 + $0x38] sm:$0xff] }
0x1c42   :  { %3915 = vperm.xlu2 %5974, %v3881_v44  }
0x1c49   :  { %3930 = vperm.xlu0 %5975, %v3884_v52   ;;  %v8885_v52 = vpop.eup %6227 }
0x1c4a   :  { %3925 = vperm.xlu2 %5974, %v3883_v35   ;;  %vm4099_vm10 = vweird.f32 %v8885_v52 }
0x1c4b   :  { %vm4100_vm12 = vmor %vm4098_vm11, %vm4099_vm10 }
0x1c51   :  { %3940 = vperm.xlu0 %5975, %v3886_v56  }
0x1c52   :  { %3935 = vperm.xlu2 %5974, %v3885_v47  }
0x1c59   :  { %3955 = vperm.xlu0 %5975, %v3889_v38  }
0x1c5a   :  { %3950 = vperm.xlu2 %5974, %v3888_v50  }
0x1c61   :  { %3965 = vperm.xlu0 %5975, %v3891_v24  }
0x1c62   :  { %3960 = vperm.xlu2 %5974, %v3890_v49   ;;  %v8896_v49 = vmul.f32 %v8885_v52, %v8868_v9 }
0x1c6a   :  { %3970 = vperm.xlu2 %5974, %v3892_v0  }
0x1c8c   :  { %v8849_v4 = vpop.permute.xlu2 %3895 }
0x1c8d   :  { %v3973_v60 = vmul.f32 %v6385_v20, %v8849_v4  ;;  %v6393_v20 = vld [vmem:[#allocation2 + $0x48] sm:$0xff] }
0x1c8f   :  { %v3989_v35 = vsel %vm214_vm0, %v3973_v60, 0.0 }
0x1c94   :  { %v8851_v37 = vpop.permute.xlu2 %3905 }
0x1c95   :  { %v3975_v14 = vmul.f32 %v6384_v11, %v8851_v37 }
0x1c97   :  { %v3998_v53 = vsel %vm214_vm0, %v3975_v14, 0.0 }
0x1c9c   :  { %v8853_v27 = vpop.permute.xlu2 %3915 }
0x1c9d   :  { %v3977_v7 = vmul.f32 %v6387_v29, %v8853_v27 }
0x1c9f   :  { %v4007_v50 = vsel %vm214_vm0, %v3977_v7, 0.0 }
0x1ca3   :  { %v8858_v32 = vpop.permute.xlu0 %3900  ;;  %v8891_v12 = vpop.permute.xlu1 %3945 }
0x1ca4   :  { %v8860_v57 = vpop.permute.xlu2 %3925  ;;  %v3974_v25 = vmul.f32 %v6383_v8, %v8858_v32 }
0x1ca5   :  { %v3979_v56 = vmul.f32 %v6389_v33, %v8860_v57 }
0x1ca6   :  { %v3990_v48 = vsel %vm214_vm0, %v3974_v25, 0.0 }
0x1ca7   :  { %v3991_v38 = vadd.f32 %v3990_v48, %v3989_v35  ;;  %v4016_v63 = vsel %vm214_vm0, %v3979_v56, 0.0 }
0x1ca9   :  { %v3992_v25 = vrot.slane %v3991_v38, 4 }
0x1cab   :  { %v8862_v18 = vpop.permute.xlu0 %3910  ;;  %v3993_v33 = vadd.f32 %v3992_v25, %v3991_v38 }
0x1cac   :  { %v8864_v5 = vpop.permute.xlu2 %3935  ;;  %v3976_v21 = vmul.f32 %v6382_v22, %v8862_v18 }
0x1cad   :  { %v3981_v22 = vmul.f32 %v6391_v58, %v8864_v5 }
0x1cae   :  { %v3999_v54 = vsel %vm214_vm0, %v3976_v21, 0.0  ;;  %v6392_v21 = vld [vmem:[#allocation2 + $0x50] sm:$0xff] }
0x1caf   :  { %v4000_v47 = vadd.f32 %v3999_v54, %v3998_v53  ;;  %v3983_v8 = vmul.f32 %v6392_v21, %v8891_v12  ;;  %v4145_v21 = vld [vmem:[#allocation14 + $0x48] sm:$0xff] }
0x1cb1   :  { %v4001_v46 = vrot.slane %v4000_v47, 4  ;;  %v4034_v35 = vsel %vm214_vm0, %v3983_v8, 0.0  ;;  %v3994_v8 = vrot.slane %v3993_v33, 2 }
0x1cb3   :  { %v8866_v40 = vpop.permute.xlu0 %3920  ;;  %v4002_v48 = vadd.f32 %v4001_v46, %v4000_v47  ;;  %v4253_v47 = vperm.slane %v8853_v27, %v7066_v39 }
0x1cb4   :  { %v3978_v17 = vmul.f32 %v6386_v43, %v8866_v40  ;;  %v8877_v15 = vpop.permute.xlu2 %3950  ;;  %v4095_v43 = vsub.f32 1.0, %v8896_v49  ;;  %v4254_v38 = vperm.slane %v8866_v40, %v7071_v41  ;;  %v4259_v40 = vperm.slane %v8864_v5, %v7066_v39 }
0x1cb5   :  { %v3984_v26 = vmul.f32 %v6390_v28, %v8877_v15  ;;  %v4146_v28 = vld [vmem:[#allocation14 + $0x50] sm:$0xff]  ;;  %v4003_v58 = vrot.slane %v4002_v48, 2 }
0x1cb6   :  { %v4008_v42 = vsel %vm214_vm0, %v3978_v17, 0.0  ;;  %v4248_v17 = vperm.slane %v8858_v32, %v7071_v41  ;;  %v4247_v32 = vperm.slane %v8849_v4, %v7066_v39 }
0x1cb7   :  { %v4009_v0 = vadd.f32 %v4008_v42, %v4007_v50  ;;  %v4035_v29 = vsel %vm214_vm0, %v3984_v26, 0.0  ;;  %v4250_v50 = vperm.slane %v8851_v37, %v7066_v39  ;;  %v4256_v26 = vperm.slane %v8860_v57, %v7066_v39 }
0x1cb8   :  { %v4249_v25 = vsel %vm506_vm1, %v4248_v17, %v4247_v32 }
0x1cb9   :  { %v4010_v54 = vrot.slane %v4009_v0, 4 }
0x1cbb   :  { %v8879_v31 = vpop.permute.xlu0 %3930 }
0x1cbc   :  { %v3980_v44 = vmul.f32 %v6388_v6, %v8879_v31  ;;  %v8906_v7 = vpop.permute.xlu2 %3960  ;;  %v4251_v6 = vperm.slane %v8862_v18, %v7071_v41  ;;  %v4147_v18 = vld [vmem:[#allocation14 + $0x58] sm:$0xff]  ;;  %v4257_v37 = vperm.slane %v8879_v31, %v7071_v41  ;;  %v4144_v31 = vld [vmem:[#allocation14 + $0x40] sm:$0xff] }
0x1cbd   :  { %4159 = vmatpush.msra.mxu3 %v4147_v18 }
0x1cbe   :  { %v4017_v24 = vsel %vm214_vm0, %v3980_v44, 0.0  ;;  %v4025_v44 = vsel %vm214_vm0, %v3981_v22, 0.0  ;;  %v4252_v4 = vsel %vm506_vm1, %v4251_v6, %v4250_v50  ;;  %v6394_v22 = vld [vmem:[#allocation2 + $0x68] sm:$0xff]  ;;  %v4258_v17 = vsel %vm506_vm1, %v4257_v37, %v4256_v26 }
0x1cbf   :  { %v4018_v11 = vadd.f32 %v4017_v24, %v4016_v63  ;;  %v4036_v24 = vadd.f32 %v4035_v29, %v4034_v35  ;;  %v4011_v63 = vadd.f32 %v4010_v54, %v4009_v0  ;;  %v3986_v27 = vmul.f32 %v6394_v22, %v8906_v7  ;;  %4160 = vmatpush.msra.mxu3 %v4146_v28  ;;  %v6395_v29 = vld [vmem:[#allocation2 + $0x60] sm:$0xff] }
0x1cc0   :  { %v4255_v35 = vsel %vm506_vm1, %v4254_v38, %v4253_v47  ;;  %v4142_v38 = vld [vmem:[#allocation14 + $0x30] sm:$0xff]  ;;  %v4266_v37 = vperm.slane %v8906_v7, %v7071_v41 }
0x1cc1   :  { %v4019_v56 = vrot.slane %v4018_v11, 4  ;;  %4161 = vmatpush.msra.mxu3 %v4145_v21 }
0x1cc3   :  { %v3941_v14 = vpop.permute.xlu0 %3940  ;;  %v4020_v57 = vadd.f32 %v4019_v56, %v4018_v11  ;;  %v4263_v11 = vperm.slane %v8877_v15, %v7071_v41  ;;  %v4044_v56 = vsel %vm214_vm0, %v3986_v27, 0.0  ;;  %4162 = vmatpush.msra.mxu3 %v4144_v31  ;;  %v4262_v15 = vperm.slane %v8891_v12, %v7066_v39  ;;  %v6397_v31 = vld [vmem:[#allocation2 + $0x70] sm:$0xff] }
0x1cc4   :  { %v3982_v60 = vmul.f32 %v6393_v20, %v3941_v14  ;;  %v4260_v0 = vperm.slane %v3941_v14, %v7071_v41  ;;  %v4004_v14 = vadd.f32 %v4003_v58, %v4002_v48  ;;  %v3971_v18 = vpop.permute.xlu2 %3970  ;;  %v3995_v27 = vadd.f32 %v3994_v8, %v3993_v33  ;;  %v4140_v8 = vld [vmem:[#allocation14 + $0x20] sm:$0xff] }
0x1cc5   :  { %v4021_v32 = vrot.slane %v4020_v57, 2  ;;  %v4264_v21 = vsel %vm506_vm1, %v4263_v11, %v4262_v15  ;;  %v4269_v7 = vperm.slane %v3971_v18, %v7071_v41 }
0x1cc6   :  { %v4026_v53 = vsel %vm214_vm0, %v3982_v60, 0.0  ;;  %v4037_v60 = vrot.slane %v4036_v24, 4  ;;  %v4261_v50 = vsel %vm506_vm1, %v4260_v0, %v4259_v40  ;;  %v6396_v0 = vld [vmem:[#allocation2 + $0x78] sm:$0xff]  ;;  %v4005_v40 = vrot.slane %v4004_v14, 1 }
0x1cc7   :  { %v4027_v42 = vadd.f32 %v4026_v53, %v4025_v44  ;;  %v4271_v44 = vsel %vm529_vm2, %v4252_v4, %v4249_v25  ;;  %v4012_v53 = vrot.slane %v4011_v63, 2  ;;  %v3988_v12 = vmul.f32 %v6396_v0, %v3971_v18 }
0x1cc8   :  { %v4272_v48 = vsel %vm531_vm3, %v4255_v35, %v4271_v44  ;;  %v4038_v47 = vadd.f32 %v4037_v60, %v4036_v24  ;;  %v4022_v24 = vadd.f32 %v4021_v32, %v4020_v57  ;;  %v3996_v32 = vrot.slane %v3995_v27, 1 }
0x1cc9   :  { %v4028_v46 = vrot.slane %v4027_v42, 4  ;;  %v4013_v58 = vadd.f32 %v4012_v53, %v4011_v63  ;;  %v4273_v4 = vsel %vm533_vm4, %v4258_v17, %v4272_v48  ;;  %v4053_v57 = vsel %vm214_vm0, %v3988_v12, 0.0 }
0x1cca   :  { %v4274_v25 = vsel %vm535_vm5, %v4261_v50, %v4273_v4  ;;  %v4039_v35 = vrot.slane %v4038_v47, 2  ;;  %v4023_v50 = vrot.slane %v4022_v24, 1  ;;  %v3997_v0 = vadd.f32 %v3996_v32, %v3995_v27 }
0x1ccb   :  { %v3956_v20 = vpop.permute.xlu0 %3955  ;;  %v4029_v54 = vadd.f32 %v4028_v46, %v4027_v42  ;;  %v4143_v42 = vld [vmem:[#allocation14 + $0x38] sm:$0xff]  ;;  %v4014_v53 = vrot.slane %v4013_v58, 1  ;;  %v4275_v17 = vsel %vm537_vm6, %v4264_v21, %v4274_v25  ;;  %v4096_v21 = vmul.f32 %v8885_v52, %v4095_v43  ;;  %v4137_v25 = vld [vmem:[#allocation14 + $0x8] sm:$0xff] }
0x1ccc   :  { %v3985_v6 = vmul.f32 %v6395_v29, %v3956_v20  ;;  %v4265_v46 = vperm.slane %v3956_v20, %v7066_v39  ;;  %4163 = vmatpush.msra.mxu3 %v4143_v42  ;;  %v4141_v20 = vld [vmem:[#allocation14 + $0x28] sm:$0xff]  ;;  %v4139_v42 = vld [vmem:[#allocation14 + $0x18] sm:$0xff]  ;;  %v4040_v4 = vadd.f32 %v4039_v35, %v4038_v47  ;;  %v4024_v12 = vadd.f32 %v4023_v50, %v4022_v24 }
0x1ccd   :  { %v4030_v26 = vrot.slane %v4029_v54, 2  ;;  %v4104_v27 = vand.u32 2147483648, %v8868_v9  ;;  %v4102_v24 = vand.u32 2147483647, %v8868_v9  ;;  %v4136_v9 = vld [vmem:[#allocation14] sm:$0xff] }
0x1cce   :  { %v4043_v5 = vsel %vm214_vm0, %v3985_v6, 0.0  ;;  %v4267_v63 = vsel %vm506_vm1, %v4266_v37, %v4265_v46  ;;  %4164 = vmatpush.msra.mxu3 %v4142_v38  ;;  %v4006_v38 = vadd.f32 %v4005_v40, %v4004_v14  ;;  %v5997_v50 = vld [vmem:[%s9812_s12] ss:$0 sm:$0xff] }
0x1ccf   :  { %v4045_v28 = vadd.f32 %v4044_v56, %v4043_v5  ;;  %v4031_v6 = vadd.f32 %v4030_v26, %v4029_v54  ;;  %v4276_v56 = vsel %vm539_vm7, %v4267_v63, %v4275_v17  ;;  %v4138_v26 = vld [vmem:[#allocation14 + $0x10] sm:$0xff]  ;;  %vm4103_vm13 = vcmp.eq.f32.partialorder %v4102_v24, 8.507059e+37  ;;  %v4283_v24 = vld [vmem:[#allocation11 + $0x8] sm:$0xff] }
0x1cd0   :  { %4165 = vmatpush.msra.mxu3 %v4141_v20 }
0x1cd1   :  { %v4046_v22 = vrot.slane %v4045_v28, 4  ;;  %v4032_v46 = vrot.slane %v4031_v6, 1 }
0x1cd2   :  { %4166 = vmatpush.msra.mxu3 %v4140_v8 }
0x1cd3   :  { %v4047_v60 = vadd.f32 %v4046_v22, %v4045_v28  ;;  %v3966_v29 = vpop.permute.xlu0 %3965  ;;  %v4015_v22 = vadd.f32 %v4014_v53, %v4013_v58  ;;  %v4033_v63 = vadd.f32 %v4032_v46, %v4031_v6  ;;  %v4097_v58 = vadd.f32 %v8885_v52, %v4096_v21 }
0x1cd4   :  { %v3987_v44 = vmul.f32 %v6397_v31, %v3966_v29  ;;  %v4268_v33 = vperm.slane %v3966_v29, %v7066_v39  ;;  %4167 = vmatpush.msra.mxu3 %v4139_v42  ;;  %v4116_v29 = vsel %vm529_vm2, %v4006_v38, %v3997_v0  ;;  %v4105_v53 = vor.u32 1.1754944e-38, %v4104_v27  ;;  %v4132_v42 = vpop.permute.xlu1 %4131  ;;  %v4284_v27 = vld [vmem:[#allocation11 + $0x10] sm:$0xff] }
0x1cd5   :  { %v4048_v11 = vrot.slane %v4047_v60, 2  ;;  %v4117_v47 = vsel %vm531_vm3, %v4015_v22, %v4116_v29 }
0x1cd6   :  { %v4052_v5 = vsel %vm214_vm0, %v3987_v44, 0.0  ;;  %v4270_v54 = vsel %vm506_vm1, %v4269_v7, %v4268_v33  ;;  %4168 = vmatpush.msra.mxu3 %v4138_v26  ;;  %v4041_v7 = vrot.slane %v4040_v4, 1  ;;  %v4118_v49 = vsel %vm533_vm4, %v4024_v12, %v4117_v47 }
0x1cd7   :  { %v4054_v18 = vadd.f32 %v4053_v57, %v4052_v5  ;;  %v4277_v28 = vsel %vm541_vm8, %v4270_v54, %v4276_v56  ;;  %v4049_v15 = vadd.f32 %v4048_v11, %v4047_v60  ;;  %v4119_v6 = vsel %vm535_vm5, %v4033_v63, %v4118_v49  ;;  %v4126_v5 = vld [vmem:[#allocation5 + $0x20] sm:$0xff] }
0x1cd8   :  { %v4279_v48 = vsel %vm544_vm9, %v4277_v28, 0.0  ;;  %4169 = vmatpush.msra.mxu3 %v4137_v25  ;;  %v4042_v31 = vadd.f32 %v4041_v7, %v4040_v4  ;;  %v4101_v33 = vsel %vm4100_vm12, %v8885_v52, %v4097_v58  ;;  %v4285_v49 = vld [vmem:[#allocation11 + $0x18] sm:$0xff] }
0x1cd9   :  { %v4055_v37 = vrot.slane %v4054_v18, 4  ;;  %4281 = vst [vmem:[#allocation18 + $0x20] sm:$0xff] %v4279_v48  ;;  %v4050_v60 = vrot.slane %v4049_v15, 1  ;;  %v4106_v17 = vsel %vm4103_vm13, %v4105_v53, %v4101_v33  ;;  %4302 = vmatpush.msra.mxu2 %v4285_v49  ;;  %v4849_v53 = vld [vmem:[#allocation13 + $0x10] sm:$0xff] }
0x1cda   :  { %v4120_v35 = vsel %vm537_vm6, %v4042_v31, %v4119_v6  ;;  %4170 = vmatpush.msra.mxu3 %v4136_v9  ;;  %v4213_v6 = vld [vmem:[#allocation16 + $0x8] sm:$0xff]  ;;  %v4282_v31 = vld [vmem:[#allocation11] sm:$0xff] }
0x1cdb   :  { %v4056_v20 = vadd.f32 %v4055_v37, %v4054_v18  ;;  %v4051_v40 = vadd.f32 %v4050_v60, %v4049_v15  ;;  %4303 = vmatpush.msra.mxu2 %v4284_v27 }
0x1cdd   :  { %v4057_v14 = vrot.slane %v4056_v20, 2  ;;  %v4121_v11 = vsel %vm539_vm7, %v4051_v40, %v4120_v35  ;;  %v4214_v40 = vld [vmem:[#allocation16 + $0x10] sm:$0xff]  ;;  %4304 = vmatpush.msra.mxu2 %v4283_v24  ;;  %v4848_v35 = vld [vmem:[#allocation13 + $0x8] sm:$0xff] }
0x1cdf   :  { %v4058_v43 = vadd.f32 %v4057_v14, %v4056_v20  ;;  %4305 = vmatpush.msra.mxu2 %v4282_v31 }
0x1ce1   :  { %v4059_v44 = vrot.slane %v4058_v43, 1 }
0x1ce3   :  { %v4060_v8 = vadd.f32 %v4059_v44, %v4058_v43  ;;  %v4215_v43 = vld [vmem:[#allocation16 + $0x18] sm:$0xff] }
0x1ce4   :  { %4237 = vmatpush.msrb.mxu1 %v4215_v43 }
0x1ce5   :  { %v4122_v57 = vsel %vm541_vm8, %v4060_v8, %v4121_v11  ;;  %v4850_v8 = vld [vmem:[#allocation13 + $0x18] sm:$0xff]  ;;  %v4847_v11 = vld [vmem:[#allocation13] sm:$0xff] }
0x1ce6   :  { %v4124_v56 = vmul.f32 %v4122_v57, %v4106_v17  ;;  %4238 = vmatpush.msrb.mxu1 %v4214_v40  ;;  %v5998_v57 = vld [vmem:[%s9814_s14] ss:$0 sm:$0xff] }
0x1ce8   :  { %4128 = vrot.lane.b32.xlu0 %v4124_v56, %s6723_s24  ;;  %4239 = vmatpush.msrb.mxu1 %v4213_v6 }
0x1d5a   :  { %v4129_v54 = vpop.permute.xlu0 %4128 }
0x1d5b   :  { %v4134_v52 = vsel %vm214_vm0, %v4126_v5, %v4129_v54  ;;  %v5999_v5 = vld [vmem:[%s9807_s7] ss:$0 sm:$0xff] }
0x1d5c   :  { %v4135_v32 = vsel %vm987_vm14, %v4134_v52, %v4132_v42 }
0x1d5d   :  { %5938 = vmatmul.msk.f32.vlgmr.msra.gmra.mxu3 %vm1005_vm15, %v4135_v32 }
0x1de0   :  { %v4172_v18 = vpop.f32.mrf.mxu3 }
0x1de1   :  { %v4173_v28 = vadd.f32 %v5997_v50, %v4172_v18 }
0x1de3   :  { %6229 = vtanh.f32 %v4173_v28  ;;  %v5939_v15 = vmul.f32 -1.442695, %v4173_v28 }
0x1de5   :  { %6231 = vpow2.f32 %v5939_v15 }
0x1de9   :  { %v6230_v46 = vpop.eup %6229 }
0x1dea   :  { %4197 = vrot.lane.b32.xlu2 %v6230_v46, %s6722_s5 }
0x1deb   :  { %v6232_v48 = vpop.eup %6231 }
0x1dec   :  { %v4178_v26 = vadd.f32 1.0, %v6232_v48 }
0x1dee   :  { %6233 = vrcp.f32 %v4178_v26  ;;  %v4190_v25 = vand.u32 2147483648, %v4178_v26  ;;  %vm4184_vm11 = vweird.f32 %v4178_v26  ;;  %v4188_v0 = vand.u32 2147483647, %v4178_v26 }
0x1df0   :  { %v4191_v20 = vor.u32 1.1754944e-38, %v4190_v25  ;;  %vm4189_vm13 = vcmp.eq.f32.partialorder %v4188_v0, 8.507059e+37  ;;  %v9016_v25 = vld [vmem:[%s9808_s8] ss:$0 sm:$0xff] }
0x1df4   :  { %v6234_v38 = vpop.eup %6233 }
0x1df5   :  { %v4180_v4 = vmul.f32 %v6234_v38, %v4178_v26  ;;  %vm4185_vm10 = vweird.f32 %v6234_v38 }
0x1df6   :  { %vm4186_vm12 = vmor %vm4184_vm11, %vm4185_vm10 }
0x1df7   :  { %v4181_v37 = vsub.f32 1.0, %v4180_v4 }
0x1df9   :  { %v4182_v22 = vmul.f32 %v6234_v38, %v4181_v37 }
0x1dfb   :  { %v4183_v21 = vadd.f32 %v6234_v38, %v4182_v22 }
0x1dfd   :  { %v4187_v12 = vsel %vm4186_vm12, %v6234_v38, %v4183_v21 }
0x1dfe   :  { %v4192_v60 = vsel %vm4189_vm13, %v4191_v20, %v4187_v12 }
0x1dff   :  { %v4195_v7 = vmul.f32 %v4192_v60, %v8599_v23  ;;  %v4212_v23 = vld [vmem:[#allocation16] sm:$0xff] }
0x1e00   :  { %4240 = vmatpush.msrb.mxu1 %v4212_v23 }
0x1e02   :  { %4867 = vmatpush.msra.mxu1 %v4850_v8 }
0x1e04   :  { %4868 = vmatpush.msra.mxu1 %v4849_v53 }
0x1e06   :  { %4869 = vmatpush.msra.mxu1 %v4848_v35 }
0x1e08   :  { %4870 = vmatpush.msra.mxu1 %v4847_v11 }
0x1e44   :  { %v4198_v63 = vpop.permute.xlu2 %4197 }
0x1e45   :  { %v4200_v29 = vmul.f32 %v4198_v63, %v4192_v60 }
0x1e47   :  { %4202 = vrot.lane.b32.xlu0 %v4200_v29, %s6723_s24 }
0x1eb9   :  { %v4203_v14 = vpop.permute.xlu0 %4202 }
0x1eba   :  { %v8984_v47 = vadd.f32 %v4203_v14, %v4195_v7 }
0x1ebc   :  { %6235 = vtanh.f32 %v8984_v47 }
0x1ec2   :  { %v6236_v58 = vpop.eup %6235 }
0x1ec3   :  { %4208 = vrot.lane.b32.xlu1 %v6236_v58, %s6722_s5 }
0x1f35   :  { %v4209_v44 = vpop.permute.xlu1 %4208 }
0x1f36   :  { %v8988_v33 = vmul.f32 %v4209_v44, %v4192_v60 }
0x1f38   :  { %4221 = vrot.lane.b32.xlu2 %v8988_v33, %s6723_s24 }
0x1f92   :  { %v4222_v17 = vpop.permute.xlu2 %4221 }
0x1f93   :  { %5940 = vmatmul.msk.f32.vlgmr.msrb.gmra.mxu1 %vm214_vm0, %v4222_v17  ;;  %5941 = vmatmul.msk.f32.vlgmr.msra.gmra.mxu2 %vm214_vm0, %v4222_v17 }
0x1f9b   :  { %5942 = vmatmul.msk.f32.vlgmr.msra.gmra.mxu1 %vm214_vm0, %v4222_v17 }
0x2010   :  { %v4242_v56 = vpop.f32.mrf.mxu1 }
0x2011   :  { %v4243_v9 = vadd.f32 %v5998_v57, %v4242_v56 }
0x2013   :  { %4246 = vst [vmem:[#allocation17 + $0x20] sm:$0xff] %v4243_v9 }
0x2016   :  { %v4307_v54 = vpop.f32.mrf.mxu2 }
0x2017   :  { %v9001_v42 = vadd.f32 %v5999_v5, %v4307_v54 }
0x2019   :  { %v4318_v52 = vperm.slane %v9001_v42, 0  ;;  %v4311_v32 = vrot.slane %v9001_v42, 1  ;;  %v4312_v50 = vrot.slane %v9001_v42, 2  ;;  %v4313_v48 = vrot.slane %v9001_v42, 3 }
0x201a   :  { %v4314_v21 = vrot.slane %v9001_v42, 4  ;;  %v4315_v24 = vrot.slane %v9001_v42, 5  ;;  %v4316_v54 = vrot.slane %v9001_v42, 6 }
0x201b   :  { %v4335_v18 = vadd.f32 %v4318_v52, %v6946_v36  ;;  %v4334_v28 = vadd.f32 %v4318_v52, %v6936_v30  ;;  %v4319_v46 = vperm.slane %v4311_v32, 0  ;;  %v4320_v15 = vperm.slane %v4312_v50, 0 }
0x201c   :  { %v4321_v29 = vperm.slane %v4313_v48, 0  ;;  %v4322_v40 = vperm.slane %v4314_v21, 0  ;;  %v4323_v35 = vperm.slane %v4315_v24, 0  ;;  %v4324_v48 = vperm.slane %v4316_v54, 0 }
0x201d   :  { %v4351_v26 = vmax.f32 %v4335_v18, 0.0  ;;  %v4350_v38 = vmax.f32 %v4334_v28, 0.0  ;;  %v4336_v4 = vadd.f32 %v4319_v46, %v6954_v45  ;;  %v4338_v37 = vadd.f32 %v4320_v15, %v6967_v59 }
0x201e   :  { %v4337_v22 = vadd.f32 %v4319_v46, %v6960_v51  ;;  %v4339_v63 = vadd.f32 %v4320_v15, %v6973_v1  ;;  %v4341_v23 = vadd.f32 %v4321_v29, %v9851_v62  ;;  %v4340_v44 = vadd.f32 %v4321_v29, %v9850_v61 }
0x201f   :  { %v4367_v0 = vmul.f32 %v9016_v25, %v4351_v26  ;;  %v4366_v12 = vmul.f32 %v9016_v25, %v4350_v38  ;;  %v4352_v20 = vmax.f32 %v4336_v4, 0.0  ;;  %v4354_v60 = vmax.f32 %v4338_v37, 0.0 }
0x2020   :  { %v4353_v49 = vmax.f32 %v4337_v22, 0.0  ;;  %v4355_v27 = vmax.f32 %v4339_v63, 0.0  ;;  %v4342_v53 = vadd.f32 %v4322_v40, %v9849_v19  ;;  %v4357_v57 = vmax.f32 %v4341_v23, 0.0 }
0x2021   :  { %v4385_v7 = vsel %vm214_vm0, %v4367_v0, 0.0  ;;  %v4382_v14 = vsel %vm214_vm0, %v4366_v12, 0.0  ;;  %v4368_v58 = vmul.f32 %v9016_v25, %v4352_v20  ;;  %v4370_v6 = vmul.f32 %v9016_v25, %v4354_v60 }
0x2022   :  { %4386 = vadd.xlane.f32.xlu1 %v4385_v7  ;;  %4383 = vadd.xlane.f32.xlu0 %v4382_v14  ;;  %v4369_v31 = vmul.f32 %v9016_v25, %v4353_v49  ;;  %v4371_v8 = vmul.f32 %v9016_v25, %v4355_v27  ;;  %v4356_v56 = vmax.f32 %v4340_v44, 0.0  ;;  %v4358_v5 = vmax.f32 %v4342_v53, 0.0 }
0x2023   :  { %v4388_v43 = vsel %vm214_vm0, %v4368_v58, 0.0  ;;  %v4394_v11 = vsel %vm214_vm0, %v4370_v6, 0.0  ;;  %v4373_v52 = vmul.f32 %v9016_v25, %v4357_v57  ;;  %v4344_v50 = vadd.f32 %v4323_v35, %v9854_v10 }
0x2024   :  { %4389 = vadd.xlane.f32.xlu2 %v4388_v43  ;;  %v4391_v17 = vsel %vm214_vm0, %v4369_v31, 0.0  ;;  %v4397_v9 = vsel %vm214_vm0, %v4371_v8, 0.0  ;;  %v4372_v32 = vmul.f32 %v9016_v25, %v4356_v56  ;;  %v4343_v18 = vadd.f32 %v4322_v40, %v9853_v55 }
0x2025   :  { %v4374_v28 = vmul.f32 %v9016_v25, %v4358_v5  ;;  %v4345_v46 = vadd.f32 %v4323_v35, %v9852_v2  ;;  %v4317_v15 = vrot.slane %v9001_v42, 7  ;;  %v4403_v26 = vsel %vm214_vm0, %v4373_v52, 0.0 }
0x2026   :  { %v4400_v38 = vsel %vm214_vm0, %v4372_v32, 0.0  ;;  %v4360_v4 = vmax.f32 %v4344_v50, 0.0  ;;  %v4359_v37 = vmax.f32 %v4343_v18, 0.0  ;;  %v4347_v42 = vadd.f32 %v4324_v48, %v9857_v16 }
0x2027   :  { %v4406_v22 = vsel %vm214_vm0, %v4374_v28, 0.0  ;;  %v4361_v21 = vmax.f32 %v4345_v46, 0.0  ;;  %v4325_v0 = vperm.slane %v4317_v15, 0  ;;  %v4346_v63 = vadd.f32 %v4324_v48, %v9856_v13 }
0x2028   :  { %v4376_v12 = vmul.f32 %v9016_v25, %v4360_v4  ;;  %v4375_v20 = vmul.f32 %v9016_v25, %v4359_v37  ;;  %v4363_v58 = vmax.f32 %v4347_v42, 0.0 }
0x2029   :  { %v4377_v60 = vmul.f32 %v9016_v25, %v4361_v21  ;;  %v4348_v29 = vadd.f32 %v4325_v0, %v9855_v34  ;;  %v4362_v49 = vmax.f32 %v4346_v63, 0.0  ;;  %v4349_v6 = vadd.f32 %v4325_v0, %v9858_v3 }
0x202a   :  { %4395 = vadd.xlane.f32.xlu1 %v4394_v11  ;;  %4392 = vadd.xlane.f32.xlu0 %v4391_v17  ;;  %v4412_v7 = vsel %vm214_vm0, %v4376_v12, 0.0  ;;  %v4409_v14 = vsel %vm214_vm0, %v4375_v20, 0.0  ;;  %v4379_v40 = vmul.f32 %v9016_v25, %v4363_v58 }
0x202b   :  { %v4415_v43 = vsel %vm214_vm0, %v4377_v60, 0.0  ;;  %v4364_v27 = vmax.f32 %v4348_v29, 0.0  ;;  %v4378_v24 = vmul.f32 %v9016_v25, %v4362_v49  ;;  %v4365_v8 = vmax.f32 %v4349_v6, 0.0 }
0x202c   :  { %4398 = vadd.xlane.f32.xlu2 %v4397_v9  ;;  %v4421_v23 = vsel %vm214_vm0, %v4379_v40, 0.0 }
0x202d   :  { %v4380_v31 = vmul.f32 %v9016_v25, %v4364_v27  ;;  %v4418_v44 = vsel %vm214_vm0, %v4378_v24, 0.0  ;;  %v4381_v35 = vmul.f32 %v9016_v25, %v4365_v8 }
0x202f   :  { %v4424_v53 = vsel %vm214_vm0, %v4380_v31, 0.0  ;;  %v4427_v11 = vsel %vm214_vm0, %v4381_v35, 0.0 }
0x2032   :  { %4404 = vadd.xlane.f32.xlu1 %v4403_v26  ;;  %4401 = vadd.xlane.f32.xlu0 %v4400_v38 }
0x2034   :  { %4407 = vadd.xlane.f32.xlu2 %v4406_v22 }
0x203a   :  { %4413 = vadd.xlane.f32.xlu1 %v4412_v7  ;;  %4410 = vadd.xlane.f32.xlu0 %v4409_v14 }
0x203c   :  { %4416 = vadd.xlane.f32.xlu2 %v4415_v43 }
0x2042   :  { %4422 = vadd.xlane.f32.xlu1 %v4421_v23  ;;  %4419 = vadd.xlane.f32.xlu0 %v4418_v44 }
0x2044   :  { %4425 = vadd.xlane.f32.xlu2 %v4424_v53 }
0x204a   :  { %4428 = vadd.xlane.f32.xlu0 %v4427_v11 }
0x2095   :  { %v4387_v17 = vpop.xlane.xlu1 %4386  ;;  %v4384_v57 = vpop.xlane.xlu0 %4383 }
0x2096   :  { %v4447_v15 = vperm.slane %v4387_v17, %v7071_v41  ;;  %v4446_v48 = vperm.slane %v4384_v57, %v7066_v39 }
0x2097   :  { %v4390_v56 = vpop.xlane.xlu2 %4389 }
0x2098   :  { %v4449_v26 = vperm.slane %v4390_v56, %v7066_v39  ;;  %v4448_v20 = vsel %vm506_vm1, %v4447_v15, %v4446_v48 }
0x209d   :  { %v4396_v9 = vpop.xlane.xlu1 %4395  ;;  %v4393_v5 = vpop.xlane.xlu0 %4392 }
0x209e   :  { %v4450_v25 = vperm.slane %v4393_v5, %v7071_v41  ;;  %v4452_v21 = vperm.slane %v4396_v9, %v7066_v39 }
0x209f   :  { %v9064_v54 = vpop.xlane.xlu2 %4398 }
0x20a0   :  { %v4453_v38 = vperm.slane %v9064_v54, %v7071_v41  ;;  %v4451_v4 = vsel %vm506_vm1, %v4450_v25, %v4449_v26 }
0x20a1   :  { %v4470_v63 = vsel %vm529_vm2, %v4451_v4, %v4448_v20 }
0x20a2   :  { %v4454_v60 = vsel %vm506_vm1, %v4453_v38, %v4452_v21 }
0x20a3   :  { %v4471_v27 = vsel %vm531_vm3, %v4454_v60, %v4470_v63 }
0x20a5   :  { %v9066_v52 = vpop.xlane.xlu1 %4404  ;;  %v4402_v32 = vpop.xlane.xlu0 %4401 }
0x20a6   :  { %v4456_v37 = vperm.slane %v9066_v52, %v7071_v41  ;;  %v4455_v22 = vperm.slane %v4402_v32, %v7066_v39 }
0x20a7   :  { %v9068_v50 = vpop.xlane.xlu2 %4407 }
0x20a8   :  { %v4458_v29 = vperm.slane %v9068_v50, %v7066_v39  ;;  %v4457_v7 = vsel %vm506_vm1, %v4456_v37, %v4455_v22 }
0x20a9   :  { %v4472_v24 = vsel %vm533_vm4, %v4457_v7, %v4471_v27 }
0x20ad   :  { %v9070_v18 = vpop.xlane.xlu1 %4413  ;;  %v9072_v28 = vpop.xlane.xlu0 %4410 }
0x20ae   :  { %v4459_v0 = vperm.slane %v9072_v28, %v7071_v41  ;;  %v4461_v40 = vperm.slane %v9070_v18, %v7066_v39 }
0x20af   :  { %v9075_v46 = vpop.xlane.xlu2 %4416 }
0x20b0   :  { %v4462_v14 = vperm.slane %v9075_v46, %v7071_v41  ;;  %v4460_v58 = vsel %vm506_vm1, %v4459_v0, %v4458_v29 }
0x20b1   :  { %v4473_v31 = vsel %vm535_vm5, %v4460_v58, %v4472_v24 }
0x20b2   :  { %v4463_v23 = vsel %vm506_vm1, %v4462_v14, %v4461_v40 }
0x20b3   :  { %v4474_v11 = vsel %vm537_vm6, %v4463_v23, %v4473_v31 }
0x20b5   :  { %v9089_v12 = vpop.xlane.xlu0 %4419  ;;  %v9092_v42 = vpop.xlane.xlu1 %4422 }
0x20b6   :  { %v4465_v49 = vperm.slane %v9092_v42, %v7071_v41  ;;  %v4464_v43 = vperm.slane %v9089_v12, %v7066_v39 }
0x20b7   :  { %v9110_v6 = vpop.xlane.xlu2 %4425 }
0x20b8   :  { %v4466_v44 = vsel %vm506_vm1, %v4465_v49, %v4464_v43  ;;  %v4467_v53 = vperm.slane %v9110_v6, %v7066_v39 }
0x20b9   :  { %v4475_v15 = vsel %vm539_vm7, %v4466_v44, %v4474_v11 }
0x20bd   :  { %v9115_v8 = vpop.xlane.xlu0 %4428 }
0x20be   :  { %v4468_v35 = vperm.slane %v9115_v8, %v7071_v41 }
0x20c0   :  { %v4469_v25 = vsel %vm506_vm1, %v4468_v35, %v4467_v53 }
0x20c1   :  { %v4476_v48 = vsel %vm541_vm8, %v4469_v25, %v4475_v15 }
0x20c2   :  { %v4478_v26 = vsel %vm544_vm9, %v4476_v48, -inf }
0x20c3   :  { %4479 = vmax.xlane.f32.xlu1 %v4478_v26 }
0x2136   :  { %v9126_v38 = vpop.xlane.xlu1 %4479 }
0x2137   :  { %v4482_v4 = vperm.slane %v9126_v38, 0  ;;  %v4483_v37 = vperm.slane %v9126_v38, 1  ;;  %v4484_v20 = vperm.slane %v9126_v38, 2  ;;  %v4485_v63 = vperm.slane %v9126_v38, 3 }
0x2138   :  { %v4487_v31 = vperm.slane %v9126_v38, 5  ;;  %v4488_v35 = vperm.slane %v9126_v38, 6 }
0x2139   :  { %v4498_v22 = vsub.f32 %v4384_v57, %v4482_v4  ;;  %v4499_v21 = vsub.f32 %v4387_v17, %v4482_v4  ;;  %v4500_v0 = vsub.f32 %v4390_v56, %v4483_v37  ;;  %v4502_v14 = vsub.f32 %v4396_v9, %v4484_v20 }
0x213a   :  { %v4501_v58 = vsub.f32 %v4393_v5, %v4483_v37  ;;  %v4504_v49 = vsub.f32 %v4402_v32, %v4485_v63  ;;  %v4486_v17 = vperm.slane %v9126_v38, 4  ;;  %v4505_v9 = vsub.f32 %v9066_v52, %v4485_v63 }
0x213b   :  { %v4514_v60 = vmul.f32 1.442695, %v4498_v22  ;;  %v4516_v29 = vmul.f32 1.442695, %v4499_v21  ;;  %v4518_v7 = vmul.f32 1.442695, %v4500_v0  ;;  %v4503_v5 = vsub.f32 %v9064_v54, %v4484_v20 }
0x213c   :  { %v4522_v43 = vmul.f32 1.442695, %v4502_v14  ;;  %v4520_v27 = vmul.f32 1.442695, %v4501_v58  ;;  %v4526_v57 = vmul.f32 1.442695, %v4504_v49  ;;  %v4507_v32 = vsub.f32 %v9072_v28, %v4486_v17 }
0x213d   :  { %6237 = vpow2.f32 %v4514_v60  ;;  %v4528_v23 = vmul.f32 1.442695, %v4505_v9  ;;  %v4524_v44 = vmul.f32 1.442695, %v4503_v5  ;;  %v4508_v25 = vsub.f32 %v9070_v18, %v4487_v31 }
0x213e   :  { %6239 = vpow2.f32 %v4516_v29  ;;  %v4532_v52 = vmul.f32 1.442695, %v4507_v32  ;;  %v4506_v28 = vsub.f32 %v9068_v50, %v4486_v17  ;;  %v4510_v15 = vsub.f32 %v9089_v12, %v4488_v35 }
0x213f   :  { %6241 = vpow2.f32 %v4518_v7  ;;  %v4534_v48 = vmul.f32 1.442695, %v4508_v25  ;;  %v4489_v37 = vperm.slane %v9126_v38, 7  ;;  %v4511_v50 = vsub.f32 %v9092_v42, %v4488_v35 }
0x2140   :  { %6243 = vpow2.f32 %v4522_v43  ;;  %v4530_v26 = vmul.f32 1.442695, %v4506_v28  ;;  %v4538_v22 = vmul.f32 1.442695, %v4510_v15  ;;  %v4509_v12 = vsub.f32 %v9075_v46, %v4487_v31 }
0x2141   :  { %6245 = vpow2.f32 %v4520_v27  ;;  %v4513_v0 = vsub.f32 %v9115_v8, %v4489_v37  ;;  %v4540_v38 = vmul.f32 1.442695, %v4511_v50  ;;  %v4512_v46 = vsub.f32 %v9110_v6, %v4489_v37 }
0x2142   :  { %6247 = vpow2.f32 %v4526_v57  ;;  %v4536_v20 = vmul.f32 1.442695, %v4509_v12 }
0x2143   :  { %v9132_v40 = vpop.eup %6237  ;;  %6249 = vpow2.f32 %v4528_v23  ;;  %v4544_v60 = vmul.f32 1.442695, %v4513_v0  ;;  %v4542_v8 = vmul.f32 1.442695, %v4512_v46 }
0x2144   :  { %v9135_v56 = vpop.eup %6239  ;;  %4563 = vperm.xlu2 %5974, %v9132_v40   ;;  %6251 = vpow2.f32 %v4524_v44 }
0x2145   :  { %v9138_v24 = vpop.eup %6241  ;;  %4566 = vperm.xlu0 %5975, %v9135_v56   ;;  %6253 = vpow2.f32 %v4532_v52 }
0x2146   :  { %4569 = vperm.xlu1 %5976, %v9138_v24   ;;  %v9146_v53 = vpop.eup %6243  ;;  %6255 = vpow2.f32 %v4534_v48 }
0x2147   :  { %v9149_v11 = vpop.eup %6245  ;;  %6257 = vpow2.f32 %v4530_v26 }
0x2148   :  { %v9152_v54 = vpop.eup %6247  ;;  %6259 = vpow2.f32 %v4538_v22 }
0x2149   :  { %v9159_v4 = vpop.eup %6249  ;;  %6261 = vpow2.f32 %v4540_v38 }
0x214a   :  { %v9162_v21 = vpop.eup %6251  ;;  %6263 = vpow2.f32 %v4536_v20 }
0x214b   :  { %v9165_v18 = vpop.eup %6253  ;;  %6265 = vpow2.f32 %v4544_v60 }
0x214c   :  { %4575 = vperm.xlu2 %5974, %v9146_v53   ;;  %v9172_v63 = vpop.eup %6255  ;;  %6267 = vpow2.f32 %v4542_v8 }
0x214d   :  { %4572 = vperm.xlu0 %5975, %v9149_v11   ;;  %v9174_v29 = vpop.eup %6257 }
0x214e   :  { %4581 = vperm.xlu1 %5976, %v9152_v54   ;;  %v9177_v42 = vpop.eup %6259 }
0x214f   :  { %v9182_v7 = vpop.eup %6261 }
0x2150   :  { %v9184_v14 = vpop.eup %6263 }
0x2151   :  { %v9187_v58 = vpop.eup %6265 }
0x2152   :  { %v9191_v49 = vpop.eup %6267 }
0x2154   :  { %4584 = vperm.xlu2 %5974, %v9159_v4  }
0x2155   :  { %4578 = vperm.xlu0 %5975, %v9162_v21  }
0x2156   :  { %4590 = vperm.xlu1 %5976, %v9165_v18  }
0x215c   :  { %4593 = vperm.xlu2 %5974, %v9172_v63  }
0x215d   :  { %4587 = vperm.xlu0 %5975, %v9174_v29  }
0x215e   :  { %4599 = vperm.xlu1 %5976, %v9177_v42  }
0x2164   :  { %4602 = vperm.xlu2 %5974, %v9182_v7  }
0x2165   :  { %4596 = vperm.xlu0 %5975, %v9184_v14  }
0x2166   :  { %4608 = vperm.xlu1 %5976, %v9187_v58  }
0x216d   :  { %4605 = vperm.xlu0 %5975, %v9191_v49  }
0x219e   :  { %v4564_v6 = vpop.permute.xlu2 %4563 }
0x219f   :  { %v4610_v26 = vperm.slane %v4564_v6, %v7066_v39 }
0x21a6   :  { %v4576_v17 = vpop.permute.xlu2 %4575 }
0x21a7   :  { %v4616_v48 = vperm.slane %v4576_v17, %v7066_v39 }
0x21ae   :  { %v4585_v32 = vpop.permute.xlu2 %4584 }
0x21af   :  { %v4620_v8 = vperm.slane %v4585_v32, %v7071_v41 }
0x21b6   :  { %v4594_v44 = vpop.permute.xlu2 %4593 }
0x21b7   :  { %v4567_v43 = vpop.permute.xlu0 %4566  ;;  %v4625_v6 = vperm.slane %v4594_v44, %v7066_v39 }
0x21b8   :  { %v4570_v27 = vpop.permute.xlu1 %4569  ;;  %v4611_v15 = vperm.slane %v4567_v43, %v7071_v41 }
0x21b9   :  { %v4613_v28 = vperm.slane %v4570_v27, %v7066_v39 }
0x21ba   :  { %v4612_v0 = vsel %vm506_vm1, %v4611_v15, %v4610_v26 }
0x21bf   :  { %v4573_v57 = vpop.permute.xlu0 %4572 }
0x21c0   :  { %v4582_v9 = vpop.permute.xlu1 %4581  ;;  %v4614_v35 = vperm.slane %v4573_v57, %v7071_v41  ;;  %v4603_v57 = vpop.permute.xlu2 %4602 }
0x21c1   :  { %v4619_v38 = vperm.slane %v4582_v9, %v7066_v39  ;;  %v4629_v32 = vperm.slane %v4603_v57, %v7071_v41 }
0x21c2   :  { %v4615_v37 = vsel %vm506_vm1, %v4614_v35, %v4613_v28 }
0x21c3   :  { %v4634_v60 = vsel %vm529_vm2, %v4615_v37, %v4612_v0  ;;  %v4621_v17 = vsel %vm506_vm1, %v4620_v8, %v4619_v38 }
0x21c7   :  { %v4579_v5 = vpop.permute.xlu0 %4578 }
0x21c8   :  { %v4591_v31 = vpop.permute.xlu1 %4590  ;;  %v4617_v52 = vperm.slane %v4579_v5, %v7071_v41 }
0x21c9   :  { %v4623_v46 = vperm.slane %v4591_v31, %v7071_v41 }
0x21ca   :  { %v4618_v22 = vsel %vm506_vm1, %v4617_v52, %v4616_v48 }
0x21cb   :  { %v4635_v43 = vsel %vm531_vm3, %v4618_v22, %v4634_v60 }
0x21cf   :  { %v4588_v23 = vpop.permute.xlu0 %4587 }
0x21d0   :  { %v4600_v25 = vpop.permute.xlu1 %4599  ;;  %v4622_v50 = vperm.slane %v4588_v23, %v7066_v39  ;;  %v4636_v23 = vsel %vm533_vm4, %v4621_v17, %v4635_v43 }
0x21d1   :  { %v4628_v9 = vperm.slane %v4600_v25, %v7066_v39 }
0x21d2   :  { %v4624_v27 = vsel %vm506_vm1, %v4623_v46, %v4622_v50 }
0x21d3   :  { %v4637_v31 = vsel %vm535_vm5, %v4624_v27, %v4636_v23  ;;  %v4630_v48 = vsel %vm506_vm1, %v4629_v32, %v4628_v9 }
0x21d7   :  { %v4597_v12 = vpop.permute.xlu0 %4596 }
0x21d8   :  { %v4626_v20 = vperm.slane %v4597_v12, %v7071_v41  ;;  %v4609_v35 = vpop.permute.xlu1 %4608 }
0x21d9   :  { %v4632_v28 = vperm.slane %v4609_v35, %v7071_v41  ;;  %v4872_v35 = vpop.f32.mrf.mxu1 }
0x21da   :  { %v4627_v5 = vsel %vm506_vm1, %v4626_v20, %v4625_v6 }
0x21db   :  { %v4638_v44 = vsel %vm537_vm6, %v4627_v5, %v4637_v31 }
0x21dc   :  { %v4639_v25 = vsel %vm539_vm7, %v4630_v48, %v4638_v44 }
0x21df   :  { %v4606_v52 = vpop.permute.xlu0 %4605 }
0x21e0   :  { %v4631_v15 = vperm.slane %v4606_v52, %v7066_v39 }
0x21e2   :  { %v4633_v26 = vsel %vm506_vm1, %v4632_v28, %v4631_v15  ;;  %v6399_v15 = vld [vmem:[#allocation2 + $0x8] sm:$0xff] }
0x21e3   :  { %v4640_v37 = vsel %vm541_vm8, %v4633_v26, %v4639_v25  ;;  %v6400_v26 = vld [vmem:[#allocation2] sm:$0xff] }
0x21e4   :  { %v4642_v22 = vsel %vm544_vm9, %v4640_v37, 0.0 }
0x21e5   :  { %4643 = vadd.xlane.f32.xlu2 %v4642_v22  ;;  %v6401_v22 = vld [vmem:[#allocation2 + $0x18] sm:$0xff] }
0x2258   :  { %v4644_v50 = vpop.xlane.xlu2 %4643 }
0x2259   :  { %6269 = vrcp.f32 %v4644_v50 }
0x225f   :  { %v6270_v12 = vpop.eup %6269 }
0x2260   :  { %v4652_v0 = vperm.slane %v6270_v12, 5  ;;  %v4647_v38 = vperm.slane %v6270_v12, 0  ;;  %v4648_v8 = vperm.slane %v6270_v12, 1  ;;  %v4649_v27 = vperm.slane %v6270_v12, 2 }
0x2261   :  { %v4653_v5 = vperm.slane %v6270_v12, 6  ;;  %v4654_v9 = vperm.slane %v6270_v12, 7 }
0x2262   :  { %v4673_v20 = vmul.f32 %v9172_v63, %v4652_v0  ;;  %v4664_v60 = vmul.f32 %v9135_v56, %v4647_v38  ;;  %v4663_v46 = vmul.f32 %v9132_v40, %v4647_v38  ;;  %v4666_v6 = vmul.f32 %v9149_v11, %v4648_v8 }
0x2263   :  { %v4665_v43 = vmul.f32 %v9138_v24, %v4648_v8  ;;  %v4668_v63 = vmul.f32 %v9162_v21, %v4649_v27  ;;  %v4667_v56 = vmul.f32 %v9146_v53, %v4649_v27  ;;  %v4650_v40 = vperm.slane %v6270_v12, 3  ;;  %v6404_v8 = vld [vmem:[#allocation2 + $0x20] sm:$0xff] }
0x2264   :  { %4731 = vperm.xlu2 %5974, %v4673_v20   ;;  %4686 = vperm.xlu1 %5976, %v4664_v60   ;;  %v4651_v24 = vperm.slane %v6270_v12, 4  ;;  %v4675_v21 = vmul.f32 %v9177_v42, %v4653_v5  ;;  %v4674_v53 = vmul.f32 %v9184_v14, %v4652_v0  ;;  %v6000_v42 = vld [vmem:[%s9810_s10] ss:$0 sm:$0xff]  ;;  %v6402_v12 = vld [vmem:[#allocation2 + $0x10] sm:$0xff]  ;;  %v6403_v60 = vld [vmem:[#allocation2 + $0x28] sm:$0xff] }
0x2265   :  { %4681 = vperm.xlu0 %5975, %v4663_v46   ;;  %v4670_v17 = vmul.f32 %v9159_v4, %v4650_v40  ;;  %v4669_v57 = vmul.f32 %v9152_v54, %v4650_v40  ;;  %v4677_v4 = vmul.f32 %v9191_v49, %v4654_v9  ;;  %v4676_v54 = vmul.f32 %v9182_v7, %v4653_v5  ;;  %v6407_v5 = vld [vmem:[#allocation2 + $0x48] sm:$0xff] }
0x2266   :  { %v4672_v11 = vmul.f32 %v9165_v18, %v4651_v24  ;;  %v4678_v18 = vmul.f32 %v9187_v58, %v4654_v9  ;;  %v4873_v49 = vadd.f32 %v6000_v42, %v4872_v35  ;;  %v6409_v42 = vld [vmem:[#allocation2 + $0x50] sm:$0xff] }
0x2268   :  { %v5943_v7 = vmul.f32 -1.442695, %v4873_v49 }
0x226a   :  { %6271 = vpow2.f32 %v5943_v7 }
0x226c   :  { %4917 = vrot.lane.b32.xlu2 %v8988_v33, %s6724_s11  ;;  %4696 = vperm.xlu1 %5976, %v4666_v6   ;;  %v4671_v33 = vmul.f32 %v9174_v29, %v4651_v24 }
0x226d   :  { %4691 = vperm.xlu0 %5975, %v4665_v43  }
0x2270   :  { %v6272_v28 = vpop.eup %6271 }
0x2271   :  { %v9265_v37 = vadd.f32 1.0, %v6272_v28 }
0x2273   :  { %6273 = vrcp.f32 %v9265_v37  ;;  %vm4884_vm11 = vweird.f32 %v9265_v37 }
0x2274   :  { %4706 = vperm.xlu1 %5976, %v4668_v63  }
0x2275   :  { %4701 = vperm.xlu0 %5975, %v4667_v56  }
0x2279   :  { %v9289_v49 = vpop.eup %6273 }
0x227a   :  { %vm4885_vm10 = vweird.f32 %v9289_v49 }
0x227b   :  { %vm4886_vm12 = vmor %vm4884_vm11, %vm4885_vm10 }
0x227c   :  { %4716 = vperm.xlu1 %5976, %v4670_v17  }
0x227d   :  { %4711 = vperm.xlu0 %5975, %v4669_v57   ;;  %v6405_v57 = vld [vmem:[#allocation2 + $0x38] sm:$0xff] }
0x2284   :  { %4726 = vperm.xlu1 %5976, %v4672_v11   ;;  %v6406_v11 = vld [vmem:[#allocation2 + $0x30] sm:$0xff] }
0x2285   :  { %4721 = vperm.xlu0 %5975, %v4671_v33  }
0x228c   :  { %4741 = vperm.xlu1 %5976, %v4675_v21  }
0x228d   :  { %4736 = vperm.xlu0 %5975, %v4674_v53   ;;  %v6408_v53 = vld [vmem:[#allocation2 + $0x40] sm:$0xff] }
0x2294   :  { %4751 = vperm.xlu1 %5976, %v4677_v4  }
0x2295   :  { %4746 = vperm.xlu0 %5975, %v4676_v54  }
0x229d   :  { %4756 = vperm.xlu0 %5975, %v4678_v18  }
0x22be   :  { %v9280_v40 = vpop.permute.xlu2 %4731 }
0x22bf   :  { %v4769_v35 = vmul.f32 %v6409_v42, %v9280_v40 }
0x22d6   :  { %v9244_v29 = vpop.permute.xlu1 %4686 }
0x22d7   :  { %v9246_v23 = vpop.permute.xlu0 %4681  ;;  %v4760_v48 = vmul.f32 %v6399_v15, %v9244_v29 }
0x22d8   :  { %v4759_v25 = vmul.f32 %v6400_v26, %v9246_v23 }
0x22d9   :  { %v4776_v38 = vsel %vm214_vm0, %v4760_v48, 0.0 }
0x22da   :  { %v4775_v20 = vsel %vm214_vm0, %v4759_v25, 0.0 }
0x22db   :  { %v4777_v17 = vadd.f32 %v4776_v38, %v4775_v20  ;;  %v6410_v20 = vld [vmem:[#allocation2 + $0x58] sm:$0xff] }
0x22dd   :  { %v4778_v7 = vrot.slane %v4777_v17, 4 }
0x22de   :  { %v9251_v14 = vpop.permute.xlu1 %4696 }
0x22df   :  { %v9253_v31 = vpop.permute.xlu0 %4691  ;;  %v4762_v50 = vmul.f32 %v6401_v22, %v9251_v14 }
0x22e0   :  { %v4761_v0 = vmul.f32 %v6402_v12, %v9253_v31  ;;  %v9299_v12 = vmul.f32 %v9289_v49, %v9265_v37 }
0x22e1   :  { %v4785_v63 = vsel %vm214_vm0, %v4762_v50, 0.0 }
0x22e2   :  { %v4784_v56 = vsel %vm214_vm0, %v4761_v0, 0.0  ;;  %v4820_v0 = vsel %vm214_vm0, %v4769_v35, 0.0  ;;  %v6411_v35 = vld [vmem:[#allocation2 + $0x60] sm:$0xff] }
0x22e3   :  { %v4786_v4 = vadd.f32 %v4785_v63, %v4784_v56 }
0x22e5   :  { %v4787_v22 = vrot.slane %v4786_v4, 4 }
0x22e6   :  { %v9255_v32 = vpop.permute.xlu1 %4706 }
0x22e7   :  { %v9257_v52 = vpop.permute.xlu0 %4701  ;;  %v4764_v46 = vmul.f32 %v6403_v60, %v9255_v32 }
0x22e8   :  { %v4763_v6 = vmul.f32 %v6404_v8, %v9257_v52  ;;  %v4779_v8 = vadd.f32 %v4778_v7, %v4777_v17  ;;  %v4932_v17 = vld [vmem:[#allocation14 + $0x50] sm:$0xff]  ;;  %v4931_v7 = vld [vmem:[#allocation14 + $0x48] sm:$0xff] }
0x22e9   :  { %v4794_v54 = vsel %vm214_vm0, %v4764_v46, 0.0  ;;  %v5034_v46 = vperm.slane %v9244_v29, %v7071_v41  ;;  %v4933_v29 = vld [vmem:[#allocation14 + $0x58] sm:$0xff] }
0x22ea   :  { %v4793_v18 = vsel %vm214_vm0, %v4763_v6, 0.0  ;;  %v5033_v6 = vperm.slane %v9246_v23, %v7066_v39  ;;  %v5048_v23 = vperm.slane %v9280_v40, %v7066_v39  ;;  %4945 = vmatpush.msrb.mxu2 %v4933_v29 }
0x22eb   :  { %v4795_v48 = vadd.f32 %v4794_v54, %v4793_v18  ;;  %v4780_v54 = vrot.slane %v4779_v8, 2 }
0x22ec   :  { %4946 = vmatpush.msrb.mxu2 %v4932_v17 }
0x22ee   :  { %v9259_v58 = vpop.permute.xlu1 %4716  ;;  %4947 = vmatpush.msrb.mxu2 %v4931_v7 }
0x22ef   :  { %v9261_v44 = vpop.permute.xlu0 %4711  ;;  %v4766_v24 = vmul.f32 %v6405_v57, %v9259_v58  ;;  %v5037_v57 = vperm.slane %v9251_v14, %v7071_v41  ;;  %v5035_v14 = vsel %vm506_vm1, %v5034_v46, %v5033_v6  ;;  %v4930_v46 = vld [vmem:[#allocation14 + $0x40] sm:$0xff]  ;;  %v9328_v6 = vadd.f32 %v4780_v54, %v4779_v8 }
0x22f0   :  { %v4765_v33 = vmul.f32 %v6406_v11, %v9261_v44  ;;  %v4796_v11 = vrot.slane %v4795_v48, 4  ;;  %4948 = vmatpush.msrb.mxu2 %v4930_v46 }
0x22f1   :  { %v4803_v28 = vsel %vm214_vm0, %v4766_v24, 0.0  ;;  %v5036_v24 = vperm.slane %v9253_v31, %v7066_v39 }
0x22f2   :  { %v4802_v15 = vsel %vm214_vm0, %v4765_v33, 0.0  ;;  %v4797_v42 = vadd.f32 %v4796_v11, %v4795_v48  ;;  %v5042_v48 = vperm.slane %v9261_v44, %v7066_v39  ;;  %v4929_v11 = vld [vmem:[#allocation14 + $0x38] sm:$0xff] }
0x22f3   :  { %v4804_v38 = vadd.f32 %v4803_v28, %v4802_v15  ;;  %v5038_v31 = vsel %vm506_vm1, %v5037_v57, %v5036_v24  ;;  %v5040_v15 = vperm.slane %v9255_v32, %v7071_v41  ;;  %4949 = vmatpush.msrb.mxu2 %v4929_v11 }
0x22f4   :  { %v4798_v24 = vrot.slane %v4797_v42, 2 }
0x22f6   :  { %v9274_v43 = vpop.permute.xlu1 %4726 }
0x22f7   :  { %v9276_v27 = vpop.permute.xlu0 %4721  ;;  %v4768_v21 = vmul.f32 %v6407_v5, %v9274_v43  ;;  %v4788_v5 = vadd.f32 %v4787_v22, %v4786_v4  ;;  %v5043_v22 = vperm.slane %v9259_v58, %v7071_v41  ;;  %v5046_v32 = vperm.slane %v9274_v43, %v7071_v41 }
0x22f8   :  { %v4767_v9 = vmul.f32 %v6408_v53, %v9276_v27  ;;  %v4805_v53 = vrot.slane %v4804_v38, 4 }
0x22f9   :  { %v4812_v26 = vsel %vm214_vm0, %v4768_v21, 0.0  ;;  %v4789_v28 = vrot.slane %v4788_v5, 2  ;;  %v5044_v54 = vsel %vm506_vm1, %v5043_v22, %v5042_v48 }
0x22fa   :  { %v4811_v25 = vsel %vm214_vm0, %v4767_v9, 0.0  ;;  %v4881_v9 = vsub.f32 1.0, %v9299_v12 }
0x22fb   :  { %v4813_v63 = vadd.f32 %v4812_v26, %v4811_v25  ;;  %v5039_v26 = vperm.slane %v9257_v52, %v7066_v39  ;;  %v5045_v52 = vperm.slane %v9276_v27, %v7066_v39  ;;  %v5057_v27 = vsel %vm529_vm2, %v5038_v31, %v5035_v14  ;;  %v4927_v14 = vld [vmem:[#allocation14 + $0x28] sm:$0xff] }
0x22fd   :  { %v4814_v18 = vrot.slane %v4813_v63, 4  ;;  %v5041_v8 = vsel %vm506_vm1, %v5040_v15, %v5039_v26 }
0x22fe   :  { %v9307_v56 = vpop.permute.xlu1 %4741  ;;  %v5058_v15 = vsel %vm531_vm3, %v5041_v8, %v5057_v27 }
0x22ff   :  { %v9295_v50 = vpop.permute.xlu0 %4736  ;;  %v4771_v4 = vmul.f32 %v6411_v35, %v9307_v56  ;;  %v4815_v57 = vadd.f32 %v4814_v18, %v4813_v63  ;;  %v4790_v63 = vadd.f32 %v4789_v28, %v4788_v5  ;;  %v4928_v18 = vld [vmem:[#allocation14 + $0x30] sm:$0xff]  ;;  %v6413_v5 = vld [vmem:[#allocation2 + $0x70] sm:$0xff]  ;;  %v5059_v31 = vsel %vm533_vm4, %v5044_v54, %v5058_v15 }
0x2300   :  { %v4770_v60 = vmul.f32 %v6410_v20, %v9295_v50  ;;  %v6412_v20 = vld [vmem:[#allocation2 + $0x68] sm:$0xff]  ;;  %4950 = vmatpush.msrb.mxu2 %v4928_v18  ;;  %v4924_v18 = vld [vmem:[#allocation14 + $0x10] sm:$0xff]  ;;  %v4923_v15 = vld [vmem:[#allocation14 + $0x8] sm:$0xff] }
0x2301   :  { %v4829_v58 = vsel %vm214_vm0, %v4771_v4, 0.0  ;;  %v4816_v35 = vrot.slane %v4815_v57, 2  ;;  %v5051_v4 = vperm.slane %v9307_v56, %v7066_v39 }
0x2302   :  { %v4821_v33 = vsel %vm214_vm0, %v4770_v60, 0.0  ;;  %4951 = vmatpush.msrb.mxu2 %v4927_v14 }
0x2303   :  { %v4822_v21 = vadd.f32 %v4821_v33, %v4820_v0  ;;  %v4806_v0 = vadd.f32 %v4805_v53, %v4804_v38  ;;  %v5049_v38 = vperm.slane %v9295_v50, %v7071_v41  ;;  %v5047_v50 = vsel %vm506_vm1, %v5046_v32, %v5045_v52 }
0x2304   :  { %v5060_v56 = vsel %vm535_vm5, %v5047_v50, %v5059_v31  ;;  %v4817_v52 = vadd.f32 %v4816_v35, %v4815_v57  ;;  %v4782_v35 = vrot.slane %v9328_v6, 1 }
0x2305   :  { %v4823_v40 = vrot.slane %v4822_v21, 4  ;;  %v4807_v17 = vrot.slane %v4806_v0, 2  ;;  %v5050_v26 = vsel %vm506_vm1, %v5049_v38, %v5048_v23  ;;  %v4926_v23 = vld [vmem:[#allocation14 + $0x20] sm:$0xff] }
0x2306   :  { %v4752_v53 = vpop.permute.xlu1 %4751  ;;  %4952 = vmatpush.msrb.mxu2 %v4926_v23 }
0x2307   :  { %v4747_v25 = vpop.permute.xlu0 %4746  ;;  %v4824_v33 = vadd.f32 %v4823_v40, %v4822_v21  ;;  %v4799_v21 = vadd.f32 %v4798_v24, %v4797_v42  ;;  %v4773_v28 = vmul.f32 %v6413_v5, %v4752_v53  ;;  %v6414_v42 = vld [vmem:[#allocation2 + $0x78] sm:$0xff]  ;;  %v4808_v32 = vadd.f32 %v4807_v17, %v4806_v0 }
0x2308   :  { %v4772_v60 = vmul.f32 %v6412_v20, %v4747_v25  ;;  %v5052_v43 = vperm.slane %v4747_v25, %v7071_v41  ;;  %v5054_v20 = vperm.slane %v4752_v53, %v7066_v39  ;;  %v5061_v24 = vsel %vm537_vm6, %v5050_v26, %v5060_v56  ;;  %v4925_v53 = vld [vmem:[#allocation14 + $0x18] sm:$0xff] }
0x2309   :  { %v4825_v40 = vrot.slane %v4824_v33, 2  ;;  %v4838_v38 = vsel %vm214_vm0, %v4773_v28, 0.0  ;;  %v4800_v0 = vrot.slane %v4799_v21, 1  ;;  %v4809_v50 = vrot.slane %v4808_v32, 1  ;;  %4953 = vmatpush.msrb.mxu2 %v4925_v53  ;;  %v4912_v53 = vld [vmem:[#allocation5 + $0x28] sm:$0xff] }
0x230a   :  { %v4830_v44 = vsel %vm214_vm0, %v4772_v60, 0.0  ;;  %v5053_v22 = vsel %vm506_vm1, %v5052_v43, %v5051_v4 }
0x230b   :  { %v4831_v29 = vadd.f32 %v4830_v44, %v4829_v58  ;;  %v5062_v44 = vsel %vm539_vm7, %v5053_v22, %v5061_v24  ;;  %v4826_v43 = vadd.f32 %v4825_v40, %v4824_v33  ;;  %v4882_v33 = vmul.f32 %v9289_v49, %v4881_v9  ;;  %4954 = vmatpush.msrb.mxu2 %v4924_v18 }
0x230c   :  { %v4801_v14 = vadd.f32 %v4800_v0, %v4799_v21  ;;  %v4783_v40 = vadd.f32 %v4782_v35, %v9328_v6  ;;  %v4888_v6 = vand.u32 2147483647, %v9265_v37 }
0x230d   :  { %v4832_v7 = vrot.slane %v4831_v29, 4  ;;  %v4827_v5 = vrot.slane %v4826_v43, 1  ;;  %4955 = vmatpush.msrb.mxu2 %v4923_v15  ;;  %v4883_v56 = vadd.f32 %v9289_v49, %v4882_v33 }
0x230e   :  { %vm4889_vm13 = vcmp.eq.f32.partialorder %v4888_v6, 8.507059e+37  ;;  %v5069_v6 = vld [vmem:[#allocation11 + $0x8] sm:$0xff] }
0x230f   :  { %v4833_v25 = vadd.f32 %v4832_v7, %v4831_v29  ;;  %v4757_v48 = vpop.permute.xlu0 %4756  ;;  %v4791_v29 = vrot.slane %v4790_v63, 1  ;;  %v4818_v7 = vrot.slane %v4817_v52, 1  ;;  %v4828_v9 = vadd.f32 %v4827_v5, %v4826_v43 }
0x2310   :  { %v4774_v60 = vmul.f32 %v6414_v42, %v4757_v48  ;;  %v5055_v46 = vperm.slane %v4757_v48, %v7071_v41  ;;  %v4887_v23 = vsel %vm4886_vm12, %v9289_v49, %v4883_v56  ;;  %v4918_v49 = vpop.permute.xlu2 %4917 }
0x2311   :  { %v4834_v58 = vrot.slane %v4833_v25, 2  ;;  %v4792_v26 = vadd.f32 %v4791_v29, %v4790_v63  ;;  %v4819_v48 = vadd.f32 %v4818_v7, %v4817_v52  ;;  %v4890_v63 = vand.u32 2147483648, %v9265_v37  ;;  %v4922_v37 = vld [vmem:[#allocation14] sm:$0xff] }
0x2312   :  { %v4839_v11 = vsel %vm214_vm0, %v4774_v60, 0.0  ;;  %v5056_v8 = vsel %vm506_vm1, %v5055_v46, %v5054_v20  ;;  %4956 = vmatpush.msrb.mxu2 %v4922_v37 }
0x2313   :  { %v4840_v27 = vadd.f32 %v4839_v11, %v4838_v38  ;;  %v5063_v54 = vsel %vm541_vm8, %v5056_v8, %v5062_v44  ;;  %v4835_v57 = vadd.f32 %v4834_v58, %v4833_v25  ;;  %v4810_v25 = vadd.f32 %v4809_v50, %v4808_v32 }
0x2314   :  { %v5065_v17 = vsel %vm544_vm9, %v5063_v54, 0.0  ;;  %v4902_v12 = vsel %vm529_vm2, %v4792_v26, %v4783_v40  ;;  %v4891_v24 = vor.u32 1.1754944e-38, %v4890_v63  ;;  %v6001_v54 = vld [vmem:[%s9812_s12] ss:$0 sm:$0xff] }
0x2315   :  { %v4841_v4 = vrot.slane %v4840_v27, 4  ;;  %5067 = vst [vmem:[#allocation18 + $0x28] sm:$0xff] %v5065_v17  ;;  %v4836_v31 = vrot.slane %v4835_v57, 1  ;;  %v4903_v42 = vsel %vm531_vm3, %v4801_v14, %v4902_v12  ;;  %v5001_v63 = vld [vmem:[#allocation16 + $0x18] sm:$0xff] }
0x2316   :  { %v4904_v60 = vsel %vm533_vm4, %v4810_v25, %v4903_v42  ;;  %v4892_v44 = vsel %vm4889_vm13, %v4891_v24, %v4887_v23  ;;  %v5070_v42 = vld [vmem:[#allocation11 + $0x10] sm:$0xff]  ;;  %5023 = vmatpush.msrb.mxu1 %v5001_v63 }
0x2317   :  { %v4842_v28 = vadd.f32 %v4841_v4, %v4840_v27  ;;  %v4837_v21 = vadd.f32 %v4836_v31, %v4835_v57  ;;  %v4905_v32 = vsel %vm535_vm5, %v4819_v48, %v4904_v60  ;;  %v4999_v60 = vld [vmem:[#allocation16 + $0x8] sm:$0xff]  ;;  %v5635_v24 = vld [vmem:[#allocation13 + $0x10] sm:$0xff] }
0x2318   :  { %v4906_v58 = vsel %vm537_vm6, %v4828_v9, %v4905_v32 }
0x2319   :  { %v4843_v22 = vrot.slane %v4842_v28, 2  ;;  %v4907_v38 = vsel %vm539_vm7, %v4837_v21, %v4906_v58  ;;  %v5000_v21 = vld [vmem:[#allocation16 + $0x10] sm:$0xff]  ;;  %v5634_v58 = vld [vmem:[#allocation13 + $0x8] sm:$0xff] }
0x231a   :  { %5024 = vmatpush.msrb.mxu1 %v5000_v21 }
0x231b   :  { %v4844_v20 = vadd.f32 %v4843_v22, %v4842_v28 }
0x231c   :  { %5025 = vmatpush.msrb.mxu1 %v4999_v60 }
0x231d   :  { %v4845_v46 = vrot.slane %v4844_v20, 1 }
0x231f   :  { %v4846_v52 = vadd.f32 %v4845_v46, %v4844_v20  ;;  %v5071_v20 = vld [vmem:[#allocation11 + $0x18] sm:$0xff]  ;;  %v5068_v46 = vld [vmem:[#allocation11] sm:$0xff] }
0x2320   :  { %5088 = vmatpush.msrb.mxu3 %v5071_v20 }
0x2321   :  { %v4908_v11 = vsel %vm541_vm8, %v4846_v52, %v4907_v38  ;;  %v5636_v52 = vld [vmem:[#allocation13 + $0x18] sm:$0xff]  ;;  %v5633_v38 = vld [vmem:[#allocation13] sm:$0xff] }
0x2322   :  { %v4910_v8 = vmul.f32 %v4908_v11, %v4892_v44  ;;  %5089 = vmatpush.msrb.mxu3 %v5070_v42  ;;  %v6002_v11 = vld [vmem:[%s9814_s14] ss:$0 sm:$0xff] }
0x2324   :  { %4914 = vrot.lane.b32.xlu1 %v4910_v8, %s6723_s24  ;;  %5090 = vmatpush.msrb.mxu3 %v5069_v6 }
0x2326   :  { %5091 = vmatpush.msrb.mxu3 %v5068_v46 }
0x2396   :  { %v4915_v29 = vpop.permute.xlu1 %4914 }
0x2397   :  { %v4920_v43 = vsel %vm214_vm0, %v4912_v53, %v4915_v29  ;;  %v6003_v53 = vld [vmem:[%s9807_s7] ss:$0 sm:$0xff] }
0x2398   :  { %v4921_v27 = vsel %vm987_vm14, %v4920_v43, %v4918_v49 }
0x2399   :  { %5944 = vmatmul.msk.f32.vlgmr.msrb.gmra.mxu2 %vm1005_vm15, %v4921_v27 }
0x241c   :  { %v4958_v0 = vpop.f32.mrf.mxu2 }
0x241d   :  { %v4959_v57 = vadd.f32 %v6001_v54, %v4958_v0 }
0x241f   :  { %6275 = vtanh.f32 %v4959_v57  ;;  %v5945_v18 = vmul.f32 -1.442695, %v4959_v57 }
0x2421   :  { %6277 = vpow2.f32 %v5945_v18 }
0x2425   :  { %v6276_v17 = vpop.eup %6275 }
0x2426   :  { %4983 = vrot.lane.b32.xlu0 %v6276_v17, %s6722_s5 }
0x2427   :  { %v6278_v35 = vpop.eup %6277 }
0x2428   :  { %v4964_v50 = vadd.f32 1.0, %v6278_v35 }
0x242a   :  { %6279 = vrcp.f32 %v4964_v50  ;;  %v4976_v5 = vand.u32 2147483648, %v4964_v50  ;;  %vm4970_vm11 = vweird.f32 %v4964_v50  ;;  %v4974_v28 = vand.u32 2147483647, %v4964_v50 }
0x242c   :  { %v4977_v31 = vor.u32 1.1754944e-38, %v4976_v5  ;;  %vm4975_vm13 = vcmp.eq.f32.partialorder %v4974_v28, 8.507059e+37 }
0x2430   :  { %v6280_v4 = vpop.eup %6279 }
0x2431   :  { %v4966_v7 = vmul.f32 %v6280_v4, %v4964_v50  ;;  %vm4971_vm10 = vweird.f32 %v6280_v4 }
0x2432   :  { %vm4972_vm12 = vmor %vm4970_vm11, %vm4971_vm10 }
0x2433   :  { %v4967_v33 = vsub.f32 1.0, %v4966_v7 }
0x2435   :  { %v4968_v15 = vmul.f32 %v6280_v4, %v4967_v33 }
0x2437   :  { %v4969_v26 = vadd.f32 %v6280_v4, %v4968_v15 }
0x2439   :  { %v4973_v14 = vsel %vm4972_vm12, %v6280_v4, %v4969_v26 }
0x243a   :  { %v4978_v25 = vsel %vm4975_vm13, %v4977_v31, %v4973_v14 }
0x243b   :  { %v4981_v48 = vmul.f32 %v4978_v25, %v8984_v47  ;;  %v4998_v47 = vld [vmem:[#allocation16] sm:$0xff] }
0x243c   :  { %5026 = vmatpush.msrb.mxu1 %v4998_v47 }
0x243e   :  { %5653 = vmatpush.msra.mxu1 %v5636_v52 }
0x2440   :  { %5654 = vmatpush.msra.mxu1 %v5635_v24 }
0x2442   :  { %5655 = vmatpush.msra.mxu1 %v5634_v58 }
0x2444   :  { %5656 = vmatpush.msra.mxu1 %v5633_v38 }
0x2498   :  { %v4984_v40 = vpop.permute.xlu0 %4983 }
0x2499   :  { %v4986_v22 = vmul.f32 %v4984_v40, %v4978_v25 }
0x249b   :  { %4988 = vrot.lane.b32.xlu1 %v4986_v22, %s6723_s24 }
0x250d   :  { %v4989_v56 = vpop.permute.xlu1 %4988 }
0x250e   :  { %v9387_v12 = vadd.f32 %v4989_v56, %v4981_v48 }
0x2510   :  { %6281 = vtanh.f32 %v9387_v12 }
0x2516   :  { %v6282_v9 = vpop.eup %6281 }
0x2517   :  { %4994 = vrot.lane.b32.xlu2 %v6282_v9, %s6722_s5 }
0x2571   :  { %v4995_v23 = vpop.permute.xlu2 %4994 }
0x2572   :  { %v9391_v32 = vmul.f32 %v4995_v23, %v4978_v25 }
0x2574   :  { %5007 = vrot.lane.b32.xlu0 %v9391_v32, %s6723_s24 }
0x25e6   :  { %v5008_v44 = vpop.permute.xlu0 %5007 }
0x25e7   :  { %5946 = vmatmul.msk.f32.vlgmr.msrb.gmra.mxu1 %vm214_vm0, %v5008_v44  ;;  %5947 = vmatmul.msk.f32.vlgmr.msrb.gmra.mxu3 %vm214_vm0, %v5008_v44 }
0x25ef   :  { %5948 = vmatmul.msk.f32.vlgmr.msra.gmra.mxu1 %vm214_vm0, %v5008_v44 }
0x2664   :  { %v5028_v8 = vpop.f32.mrf.mxu1 }
0x2665   :  { %v5029_v37 = vadd.f32 %v6002_v11, %v5028_v8 }
0x2667   :  { %5032 = vst [vmem:[#allocation17 + $0x28] sm:$0xff] %v5029_v37 }
0x266a   :  { %v5093_v29 = vpop.f32.mrf.mxu3 }
0x266b   :  { %v9404_v49 = vadd.f32 %v6003_v53, %v5093_v29 }
0x266d   :  { %v5104_v43 = vperm.slane %v9404_v49, 0  ;;  %v5097_v27 = vrot.slane %v9404_v49, 1  ;;  %v5098_v54 = vrot.slane %v9404_v49, 2  ;;  %v5099_v35 = vrot.slane %v9404_v49, 3 }
0x266e   :  { %v5100_v26 = vrot.slane %v9404_v49, 4  ;;  %v5101_v9 = vrot.slane %v9404_v49, 5  ;;  %v5103_v37 = vrot.slane %v9404_v49, 7 }
0x266f   :  { %v5121_v0 = vadd.f32 %v5104_v43, %v6946_v36  ;;  %v5120_v57 = vadd.f32 %v5104_v43, %v6936_v30  ;;  %v5105_v17 = vperm.slane %v5097_v27, 0  ;;  %v5106_v18 = vperm.slane %v5098_v54, 0  ;;  %v9419_v36 = vld [vmem:[%s9808_s8] ss:$0 sm:$0xff] }
0x2670   :  { %v5108_v56 = vperm.slane %v5100_v26, 0  ;;  %v5109_v60 = vperm.slane %v5101_v9, 0 }
0x2671   :  { %v5137_v50 = vmax.f32 %v5121_v0, 0.0  ;;  %v5136_v4 = vmax.f32 %v5120_v57, 0.0  ;;  %v5122_v7 = vadd.f32 %v5105_v17, %v6954_v45  ;;  %v5124_v33 = vadd.f32 %v5106_v18, %v6967_v59 }
0x2672   :  { %v5123_v15 = vadd.f32 %v5105_v17, %v6960_v51  ;;  %v5125_v14 = vadd.f32 %v5106_v18, %v6973_v1  ;;  %v5107_v45 = vperm.slane %v5099_v35, 0  ;;  %v5128_v6 = vadd.f32 %v5108_v56, %v9849_v19 }
0x2673   :  { %v5153_v30 = vmul.f32 %v9419_v36, %v5137_v50  ;;  %v5152_v5 = vmul.f32 %v9419_v36, %v5136_v4  ;;  %v5138_v28 = vmax.f32 %v5122_v7, 0.0  ;;  %v5140_v31 = vmax.f32 %v5124_v33, 0.0 }
0x2674   :  { %v5139_v25 = vmax.f32 %v5123_v15, 0.0  ;;  %v5141_v48 = vmax.f32 %v5125_v14, 0.0  ;;  %v5127_v63 = vadd.f32 %v5107_v45, %v9851_v62  ;;  %v5126_v42 = vadd.f32 %v5107_v45, %v9850_v61 }
0x2675   :  { %v5171_v59 = vsel %vm214_vm0, %v5153_v30, 0.0  ;;  %v5168_v51 = vsel %vm214_vm0, %v5152_v5, 0.0  ;;  %v5154_v40 = vmul.f32 %v9419_v36, %v5138_v28  ;;  %v5156_v1 = vmul.f32 %v9419_v36, %v5140_v31 }
0x2676   :  { %5172 = vadd.xlane.f32.xlu2 %v5171_v59  ;;  %5169 = vadd.xlane.f32.xlu1 %v5168_v51  ;;  %v5155_v20 = vmul.f32 %v9419_v36, %v5139_v25  ;;  %v5157_v21 = vmul.f32 %v9419_v36, %v5141_v48  ;;  %v5143_v23 = vmax.f32 %v5127_v63, 0.0  ;;  %v5142_v52 = vmax.f32 %v5126_v42, 0.0 }
0x2677   :  { %v5174_v22 = vsel %vm214_vm0, %v5154_v40, 0.0  ;;  %v5180_v46 = vsel %vm214_vm0, %v5156_v1, 0.0  ;;  %v5144_v58 = vmax.f32 %v5128_v6, 0.0  ;;  %v5102_v62 = vrot.slane %v9404_v49, 6 }
0x2678   :  { %5175 = vadd.xlane.f32.xlu0 %v5174_v22  ;;  %v5177_v47 = vsel %vm214_vm0, %v5155_v20, 0.0  ;;  %v5183_v24 = vsel %vm214_vm0, %v5157_v21, 0.0  ;;  %v5159_v61 = vmul.f32 %v9419_v36, %v5143_v23  ;;  %v5158_v38 = vmul.f32 %v9419_v36, %v5142_v52 }
0x2679   :  { %v5130_v19 = vadd.f32 %v5109_v60, %v9854_v10  ;;  %v5129_v44 = vadd.f32 %v5108_v56, %v9853_v55  ;;  %v5160_v11 = vmul.f32 %v9419_v36, %v5144_v58  ;;  %v5131_v8 = vadd.f32 %v5109_v60, %v9852_v2 }
0x267a   :  { %v5110_v53 = vperm.slane %v5102_v62, 0  ;;  %v5189_v29 = vsel %vm214_vm0, %v5159_v61, 0.0  ;;  %v5186_v43 = vsel %vm214_vm0, %v5158_v38, 0.0  ;;  %v5111_v57 = vperm.slane %v5103_v37, 0 }
0x267b   :  { %v5146_v27 = vmax.f32 %v5130_v19, 0.0  ;;  %v5145_v54 = vmax.f32 %v5129_v44, 0.0  ;;  %v5192_v0 = vsel %vm214_vm0, %v5160_v11, 0.0  ;;  %v5147_v10 = vmax.f32 %v5131_v8, 0.0 }
0x267c   :  { %v5133_v49 = vadd.f32 %v5110_v53, %v9857_v16  ;;  %v5132_v17 = vadd.f32 %v5110_v53, %v9856_v13  ;;  %v5134_v35 = vadd.f32 %v5111_v57, %v9855_v34  ;;  %v5135_v30 = vadd.f32 %v5111_v57, %v9858_v3 }
0x267d   :  { %v5162_v55 = vmul.f32 %v9419_v36, %v5146_v27  ;;  %v5161_v2 = vmul.f32 %v9419_v36, %v5145_v54  ;;  %v5163_v18 = vmul.f32 %v9419_v36, %v5147_v10 }
0x267e   :  { %5181 = vadd.xlane.f32.xlu2 %v5180_v46  ;;  %5178 = vadd.xlane.f32.xlu1 %v5177_v47  ;;  %v5149_v7 = vmax.f32 %v5133_v49, 0.0  ;;  %v5148_v33 = vmax.f32 %v5132_v17, 0.0  ;;  %v5150_v26 = vmax.f32 %v5134_v35, 0.0  ;;  %v5151_v14 = vmax.f32 %v5135_v30, 0.0 }
0x267f   :  { %v5198_v50 = vsel %vm214_vm0, %v5162_v55, 0.0  ;;  %v5195_v4 = vsel %vm214_vm0, %v5161_v2, 0.0  ;;  %v5201_v15 = vsel %vm214_vm0, %v5163_v18, 0.0 }
0x2680   :  { %5184 = vadd.xlane.f32.xlu0 %v5183_v24  ;;  %v5165_v16 = vmul.f32 %v9419_v36, %v5149_v7  ;;  %v5164_v13 = vmul.f32 %v9419_v36, %v5148_v33  ;;  %v5166_v34 = vmul.f32 %v9419_v36, %v5150_v26  ;;  %v5167_v45 = vmul.f32 %v9419_v36, %v5151_v14 }
0x2682   :  { %v5207_v5 = vsel %vm214_vm0, %v5165_v16, 0.0  ;;  %v5204_v28 = vsel %vm214_vm0, %v5164_v13, 0.0  ;;  %v5210_v31 = vsel %vm214_vm0, %v5166_v34, 0.0  ;;  %v5213_v59 = vsel %vm214_vm0, %v5167_v45, 0.0 }
0x2686   :  { %5190 = vadd.xlane.f32.xlu2 %v5189_v29  ;;  %5187 = vadd.xlane.f32.xlu1 %v5186_v43 }
0x2688   :  { %5193 = vadd.xlane.f32.xlu0 %v5192_v0 }
0x268e   :  { %5199 = vadd.xlane.f32.xlu2 %v5198_v50  ;;  %5196 = vadd.xlane.f32.xlu1 %v5195_v4 }
0x2690   :  { %5202 = vadd.xlane.f32.xlu0 %v5201_v15 }
0x2696   :  { %5208 = vadd.xlane.f32.xlu2 %v5207_v5  ;;  %5205 = vadd.xlane.f32.xlu1 %v5204_v28 }
0x2698   :  { %5211 = vadd.xlane.f32.xlu0 %v5210_v31 }
0x269e   :  { %5214 = vadd.xlane.f32.xlu1 %v5213_v59 }
0x26e9   :  { %v5173_v51 = vpop.xlane.xlu2 %5172  ;;  %v5170_v40 = vpop.xlane.xlu1 %5169 }
0x26ea   :  { %v5233_v21 = vperm.slane %v5173_v51, %v7071_v41  ;;  %v5232_v6 = vperm.slane %v5170_v40, %v7066_v39 }
0x26eb   :  { %v5176_v3 = vpop.xlane.xlu0 %5175 }
0x26ec   :  { %v5235_v60 = vperm.slane %v5176_v3, %v7066_v39  ;;  %v5234_v61 = vsel %vm506_vm1, %v5233_v21, %v5232_v6 }
0x26f1   :  { %v5182_v25 = vpop.xlane.xlu2 %5181  ;;  %v5179_v22 = vpop.xlane.xlu1 %5178 }
0x26f2   :  { %v5236_v36 = vperm.slane %v5179_v22, %v7071_v41  ;;  %v5238_v24 = vperm.slane %v5182_v25, %v7066_v39 }
0x26f3   :  { %v5185_v48 = vpop.xlane.xlu0 %5184 }
0x26f4   :  { %v5239_v46 = vperm.slane %v5185_v48, %v7071_v41  ;;  %v5237_v47 = vsel %vm506_vm1, %v5236_v36, %v5235_v60 }
0x26f5   :  { %v5256_v19 = vsel %vm529_vm2, %v5237_v47, %v5234_v61 }
0x26f6   :  { %v5240_v44 = vsel %vm506_vm1, %v5239_v46, %v5238_v24 }
0x26f7   :  { %v5257_v27 = vsel %vm531_vm3, %v5240_v44, %v5256_v19 }
0x26f9   :  { %v9467_v56 = vpop.xlane.xlu2 %5190  ;;  %v9469_v9 = vpop.xlane.xlu1 %5187 }
0x26fa   :  { %v5242_v23 = vperm.slane %v9467_v56, %v7071_v41  ;;  %v5241_v52 = vperm.slane %v9469_v9, %v7066_v39 }
0x26fb   :  { %v9471_v1 = vpop.xlane.xlu0 %5193 }
0x26fc   :  { %v5244_v11 = vperm.slane %v9471_v1, %v7066_v39  ;;  %v5243_v8 = vsel %vm506_vm1, %v5242_v23, %v5241_v52 }
0x26fd   :  { %v5258_v0 = vsel %vm533_vm4, %v5243_v8, %v5257_v27 }
0x2701   :  { %v9473_v20 = vpop.xlane.xlu2 %5199  ;;  %v9475_v63 = vpop.xlane.xlu1 %5196 }
0x2702   :  { %v5245_v58 = vperm.slane %v9475_v63, %v7071_v41  ;;  %v5247_v54 = vperm.slane %v9473_v20, %v7066_v39 }
0x2703   :  { %v9478_v42 = vpop.xlane.xlu0 %5202 }
0x2704   :  { %v5248_v37 = vperm.slane %v9478_v42, %v7071_v41  ;;  %v5246_v53 = vsel %vm506_vm1, %v5245_v58, %v5244_v11 }
0x2705   :  { %v5259_v57 = vsel %vm535_vm5, %v5246_v53, %v5258_v0 }
0x2706   :  { %v5249_v55 = vsel %vm506_vm1, %v5248_v37, %v5247_v54 }
0x2707   :  { %v5260_v35 = vsel %vm537_vm6, %v5249_v55, %v5259_v57 }
0x2709   :  { %v9492_v62 = vpop.xlane.xlu1 %5205  ;;  %v9495_v38 = vpop.xlane.xlu2 %5208 }
0x270a   :  { %v5251_v29 = vperm.slane %v9495_v38, %v7071_v41  ;;  %v5250_v43 = vperm.slane %v9492_v62, %v7066_v39 }
0x270b   :  { %v9513_v10 = vpop.xlane.xlu0 %5211 }
0x270c   :  { %v5252_v2 = vsel %vm506_vm1, %v5251_v29, %v5250_v43  ;;  %v5253_v17 = vperm.slane %v9513_v10, %v7066_v39 }
0x270d   :  { %v5261_v4 = vsel %vm539_vm7, %v5252_v2, %v5260_v35 }
0x2711   :  { %v9518_v49 = vpop.xlane.xlu1 %5214 }
0x2712   :  { %v5254_v18 = vperm.slane %v9518_v49, %v7071_v41 }
0x2714   :  { %v5255_v50 = vsel %vm506_vm1, %v5254_v18, %v5253_v17 }
0x2715   :  { %v5262_v7 = vsel %vm541_vm8, %v5255_v50, %v5261_v4 }
0x2716   :  { %v5264_v33 = vsel %vm544_vm9, %v5262_v7, -inf }
0x2717   :  { %5265 = vmax.xlane.f32.xlu2 %v5264_v33 }
0x278a   :  { %v9529_v15 = vpop.xlane.xlu2 %5265 }
0x278b   :  { %v5268_v26 = vperm.slane %v9529_v15, 0  ;;  %v5269_v16 = vperm.slane %v9529_v15, 1  ;;  %v5270_v5 = vperm.slane %v9529_v15, 2  ;;  %v5271_v21 = vperm.slane %v9529_v15, 3 }
0x278c   :  { %v5273_v52 = vperm.slane %v9529_v15, 5  ;;  %v5274_v11 = vperm.slane %v9529_v15, 6  ;;  %v5275_v29 = vperm.slane %v9529_v15, 7 }
0x278d   :  { %v5284_v13 = vsub.f32 %v5170_v40, %v5268_v26  ;;  %v5285_v30 = vsub.f32 %v5173_v51, %v5268_v26  ;;  %v5286_v34 = vsub.f32 %v5176_v3, %v5269_v16  ;;  %v5287_v45 = vsub.f32 %v5179_v22, %v5269_v16 }
0x278e   :  { %v5288_v59 = vsub.f32 %v5182_v25, %v5270_v5  ;;  %v5289_v36 = vsub.f32 %v5185_v48, %v5270_v5  ;;  %v5272_v51 = vperm.slane %v9529_v15, 4  ;;  %v5290_v25 = vsub.f32 %v9469_v9, %v5271_v21 }
0x278f   :  { %v5300_v28 = vmul.f32 1.442695, %v5284_v13  ;;  %v5302_v14 = vmul.f32 1.442695, %v5285_v30  ;;  %v5304_v31 = vmul.f32 1.442695, %v5286_v34  ;;  %v5291_v22 = vsub.f32 %v9467_v56, %v5271_v21 }
0x2790   :  { %v5306_v6 = vmul.f32 1.442695, %v5287_v45  ;;  %v5308_v60 = vmul.f32 1.442695, %v5288_v59  ;;  %v5310_v40 = vmul.f32 1.442695, %v5289_v36  ;;  %v5292_v48 = vsub.f32 %v9471_v1, %v5272_v51 }
0x2791   :  { %6283 = vpow2.f32 %v5300_v28  ;;  %v5312_v23 = vmul.f32 1.442695, %v5290_v25  ;;  %v5314_v24 = vmul.f32 1.442695, %v5291_v22  ;;  %v5293_v56 = vsub.f32 %v9475_v63, %v5272_v51 }
0x2792   :  { %6285 = vpow2.f32 %v5302_v14  ;;  %v5316_v61 = vmul.f32 1.442695, %v5292_v48  ;;  %v5294_v1 = vsub.f32 %v9473_v20, %v5273_v52  ;;  %v5295_v44 = vsub.f32 %v9478_v42, %v5273_v52 }
0x2793   :  { %6287 = vpow2.f32 %v5304_v31  ;;  %v5318_v8 = vmul.f32 1.442695, %v5293_v56  ;;  %v5296_v27 = vsub.f32 %v9492_v62, %v5274_v11  ;;  %v5297_v42 = vsub.f32 %v9495_v38, %v5274_v11 }
0x2794   :  { %6289 = vpow2.f32 %v5306_v6  ;;  %v5320_v37 = vmul.f32 1.442695, %v5294_v1  ;;  %v5322_v63 = vmul.f32 1.442695, %v5295_v44  ;;  %v5298_v54 = vsub.f32 %v9513_v10, %v5275_v29 }
0x2795   :  { %6291 = vpow2.f32 %v5308_v60  ;;  %v5324_v0 = vmul.f32 1.442695, %v5296_v27  ;;  %v5326_v57 = vmul.f32 1.442695, %v5297_v42  ;;  %v5299_v18 = vsub.f32 %v9518_v49, %v5275_v29 }
0x2796   :  { %6293 = vpow2.f32 %v5310_v40  ;;  %v5328_v2 = vmul.f32 1.442695, %v5298_v54 }
0x2797   :  { %v9535_v46 = vpop.eup %6283  ;;  %6295 = vpow2.f32 %v5312_v23  ;;  %v5330_v38 = vmul.f32 1.442695, %v5299_v18 }
0x2798   :  { %v9538_v3 = vpop.eup %6285  ;;  %5349 = vperm.xlu0 %5975, %v9535_v46   ;;  %6297 = vpow2.f32 %v5314_v24 }
0x2799   :  { %v9541_v47 = vpop.eup %6287  ;;  %5352 = vperm.xlu1 %5976, %v9538_v3   ;;  %6299 = vpow2.f32 %v5316_v61 }
0x279a   :  { %5355 = vperm.xlu2 %5974, %v9541_v47   ;;  %v9549_v58 = vpop.eup %6289  ;;  %6301 = vpow2.f32 %v5318_v8 }
0x279b   :  { %v9551_v19 = vpop.eup %6291  ;;  %6303 = vpow2.f32 %v5320_v37 }
0x279c   :  { %v9554_v9 = vpop.eup %6293  ;;  %6305 = vpow2.f32 %v5322_v63 }
0x279d   :  { %v9562_v53 = vpop.eup %6295  ;;  %6307 = vpow2.f32 %v5324_v0 }
0x279e   :  { %v9565_v43 = vpop.eup %6297  ;;  %6309 = vpow2.f32 %v5326_v57 }
0x279f   :  { %v9568_v20 = vpop.eup %6299  ;;  %6311 = vpow2.f32 %v5328_v2 }
0x27a0   :  { %5358 = vperm.xlu0 %5975, %v9549_v58   ;;  %v9575_v55 = vpop.eup %6301  ;;  %6313 = vpow2.f32 %v5330_v38 }
0x27a1   :  { %5361 = vperm.xlu1 %5976, %v9551_v19   ;;  %v9577_v17 = vpop.eup %6303 }
0x27a2   :  { %5364 = vperm.xlu2 %5974, %v9554_v9   ;;  %v9580_v62 = vpop.eup %6305 }
0x27a3   :  { %v9585_v10 = vpop.eup %6307 }
0x27a4   :  { %v9587_v35 = vpop.eup %6309 }
0x27a5   :  { %v9590_v50 = vpop.eup %6311 }
0x27a6   :  { %v9594_v49 = vpop.eup %6313 }
0x27a8   :  { %5367 = vperm.xlu0 %5975, %v9562_v53  }
0x27a9   :  { %5370 = vperm.xlu1 %5976, %v9565_v43  }
0x27aa   :  { %5373 = vperm.xlu2 %5974, %v9568_v20  }
0x27b0   :  { %5376 = vperm.xlu0 %5975, %v9575_v55  }
0x27b1   :  { %5379 = vperm.xlu1 %5976, %v9577_v17  }
0x27b2   :  { %5382 = vperm.xlu2 %5974, %v9580_v62  }
0x27b8   :  { %5385 = vperm.xlu0 %5975, %v9585_v10  }
0x27b9   :  { %5388 = vperm.xlu1 %5976, %v9587_v35  }
0x27ba   :  { %5391 = vperm.xlu2 %5974, %v9590_v50  }
0x27c0   :  { %5394 = vperm.xlu0 %5975, %v9594_v49  }
0x27f4   :  { %v5356_v4 = vpop.permute.xlu2 %5355 }
0x27f5   :  { %v5399_v45 = vperm.slane %v5356_v4, %v7066_v39 }
0x27fc   :  { %v5365_v15 = vpop.permute.xlu2 %5364 }
0x27fd   :  { %v5403_v40 = vperm.slane %v5365_v15, %v7071_v41 }
0x2804   :  { %v5374_v34 = vpop.permute.xlu2 %5373 }
0x2805   :  { %v5408_v52 = vperm.slane %v5374_v34, %v7066_v39 }
0x280a   :  { %v5350_v7 = vpop.permute.xlu0 %5349 }
0x280b   :  { %v5353_v33 = vpop.permute.xlu1 %5352  ;;  %v5396_v36 = vperm.slane %v5350_v7, %v7066_v39 }
0x280c   :  { %v5383_v31 = vpop.permute.xlu2 %5382  ;;  %v5397_v59 = vperm.slane %v5353_v33, %v7071_v41 }
0x280d   :  { %v5412_v37 = vperm.slane %v5383_v31, %v7071_v41 }
0x280e   :  { %v5398_v48 = vsel %vm506_vm1, %v5397_v59, %v5396_v36 }
0x2812   :  { %v5359_v26 = vpop.permute.xlu0 %5358 }
0x2813   :  { %v5362_v16 = vpop.permute.xlu1 %5361  ;;  %v5400_v14 = vperm.slane %v5359_v26, %v7071_v41 }
0x2814   :  { %v5402_v21 = vperm.slane %v5362_v16, %v7066_v39  ;;  %v5392_v63 = vpop.permute.xlu2 %5391 }
0x2815   :  { %v5401_v6 = vsel %vm506_vm1, %v5400_v14, %v5399_v45  ;;  %v5417_v2 = vperm.slane %v5392_v63, %v7066_v39  ;;  %v6420_v63 = vld [vmem:[#allocation2 + $0x28] sm:$0xff] }
0x2816   :  { %v5404_v24 = vsel %vm506_vm1, %v5403_v40, %v5402_v21  ;;  %v5420_v61 = vsel %vm529_vm2, %v5401_v6, %v5398_v48  ;;  %v5658_v40 = vpop.f32.mrf.mxu1 }
0x2817   :  { %v5421_v29 = vsel %vm531_vm3, %v5404_v24, %v5420_v61  ;;  %v6416_v61 = vld [vmem:[#allocation2 + $0x18] sm:$0xff] }
0x281a   :  { %v5368_v13 = vpop.permute.xlu0 %5367 }
0x281b   :  { %v5371_v30 = vpop.permute.xlu1 %5370  ;;  %v5405_v51 = vperm.slane %v5368_v13, %v7066_v39 }
0x281c   :  { %v5406_v60 = vperm.slane %v5371_v30, %v7071_v41 }
0x281e   :  { %v5407_v56 = vsel %vm506_vm1, %v5406_v60, %v5405_v51 }
0x281f   :  { %v5422_v27 = vsel %vm533_vm4, %v5407_v56, %v5421_v29 }
0x2822   :  { %v5377_v5 = vpop.permute.xlu0 %5376 }
0x2823   :  { %v5380_v28 = vpop.permute.xlu1 %5379  ;;  %v5409_v25 = vperm.slane %v5377_v5, %v7071_v41 }
0x2824   :  { %v5411_v1 = vperm.slane %v5380_v28, %v7066_v39 }
0x2825   :  { %v5410_v44 = vsel %vm506_vm1, %v5409_v25, %v5408_v52 }
0x2826   :  { %v5413_v42 = vsel %vm506_vm1, %v5412_v37, %v5411_v1  ;;  %v5423_v54 = vsel %vm535_vm5, %v5410_v44, %v5422_v27  ;;  %v6417_v1 = vld [vmem:[#allocation2 + $0x8] sm:$0xff]  ;;  %v6419_v37 = vld [vmem:[#allocation2] sm:$0xff] }
0x2827   :  { %v5424_v38 = vsel %vm537_vm6, %v5413_v42, %v5423_v54 }
0x282a   :  { %v5386_v22 = vpop.permute.xlu0 %5385 }
0x282b   :  { %v5389_v23 = vpop.permute.xlu1 %5388  ;;  %v5414_v8 = vperm.slane %v5386_v22, %v7066_v39 }
0x282c   :  { %v5415_v11 = vperm.slane %v5389_v23, %v7071_v41 }
0x282e   :  { %v5416_v0 = vsel %vm506_vm1, %v5415_v11, %v5414_v8  ;;  %v6418_v11 = vld [vmem:[#allocation2 + $0x10] sm:$0xff] }
0x282f   :  { %v5425_v7 = vsel %vm539_vm7, %v5416_v0, %v5424_v38  ;;  %v6422_v38 = vld [vmem:[#allocation2 + $0x38] sm:$0xff] }
0x2832   :  { %v5395_v57 = vpop.permute.xlu0 %5394 }
0x2833   :  { %v5418_v18 = vperm.slane %v5395_v57, %v7071_v41  ;;  %v6421_v57 = vld [vmem:[#allocation2 + $0x20] sm:$0xff] }
0x2835   :  { %v5419_v4 = vsel %vm506_vm1, %v5418_v18, %v5417_v2 }
0x2836   :  { %v5426_v33 = vsel %vm541_vm8, %v5419_v4, %v5425_v7 }
0x2837   :  { %v5428_v15 = vsel %vm544_vm9, %v5426_v33, 0.0 }
0x2838   :  { %5429 = vadd.xlane.f32.xlu1 %v5428_v15 }
0x28ab   :  { %v5430_v26 = vpop.xlane.xlu1 %5429 }
0x28ac   :  { %6315 = vrcp.f32 %v5430_v26  ;;  %v6423_v26 = vld [vmem:[#allocation2 + $0x30] sm:$0xff] }
0x28b2   :  { %v6316_v16 = vpop.eup %6315 }
0x28b3   :  { %v5438_v13 = vperm.slane %v6316_v16, 5  ;;  %v5433_v30 = vperm.slane %v6316_v16, 0  ;;  %v5434_v14 = vperm.slane %v6316_v16, 1  ;;  %v5435_v59 = vperm.slane %v6316_v16, 2 }
0x28b4   :  { %v5437_v6 = vperm.slane %v6316_v16, 4  ;;  %v5439_v60 = vperm.slane %v6316_v16, 6  ;;  %v5440_v51 = vperm.slane %v6316_v16, 7 }
0x28b5   :  { %v5460_v34 = vmul.f32 %v9580_v62, %v5438_v13  ;;  %v5450_v5 = vmul.f32 %v9538_v3, %v5433_v30  ;;  %v5449_v28 = vmul.f32 %v9535_v46, %v5433_v30  ;;  %v5452_v31 = vmul.f32 %v9549_v58, %v5434_v14 }
0x28b6   :  { %v5451_v45 = vmul.f32 %v9541_v47, %v5434_v14  ;;  %v5454_v36 = vmul.f32 %v9554_v9, %v5435_v59  ;;  %v5453_v21 = vmul.f32 %v9551_v19, %v5435_v59  ;;  %v5436_v3 = vperm.slane %v6316_v16, 3  ;;  %v6424_v59 = vld [vmem:[#allocation2 + $0x50] sm:$0xff] }
0x28b7   :  { %5522 = vperm.xlu1 %5976, %v5460_v34   ;;  %5472 = vperm.xlu0 %5975, %v5450_v5   ;;  %v5458_v58 = vmul.f32 %v9575_v55, %v5437_v6  ;;  %v5457_v47 = vmul.f32 %v9568_v20, %v5437_v6  ;;  %v5461_v9 = vmul.f32 %v9585_v10, %v5439_v60  ;;  %v6426_v6 = vld [vmem:[#allocation2 + $0x58] sm:$0xff] }
0x28b8   :  { %5467 = vperm.xlu2 %5974, %v5449_v28   ;;  %v5456_v46 = vmul.f32 %v9565_v43, %v5436_v3  ;;  %v5455_v62 = vmul.f32 %v9562_v53, %v5436_v3  ;;  %v5459_v19 = vmul.f32 %v9577_v17, %v5438_v13  ;;  %v5463_v43 = vmul.f32 %v9590_v50, %v5440_v51  ;;  %v6004_v50 = vld [vmem:[%s9810_s10] ss:$0 sm:$0xff] }
0x28b9   :  { %v5462_v53 = vmul.f32 %v9587_v35, %v5439_v60  ;;  %v5464_v55 = vmul.f32 %v9594_v49, %v5440_v51  ;;  %v5659_v35 = vadd.f32 %v6004_v50, %v5658_v40 }
0x28bb   :  { %v5949_v22 = vmul.f32 -1.442695, %v5659_v35 }
0x28bd   :  { %6317 = vpow2.f32 %v5949_v22 }
0x28bf   :  { %5482 = vperm.xlu0 %5975, %v5452_v31  }
0x28c0   :  { %5477 = vperm.xlu2 %5974, %v5451_v45  }
0x28c7   :  { %5492 = vperm.xlu0 %5975, %v5454_v36  }
0x28c8   :  { %5487 = vperm.xlu2 %5974, %v5453_v21  }
0x28cf   :  { %5502 = vperm.xlu0 %5975, %v5456_v46   ;;  %v6425_v46 = vld [vmem:[#allocation2 + $0x40] sm:$0xff] }
0x28d0   :  { %5497 = vperm.xlu2 %5974, %v5455_v62  }
0x28d7   :  { %5512 = vperm.xlu0 %5975, %v5458_v58  }
0x28d8   :  { %5507 = vperm.xlu2 %5974, %v5457_v47  }
0x28df   :  { %5527 = vperm.xlu0 %5975, %v5461_v9  }
0x28e0   :  { %5517 = vperm.xlu2 %5974, %v5459_v19   ;;  %v6427_v19 = vld [vmem:[#allocation2 + $0x48] sm:$0xff] }
0x28e7   :  { %5537 = vperm.xlu0 %5975, %v5463_v43  }
0x28e8   :  { %5532 = vperm.xlu2 %5974, %v5462_v53  }
0x28f0   :  { %5542 = vperm.xlu2 %5974, %v5464_v55  }
0x28f8   :  { %5703 = vrot.lane.b32.xlu2 %v9391_v32, %s6724_s11  ;;  %v6318_v32 = vpop.eup %6317 }
0x28f9   :  { %v9666_v24 = vadd.f32 1.0, %v6318_v32 }
0x28fb   :  { %6319 = vrcp.f32 %v9666_v24 }
0x2901   :  { %v9683_v33 = vpop.eup %6319 }
0x2902   :  { %v9694_v31 = vmul.f32 %v9683_v33, %v9666_v24 }
0x2904   :  { %v5667_v43 = vsub.f32 1.0, %v9694_v31 }
0x2912   :  { %v9647_v20 = vpop.permute.xlu2 %5467 }
0x2913   :  { %v5545_v29 = vmul.f32 %v6419_v37, %v9647_v20 }
0x2915   :  { %v5561_v15 = vsel %vm214_vm0, %v5545_v29, 0.0 }
0x291a   :  { %v9649_v10 = vpop.permute.xlu2 %5477 }
0x291b   :  { %v5547_v8 = vmul.f32 %v6418_v11, %v9649_v10 }
0x291d   :  { %v5570_v7 = vsel %vm214_vm0, %v5547_v8, 0.0  ;;  %v5822_v8 = vperm.slane %v9649_v10, %v7066_v39 }
0x2922   :  { %v9651_v17 = vpop.permute.xlu2 %5487 }
0x2923   :  { %v5549_v2 = vmul.f32 %v6421_v57, %v9651_v17  ;;  %v5825_v37 = vperm.slane %v9651_v17, %v7066_v39 }
0x2925   :  { %v5579_v5 = vsel %vm214_vm0, %v5549_v2, 0.0 }
0x2929   :  { %v9656_v25 = vpop.permute.xlu0 %5472  ;;  %v9689_v28 = vpop.permute.xlu1 %5522 }
0x292a   :  { %v9658_v49 = vpop.permute.xlu2 %5497  ;;  %v5546_v44 = vmul.f32 %v6417_v1, %v9656_v25  ;;  %v5556_v58 = vmul.f32 %v6426_v6, %v9689_v28  ;;  %v5820_v53 = vperm.slane %v9656_v25, %v7071_v41  ;;  %v5819_v25 = vperm.slane %v9647_v20, %v7066_v39 }
0x292b   :  { %v5551_v16 = vmul.f32 %v6423_v26, %v9658_v49 }
0x292c   :  { %v5562_v18 = vsel %vm214_vm0, %v5546_v44, 0.0 }
0x292d   :  { %v5563_v34 = vadd.f32 %v5562_v18, %v5561_v15  ;;  %v5588_v21 = vsel %vm214_vm0, %v5551_v16, 0.0  ;;  %v5821_v15 = vsel %vm506_vm1, %v5820_v53, %v5819_v25  ;;  %v5713_v25 = vld [vmem:[#allocation14 + $0x28] sm:$0xff] }
0x292f   :  { %v5564_v47 = vrot.slane %v5563_v34, 4 }
0x2931   :  { %v9660_v48 = vpop.permute.xlu0 %5482  ;;  %v5565_v1 = vadd.f32 %v5564_v47, %v5563_v34  ;;  %v6429_v34 = vld [vmem:[#allocation2 + $0x60] sm:$0xff] }
0x2932   :  { %v9662_v23 = vpop.permute.xlu2 %5507  ;;  %v5548_v56 = vmul.f32 %v6416_v61, %v9660_v48  ;;  %v5823_v22 = vperm.slane %v9660_v48, %v7071_v41  ;;  %v5719_v48 = vld [vmem:[#allocation14 + $0x58] sm:$0xff] }
0x2933   :  { %v5553_v62 = vmul.f32 %v6425_v46, %v9662_v23  ;;  %5731 = vmatpush.msra.mxu3 %v5719_v48 }
0x2934   :  { %v5571_v42 = vsel %vm214_vm0, %v5548_v56, 0.0  ;;  %v5607_v56 = vsel %vm214_vm0, %v5556_v58, 0.0  ;;  %v5824_v20 = vsel %vm506_vm1, %v5823_v22, %v5822_v8 }
0x2935   :  { %v5572_v13 = vadd.f32 %v5571_v42, %v5570_v7  ;;  %v5597_v32 = vsel %vm214_vm0, %v5553_v62, 0.0  ;;  %v5566_v7 = vrot.slane %v5565_v1, 2  ;;  %v5715_v62 = vld [vmem:[#allocation14 + $0x38] sm:$0xff] }
0x2937   :  { %v5573_v3 = vrot.slane %v5572_v13, 4 }
0x2939   :  { %v9664_v52 = vpop.permute.xlu0 %5492  ;;  %v5574_v35 = vadd.f32 %v5573_v3, %v5572_v13 }
0x293a   :  { %v5550_v27 = vmul.f32 %v6420_v63, %v9664_v52  ;;  %v9675_v54 = vpop.permute.xlu2 %5517  ;;  %v5718_v63 = vld [vmem:[#allocation14 + $0x50] sm:$0xff]  ;;  %v5826_v57 = vperm.slane %v9664_v52, %v7071_v41  ;;  %v5831_v52 = vperm.slane %v9662_v23, %v7066_v39 }
0x293b   :  { %v5555_v36 = vmul.f32 %v6424_v59, %v9675_v54  ;;  %v5575_v18 = vrot.slane %v5574_v35, 2  ;;  %5732 = vmatpush.msra.mxu3 %v5718_v63 }
0x293c   :  { %v5580_v30 = vsel %vm214_vm0, %v5550_v27, 0.0  ;;  %v5828_v27 = vperm.slane %v9658_v49, %v7066_v39  ;;  %v5827_v59 = vsel %vm506_vm1, %v5826_v57, %v5825_v37 }
0x293d   :  { %v5581_v45 = vadd.f32 %v5580_v30, %v5579_v5  ;;  %v5606_v50 = vsel %vm214_vm0, %v5555_v36, 0.0  ;;  %v5834_v36 = vperm.slane %v9675_v54, %v7066_v39  ;;  %v5835_v54 = vperm.slane %v9689_v28, %v7071_v41 }
0x293e   :  { %v5608_v29 = vadd.f32 %v5607_v56, %v5606_v50 }
0x293f   :  { %v5582_v55 = vrot.slane %v5581_v45, 4  ;;  %v5836_v56 = vsel %vm506_vm1, %v5835_v54, %v5834_v36  ;;  %v5709_v36 = vld [vmem:[#allocation14 + $0x8] sm:$0xff]  ;;  %v5676_v54 = vand.u32 2147483648, %v9666_v24 }
0x2940   :  { %v5609_v13 = vrot.slane %v5608_v29, 4 }
0x2941   :  { %v9677_v0 = vpop.permute.xlu0 %5502  ;;  %v5583_v42 = vadd.f32 %v5582_v55, %v5581_v45  ;;  %v5714_v55 = vld [vmem:[#allocation14 + $0x30] sm:$0xff] }
0x2942   :  { %v5552_v4 = vmul.f32 %v6422_v38, %v9677_v0  ;;  %v9704_v40 = vpop.permute.xlu2 %5532  ;;  %v5829_v10 = vperm.slane %v9677_v0, %v7071_v41  ;;  %v6428_v38 = vld [vmem:[#allocation2 + $0x68] sm:$0xff] }
0x2943   :  { %v5558_v17 = vmul.f32 %v6428_v38, %v9704_v40  ;;  %v5716_v0 = vld [vmem:[#allocation14 + $0x40] sm:$0xff]  ;;  %v5584_v45 = vrot.slane %v5583_v42, 2  ;;  %v5838_v22 = vperm.slane %v9704_v40, %v7071_v41 }
0x2944   :  { %v5589_v14 = vsel %vm214_vm0, %v5552_v4, 0.0  ;;  %v5717_v4 = vld [vmem:[#allocation14 + $0x48] sm:$0xff]  ;;  %v5830_v3 = vsel %vm506_vm1, %v5829_v10, %v5828_v27 }
0x2945   :  { %v5590_v60 = vadd.f32 %v5589_v14, %v5588_v21  ;;  %v5843_v14 = vsel %vm529_vm2, %v5824_v20, %v5821_v15  ;;  %5733 = vmatpush.msra.mxu3 %v5717_v4  ;;  %v5576_v21 = vadd.f32 %v5575_v18, %v5574_v35  ;;  %v5616_v46 = vsel %vm214_vm0, %v5558_v17, 0.0 }
0x2946   :  { %v5585_v50 = vadd.f32 %v5584_v45, %v5583_v42  ;;  %v6431_v42 = vld [vmem:[#allocation2 + $0x70] sm:$0xff] }
0x2947   :  { %v5591_v44 = vrot.slane %v5590_v60, 4  ;;  %5734 = vmatpush.msra.mxu3 %v5716_v0  ;;  %v5577_v8 = vrot.slane %v5576_v21, 1 }
0x2948   :  { %v5586_v18 = vrot.slane %v5585_v50, 1 }
0x2949   :  { %v5513_v9 = vpop.permute.xlu0 %5512  ;;  %v5592_v49 = vadd.f32 %v5591_v44, %v5590_v60  ;;  %5735 = vmatpush.msra.mxu3 %v5715_v62 }
0x294a   :  { %v5554_v51 = vmul.f32 %v6427_v19, %v5513_v9  ;;  %v5832_v26 = vperm.slane %v5513_v9, %v7071_v41  ;;  %v5543_v47 = vpop.permute.xlu2 %5542  ;;  %v5844_v19 = vsel %vm531_vm3, %v5827_v59, %v5843_v14  ;;  %v5587_v45 = vadd.f32 %v5586_v18, %v5585_v50 }
0x294b   :  { %v5593_v6 = vrot.slane %v5592_v49, 2  ;;  %v5845_v35 = vsel %vm533_vm4, %v5830_v3, %v5844_v19  ;;  %5736 = vmatpush.msra.mxu3 %v5714_v55  ;;  %v5841_v40 = vperm.slane %v5543_v47, %v7071_v41  ;;  %v5711_v41 = vld [vmem:[#allocation14 + $0x18] sm:$0xff]  ;;  %v5668_v59 = vmul.f32 %v9683_v33, %v5667_v43 }
0x294c   :  { %v5598_v61 = vsel %vm214_vm0, %v5554_v51, 0.0  ;;  %v5833_v58 = vsel %vm506_vm1, %v5832_v26, %v5831_v52  ;;  %v5610_v51 = vadd.f32 %v5609_v13, %v5608_v29 }
0x294d   :  { %v5599_v11 = vadd.f32 %v5598_v61, %v5597_v32  ;;  %v5567_v61 = vadd.f32 %v5566_v7, %v5565_v1  ;;  %v5846_v44 = vsel %vm535_vm5, %v5833_v58, %v5845_v35  ;;  %v5594_v37 = vadd.f32 %v5593_v6, %v5592_v49  ;;  %5737 = vmatpush.msra.mxu3 %v5713_v25  ;;  %v5698_v25 = vld [vmem:[#allocation5 + $0x30] sm:$0xff] }
0x294e   :  { %v5611_v20 = vrot.slane %v5610_v51, 2  ;;  %v5847_v38 = vsel %vm537_vm6, %v5836_v56, %v5846_v44 }
0x294f   :  { %v5600_v2 = vrot.slane %v5599_v11, 4  ;;  %v5568_v49 = vrot.slane %v5567_v61, 1  ;;  %v5595_v26 = vrot.slane %v5594_v37, 1 }
0x2950   :  { %v5612_v0 = vadd.f32 %v5611_v20, %v5610_v51  ;;  %v5674_v51 = vand.u32 2147483647, %v9666_v24 }
0x2951   :  { %v5528_v16 = vpop.permute.xlu0 %5527  ;;  %v5601_v30 = vadd.f32 %v5600_v2, %v5599_v11  ;;  %v6430_v11 = vld [vmem:[#allocation2 + $0x78] sm:$0xff]  ;;  %v5712_v2 = vld [vmem:[#allocation14 + $0x20] sm:$0xff]  ;;  %v5569_v3 = vadd.f32 %v5568_v49, %v5567_v61 }
0x2952   :  { %v5557_v5 = vmul.f32 %v6429_v34, %v5528_v16  ;;  %v5837_v9 = vperm.slane %v5528_v16, %v7066_v39  ;;  %v5560_v28 = vmul.f32 %v6430_v11, %v5543_v47  ;;  %5738 = vmatpush.msra.mxu3 %v5712_v2  ;;  %v5710_v34 = vld [vmem:[#allocation14 + $0x10] sm:$0xff]  ;;  %v5613_v47 = vrot.slane %v5612_v0, 1 }
0x2953   :  { %v5602_v53 = vrot.slane %v5601_v30, 2 }
0x2954   :  { %v5615_v23 = vsel %vm214_vm0, %v5557_v5, 0.0  ;;  %v5839_v48 = vsel %vm506_vm1, %v5838_v22, %v5837_v9  ;;  %v5625_v17 = vsel %vm214_vm0, %v5560_v28, 0.0  ;;  %v5578_v5 = vadd.f32 %v5577_v8, %v5576_v21  ;;  %5739 = vmatpush.msra.mxu3 %v5711_v41 }
0x2955   :  { %v5617_v60 = vadd.f32 %v5616_v46, %v5615_v23  ;;  %v5603_v27 = vadd.f32 %v5602_v53, %v5601_v30  ;;  %v5848_v4 = vsel %vm539_vm7, %v5839_v48, %v5847_v38  ;;  %v5596_v46 = vadd.f32 %v5595_v26, %v5594_v37  ;;  %v5704_v37 = vpop.permute.xlu2 %5703  ;;  %v6005_v48 = vld [vmem:[%s9812_s12] ss:$0 sm:$0xff]  ;;  %s6725_s12 = smov [#allocation18]  }
0x2956   :  { %5740 = vmatpush.msra.mxu3 %v5710_v34  ;;  %v5688_v58 = vsel %vm529_vm2, %v5578_v5, %v5569_v3  ;;  %v5669_v9 = vadd.f32 %v9683_v33, %v5668_v59  ;;  %v5614_v55 = vadd.f32 %v5613_v47, %v5612_v0  ;;  %v5786_v34 = vld [vmem:[#allocation16 + $0x10] sm:$0xff]  ;;  %v5785_v5 = vld [vmem:[#allocation16 + $0x8] sm:$0xff]  ;;  %v5784_v0 = vld [vmem:[#allocation16] sm:$0xff]  ;;  %s5871_s23 = sshll.u32 %s6725_s12, 4  ;;  %s5872_s23 = int_to_ptr.vmem [resolvable:$true] %s5871_s23 }
0x2957   :  { %v5618_v32 = vrot.slane %v5617_v60, 4  ;;  %v5604_v52 = vrot.slane %v5603_v27, 1 }
0x2958   :  { %5741 = vmatpush.msra.mxu3 %v5709_v36 }
0x2959   :  { %v5619_v29 = vadd.f32 %v5618_v32, %v5617_v60  ;;  %v5538_v63 = vpop.permute.xlu0 %5537  ;;  %v5605_v62 = vadd.f32 %v5604_v52, %v5603_v27  ;;  %v5689_v60 = vsel %vm531_vm3, %v5587_v45, %v5688_v58  ;;  %v5677_v32 = vor.u32 1.1754944e-38, %v5676_v54 }
0x295a   :  { %v5559_v57 = vmul.f32 %v6431_v42, %v5538_v63  ;;  %v5840_v1 = vperm.slane %v5538_v63, %v7066_v39  ;;  %v5690_v31 = vsel %vm533_vm4, %v5596_v46, %v5689_v60  ;;  %vm5675_vm3 = vcmp.eq.f32.partialorder %v5674_v51, 8.507059e+37 }
0x295b   :  { %v5620_v10 = vrot.slane %v5619_v29, 2  ;;  %v5691_v53 = vsel %vm535_vm5, %v5605_v62, %v5690_v31 }
0x295c   :  { %v5624_v7 = vsel %vm214_vm0, %v5559_v57, 0.0  ;;  %v5842_v15 = vsel %vm506_vm1, %v5841_v40, %v5840_v1  ;;  %vm5671_vm1 = vweird.f32 %v9683_v33  ;;  %v5692_v61 = vsel %vm537_vm6, %v5614_v55, %v5691_v53 }
0x295d   :  { %v5626_v16 = vadd.f32 %v5625_v17, %v5624_v7  ;;  %v5849_v39 = vsel %vm541_vm8, %v5842_v15, %v5848_v4  ;;  %v5621_v13 = vadd.f32 %v5620_v10, %v5619_v29 }
0x295e   :  { %v5851_v30 = vsel %vm544_vm9, %v5849_v39, 0.0  ;;  %vm5670_vm9 = vweird.f32 %v9666_v24  ;;  %v5708_v24 = vld [vmem:[#allocation14] sm:$0xff] }
0x295f   :  { %v5627_v14 = vrot.slane %v5626_v16, 4  ;;  %5853 = vst [vmem:[#allocation18 + $0x30] sm:$0xff] %v5851_v30  ;;  %v5622_v6 = vrot.slane %v5621_v13, 1  ;;  %vm5672_vm2 = vmor %vm5670_vm9, %vm5671_vm1  ;;  %5742 = vmatpush.msra.mxu3 %v5708_v24  ;;  %v5787_v30 = vld [vmem:[#allocation16 + $0x18] sm:$0xff] }
0x2960   :  { %v5673_v35 = vsel %vm5672_vm2, %v9683_v33, %v5669_v9  ;;  %5809 = vmatpush.msrb.mxu1 %v5787_v30 }
0x2961   :  { %v5628_v23 = vadd.f32 %v5627_v14, %v5626_v16  ;;  %v5623_v19 = vadd.f32 %v5622_v6, %v5621_v13  ;;  %v5678_v44 = vsel %vm5675_vm3, %v5677_v32, %v5673_v35 }
0x2962   :  { %5810 = vmatpush.msrb.mxu1 %v5786_v34 }
0x2963   :  { %v5629_v21 = vrot.slane %v5628_v23, 2  ;;  %v5693_v56 = vsel %vm539_vm7, %v5623_v19, %v5692_v61 }
0x2964   :  { %5811 = vmatpush.msrb.mxu1 %v5785_v5 }
0x2965   :  { %v5630_v43 = vadd.f32 %v5629_v21, %v5628_v23 }
0x2966   :  { %5812 = vmatpush.msrb.mxu1 %v5784_v0 }
0x2967   :  { %v5631_v50 = vrot.slane %v5630_v43, 1 }
0x2969   :  { %v5632_v22 = vadd.f32 %v5631_v50, %v5630_v43 }
0x296b   :  { %v5694_v11 = vsel %vm541_vm8, %v5632_v22, %v5693_v56 }
0x296c   :  { %v5696_v28 = vmul.f32 %v5694_v11, %v5678_v44 }
0x296e   :  { %5700 = vrot.lane.b32.xlu0 %v5696_v28, %s6723_s24 }
0x29e0   :  { %v5701_v8 = vpop.permute.xlu0 %5700 }
0x29e1   :  { %v5706_v33 = vsel %vm214_vm0, %v5698_v25, %v5701_v8 }
0x29e2   :  { %v5707_v29 = vsel %vm987_vm14, %v5706_v33, %v5704_v37 }
0x29e3   :  { %5950 = vmatmul.msk.f32.vlgmr.msra.gmra.mxu3 %vm1005_vm15, %v5707_v29 }
0x2a66   :  { %v5744_v63 = vpop.f32.mrf.mxu3 }
0x2a67   :  { %v5745_v27 = vadd.f32 %v6005_v48, %v5744_v63 }
0x2a69   :  { %6321 = vtanh.f32 %v5745_v27  ;;  %v5951_v42 = vmul.f32 -1.442695, %v5745_v27 }
0x2a6b   :  { %6323 = vpow2.f32 %v5951_v42 }
0x2a6f   :  { %v6322_v40 = vpop.eup %6321 }
0x2a70   :  { %5769 = vrot.lane.b32.xlu0 %v6322_v40, %s6722_s5 }
0x2a71   :  { %v6324_v57 = vpop.eup %6323 }
0x2a72   :  { %v5750_v1 = vadd.f32 1.0, %v6324_v57 }
0x2a74   :  { %6325 = vrcp.f32 %v5750_v1  ;;  %v5762_v17 = vand.u32 2147483648, %v5750_v1  ;;  %vm5756_vm5 = vweird.f32 %v5750_v1  ;;  %v5760_v4 = vand.u32 2147483647, %v5750_v1 }
0x2a76   :  { %v5763_v15 = vor.u32 1.1754944e-38, %v5762_v17  ;;  %vm5761_vm7 = vcmp.eq.f32.partialorder %v5760_v4, 8.507059e+37 }
0x2a7a   :  { %v6326_v2 = vpop.eup %6325 }
0x2a7b   :  { %v5752_v18 = vmul.f32 %v6326_v2, %v5750_v1  ;;  %vm5757_vm4 = vweird.f32 %v6326_v2 }
0x2a7c   :  { %vm5758_vm6 = vmor %vm5756_vm5, %vm5757_vm4 }
0x2a7d   :  { %v5753_v20 = vsub.f32 1.0, %v5752_v18 }
0x2a7f   :  { %v5754_v10 = vmul.f32 %v6326_v2, %v5753_v20 }
0x2a81   :  { %v5755_v38 = vadd.f32 %v6326_v2, %v5754_v10 }
0x2a83   :  { %v5759_v7 = vsel %vm5758_vm6, %v6326_v2, %v5755_v38 }
0x2a84   :  { %v5764_v49 = vsel %vm5761_vm7, %v5763_v15, %v5759_v7 }
0x2a85   :  { %v5767_v16 = vmul.f32 %v5764_v49, %v9387_v12  ;;  %v6006_v12 = vld [vmem:[%s9814_s14] ss:$0 sm:$0xff] }
0x2ae2   :  { %v5770_v41 = vpop.permute.xlu0 %5769 }
0x2ae3   :  { %v5772_v26 = vmul.f32 %v5770_v41, %v5764_v49 }
0x2ae5   :  { %5774 = vrot.lane.b32.xlu1 %v5772_v26, %s6723_s24 }
0x2b57   :  { %v5775_v39 = vpop.permute.xlu1 %5774 }
0x2b58   :  { %v5777_v52 = vadd.f32 %v5775_v39, %v5767_v16 }
0x2b5a   :  { %6327 = vtanh.f32 %v5777_v52 }
0x2b60   :  { %v6328_v13 = vpop.eup %6327 }
0x2b61   :  { %5780 = vrot.lane.b32.xlu2 %v6328_v13, %s6722_s5  ;;  %s5873_s5 = sshll.u32 %s9816_s16, 4  ;;  %s5874_s5 = int_to_ptr.hbm [resolvable:$true] %s5873_s5 }
0x2b62   :  { %5879 = dma.vmem_to_hbm [thread:$0]  %s5872_s23, 896, %s5874_s5, [#allocation19], %s6711_s29, %s6711_s29, %s6712_s30  }
0x2bbb   :  { %v5781_v14 = vpop.permute.xlu2 %5780 }
0x2bbc   :  { %v5783_v45 = vmul.f32 %v5781_v14, %v5764_v49 }
0x2bbe   :  { %5793 = vrot.lane.b32.xlu0 %v5783_v45, %s6723_s24  ;;  %s6726_s24 = smov [#allocation17]  }
0x2bbf   :  { %s5858_s6 = sshll.u32 %s6726_s24, 4  ;;  %s5859_s6 = int_to_ptr.vmem [resolvable:$true] %s5858_s6 }
0x2c30   :  { %v5794_v59 = vpop.permute.xlu0 %5793 }
0x2c31   :  { %5952 = vmatmul.msk.f32.vlgmr.msrb.gmra.mxu1 %vm214_vm0, %v5794_v59 }
0x2cae   :  { %v5814_v36 = vpop.f32.mrf.mxu1 }
0x2caf   :  { %v5815_v3 = vadd.f32 %v6006_v12, %v5814_v36 }
0x2cb1   :  { %5818 = vst [vmem:[#allocation17 + $0x30] sm:$0xff] %v5815_v3 }
0x2cb2   :  { %5866 = dma.vmem_to_hbm [thread:$0]  %s5859_s6, 896, %s5861_s9, [#allocation4], %s6711_s29, %s6711_s29, %s6712_s30  }
0x2cb3   :  { %6706 = dma.done.wait [#allocation4], 896  }
0x2cb4   :  { %6707 = vsyncadd [#allocation4], 4294966400 }
0x2cb5   :  { %6708 = dma.done.wait [#allocation19], 896  }
0x2cb6   :  { %6709 = vsyncadd [#allocation19], 4294966400 }
0x2cb7   :  { %5888 = vsyncpa [#allocation3], 1 }
0x2cb8   :  { %5889 = vsyncpa [#allocation6], 1 }
0x2cb9   :  { %5890 = vsyncpa [#allocation9], 1 }
0x2cba   :  { %5891 = vsyncpa [#allocation12], 1 }
0x2cbb   :  { %5892 = vsyncpa [#allocation15], 1 }
0x2cbc   :  { %5893 = vsyncpa [#allocation4], 1 }
0x2cbd   :  { %5894 = vsyncpa [#allocation19], 1 }

</bundles_post_ra>
